<compile_context>
chip_gen: v6e
topology: v6e:2x2x1
jax: 0.10.0
libtpu: 0.0.40
codegen_flags: <defaults>
</compile_context>

<pallas_src>
import jax
import jax.numpy as jnp
import numpy as np
from jax.experimental import pallas as pl
from jax.experimental.pallas import tpu as pltpu


def _round_up(x, m):
    return (x + m - 1) // m * m


# ------------------------------------------------------------------ kernel ---
def _make_mlp_kernel(D, skips, act_fn, input_ch, output_ch, skip_slot):
    """Build the fused-MLP kernel. All layer structure is static (unrolled)."""
    skips = tuple(skips)

    def kernel(x_ref, w_ref, b_ref, o_ref):
        # x_ref : (T, input_ch)       f32
        # w_ref : (L + n_skip, P, P)  bf16  packed, lane-padded weights
        # b_ref : (D + 1, 1, P)       f32   packed, lane-padded biases
        # o_ref : (T, output_ch)      f32   narrow output block (masked vst)
        x = x_ref[...]
        xb = x.astype(jnp.bfloat16)

        if D == 0:
            out = jnp.dot(xb, w_ref[0, :input_ch, :],
                          preferred_element_type=jnp.float32) + b_ref[0]
        else:
            # layer 0: input_ch -> W (padded to P lanes)
            h = jnp.dot(xb, w_ref[0, :input_ch, :],
                        preferred_element_type=jnp.float32) + b_ref[0]
            h = jnp.maximum(h, 0.0)
            # hidden layers 1 .. D-1
            for l in range(1, D):
                acc = jnp.dot(h.astype(jnp.bfloat16), w_ref[l],
                              preferred_element_type=jnp.float32)
                if (l - 1) in skips:
                    # torch.cat([inputs, h], -1) @ W  ==  x @ W_x + h @ W_h
                    acc = acc + jnp.dot(
                        xb, w_ref[skip_slot[l - 1], :input_ch, :],
                        preferred_element_type=jnp.float32)
                h = jnp.maximum(acc + b_ref[l], 0.0)
            # output linear
            out = jnp.dot(h.astype(jnp.bfloat16), w_ref[D],
                          preferred_element_type=jnp.float32) + b_ref[D]

        # Narrow to the real output channels before the (EUP) activation.
        out = out[:, :output_ch]
        if act_fn == "softplus":
            out = jax.nn.softplus(out)
        elif act_fn == "tanh":
            out = jnp.tanh(out)
        # act_fn == 'none' -> identity
        o_ref[...] = out.astype(o_ref.dtype)

    return kernel


# -------------------------------------------------------- parameter packing --
def _pack_params(weights, biases, *, D, skips, input_ch, W, output_ch, P):
    """Pack all layers into one lane-padded bf16 weight slab + f32 bias slab.

    Slab layout (each slot is a (P, P) tile, live region noted):
      slot 0      : layer-0 weight            [0:input_ch, 0:W]
      slot l<D    : hidden layer l, h-part    [0:W,        0:W]
      slot D      : output linear             [0:W,        0:output_ch]
      slot D+1+j  : x-part of skip s_j's next layer  [0:input_ch, 0:W]
    """
    skips = tuple(sorted(skips))
    L = D + 1
    n_skip = len(skips)
    w_slab = np.zeros((L + n_skip, P, P), np.float32)
    b_slab = np.zeros((L, 1, P), np.float32)
    skip_slot = {}

    if D == 0:
        w_slab[0, :input_ch, :output_ch] = np.asarray(weights[0])
        b_slab[0, 0, :output_ch] = np.asarray(biases[0]).reshape(-1)
    else:
        w_slab[0, :input_ch, :W] = np.asarray(weights[0])
        b_slab[0, 0, :W] = np.asarray(biases[0]).reshape(-1)
        for l in range(1, D):
            wl = np.asarray(weights[l])
            if (l - 1) in skips:
                # cat order is [inputs, h]: rows 0:input_ch -> x, rest -> h
                w_slab[l, :W, :W] = wl[input_ch:, :]
            else:
                w_slab[l, :W, :W] = wl
            b_slab[l, 0, :W] = np.asarray(biases[l]).reshape(-1)
        w_slab[D, :W, :output_ch] = np.asarray(weights[D])
        b_slab[D, 0, :output_ch] = np.asarray(biases[D]).reshape(-1)
        for j, s in enumerate(skips):
            slot = L + j
            skip_slot[s] = slot
            w_slab[slot, :input_ch, :W] = np.asarray(weights[s + 1])[:input_ch, :]

    return (jnp.asarray(w_slab, jnp.bfloat16),
            jnp.asarray(b_slab, jnp.float32),
            skip_slot)


# ----------------------------------------------------------------- wrapper ---
def multi_linear_forward(x, weights, biases, *, D, skips, act_fn="none",
                         tile_rows=1024):
    """x: (N, input_ch) f32. weights[i]: (in_i, out_i); biases[i]: (1, out_i)."""
    N, input_ch = x.shape
    output_ch = weights[-1].shape[1]
    # Only skips that can actually fire in torch's forward matter.
    skips = tuple(s for s in skips if 0 <= s < D)
    if D > 0:
        W = weights[0].shape[1]
        # A skip after the last hidden layer would also be a shape error in the
        # torch module (output_linear expects W inputs), so rejecting it here
        # is faithful to the spec.
        assert all(s < D - 1 for s in skips), \
            "skip after the last hidden layer is not valid in the torch module"
    else:
        W = input_ch

    # Lane-padded working width (covers hidden width and output width).
    P = _round_up(max(input_ch, W, output_ch), 128)

    w_slab, b_slab, skip_slot = _pack_params(
        weights, biases, D=D, skips=skips, input_ch=input_ch, W=W,
        output_ch=output_ch, P=P)

    # ---- row tiling (no padding / copy of x) --------------------------------
    tile_rows = int(tile_rows)
    if N >= 2048:
        # Keep >= 2 grid steps when there is enough work so the "parallel"
        # row axis can shard across both TensorCores on v7x.
        tile_rows = min(tile_rows, _round_up((N + 1) // 2, 8))
    if tile_rows >= N:
        tile_rows = N                       # full extent: always a legal block
    else:
        tile_rows = _round_up(tile_rows, 8)  # sublane-aligned row tile
    grid_n = pl.cdiv(N, tile_rows)
    # Tail block (when N % tile_rows != 0): overhang input rows are don't-care
    # and overhang output rows are clipped on store.  softplus/tanh of that
    # garbage may be non-finite but never reaches HBM.

    kernel = _make_mlp_kernel(D, skips, act_fn, input_ch, output_ch, skip_slot)

    n_slots = int(w_slab.shape[0])
    cost = pl.CostEstimate(
        flops=int(2 * N * P * P * n_slots),
        transcendentals=int(N * output_ch) if act_fn in ("softplus", "tanh") else 0,
        bytes_accessed=int(x.size * 4 + N * output_ch * 4
                           + w_slab.size * 2 + b_slab.size * 4),
    )

    # VMEM budget per step (tile_rows=1024, P=128):
    #   x tile 2x64 KiB, out tile 2x16 KiB, weight slab ~192 KiB (single-buf),
    #   f32 intermediates ~512 KiB each -> far under the scoped default on all
    #   generations; no vmem_limit needed.
    out = pl.pallas_call(
        kernel,
        out_shape=jax.ShapeDtypeStruct((N, output_ch), x.dtype),
        grid_spec=pltpu.PrefetchScalarGridSpec(
            num_scalar_prefetch=0,
            grid=(grid_n,),
            in_specs=[
                pl.BlockSpec((tile_rows, input_ch), lambda i: (i, 0)),
                # Constant index_map + single buffer -> slabs DMA'd once,
                # resident in VMEM for the whole grid.
                pl.BlockSpec(w_slab.shape, lambda i: (0, 0, 0),
                             pipeline_mode=pl.Buffered(1)),
                pl.BlockSpec(b_slab.shape, lambda i: (0, 0, 0),
                             pipeline_mode=pl.Buffered(1)),
            ],
            # Narrow, full-extent last dim (== output_ch) -> no 128-lane HBM
            # padding writeback and no external slice needed.
            out_specs=pl.BlockSpec((tile_rows, output_ch), lambda i: (i, 0)),
        ),
        compiler_params=pltpu.CompilerParams(
            dimension_semantics=("parallel",)),
        cost_estimate=cost,
    )(x, w_slab, b_slab)

    return out


# --------------------------------------------------------- parameter setup ---
def init_multi_linear_params(key, D, W, input_ch, output_ch, skips,
                             init_bias=0.693):
    """Deterministic synthetic parameters matching the torch module's shapes."""
    skips = tuple(skips)
    weights, biases = [], []
    if D > 0:
        in_dims = [input_ch]                     # linears[0]: input_ch -> W
        for i in range(D - 1):                   # linears[i+1]
            in_dims.append(W + input_ch if i in skips else W)
        for in_d in in_dims:
            key, k1, k2 = jax.random.split(key, 3)
            weights.append(jax.random.normal(k1, (in_d, W), jnp.float32) * 0.1)
            biases.append(jax.random.normal(k2, (1, W), jnp.float32) * 0.01)
        out_in = W
    else:
        out_in = input_ch
    key, k1 = jax.random.split(key)
    weights.append(jax.random.normal(k1, (out_in, output_ch), jnp.float32) * 0.1)
    biases.append(jnp.full((1, output_ch), init_bias, jnp.float32))  # .fill_(init_bias)
    return weights, biases


# -------------------------------------------------------- pure-JAX reference -
def multi_linear_ref(x, weights, biases, *, D, skips, act_fn="none"):
    skips = tuple(skips)
    h = x
    for i in range(D):
        h = jnp.maximum(h @ weights[i] + biases[i], 0.0)
        if i in skips:
            h = jnp.concatenate([x, h], axis=-1)
    out = h @ weights[D] + biases[D]
    if act_fn == "softplus":
        out = jax.nn.softplus(out)
    elif act_fn == "tanh":
        out = jnp.tanh(out)
    return out


# -------------------------------------------------------------------- main ---
if __name__ == "__main__":
    # Small, module-consistent configuration.
    D, W = 4, 32
    input_ch, output_ch = 16, 4
    skips = (2,)
    act_fn = "none"      # module default
    N = 1000             # not a multiple of the small tile -> exercises tail clip

    key = jax.random.PRNGKey(0)
    key, kx = jax.random.split(key)
    x = jax.random.normal(kx, (N, input_ch), jnp.float32)

    weights, biases = init_multi_linear_params(
        key, D, W, input_ch, output_ch, skips, init_bias=0.693)

    ref = multi_linear_ref(x, weights, biases, D=D, skips=skips, act_fn=act_fn)

    # Default (large-tile) path: single full-extent row block.
    out_big = multi_linear_forward(x, weights, biases, D=D, skips=skips,
                                   act_fn=act_fn)
    out_big = jax.block_until_ready(out_big)
    # bf16 MXU operands (f32 accumulation) -> loosened tolerance vs f32 ref.
    np.testing.assert_allclose(np.asarray(out_big), np.asarray(ref),
                               rtol=5e-2, atol=5e-2)

    # Small-tile path: exercises the cdiv grid and the clipped tail block
    # (no jnp.pad copy of x, narrow output block stores).
    out_small = multi_linear_forward(x, weights, biases, D=D, skips=skips,
                                     act_fn=act_fn, tile_rows=256)
    out_small = jax.block_until_ready(out_small)
    np.testing.assert_allclose(np.asarray(out_small), np.asarray(ref),
                               rtol=5e-2, atol=5e-2)

    print("KERNEL_OK")
</pallas_src>

<mosaic_0001>
module attributes {stable_mosaic.version = 11 : i64} {
  func.func @kernel(%arg0: i32, %arg1: memref<1000x16xf32, #tpu.memory_space<vmem>>, %arg2: memref<6x128x128xbf16, #tpu.memory_space<vmem>>, %arg3: memref<5x1x128xf32, #tpu.memory_space<vmem>>, %arg4: memref<1000x4xf32, #tpu.memory_space<vmem>>) attributes {dimension_semantics = [#tpu.dimension_semantics<parallel>], iteration_bounds = array<i64: 1>, scalar_prefetch = 0 : i64, scratch_operands = 0 : i64, tpu.core_type = #tpu.core_type<tc>, window_params = [{transform_indices = @transform_0, window_bounds = array<i64: 1000, 16>}, {pipeline_mode = #tpu.pipeline_mode<synchronous>, transform_indices = @transform_1, window_bounds = array<i64: 6, 128, 128>}, {pipeline_mode = #tpu.pipeline_mode<synchronous>, transform_indices = @transform_2, window_bounds = array<i64: 5, 1, 128>}, {transform_indices = @transform_3, window_bounds = array<i64: 1000, 4>}]} {
    %c0 = arith.constant 0 : index
    %c0_0 = arith.constant 0 : index
    %0 = vector.load %arg1[%c0, %c0_0] : memref<1000x16xf32, #tpu.memory_space<vmem>>, vector<1000x16xf32>
    %1 = arith.truncf %0 : vector<1000x16xf32> to vector<1000x16xbf16>
    %c0_1 = arith.constant 0 : index
    %c0_2 = arith.constant 0 : index
    %c0_3 = arith.constant 0 : index
    %2 = vector.load %arg2[%c0_1, %c0_2, %c0_3] : memref<6x128x128xbf16, #tpu.memory_space<vmem>>, vector<1x16x128xbf16>
    %3 = vector.shape_cast %2 : vector<1x16x128xbf16> to vector<16x128xbf16>
    %cst = arith.constant dense<0.000000e+00> : vector<1000x128xf32>
    %4 = tpu.matmul %1, %3, %cst {dimension_numbers = #tpu.dot_dimension_numbers<[1], [0], [0], [1], [0, 0, 1, 1], [], []>} : vector<1000x16xbf16>, vector<16x128xbf16>, vector<1000x128xf32> -> vector<1000x128xf32>
    %c0_4 = arith.constant 0 : index
    %c0_5 = arith.constant 0 : index
    %c0_6 = arith.constant 0 : index
    %5 = vector.load %arg3[%c0_4, %c0_5, %c0_6] : memref<5x1x128xf32, #tpu.memory_space<vmem>>, vector<1x1x128xf32>
    %6 = vector.shape_cast %5 : vector<1x1x128xf32> to vector<1x128xf32>
    %7 = vector.broadcast %6 : vector<1x128xf32> to vector<1000x128xf32>
    %8 = arith.addf %4, %7 : vector<1000x128xf32>
    %cst_7 = arith.constant 0.000000e+00 : f32
    %9 = vector.broadcast %cst_7 : f32 to vector<1000x128xf32>
    %10 = arith.maximumf %8, %9 : vector<1000x128xf32>
    %11 = arith.truncf %10 : vector<1000x128xf32> to vector<1000x128xbf16>
    %c1 = arith.constant 1 : index
    %c0_8 = arith.constant 0 : index
    %c0_9 = arith.constant 0 : index
    %12 = vector.load %arg2[%c1, %c0_8, %c0_9] : memref<6x128x128xbf16, #tpu.memory_space<vmem>>, vector<1x128x128xbf16>
    %13 = vector.shape_cast %12 : vector<1x128x128xbf16> to vector<128x128xbf16>
    %cst_10 = arith.constant dense<0.000000e+00> : vector<1000x128xf32>
    %14 = tpu.matmul %11, %13, %cst_10 {dimension_numbers = #tpu.dot_dimension_numbers<[1], [0], [0], [1], [0, 0, 1, 1], [], []>} : vector<1000x128xbf16>, vector<128x128xbf16>, vector<1000x128xf32> -> vector<1000x128xf32>
    %c1_11 = arith.constant 1 : index
    %c0_12 = arith.constant 0 : index
    %c0_13 = arith.constant 0 : index
    %15 = vector.load %arg3[%c1_11, %c0_12, %c0_13] : memref<5x1x128xf32, #tpu.memory_space<vmem>>, vector<1x1x128xf32>
    %16 = vector.shape_cast %15 : vector<1x1x128xf32> to vector<1x128xf32>
    %17 = vector.broadcast %16 : vector<1x128xf32> to vector<1000x128xf32>
    %18 = arith.addf %14, %17 : vector<1000x128xf32>
    %cst_14 = arith.constant 0.000000e+00 : f32
    %19 = vector.broadcast %cst_14 : f32 to vector<1000x128xf32>
    %20 = arith.maximumf %18, %19 : vector<1000x128xf32>
    %21 = arith.truncf %20 : vector<1000x128xf32> to vector<1000x128xbf16>
    %c2 = arith.constant 2 : index
    %c0_15 = arith.constant 0 : index
    %c0_16 = arith.constant 0 : index
    %22 = vector.load %arg2[%c2, %c0_15, %c0_16] : memref<6x128x128xbf16, #tpu.memory_space<vmem>>, vector<1x128x128xbf16>
    %23 = vector.shape_cast %22 : vector<1x128x128xbf16> to vector<128x128xbf16>
    %cst_17 = arith.constant dense<0.000000e+00> : vector<1000x128xf32>
    %24 = tpu.matmul %21, %23, %cst_17 {dimension_numbers = #tpu.dot_dimension_numbers<[1], [0], [0], [1], [0, 0, 1, 1], [], []>} : vector<1000x128xbf16>, vector<128x128xbf16>, vector<1000x128xf32> -> vector<1000x128xf32>
    %c2_18 = arith.constant 2 : index
    %c0_19 = arith.constant 0 : index
    %c0_20 = arith.constant 0 : index
    %25 = vector.load %arg3[%c2_18, %c0_19, %c0_20] : memref<5x1x128xf32, #tpu.memory_space<vmem>>, vector<1x1x128xf32>
    %26 = vector.shape_cast %25 : vector<1x1x128xf32> to vector<1x128xf32>
    %27 = vector.broadcast %26 : vector<1x128xf32> to vector<1000x128xf32>
    %28 = arith.addf %24, %27 : vector<1000x128xf32>
    %cst_21 = arith.constant 0.000000e+00 : f32
    %29 = vector.broadcast %cst_21 : f32 to vector<1000x128xf32>
    %30 = arith.maximumf %28, %29 : vector<1000x128xf32>
    %31 = arith.truncf %30 : vector<1000x128xf32> to vector<1000x128xbf16>
    %c3 = arith.constant 3 : index
    %c0_22 = arith.constant 0 : index
    %c0_23 = arith.constant 0 : index
    %32 = vector.load %arg2[%c3, %c0_22, %c0_23] : memref<6x128x128xbf16, #tpu.memory_space<vmem>>, vector<1x128x128xbf16>
    %33 = vector.shape_cast %32 : vector<1x128x128xbf16> to vector<128x128xbf16>
    %cst_24 = arith.constant dense<0.000000e+00> : vector<1000x128xf32>
    %34 = tpu.matmul %31, %33, %cst_24 {dimension_numbers = #tpu.dot_dimension_numbers<[1], [0], [0], [1], [0, 0, 1, 1], [], []>} : vector<1000x128xbf16>, vector<128x128xbf16>, vector<1000x128xf32> -> vector<1000x128xf32>
    %c5 = arith.constant 5 : index
    %c0_25 = arith.constant 0 : index
    %c0_26 = arith.constant 0 : index
    %35 = vector.load %arg2[%c5, %c0_25, %c0_26] : memref<6x128x128xbf16, #tpu.memory_space<vmem>>, vector<1x16x128xbf16>
    %36 = vector.shape_cast %35 : vector<1x16x128xbf16> to vector<16x128xbf16>
    %cst_27 = arith.constant dense<0.000000e+00> : vector<1000x128xf32>
    %37 = tpu.matmul %1, %36, %cst_27 {dimension_numbers = #tpu.dot_dimension_numbers<[1], [0], [0], [1], [0, 0, 1, 1], [], []>} : vector<1000x16xbf16>, vector<16x128xbf16>, vector<1000x128xf32> -> vector<1000x128xf32>
    %38 = arith.addf %34, %37 : vector<1000x128xf32>
    %c3_28 = arith.constant 3 : index
    %c0_29 = arith.constant 0 : index
    %c0_30 = arith.constant 0 : index
    %39 = vector.load %arg3[%c3_28, %c0_29, %c0_30] : memref<5x1x128xf32, #tpu.memory_space<vmem>>, vector<1x1x128xf32>
    %40 = vector.shape_cast %39 : vector<1x1x128xf32> to vector<1x128xf32>
    %41 = vector.broadcast %40 : vector<1x128xf32> to vector<1000x128xf32>
    %42 = arith.addf %38, %41 : vector<1000x128xf32>
    %cst_31 = arith.constant 0.000000e+00 : f32
    %43 = vector.broadcast %cst_31 : f32 to vector<1000x128xf32>
    %44 = arith.maximumf %42, %43 : vector<1000x128xf32>
    %45 = arith.truncf %44 : vector<1000x128xf32> to vector<1000x128xbf16>
    %c4 = arith.constant 4 : index
    %c0_32 = arith.constant 0 : index
    %c0_33 = arith.constant 0 : index
    %46 = vector.load %arg2[%c4, %c0_32, %c0_33] : memref<6x128x128xbf16, #tpu.memory_space<vmem>>, vector<1x128x128xbf16>
    %47 = vector.shape_cast %46 : vector<1x128x128xbf16> to vector<128x128xbf16>
    %cst_34 = arith.constant dense<0.000000e+00> : vector<1000x128xf32>
    %48 = tpu.matmul %45, %47, %cst_34 {dimension_numbers = #tpu.dot_dimension_numbers<[1], [0], [0], [1], [0, 0, 1, 1], [], []>} : vector<1000x128xbf16>, vector<128x128xbf16>, vector<1000x128xf32> -> vector<1000x128xf32>
    %c4_35 = arith.constant 4 : index
    %c0_36 = arith.constant 0 : index
    %c0_37 = arith.constant 0 : index
    %49 = vector.load %arg3[%c4_35, %c0_36, %c0_37] : memref<5x1x128xf32, #tpu.memory_space<vmem>>, vector<1x1x128xf32>
    %50 = vector.shape_cast %49 : vector<1x1x128xf32> to vector<1x128xf32>
    %51 = vector.broadcast %50 : vector<1x128xf32> to vector<1000x128xf32>
    %52 = arith.addf %48, %51 : vector<1000x128xf32>
    %53 = vector.extract_strided_slice %52 {offsets = [0, 0], sizes = [1000, 4], strides = [1, 1]} : vector<1000x128xf32> to vector<1000x4xf32>
    %c0_38 = arith.constant 0 : index
    %c0_39 = arith.constant 0 : index
    %54 = vector.load %arg4[%c0_38, %c0_39] : memref<1000x4xf32, #tpu.memory_space<vmem>>, vector<1000x4xf32>
    tpu.vector_store %arg4[%c0_38, %c0_39], %53 {strides = array<i32>} : memref<1000x4xf32, #tpu.memory_space<vmem>>, vector<1000x4xf32>,
    return
  }
  func.func @transform_0(%arg0: i32) -> (i32, i32) {
    %c0_i32 = arith.constant 0 : i32
    %c0_i32_0 = arith.constant 0 : i32
    return %arg0, %c0_i32 : i32, i32
  }
  func.func @transform_1(%arg0: i32) -> (i32, i32, i32) {
    %c0_i32 = arith.constant 0 : i32
    %c0_i32_0 = arith.constant 0 : i32
    %c0_i32_1 = arith.constant 0 : i32
    %c0_i32_2 = arith.constant 0 : i32
    return %c0_i32, %c0_i32_0, %c0_i32_1 : i32, i32, i32
  }
  func.func @transform_2(%arg0: i32) -> (i32, i32, i32) {
    %c0_i32 = arith.constant 0 : i32
    %c0_i32_0 = arith.constant 0 : i32
    %c0_i32_1 = arith.constant 0 : i32
    %c0_i32_2 = arith.constant 0 : i32
    return %c0_i32, %c0_i32_0, %c0_i32_1 : i32, i32, i32
  }
  func.func @transform_3(%arg0: i32) -> (i32, i32) {
    %c0_i32 = arith.constant 0 : i32
    %c0_i32_0 = arith.constant 0 : i32
    return %arg0, %c0_i32 : i32, i32
  }
}

</mosaic_0001>

<bundles_post_ra>
// kernel: tpu_custom_call.1
= control target key start
LH: loop header
LB: loop body
LE: loop exit
PB: predicated region body
PF: predicated region fallthrough
CT: control target
= control target key end

     0   :  { %v10913_v0 = vmov 0.0   ;;  %vm7227_vm0 = vmmov 0   ;;  %vm218_vm1 = vcmask 130048   ;;  %vm4802_vm2 = vcmask 31744   ;;  %s10880_s1 = inlined_call_operand.vmem [shape: bf16[6,128,128], index: 1, kind: input, shape index: {}]   ;;  %s10881_s0 = inlined_call_operand.vmem [shape: f32[1000,16], index: 0, kind: input, shape index: {}]   ;;  %s10882_s2 = inlined_call_operand.vmem [shape: f32[5,1,128], index: 2, kind: input, shape index: {}]   ;;  %s10883_s3 = inlined_call_operand.vmem [shape: f32[1000,4], index: 3, kind: output, shape index: {}]  }
   0x1   :  { %5579 = vmatprep.subr.bf16.mxu0 %v10913_v0  ;;  %v7177_v1 = vld [vmem:[%s10880_s1] sm:$0xff]   ;;  %5581 = vmatprep.mubr.msk.bf16.mxu0 %vm7227_vm0, %v10913_v0  ;;  %v16_v3 = vld [vmem:[%s10881_s0 + $0x8] sm:$0xff]  ;;  %v7178_v5 = vld [vmem:[%s10880_s1 + $0xb8] sm:$0xff]  }
   0x2   :  { %v15_v2 = vld [vmem:[%s10881_s0] sm:$0xff]  ;;  %5833 = vmatprep.subr.bf16.mxu1 %v10913_v0  ;;  %5849 = vmatprep.mubr.msk.bf16.mxu1 %vm7227_vm0, %v10913_v0  ;;  %v17_v6 = vld [vmem:[%s10881_s0 + $0x10] sm:$0xff]  ;;  %v18_v7 = vld [vmem:[%s10881_s0 + $0x18] sm:$0xff] }
   0x3   :  { %5580 = vmatpush3.bf16.msra.mxu0 %v7177_v1  ;;  %v7263_v4 = vpack.c.bf16 %v16_v3, %v15_v2  ;;  %v7179_v8 = vld [vmem:[%s10880_s1 + $0xb0] sm:$0xff]   ;;  %v7283_v9 = vpack.c.bf16 %v18_v7, %v17_v6  ;;  %v19_v10 = vld [vmem:[%s10881_s0 + $0x20] sm:$0xff]  ;;  %v20_v11 = vld [vmem:[%s10881_s0 + $0x28] sm:$0xff] }
   0x4   :  { %6101 = vmatprep.subr.bf16.mxu0 %v10913_v0  ;;  %v7180_v12 = vld [vmem:[%s10880_s1 + $0xa8] sm:$0xff]   ;;  %v7299_v13 = vpack.c.bf16 %v20_v11, %v19_v10  ;;  %v21_v14 = vld [vmem:[%s10881_s0 + $0x30] sm:$0xff]  ;;  %v22_v15 = vld [vmem:[%s10881_s0 + $0x38] sm:$0xff] }
   0x5   :  { %v7312_v16 = vpack.c.bf16 %v22_v15, %v21_v14  ;;  %v23_v17 = vld [vmem:[%s10881_s0 + $0x40] sm:$0xff]  ;;  %v24_v18 = vld [vmem:[%s10881_s0 + $0x48] sm:$0xff]  ;;  %v25_v20 = vld [vmem:[%s10881_s0 + $0x50] sm:$0xff] }
   0x6   :  { %5582 = vmatmul.mubr.msk.bf16.vlgmr.msra.gmra.mxu0 %vm218_vm1, %v7263_v4  ;;  %v7324_v19 = vpack.c.bf16 %v24_v18, %v23_v17  ;;  %v26_v21 = vld [vmem:[%s10881_s0 + $0x58] sm:$0xff]  ;;  %v27_v24 = vld [vmem:[%s10881_s0 + $0x60] sm:$0xff]  ;;  %v28_v25 = vld [vmem:[%s10881_s0 + $0x68] sm:$0xff] }
   0x7   :  { %6102 = vmatpush3.bf16.msra.mxu0 %v7178_v5  ;;  %5585 = vmatprep.mubr.msk.bf16.mxu0 %vm7227_vm0, %v10913_v0  ;;  %v7336_v22 = vpack.c.bf16 %v26_v21, %v25_v20  ;;  %v7181_v23 = vld [vmem:[%s10880_s1 + $0x78] sm:$0xff]   ;;  %v7352_v26 = vpack.c.bf16 %v28_v25, %v27_v24  ;;  %v7182_v27 = vld [vmem:[%s10880_s1 + $0x70] sm:$0xff]   ;;  %v7183_v28 = vld [vmem:[%s10880_s1 + $0x68] sm:$0xff]  }
   0x8   :  { %6103 = vmatprep.subr.bf16.mxu0 %v10913_v0  ;;  %5834 = vmatpush3.bf16.msra.mxu1 %v7181_v23  ;;  %v29_v29 = vld [vmem:[%s10881_s0 + $0x70] sm:$0xff]  ;;  %v30_v30 = vld [vmem:[%s10881_s0 + $0x78] sm:$0xff]  ;;  %v7184_v32 = vld [vmem:[%s10880_s1 + $0x60] sm:$0xff]  }
   0x9   :  { %5835 = vmatprep.subr.bf16.mxu1 %v10913_v0  ;;  %v7371_v31 = vpack.c.bf16 %v30_v30, %v29_v29  ;;  %v7185_v33 = vld [vmem:[%s10880_s1 + $0x58] sm:$0xff]   ;;  %v7186_v34 = vld [vmem:[%s10880_s1 + $0xa0] sm:$0xff]   ;;  %v32_v36 = vld [vmem:[%s10881_s0 + $0x88] sm:$0xff] }
   0xa   :  { %v31_v35 = vld [vmem:[%s10881_s0 + $0x80] sm:$0xff]  ;;  %v7187_v38 = vld [vmem:[%s10880_s1 + $0x50] sm:$0xff]   ;;  %v34_v40 = vld [vmem:[%s10881_s0 + $0x98] sm:$0xff] }
   0xb   :  { %6104 = vmatpush3.bf16.msra.mxu0 %v7179_v8  ;;  %v7395_v37 = vpack.c.bf16 %v32_v36, %v31_v35  ;;  %v33_v39 = vld [vmem:[%s10881_s0 + $0x90] sm:$0xff]  ;;  %v7188_v41 = vld [vmem:[%s10880_s1 + $0x48] sm:$0xff]   ;;  %v7189_v43 = vld [vmem:[%s10880_s1 + $0x40] sm:$0xff]  }
   0xc   :  { %6105 = vmatprep.subr.bf16.mxu0 %v10913_v0  ;;  %5836 = vmatpush3.bf16.msra.mxu1 %v7182_v27  ;;  %v7415_v42 = vpack.c.bf16 %v34_v40, %v33_v39  ;;  %v35_v44 = vld [vmem:[%s10881_s0 + $0xa0] sm:$0xff]  ;;  %v36_v45 = vld [vmem:[%s10881_s0 + $0xa8] sm:$0xff]  ;;  %v37_v47 = vld [vmem:[%s10881_s0 + $0xb0] sm:$0xff] }
   0xd   :  { %5837 = vmatprep.subr.bf16.mxu1 %v10913_v0  ;;  %v7432_v46 = vpack.c.bf16 %v36_v45, %v35_v44  ;;  %v38_v48 = vld [vmem:[%s10881_s0 + $0xb8] sm:$0xff]  ;;  %v39_v50 = vld [vmem:[%s10881_s0 + $0xc0] sm:$0xff]  ;;  %v40_v51 = vld [vmem:[%s10881_s0 + $0xc8] sm:$0xff] }
   0xe   :  { %5586 = vmatmul.mubr.msk.bf16.gmra.mxu0 %vm218_vm1, %v7283_v9  ;;  %v7444_v49 = vpack.c.bf16 %v38_v48, %v37_v47  ;;  %v7456_v52 = vpack.c.bf16 %v40_v51, %v39_v50  ;;  %v41_v53 = vld [vmem:[%s10881_s0 + $0xd0] sm:$0xff]  ;;  %v42_v54 = vld [vmem:[%s10881_s0 + $0xd8] sm:$0xff]  ;;  %v43_v56 = vld [vmem:[%s10881_s0 + $0xe0] sm:$0xff] }
   0xf   :  { %5589 = vmatprep.mubr.msk.bf16.mxu0 %vm7227_vm0, %v10913_v0  ;;  %6106 = vmatpush3.bf16.msra.mxu0 %v7180_v12  ;;  %v7468_v55 = vpack.c.bf16 %v42_v54, %v41_v53  ;;  %v44_v57 = vld [vmem:[%s10881_s0 + $0xe8] sm:$0xff]  ;;  %v45_v59 = vld [vmem:[%s10881_s0 + $0xf0] sm:$0xff]  ;;  %v46_v60 = vld [vmem:[%s10881_s0 + $0xf8] sm:$0xff] }
  0x10   :  { %6107 = vmatprep.subr.bf16.mxu0 %v10913_v0  ;;  %5838 = vmatpush3.bf16.msra.mxu1 %v7183_v28  ;;  %v7480_v58 = vpack.c.bf16 %v44_v57, %v43_v56  ;;  %v7492_v61 = vpack.c.bf16 %v46_v60, %v45_v59  ;;  %v47_v62 = vld [vmem:[%s10881_s0 + $0x100] sm:$0xff]  ;;  %v48_v63 = vld [vmem:[%s10881_s0 + $0x108] sm:$0xff]  ;;  %v49_v2 = vld [vmem:[%s10881_s0 + $0x110] sm:$0xff] }
  0x11   :  { %5839 = vmatprep.subr.bf16.mxu1 %v10913_v0  ;;  %v7504_v1 = vpack.c.bf16 %v48_v63, %v47_v62  ;;  %v50_v3 = vld [vmem:[%s10881_s0 + $0x118] sm:$0xff]  ;;  %v51_v7 = vld [vmem:[%s10881_s0 + $0x120] sm:$0xff]  ;;  %v52_v8 = vld [vmem:[%s10881_s0 + $0x128] sm:$0xff] }
  0x12   :  { %v7191_v5 = vld [vmem:[%s10880_s1 + $0x98] sm:$0xff]   ;;  %v7519_v6 = vpack.c.bf16 %v50_v3, %v49_v2  ;;  %v7532_v10 = vpack.c.bf16 %v52_v8, %v51_v7  ;;  %v53_v11 = vld [vmem:[%s10881_s0 + $0x130] sm:$0xff]  ;;  %v55_v15 = vld [vmem:[%s10881_s0 + $0x140] sm:$0xff] }
  0x13   :  { %6108 = vmatpush3.bf16.msra.mxu0 %v7186_v34  ;;  %v54_v12 = vld [vmem:[%s10881_s0 + $0x138] sm:$0xff]  ;;  %v56_v17 = vld [vmem:[%s10881_s0 + $0x148] sm:$0xff]  ;;  %v57_v20 = vld [vmem:[%s10881_s0 + $0x150] sm:$0xff] }
  0x14   :  { %5840 = vmatpush3.bf16.msra.mxu1 %v7184_v32  ;;  %6109 = vmatprep.subr.bf16.mxu0 %v10913_v0  ;;  %v7544_v14 = vpack.c.bf16 %v54_v12, %v53_v11  ;;  %v7556_v18 = vpack.c.bf16 %v56_v17, %v55_v15  ;;  %v58_v21 = vld [vmem:[%s10881_s0 + $0x158] sm:$0xff]  ;;  %v59_v24 = vld [vmem:[%s10881_s0 + $0x160] sm:$0xff]  ;;  %v60_v25 = vld [vmem:[%s10881_s0 + $0x168] sm:$0xff] }
  0x15   :  { %5841 = vmatprep.subr.bf16.mxu1 %v10913_v0  ;;  %v7568_v23 = vpack.c.bf16 %v58_v21, %v57_v20  ;;  %v7580_v27 = vpack.c.bf16 %v60_v25, %v59_v24  ;;  %v61_v28 = vld [vmem:[%s10881_s0 + $0x170] sm:$0xff]  ;;  %v62_v29 = vld [vmem:[%s10881_s0 + $0x178] sm:$0xff]  ;;  %v63_v32 = vld [vmem:[%s10881_s0 + $0x180] sm:$0xff] }
  0x16   :  { %5590 = vmatmul.mubr.msk.bf16.gmra.mxu0 %vm218_vm1, %v7299_v13  ;;  %v7592_v30 = vpack.c.bf16 %v62_v29, %v61_v28  ;;  %v7609_v35 = vld [vmem:[%s10882_s2] ss:$0 sm:$0xff]  ;;  %v66_v39 = vld [vmem:[%s10881_s0 + $0x198] sm:$0xff]  ;;  %v7192_v40 = vld [vmem:[%s10880_s1 + $0x90] sm:$0xff]  }
  0x17   :  { %5593 = vmatprep.mubr.msk.bf16.mxu0 %vm7227_vm0, %v10913_v0  ;;  %6110 = vmatpush3.bf16.msra.mxu0 %v7191_v5  ;;  %v7190_v54 = vld [vmem:[%s10880_s1 + $0x140] sm:$0xff]   ;;  %v68_v59 = vld [vmem:[%s10881_s0 + $0x1a8] sm:$0xff]  ;;  %v69_v15 = vld [vmem:[%s10881_s0 + $0x1b0] sm:$0xff] }
  0x18   :  { %5842 = vmatpush3.bf16.msra.mxu1 %v7185_v33  ;;  %6111 = vmatprep.subr.bf16.mxu0 %v10913_v0  ;;  %v64_v33 = vld [vmem:[%s10881_s0 + $0x188] sm:$0xff]  ;;  %v67_v57 = vld [vmem:[%s10881_s0 + $0x1a0] sm:$0xff]  ;;  %v70_v17 = vld [vmem:[%s10881_s0 + $0x1b8] sm:$0xff] }
  0x19   :  { %5843 = vmatprep.subr.bf16.mxu1 %v10913_v0  ;;  %v7604_v34 = vpack.c.bf16 %v64_v33, %v63_v32  ;;  %v7643_v2 = vpack.c.bf16 %v68_v59, %v67_v57  ;;  %v7660_v25 = vpack.c.bf16 %v70_v17, %v69_v15  ;;  %v73_v57 = vld [vmem:[%s10881_s0 + $0x1d0] sm:$0xff]  ;;  %v74_v59 = vld [vmem:[%s10881_s0 + $0x1d8] sm:$0xff]  ;;  %v75_v17 = vld [vmem:[%s10881_s0 + $0x1e0] sm:$0xff] }
  0x1b   :  { %6112 = vmatpush3.bf16.msra.mxu0 %v7192_v40  ;;  %v72_v40 = vld [vmem:[%s10881_s0 + $0x1c8] sm:$0xff] }
  0x1c   :  { %5844 = vmatpush3.bf16.msra.mxu1 %v7187_v38  ;;  %v65_v38 = vld [vmem:[%s10881_s0 + $0x190] sm:$0xff]  ;;  %6113 = vmatprep.subr.bf16.mxu0 %v10913_v0 }
  0x1d   :  { %5845 = vmatprep.subr.bf16.mxu1 %v10913_v0  ;;  %v7625_v45 = vpack.c.bf16 %v66_v39, %v65_v38  ;;  %v71_v39 = vld [vmem:[%s10881_s0 + $0x1c0] sm:$0xff] }
  0x1e   :  { %5594 = vmatmul.mubr.msk.bf16.gmra.mxu0 %vm218_vm1, %v7312_v16 }
  0x1f   :  { %5597 = vmatprep.mubr.msk.bf16.mxu0 %vm7227_vm0, %v10913_v0 }
  0x20   :  { %5846 = vmatpush3.bf16.msra.mxu1 %v7188_v41 }
  0x21   :  { %5847 = vmatprep.subr.bf16.mxu1 %v10913_v0 }
  0x24   :  { %5848 = vmatpush3.bf16.msra.mxu1 %v7189_v43 }
  0x25   :  { %6369 = vmatprep.subr.bf16.mxu1 %v10913_v0 }
  0x26   :  { %5598 = vmatmul.mubr.msk.bf16.gmra.mxu0 %vm218_vm1, %v7324_v19 }
  0x27   :  { %5601 = vmatprep.mubr.msk.bf16.mxu0 %vm7227_vm0, %v10913_v0 }
  0x2e   :  { %5602 = vmatmul.mubr.msk.bf16.gmra.mxu0 %vm218_vm1, %v7336_v22 }
  0x2f   :  { %5605 = vmatprep.mubr.msk.bf16.mxu0 %vm7227_vm0, %v10913_v0 }
  0x36   :  { %5606 = vmatmul.mubr.msk.bf16.gmra.mxu0 %vm218_vm1, %v7352_v26 }
  0x37   :  { %5609 = vmatprep.mubr.msk.bf16.mxu0 %vm7227_vm0, %v10913_v0 }
  0x3e   :  { %5610 = vmatmul.mubr.msk.bf16.gmra.mxu0 %vm218_vm1, %v7371_v31 }
  0x3f   :  { %5613 = vmatprep.mubr.msk.bf16.mxu0 %vm7227_vm0, %v10913_v0 }
  0x46   :  { %5614 = vmatmul.mubr.msk.bf16.gmra.mxu0 %vm218_vm1, %v7395_v37 }
  0x47   :  { %5617 = vmatprep.mubr.msk.bf16.mxu0 %vm7227_vm0, %v10913_v0 }
  0x4e   :  { %5618 = vmatmul.mubr.msk.bf16.gmra.mxu0 %vm218_vm1, %v7415_v42 }
  0x4f   :  { %5621 = vmatprep.mubr.msk.bf16.mxu0 %vm7227_vm0, %v10913_v0 }
  0x56   :  { %5622 = vmatmul.mubr.msk.bf16.gmra.mxu0 %vm218_vm1, %v7432_v46 }
  0x57   :  { %5625 = vmatprep.mubr.msk.bf16.mxu0 %vm7227_vm0, %v10913_v0 }
  0x5e   :  { %5626 = vmatmul.mubr.msk.bf16.gmra.mxu0 %vm218_vm1, %v7444_v49 }
  0x5f   :  { %5629 = vmatprep.mubr.msk.bf16.mxu0 %vm7227_vm0, %v10913_v0 }
  0x66   :  { %5630 = vmatmul.mubr.msk.bf16.gmra.mxu0 %vm218_vm1, %v7456_v52 }
  0x67   :  { %5633 = vmatprep.mubr.msk.bf16.mxu0 %vm7227_vm0, %v10913_v0 }
  0x6e   :  { %5634 = vmatmul.mubr.msk.bf16.gmra.mxu0 %vm218_vm1, %v7468_v55 }
  0x6f   :  { %5637 = vmatprep.mubr.msk.bf16.mxu0 %vm7227_vm0, %v10913_v0 }
  0x76   :  { %5638 = vmatmul.mubr.msk.bf16.gmra.mxu0 %vm218_vm1, %v7480_v58 }
  0x77   :  { %5641 = vmatprep.mubr.msk.bf16.mxu0 %vm7227_vm0, %v10913_v0 }
  0x7e   :  { %5642 = vmatmul.mubr.msk.bf16.gmra.mxu0 %vm218_vm1, %v7492_v61 }
  0x7f   :  { %5645 = vmatprep.mubr.msk.bf16.mxu0 %vm7227_vm0, %v10913_v0 }
  0x86   :  { %5646 = vmatmul.mubr.msk.bf16.gmra.mxu0 %vm218_vm1, %v7504_v1 }
  0x87   :  { %5649 = vmatprep.mubr.msk.bf16.mxu0 %vm7227_vm0, %v10913_v0 }
  0x8e   :  { %5650 = vmatmul.mubr.msk.bf16.gmra.mxu0 %vm218_vm1, %v7519_v6 }
  0x8f   :  { %5653 = vmatprep.mubr.msk.bf16.mxu0 %vm7227_vm0, %v10913_v0 }
  0x96   :  { %5654 = vmatmul.mubr.msk.bf16.gmra.mxu0 %vm218_vm1, %v7532_v10 }
  0x97   :  { %5657 = vmatprep.mubr.msk.bf16.mxu0 %vm7227_vm0, %v10913_v0 }
  0x9e   :  { %5658 = vmatmul.mubr.msk.bf16.gmra.mxu0 %vm218_vm1, %v7544_v14 }
  0x9f   :  { %5661 = vmatprep.mubr.msk.bf16.mxu0 %vm7227_vm0, %v10913_v0 }
  0xa6   :  { %5662 = vmatmul.mubr.msk.bf16.gmra.mxu0 %vm218_vm1, %v7556_v18 }
  0xa7   :  { %5665 = vmatprep.mubr.msk.bf16.mxu0 %vm7227_vm0, %v10913_v0 }
  0xae   :  { %5666 = vmatmul.mubr.msk.bf16.gmra.mxu0 %vm218_vm1, %v7568_v23 }
  0xaf   :  { %5669 = vmatprep.mubr.msk.bf16.mxu0 %vm7227_vm0, %v10913_v0 }
  0xb6   :  { %5670 = vmatmul.mubr.msk.bf16.gmra.mxu0 %vm218_vm1, %v7580_v27 }
  0xb7   :  { %5673 = vmatprep.mubr.msk.bf16.mxu0 %vm7227_vm0, %v10913_v0 }
  0xbe   :  { %5674 = vmatmul.mubr.msk.bf16.gmra.mxu0 %vm218_vm1, %v7592_v30 }
  0xbf   :  { %5677 = vmatprep.mubr.msk.bf16.mxu0 %vm7227_vm0, %v10913_v0 }
  0xc6   :  { %v442_v36 = vpop.f32.mrf.mxu0  ;;  %5678 = vmatmul.mubr.msk.bf16.gmra.mxu0 %vm218_vm1, %v7604_v34 }
  0xc7   :  { %5681 = vmatprep.mubr.msk.bf16.mxu0 %vm7227_vm0, %v10913_v0  ;;  %v443_v43 = vadd.f32 %v7609_v35, %v442_v36 }
  0xc8   :  { %v5583_v41 = vpop.f32.mrf.mxu0 }
  0xc9   :  { %v944_v50 = vmax.f32 %v443_v43, 0.0 }
  0xca   :  { %v445_v44 = vpop.f32.mrf.mxu0 }
  0xcb   :  { %v446_v47 = vadd.f32 %v7609_v35, %v445_v44 }
  0xcc   :  { %v5584_v48 = vpop.f32.mrf.mxu0 }
  0xcd   :  { %v945_v51 = vmax.f32 %v446_v47, 0.0  ;;  %v7676_v47 = vpack.c.bf16 %v72_v40, %v71_v39 }
  0xce   :  { %v450_v53 = vpop.f32.mrf.mxu0  ;;  %5682 = vmatmul.mubr.msk.bf16.gmra.mxu0 %vm218_vm1, %v7625_v45 }
  0xcf   :  { %v1069_v56 = vpack.c.bf16 %v945_v51, %v944_v50  ;;  %5685 = vmatprep.mubr.msk.bf16.mxu0 %vm7227_vm0, %v10913_v0  ;;  %v451_v62 = vadd.f32 %v7609_v35, %v450_v53 }
  0xd0   :  { %v5587_v60 = vpop.f32.mrf.mxu0 }
  0xd1   :  { %5850 = vmatmul.mubr.bf16.vlgmr.msra.gmra.mxu1 %v1069_v56  ;;  %v946_v7 = vmax.f32 %v451_v62, 0.0 }
  0xd2   :  { %v453_v63 = vpop.f32.mrf.mxu0  ;;  %5853 = vmatprep.mubr.msk.bf16.mxu1 %vm7227_vm0, %v10913_v0  ;;  %6370 = vmatpush3.bf16.msra.mxu1 %v7190_v54 }
  0xd3   :  { %v454_v3 = vadd.f32 %v7609_v35, %v453_v63  ;;  %7159 = vmatprep.subr.bf16.mxu1 %v10913_v0 }
  0xd4   :  { %v5588_v5 = vpop.f32.mrf.mxu0 }
  0xd5   :  { %v947_v8 = vmax.f32 %v454_v3, 0.0  ;;  %v7692_v3 = vpack.c.bf16 %v74_v59, %v73_v57 }
  0xd6   :  { %v458_v11 = vpop.f32.mrf.mxu0  ;;  %5686 = vmatmul.mubr.msk.bf16.gmra.mxu0 %vm218_vm1, %v7643_v2 }
  0xd7   :  { %v1070_v12 = vpack.c.bf16 %v947_v8, %v946_v7  ;;  %5689 = vmatprep.mubr.msk.bf16.mxu0 %vm7227_vm0, %v10913_v0  ;;  %v459_v21 = vadd.f32 %v7609_v35, %v458_v11 }
  0xd8   :  { %v5591_v20 = vpop.f32.mrf.mxu0 }
  0xd9   :  { %5854 = vmatmul.mubr.bf16.gmra.mxu1 %v1070_v12  ;;  %v948_v32 = vmax.f32 %v459_v21, 0.0  ;;  %v76_v20 = vld [vmem:[%s10881_s0 + $0x1e8] sm:$0xff] }
  0xda   :  { %v461_v24 = vpop.f32.mrf.mxu0  ;;  %5857 = vmatprep.mubr.msk.bf16.mxu1 %vm7227_vm0, %v10913_v0 }
  0xdb   :  { %v462_v28 = vadd.f32 %v7609_v35, %v461_v24 }
  0xdc   :  { %v5592_v29 = vpop.f32.mrf.mxu0 }
  0xdd   :  { %v949_v33 = vmax.f32 %v462_v28, 0.0  ;;  %v7708_v29 = vpack.c.bf16 %v76_v20, %v75_v17 }
  0xde   :  { %v466_v36 = vpop.f32.mrf.mxu0  ;;  %5690 = vmatmul.mubr.msk.bf16.gmra.mxu0 %vm218_vm1, %v7660_v25 }
  0xdf   :  { %v1071_v38 = vpack.c.bf16 %v949_v33, %v948_v32  ;;  %5693 = vmatprep.mubr.msk.bf16.mxu0 %vm7227_vm0, %v10913_v0  ;;  %v467_v43 = vadd.f32 %v7609_v35, %v466_v36 }
  0xe0   :  { %v5595_v41 = vpop.f32.mrf.mxu0 }
  0xe1   :  { %5858 = vmatmul.mubr.bf16.gmra.mxu1 %v1071_v38  ;;  %v950_v51 = vmax.f32 %v467_v43, 0.0  ;;  %v77_v41 = vld [vmem:[%s10881_s0 + $0x1f0] sm:$0xff]  ;;  %v78_v43 = vld [vmem:[%s10881_s0 + $0x1f8] sm:$0xff] }
  0xe2   :  { %v469_v44 = vpop.f32.mrf.mxu0  ;;  %5861 = vmatprep.mubr.msk.bf16.mxu1 %vm7227_vm0, %v10913_v0 }
  0xe3   :  { %v470_v48 = vadd.f32 %v7609_v35, %v469_v44 }
  0xe4   :  { %v5596_v50 = vpop.f32.mrf.mxu0 }
  0xe5   :  { %v951_v53 = vmax.f32 %v470_v48, 0.0 }
  0xe6   :  { %v474_v54 = vpop.f32.mrf.mxu0  ;;  %5694 = vmatmul.mubr.msk.bf16.gmra.mxu0 %vm218_vm1, %v7676_v47 }
  0xe7   :  { %v1072_v56 = vpack.c.bf16 %v951_v53, %v950_v51  ;;  %5697 = vmatprep.mubr.msk.bf16.mxu0 %vm7227_vm0, %v10913_v0  ;;  %v475_v62 = vadd.f32 %v7609_v35, %v474_v54  ;;  %v7724_v51 = vpack.c.bf16 %v78_v43, %v77_v41 }
  0xe8   :  { %v5599_v60 = vpop.f32.mrf.mxu0 }
  0xe9   :  { %5862 = vmatmul.mubr.bf16.gmra.mxu1 %v1072_v56  ;;  %v952_v8 = vmax.f32 %v475_v62, 0.0  ;;  %v79_v62 = vld [vmem:[%s10881_s0 + $0x200] sm:$0xff] }
  0xea   :  { %v477_v63 = vpop.f32.mrf.mxu0  ;;  %5865 = vmatprep.mubr.msk.bf16.mxu1 %vm7227_vm0, %v10913_v0 }
  0xeb   :  { %v478_v5 = vadd.f32 %v7609_v35, %v477_v63  ;;  %v80_v63 = vld [vmem:[%s10881_s0 + $0x208] sm:$0xff] }
  0xec   :  { %v5600_v7 = vpop.f32.mrf.mxu0 }
  0xed   :  { %v953_v11 = vmax.f32 %v478_v5, 0.0 }
  0xee   :  { %v482_v12 = vpop.f32.mrf.mxu0  ;;  %5698 = vmatmul.mubr.msk.bf16.gmra.mxu0 %vm218_vm1, %v7692_v3 }
  0xef   :  { %v1073_v15 = vpack.c.bf16 %v953_v11, %v952_v8  ;;  %5701 = vmatprep.mubr.msk.bf16.mxu0 %vm7227_vm0, %v10913_v0  ;;  %v483_v24 = vadd.f32 %v7609_v35, %v482_v12  ;;  %v7193_v8 = vld [vmem:[%s10880_s1 + $0x88] sm:$0xff]   ;;  %v7743_v12 = vpack.c.bf16 %v80_v63, %v79_v62 }
  0xf0   :  { %v5603_v21 = vpop.f32.mrf.mxu0  ;;  %6114 = vmatpush3.bf16.msra.mxu0 %v7193_v8 }
  0xf1   :  { %5866 = vmatmul.mubr.bf16.gmra.mxu1 %v1073_v15  ;;  %v954_v36 = vmax.f32 %v483_v24, 0.0  ;;  %10917 = vst [vmem:[#allocation2_spill] sm:$0xff] %v7743_v12  ;;  %6115 = vmatprep.subr.bf16.mxu0 %v10913_v0 }
  0xf2   :  { %v485_v28 = vpop.f32.mrf.mxu0  ;;  %5869 = vmatprep.mubr.msk.bf16.mxu1 %vm7227_vm0, %v10913_v0 }
  0xf3   :  { %v486_v32 = vadd.f32 %v7609_v35, %v485_v28 }
  0xf4   :  { %v5604_v33 = vpop.f32.mrf.mxu0 }
  0xf5   :  { %v955_v38 = vmax.f32 %v486_v32, 0.0  ;;  %v81_v32 = vld [vmem:[%s10881_s0 + $0x210] sm:$0xff]  ;;  %v82_v33 = vld [vmem:[%s10881_s0 + $0x218] sm:$0xff] }
  0xf6   :  { %v490_v39 = vpop.f32.mrf.mxu0  ;;  %5702 = vmatmul.mubr.msk.bf16.gmra.mxu0 %vm218_vm1, %v7708_v29 }
  0xf7   :  { %v1074_v40 = vpack.c.bf16 %v955_v38, %v954_v36  ;;  %5705 = vmatprep.mubr.msk.bf16.mxu0 %vm7227_vm0, %v10913_v0  ;;  %v491_v48 = vadd.f32 %v7609_v35, %v490_v39 }
  0xf8   :  { %v5607_v44 = vpop.f32.mrf.mxu0 }
  0xf9   :  { %5870 = vmatmul.mubr.bf16.gmra.mxu1 %v1074_v40  ;;  %v956_v56 = vmax.f32 %v491_v48, 0.0  ;;  %v7760_v40 = vpack.c.bf16 %v82_v33, %v81_v32 }
  0xfa   :  { %v493_v50 = vpop.f32.mrf.mxu0  ;;  %5873 = vmatprep.mubr.msk.bf16.mxu1 %vm7227_vm0, %v10913_v0 }
  0xfb   :  { %v494_v53 = vadd.f32 %v7609_v35, %v493_v50  ;;  %10918 = vst [vmem:[#allocation3_spill] sm:$0xff] %v7760_v40 }
  0xfc   :  { %v5608_v54 = vpop.f32.mrf.mxu0 }
  0xfd   :  { %v957_v57 = vmax.f32 %v494_v53, 0.0  ;;  %v83_v54 = vld [vmem:[%s10881_s0 + $0x220] sm:$0xff] }
  0xfe   :  { %v498_v59 = vpop.f32.mrf.mxu0  ;;  %5706 = vmatmul.mubr.msk.bf16.gmra.mxu0 %vm218_vm1, %v7724_v51 }
  0xff   :  { %v1075_v60 = vpack.c.bf16 %v957_v57, %v956_v56  ;;  %5709 = vmatprep.mubr.msk.bf16.mxu0 %vm7227_vm0, %v10913_v0  ;;  %v499_v7 = vadd.f32 %v7609_v35, %v498_v59  ;;  %v84_v56 = vld [vmem:[%s10881_s0 + $0x228] sm:$0xff] }
 0x100   :  { %v5611_v5 = vpop.f32.mrf.mxu0  ;;  %v7776_v62 = vpack.c.bf16 %v84_v56, %v83_v54 }
 0x101   :  { %5874 = vmatmul.mubr.bf16.gmra.mxu1 %v1075_v60  ;;  %v958_v20 = vmax.f32 %v499_v7, 0.0 }
 0x102   :  { %v501_v11 = vpop.f32.mrf.mxu0  ;;  %5877 = vmatprep.mubr.msk.bf16.mxu1 %vm7227_vm0, %v10913_v0  ;;  %10919 = vst [vmem:[#allocation4_spill] sm:$0xff] %v7776_v62 }
 0x103   :  { %v502_v15 = vadd.f32 %v7609_v35, %v501_v11 }
 0x104   :  { %v5612_v17 = vpop.f32.mrf.mxu0 }
 0x105   :  { %v959_v21 = vmax.f32 %v502_v15, 0.0  ;;  %v85_v17 = vld [vmem:[%s10881_s0 + $0x230] sm:$0xff] }
 0x106   :  { %v506_v24 = vpop.f32.mrf.mxu0  ;;  %5710 = vmatmul.mubr.msk.bf16.gmra.mxu0 %vm218_vm1, %v7743_v12 }
 0x107   :  { %v1076_v28 = vpack.c.bf16 %v959_v21, %v958_v20  ;;  %5713 = vmatprep.mubr.msk.bf16.mxu0 %vm7227_vm0, %v10913_v0  ;;  %v507_v38 = vadd.f32 %v7609_v35, %v506_v24  ;;  %v86_v20 = vld [vmem:[%s10881_s0 + $0x238] sm:$0xff] }
 0x108   :  { %v5615_v36 = vpop.f32.mrf.mxu0  ;;  %v7792_v32 = vpack.c.bf16 %v86_v20, %v85_v17 }
 0x109   :  { %5878 = vmatmul.mubr.bf16.gmra.mxu1 %v1076_v28  ;;  %v960_v44 = vmax.f32 %v507_v38, 0.0 }
 0x10a   :  { %v509_v39 = vpop.f32.mrf.mxu0  ;;  %5881 = vmatprep.mubr.msk.bf16.mxu1 %vm7227_vm0, %v10913_v0  ;;  %10920 = vst [vmem:[#allocation5_spill] sm:$0xff] %v7792_v32 }
 0x10b   :  { %v510_v41 = vadd.f32 %v7609_v35, %v509_v39 }
 0x10c   :  { %v5616_v43 = vpop.f32.mrf.mxu0 }
 0x10d   :  { %v961_v48 = vmax.f32 %v510_v41, 0.0 }
 0x10e   :  { %v514_v50 = vpop.f32.mrf.mxu0  ;;  %5714 = vmatmul.mubr.msk.bf16.gmra.mxu0 %vm218_vm1, %v7760_v40 }
 0x10f   :  { %v1077_v53 = vpack.c.bf16 %v961_v48, %v960_v44  ;;  %5717 = vmatprep.mubr.msk.bf16.mxu0 %vm7227_vm0, %v10913_v0  ;;  %v515_v59 = vadd.f32 %v7609_v35, %v514_v50  ;;  %v87_v44 = vld [vmem:[%s10881_s0 + $0x240] sm:$0xff]  ;;  %v88_v48 = vld [vmem:[%s10881_s0 + $0x248] sm:$0xff] }
 0x110   :  { %v5619_v57 = vpop.f32.mrf.mxu0  ;;  %v7808_v56 = vpack.c.bf16 %v88_v48, %v87_v44 }
 0x111   :  { %5882 = vmatmul.mubr.bf16.gmra.mxu1 %v1077_v53  ;;  %v962_v7 = vmax.f32 %v515_v59, 0.0 }
 0x112   :  { %v517_v60 = vpop.f32.mrf.mxu0  ;;  %5885 = vmatprep.mubr.msk.bf16.mxu1 %vm7227_vm0, %v10913_v0  ;;  %10921 = vst [vmem:[#allocation6_spill] sm:$0xff] %v7808_v56 }
 0x113   :  { %v518_v63 = vadd.f32 %v7609_v35, %v517_v60 }
 0x114   :  { %v5620_v5 = vpop.f32.mrf.mxu0 }
 0x115   :  { %v963_v8 = vmax.f32 %v518_v63, 0.0 }
 0x116   :  { %v522_v11 = vpop.f32.mrf.mxu0  ;;  %5718 = vmatmul.mubr.msk.bf16.gmra.mxu0 %vm218_vm1, %v7776_v62 }
 0x117   :  { %v1078_v15 = vpack.c.bf16 %v963_v8, %v962_v7  ;;  %5721 = vmatprep.mubr.msk.bf16.mxu0 %vm7227_vm0, %v10913_v0  ;;  %v523_v24 = vadd.f32 %v7609_v35, %v522_v11  ;;  %v89_v8 = vld [vmem:[%s10881_s0 + $0x250] sm:$0xff]  ;;  %v90_v11 = vld [vmem:[%s10881_s0 + $0x258] sm:$0xff] }
 0x118   :  { %v5623_v21 = vpop.f32.mrf.mxu0 }
 0x119   :  { %5886 = vmatmul.mubr.bf16.gmra.mxu1 %v1078_v15  ;;  %v964_v38 = vmax.f32 %v523_v24, 0.0  ;;  %v7824_v21 = vpack.c.bf16 %v90_v11, %v89_v8  ;;  %v94_v8 = vld [vmem:[%s10881_s0 + $0x278] sm:$0xff] }
 0x11a   :  { %v525_v28 = vpop.f32.mrf.mxu0  ;;  %5889 = vmatprep.mubr.msk.bf16.mxu1 %vm7227_vm0, %v10913_v0 }
 0x11b   :  { %v526_v33 = vadd.f32 %v7609_v35, %v525_v28  ;;  %10922 = vst [vmem:[#allocation7_spill] sm:$0xff] %v7824_v21 }
 0x11c   :  { %v5624_v36 = vpop.f32.mrf.mxu0 }
 0x11d   :  { %v965_v39 = vmax.f32 %v526_v33, 0.0 }
 0x11e   :  { %v530_v41 = vpop.f32.mrf.mxu0  ;;  %5722 = vmatmul.mubr.msk.bf16.gmra.mxu0 %vm218_vm1, %v7792_v32 }
 0x11f   :  { %v1079_v43 = vpack.c.bf16 %v965_v39, %v964_v38  ;;  %5725 = vmatprep.mubr.msk.bf16.mxu0 %vm7227_vm0, %v10913_v0  ;;  %v531_v53 = vadd.f32 %v7609_v35, %v530_v41  ;;  %v91_v41 = vld [vmem:[%s10881_s0 + $0x260] sm:$0xff] }
 0x120   :  { %v5627_v50 = vpop.f32.mrf.mxu0 }
 0x121   :  { %5890 = vmatmul.mubr.bf16.gmra.mxu1 %v1079_v43  ;;  %v966_v60 = vmax.f32 %v531_v53, 0.0  ;;  %v92_v43 = vld [vmem:[%s10881_s0 + $0x268] sm:$0xff] }
 0x122   :  { %v533_v54 = vpop.f32.mrf.mxu0  ;;  %5893 = vmatprep.mubr.msk.bf16.mxu1 %vm7227_vm0, %v10913_v0  ;;  %v7840_v53 = vpack.c.bf16 %v92_v43, %v91_v41  ;;  %v95_v41 = vld [vmem:[%s10881_s0 + $0x280] sm:$0xff]  ;;  %v96_v43 = vld [vmem:[%s10881_s0 + $0x288] sm:$0xff] }
 0x123   :  { %v534_v57 = vadd.f32 %v7609_v35, %v533_v54 }
 0x124   :  { %v5628_v59 = vpop.f32.mrf.mxu0  ;;  %10923 = vst [vmem:[#allocation8_spill] sm:$0xff] %v7840_v53 }
 0x125   :  { %v967_v63 = vmax.f32 %v534_v57, 0.0 }
 0x126   :  { %v538_v5 = vpop.f32.mrf.mxu0  ;;  %5726 = vmatmul.mubr.msk.bf16.gmra.mxu0 %vm218_vm1, %v7808_v56 }
 0x127   :  { %v1080_v7 = vpack.c.bf16 %v967_v63, %v966_v60  ;;  %5729 = vmatprep.mubr.msk.bf16.mxu0 %vm7227_vm0, %v10913_v0  ;;  %v539_v17 = vadd.f32 %v7609_v35, %v538_v5 }
 0x128   :  { %v5631_v15 = vpop.f32.mrf.mxu0 }
 0x129   :  { %5894 = vmatmul.mubr.bf16.gmra.mxu1 %v1080_v7  ;;  %v968_v33 = vmax.f32 %v539_v17, 0.0  ;;  %v93_v7 = vld [vmem:[%s10881_s0 + $0x270] sm:$0xff] }
 0x12a   :  { %v541_v20 = vpop.f32.mrf.mxu0  ;;  %5897 = vmatprep.mubr.msk.bf16.mxu1 %vm7227_vm0, %v10913_v0 }
 0x12b   :  { %v542_v24 = vadd.f32 %v7609_v35, %v541_v20  ;;  %v7856_v20 = vpack.c.bf16 %v94_v8, %v93_v7 }
 0x12c   :  { %v5632_v28 = vpop.f32.mrf.mxu0 }
 0x12d   :  { %v969_v36 = vmax.f32 %v542_v24, 0.0  ;;  %10924 = vst [vmem:[#allocation9_spill] sm:$0xff] %v7856_v20 }
 0x12e   :  { %v546_v38 = vpop.f32.mrf.mxu0  ;;  %5730 = vmatmul.mubr.msk.bf16.gmra.mxu0 %vm218_vm1, %v7824_v21 }
 0x12f   :  { %v1081_v39 = vpack.c.bf16 %v969_v36, %v968_v33  ;;  %5733 = vmatprep.mubr.msk.bf16.mxu0 %vm7227_vm0, %v10913_v0  ;;  %v547_v48 = vadd.f32 %v7609_v35, %v546_v38 }
 0x130   :  { %v5635_v44 = vpop.f32.mrf.mxu0 }
 0x131   :  { %5898 = vmatmul.mubr.bf16.gmra.mxu1 %v1081_v39  ;;  %v970_v59 = vmax.f32 %v547_v48, 0.0 }
 0x132   :  { %v549_v50 = vpop.f32.mrf.mxu0  ;;  %5901 = vmatprep.mubr.msk.bf16.mxu1 %vm7227_vm0, %v10913_v0 }
 0x133   :  { %v550_v54 = vadd.f32 %v7609_v35, %v549_v50 }
 0x134   :  { %v5636_v57 = vpop.f32.mrf.mxu0 }
 0x135   :  { %v971_v60 = vmax.f32 %v550_v54, 0.0  ;;  %v7872_v54 = vpack.c.bf16 %v96_v43, %v95_v41  ;;  %v7194_v57 = vld [vmem:[%s10880_s1 + $0x80] sm:$0xff]  }
 0x136   :  { %v554_v63 = vpop.f32.mrf.mxu0  ;;  %5734 = vmatmul.mubr.msk.bf16.gmra.mxu0 %vm218_vm1, %v7840_v53 }
 0x137   :  { %v1082_v5 = vpack.c.bf16 %v971_v60, %v970_v59  ;;  %5737 = vmatprep.mubr.msk.bf16.mxu0 %vm7227_vm0, %v10913_v0  ;;  %v555_v15 = vadd.f32 %v7609_v35, %v554_v63  ;;  %10925 = vst [vmem:[#allocation10_spill] sm:$0xff] %v7872_v54  ;;  %6116 = vmatpush3.bf16.msra.mxu0 %v7194_v57 }
 0x138   :  { %v5639_v11 = vpop.f32.mrf.mxu0  ;;  %6623 = vmatprep.subr.bf16.mxu0 %v10913_v0 }
 0x139   :  { %5902 = vmatmul.mubr.bf16.gmra.mxu1 %v1082_v5  ;;  %v972_v33 = vmax.f32 %v555_v15, 0.0  ;;  %v97_v11 = vld [vmem:[%s10881_s0 + $0x290] sm:$0xff]  ;;  %v98_v15 = vld [vmem:[%s10881_s0 + $0x298] sm:$0xff] }
 0x13a   :  { %v557_v17 = vpop.f32.mrf.mxu0  ;;  %5905 = vmatprep.mubr.msk.bf16.mxu1 %vm7227_vm0, %v10913_v0 }
 0x13b   :  { %v558_v24 = vadd.f32 %v7609_v35, %v557_v17 }
 0x13c   :  { %v5640_v28 = vpop.f32.mrf.mxu0 }
 0x13d   :  { %v973_v36 = vmax.f32 %v558_v24, 0.0 }
 0x13e   :  { %v562_v38 = vpop.f32.mrf.mxu0  ;;  %5738 = vmatmul.mubr.msk.bf16.gmra.mxu0 %vm218_vm1, %v7856_v20 }
 0x13f   :  { %v1083_v39 = vpack.c.bf16 %v973_v36, %v972_v33  ;;  %5741 = vmatprep.mubr.msk.bf16.mxu0 %vm7227_vm0, %v10913_v0  ;;  %v563_v48 = vadd.f32 %v7609_v35, %v562_v38  ;;  %v7892_v33 = vpack.c.bf16 %v98_v15, %v97_v11 }
 0x140   :  { %v5643_v44 = vpop.f32.mrf.mxu0 }
 0x141   :  { %5906 = vmatmul.mubr.bf16.gmra.mxu1 %v1083_v39  ;;  %v974_v63 = vmax.f32 %v563_v48, 0.0  ;;  %10926 = vst [vmem:[#allocation11_spill] sm:$0xff] %v7892_v33  ;;  %v99_v48 = vld [vmem:[%s10881_s0 + $0x2a0] sm:$0xff] }
 0x142   :  { %v565_v50 = vpop.f32.mrf.mxu0  ;;  %5909 = vmatprep.mubr.msk.bf16.mxu1 %vm7227_vm0, %v10913_v0 }
 0x143   :  { %v566_v59 = vadd.f32 %v7609_v35, %v565_v50  ;;  %v100_v50 = vld [vmem:[%s10881_s0 + $0x2a8] sm:$0xff] }
 0x144   :  { %v5644_v60 = vpop.f32.mrf.mxu0 }
 0x145   :  { %v975_v5 = vmax.f32 %v566_v59, 0.0 }
 0x146   :  { %v570_v7 = vpop.f32.mrf.mxu0  ;;  %5742 = vmatmul.mubr.msk.bf16.gmra.mxu0 %vm218_vm1, %v7872_v54 }
 0x147   :  { %v1084_v8 = vpack.c.bf16 %v975_v5, %v974_v63  ;;  %5745 = vmatprep.mubr.msk.bf16.mxu0 %vm7227_vm0, %v10913_v0  ;;  %v571_v24 = vadd.f32 %v7609_v35, %v570_v7  ;;  %v7908_v63 = vpack.c.bf16 %v100_v50, %v99_v48 }
 0x148   :  { %v5647_v17 = vpop.f32.mrf.mxu0 }
 0x149   :  { %5910 = vmatmul.mubr.bf16.gmra.mxu1 %v1084_v8  ;;  %v976_v39 = vmax.f32 %v571_v24, 0.0  ;;  %10927 = vst [vmem:[#allocation12_spill] sm:$0xff] %v7908_v63  ;;  %v101_v24 = vld [vmem:[%s10881_s0 + $0x2b0] sm:$0xff] }
 0x14a   :  { %v573_v28 = vpop.f32.mrf.mxu0  ;;  %5913 = vmatprep.mubr.msk.bf16.mxu1 %vm7227_vm0, %v10913_v0 }
 0x14b   :  { %v574_v36 = vadd.f32 %v7609_v35, %v573_v28  ;;  %v102_v28 = vld [vmem:[%s10881_s0 + $0x2b8] sm:$0xff] }
 0x14c   :  { %v5648_v38 = vpop.f32.mrf.mxu0 }
 0x14d   :  { %v977_v41 = vmax.f32 %v574_v36, 0.0 }
 0x14e   :  { %v578_v43 = vpop.f32.mrf.mxu0  ;;  %5746 = vmatmul.mubr.msk.bf16.gmra.mxu0 %vm218_vm1, %v7892_v33 }
 0x14f   :  { %v1085_v44 = vpack.c.bf16 %v977_v41, %v976_v39  ;;  %5749 = vmatprep.mubr.msk.bf16.mxu0 %vm7227_vm0, %v10913_v0  ;;  %v579_v59 = vadd.f32 %v7609_v35, %v578_v43  ;;  %v7924_v41 = vpack.c.bf16 %v102_v28, %v101_v24 }
 0x150   :  { %v5651_v57 = vpop.f32.mrf.mxu0 }
 0x151   :  { %5914 = vmatmul.mubr.bf16.gmra.mxu1 %v1085_v44  ;;  %v978_v8 = vmax.f32 %v579_v59, 0.0  ;;  %10928 = vst [vmem:[#allocation13_spill] sm:$0xff] %v7924_v41 }
 0x152   :  { %v581_v60 = vpop.f32.mrf.mxu0  ;;  %5917 = vmatprep.mubr.msk.bf16.mxu1 %vm7227_vm0, %v10913_v0 }
 0x153   :  { %v582_v5 = vadd.f32 %v7609_v35, %v581_v60  ;;  %v103_v60 = vld [vmem:[%s10881_s0 + $0x2c0] sm:$0xff] }
 0x154   :  { %v5652_v7 = vpop.f32.mrf.mxu0 }
 0x155   :  { %v979_v11 = vmax.f32 %v582_v5, 0.0  ;;  %v104_v5 = vld [vmem:[%s10881_s0 + $0x2c8] sm:$0xff] }
 0x156   :  { %v586_v15 = vpop.f32.mrf.mxu0  ;;  %5750 = vmatmul.mubr.msk.bf16.gmra.mxu0 %vm218_vm1, %v7908_v63 }
 0x157   :  { %v1086_v17 = vpack.c.bf16 %v979_v11, %v978_v8  ;;  %5753 = vmatprep.mubr.msk.bf16.mxu0 %vm7227_vm0, %v10913_v0  ;;  %v587_v38 = vadd.f32 %v7609_v35, %v586_v15  ;;  %v7940_v15 = vpack.c.bf16 %v104_v5, %v103_v60 }
 0x158   :  { %v5655_v36 = vpop.f32.mrf.mxu0 }
 0x159   :  { %5918 = vmatmul.mubr.bf16.gmra.mxu1 %v1086_v17  ;;  %v980_v48 = vmax.f32 %v587_v38, 0.0  ;;  %10929 = vst [vmem:[#allocation14_spill] sm:$0xff] %v7940_v15 }
 0x15a   :  { %v589_v39 = vpop.f32.mrf.mxu0  ;;  %5921 = vmatprep.mubr.msk.bf16.mxu1 %vm7227_vm0, %v10913_v0 }
 0x15b   :  { %v590_v43 = vadd.f32 %v7609_v35, %v589_v39 }
 0x15c   :  { %v5656_v44 = vpop.f32.mrf.mxu0 }
 0x15d   :  { %v981_v50 = vmax.f32 %v590_v43, 0.0  ;;  %v105_v43 = vld [vmem:[%s10881_s0 + $0x2d0] sm:$0xff]  ;;  %v106_v44 = vld [vmem:[%s10881_s0 + $0x2d8] sm:$0xff] }
 0x15e   :  { %v594_v57 = vpop.f32.mrf.mxu0  ;;  %5754 = vmatmul.mubr.msk.bf16.gmra.mxu0 %vm218_vm1, %v7924_v41 }
 0x15f   :  { %v1087_v59 = vpack.c.bf16 %v981_v50, %v980_v48  ;;  %5757 = vmatprep.mubr.msk.bf16.mxu0 %vm7227_vm0, %v10913_v0  ;;  %v595_v8 = vadd.f32 %v7609_v35, %v594_v57 }
 0x160   :  { %v5659_v7 = vpop.f32.mrf.mxu0 }
 0x161   :  { %5922 = vmatmul.mubr.bf16.gmra.mxu1 %v1087_v59  ;;  %v982_v28 = vmax.f32 %v595_v8, 0.0  ;;  %v7956_v59 = vpack.c.bf16 %v106_v44, %v105_v43 }
 0x162   :  { %v597_v11 = vpop.f32.mrf.mxu0  ;;  %5925 = vmatprep.mubr.msk.bf16.mxu1 %vm7227_vm0, %v10913_v0 }
 0x163   :  { %v598_v17 = vadd.f32 %v7609_v35, %v597_v11  ;;  %10930 = vst [vmem:[#allocation15_spill] sm:$0xff] %v7956_v59 }
 0x164   :  { %v5660_v24 = vpop.f32.mrf.mxu0 }
 0x165   :  { %v983_v36 = vmax.f32 %v598_v17, 0.0  ;;  %v107_v24 = vld [vmem:[%s10881_s0 + $0x2e0] sm:$0xff] }
 0x166   :  { %v602_v38 = vpop.f32.mrf.mxu0  ;;  %5758 = vmatmul.mubr.msk.bf16.gmra.mxu0 %vm218_vm1, %v7940_v15 }
 0x167   :  { %v1088_v39 = vpack.c.bf16 %v983_v36, %v982_v28  ;;  %5761 = vmatprep.mubr.msk.bf16.mxu0 %vm7227_vm0, %v10913_v0  ;;  %v603_v50 = vadd.f32 %v7609_v35, %v602_v38  ;;  %v108_v28 = vld [vmem:[%s10881_s0 + $0x2e8] sm:$0xff] }
 0x168   :  { %v5663_v48 = vpop.f32.mrf.mxu0  ;;  %v7972_v43 = vpack.c.bf16 %v108_v28, %v107_v24 }
 0x169   :  { %5926 = vmatmul.mubr.bf16.gmra.mxu1 %v1088_v39  ;;  %v984_v7 = vmax.f32 %v603_v50, 0.0 }
 0x16a   :  { %v605_v57 = vpop.f32.mrf.mxu0  ;;  %5929 = vmatprep.mubr.msk.bf16.mxu1 %vm7227_vm0, %v10913_v0  ;;  %10931 = vst [vmem:[#allocation16_spill] sm:$0xff] %v7972_v43 }
 0x16b   :  { %v606_v60 = vadd.f32 %v7609_v35, %v605_v57 }
 0x16c   :  { %v5664_v5 = vpop.f32.mrf.mxu0 }
 0x16d   :  { %v985_v8 = vmax.f32 %v606_v60, 0.0 }
 0x16e   :  { %v610_v11 = vpop.f32.mrf.mxu0  ;;  %5762 = vmatmul.mubr.msk.bf16.gmra.mxu0 %vm218_vm1, %v7956_v59 }
 0x16f   :  { %v1089_v17 = vpack.c.bf16 %v985_v8, %v984_v7  ;;  %5765 = vmatprep.mubr.msk.bf16.mxu0 %vm7227_vm0, %v10913_v0  ;;  %v611_v38 = vadd.f32 %v7609_v35, %v610_v11  ;;  %v109_v7 = vld [vmem:[%s10881_s0 + $0x2f0] sm:$0xff]  ;;  %v110_v8 = vld [vmem:[%s10881_s0 + $0x2f8] sm:$0xff] }
 0x170   :  { %v5667_v36 = vpop.f32.mrf.mxu0  ;;  %v7988_v28 = vpack.c.bf16 %v110_v8, %v109_v7 }
 0x171   :  { %5930 = vmatmul.mubr.bf16.gmra.mxu1 %v1089_v17  ;;  %v986_v50 = vmax.f32 %v611_v38, 0.0 }
 0x172   :  { %v613_v39 = vpop.f32.mrf.mxu0  ;;  %5933 = vmatprep.mubr.msk.bf16.mxu1 %vm7227_vm0, %v10913_v0  ;;  %10932 = vst [vmem:[#allocation17_spill] sm:$0xff] %v7988_v28 }
 0x173   :  { %v614_v44 = vadd.f32 %v7609_v35, %v613_v39 }
 0x174   :  { %v5668_v48 = vpop.f32.mrf.mxu0 }
 0x175   :  { %v987_v57 = vmax.f32 %v614_v44, 0.0 }
 0x176   :  { %v618_v60 = vpop.f32.mrf.mxu0  ;;  %5766 = vmatmul.mubr.msk.bf16.gmra.mxu0 %vm218_vm1, %v7972_v43 }
 0x177   :  { %v1090_v5 = vpack.c.bf16 %v987_v57, %v986_v50  ;;  %5769 = vmatprep.mubr.msk.bf16.mxu0 %vm7227_vm0, %v10913_v0  ;;  %v619_v17 = vadd.f32 %v7609_v35, %v618_v60  ;;  %v111_v57 = vld [vmem:[%s10881_s0 + $0x300] sm:$0xff]  ;;  %v112_v60 = vld [vmem:[%s10881_s0 + $0x308] sm:$0xff] }
 0x178   :  { %v5671_v11 = vpop.f32.mrf.mxu0 }
 0x179   :  { %5934 = vmatmul.mubr.bf16.gmra.mxu1 %v1090_v5  ;;  %v988_v39 = vmax.f32 %v619_v17, 0.0  ;;  %v8004_v11 = vpack.c.bf16 %v112_v60, %v111_v57 }
 0x17a   :  { %v621_v24 = vpop.f32.mrf.mxu0  ;;  %5937 = vmatprep.mubr.msk.bf16.mxu1 %vm7227_vm0, %v10913_v0 }
 0x17b   :  { %v622_v36 = vadd.f32 %v7609_v35, %v621_v24  ;;  %10933 = vst [vmem:[#allocation18_spill] sm:$0xff] %v8004_v11 }
 0x17c   :  { %v5672_v38 = vpop.f32.mrf.mxu0 }
 0x17d   :  { %v989_v44 = vmax.f32 %v622_v36, 0.0 }
 0x17e   :  { %v626_v48 = vpop.f32.mrf.mxu0  ;;  %5770 = vmatmul.mubr.msk.bf16.gmra.mxu0 %vm218_vm1, %v7988_v28 }
 0x17f   :  { %v1091_v50 = vpack.c.bf16 %v989_v44, %v988_v39  ;;  %5773 = vmatprep.mubr.msk.bf16.mxu0 %vm7227_vm0, %v10913_v0  ;;  %v627_v7 = vadd.f32 %v7609_v35, %v626_v48  ;;  %v113_v48 = vld [vmem:[%s10881_s0 + $0x310] sm:$0xff] }
 0x180   :  { %v5675_v5 = vpop.f32.mrf.mxu0 }
 0x181   :  { %5938 = vmatmul.mubr.bf16.gmra.mxu1 %v1091_v50  ;;  %v990_v36 = vmax.f32 %v627_v7, 0.0  ;;  %v114_v50 = vld [vmem:[%s10881_s0 + $0x318] sm:$0xff] }
 0x182   :  { %v629_v8 = vpop.f32.mrf.mxu0  ;;  %5941 = vmatprep.mubr.msk.bf16.mxu1 %vm7227_vm0, %v10913_v0  ;;  %v8020_v7 = vpack.c.bf16 %v114_v50, %v113_v48 }
 0x183   :  { %v630_v17 = vadd.f32 %v7609_v35, %v629_v8 }
 0x184   :  { %v5676_v24 = vpop.f32.mrf.mxu0  ;;  %10934 = vst [vmem:[#allocation19_spill] sm:$0xff] %v8020_v7 }
 0x185   :  { %v991_v38 = vmax.f32 %v630_v17, 0.0 }
 0x186   :  { %v634_v39 = vpop.f32.mrf.mxu0  ;;  %5774 = vmatmul.mubr.msk.bf16.gmra.mxu0 %vm218_vm1, %v8004_v11 }
 0x187   :  { %v1092_v44 = vpack.c.bf16 %v991_v38, %v990_v36  ;;  %5777 = vmatprep.mubr.msk.bf16.mxu0 %vm7227_vm0, %v10913_v0  ;;  %v635_v60 = vadd.f32 %v7609_v35, %v634_v39  ;;  %v115_v39 = vld [vmem:[%s10881_s0 + $0x320] sm:$0xff] }
 0x188   :  { %v5679_v57 = vpop.f32.mrf.mxu0 }
 0x189   :  { %5942 = vmatmul.mubr.bf16.gmra.mxu1 %v1092_v44  ;;  %v992_v24 = vmax.f32 %v635_v60, 0.0  ;;  %v116_v44 = vld [vmem:[%s10881_s0 + $0x328] sm:$0xff]  ;;  %v8039_v57 = vld [vmem:[%s10882_s2 + $0x1] ss:$0 sm:$0xff] }
 0x18a   :  { %v637_v5 = vpop.f32.mrf.mxu0  ;;  %5945 = vmatprep.mubr.msk.bf16.mxu1 %vm7227_vm0, %v10913_v0 }
 0x18b   :  { %v638_v8 = vadd.f32 %v7609_v35, %v637_v5 }
 0x18c   :  { %v5680_v17 = vpop.f32.mrf.mxu0 }
 0x18d   :  { %v993_v36 = vmax.f32 %v638_v8, 0.0  ;;  %v8041_v8 = vpack.c.bf16 %v116_v44, %v115_v39  ;;  %v117_v44 = vld [vmem:[%s10881_s0 + $0x330] sm:$0xff] }
 0x18e   :  { %v642_v38 = vpop.f32.mrf.mxu0  ;;  %5778 = vmatmul.mubr.msk.bf16.gmra.mxu0 %vm218_vm1, %v8020_v7 }
 0x18f   :  { %v1093_v11 = vpack.c.bf16 %v993_v36, %v992_v24  ;;  %5781 = vmatprep.mubr.msk.bf16.mxu0 %vm7227_vm0, %v10913_v0  ;;  %v643_v50 = vadd.f32 %v7609_v35, %v642_v38  ;;  %10935 = vst [vmem:[#allocation20_spill] sm:$0xff] %v8041_v8 }
 0x190   :  { %v5683_v48 = vpop.f32.mrf.mxu0 }
 0x191   :  { %v1239_v60 = vpop.f32.mrf.mxu1  ;;  %5946 = vmatmul.mubr.bf16.gmra.mxu1 %v1093_v11  ;;  %v994_v38 = vmax.f32 %v643_v50, 0.0  ;;  %v118_v50 = vld [vmem:[%s10881_s0 + $0x338] sm:$0xff] }
 0x192   :  { %v645_v5 = vpop.f32.mrf.mxu0  ;;  %5949 = vmatprep.mubr.msk.bf16.mxu1 %vm7227_vm0, %v10913_v0  ;;  %v1240_v36 = vadd.f32 %v8039_v57, %v1239_v60 }
 0x193   :  { %v646_v17 = vadd.f32 %v7609_v35, %v645_v5  ;;  %v5851_v24 = vpop.f32.mrf.mxu1 }
 0x194   :  { %v5684_v48 = vpop.f32.mrf.mxu0  ;;  %v1741_v60 = vmax.f32 %v1240_v36, 0.0 }
 0x195   :  { %v995_v7 = vmax.f32 %v646_v17, 0.0  ;;  %v1242_v28 = vpop.f32.mrf.mxu1 }
 0x196   :  { %v1243_v43 = vadd.f32 %v8039_v57, %v1242_v28  ;;  %v650_v59 = vpop.f32.mrf.mxu0  ;;  %5782 = vmatmul.mubr.msk.bf16.gmra.mxu0 %vm218_vm1, %v8041_v8 }
 0x197   :  { %v1094_v11 = vpack.c.bf16 %v995_v7, %v994_v38  ;;  %v5852_v39 = vpop.f32.mrf.mxu1  ;;  %5785 = vmatprep.mubr.msk.bf16.mxu0 %vm7227_vm0, %v10913_v0  ;;  %v651_v17 = vadd.f32 %v7609_v35, %v650_v59  ;;  %v8061_v38 = vpack.c.bf16 %v118_v50, %v117_v44 }
 0x198   :  { %v1742_v5 = vmax.f32 %v1243_v43, 0.0  ;;  %v5687_v28 = vpop.f32.mrf.mxu0 }
 0x199   :  { %v1247_v24 = vpop.f32.mrf.mxu1  ;;  %5950 = vmatmul.mubr.bf16.gmra.mxu1 %v1094_v11  ;;  %10936 = vst [vmem:[#allocation21_spill] sm:$0xff] %v8061_v38  ;;  %v996_v43 = vmax.f32 %v651_v17, 0.0 }
 0x19a   :  { %v8059_v7 = vpack.c.bf16 %v1742_v5, %v1741_v60  ;;  %v653_v48 = vpop.f32.mrf.mxu0  ;;  %5953 = vmatprep.mubr.msk.bf16.mxu1 %vm7227_vm0, %v10913_v0  ;;  %v1248_v15 = vadd.f32 %v8039_v57, %v1247_v24  ;;  %v120_v60 = vld [vmem:[%s10881_s0 + $0x348] sm:$0xff] }
 0x19b   :  { %v654_v39 = vadd.f32 %v7609_v35, %v653_v48  ;;  %v5855_v8 = vpop.f32.mrf.mxu1 }
 0x19c   :  { %v5688_v36 = vpop.f32.mrf.mxu0  ;;  %v119_v8 = vld [vmem:[%s10881_s0 + $0x340] sm:$0xff]  ;;  %v1743_v5 = vmax.f32 %v1248_v15, 0.0 }
 0x19d   :  { %v997_v28 = vmax.f32 %v654_v39, 0.0  ;;  %v1250_v41 = vpop.f32.mrf.mxu1 }
 0x19e   :  { %v1251_v59 = vadd.f32 %v8039_v57, %v1250_v41  ;;  %v658_v11 = vpop.f32.mrf.mxu0  ;;  %5786 = vmatmul.mubr.msk.bf16.gmra.mxu0 %vm218_vm1, %v8061_v38 }
 0x19f   :  { %v1095_v44 = vpack.c.bf16 %v997_v28, %v996_v43  ;;  %v5856_v50 = vpop.f32.mrf.mxu1  ;;  %5789 = vmatprep.mubr.msk.bf16.mxu0 %vm7227_vm0, %v10913_v0  ;;  %v659_v24 = vadd.f32 %v7609_v35, %v658_v11  ;;  %v8081_v43 = vpack.c.bf16 %v120_v60, %v119_v8 }
 0x1a0   :  { %v1744_v17 = vmax.f32 %v1251_v59, 0.0  ;;  %v5691_v41 = vpop.f32.mrf.mxu0 }
 0x1a1   :  { %v1255_v48 = vpop.f32.mrf.mxu1  ;;  %5954 = vmatmul.mubr.bf16.gmra.mxu1 %v1095_v44  ;;  %10937 = vst [vmem:[#allocation22_spill] sm:$0xff] %v8081_v43  ;;  %v998_v59 = vmax.f32 %v659_v24, 0.0 }
 0x1a2   :  { %v8079_v39 = vpack.c.bf16 %v1744_v17, %v1743_v5  ;;  %v661_v36 = vpop.f32.mrf.mxu0  ;;  %5957 = vmatprep.mubr.msk.bf16.mxu1 %vm7227_vm0, %v10913_v0  ;;  %v1256_v38 = vadd.f32 %v8039_v57, %v1255_v48  ;;  %v121_v5 = vld [vmem:[%s10881_s0 + $0x350] sm:$0xff]  ;;  %v122_v17 = vld [vmem:[%s10881_s0 + $0x358] sm:$0xff] }
 0x1a3   :  { %v662_v28 = vadd.f32 %v7609_v35, %v661_v36  ;;  %v5859_v50 = vpop.f32.mrf.mxu1 }
 0x1a4   :  { %v5692_v15 = vpop.f32.mrf.mxu0  ;;  %v1745_v24 = vmax.f32 %v1256_v38, 0.0 }
 0x1a5   :  { %v999_v41 = vmax.f32 %v662_v28, 0.0  ;;  %v1258_v63 = vpop.f32.mrf.mxu1 }
 0x1a6   :  { %v1259_v11 = vadd.f32 %v8039_v57, %v1258_v63  ;;  %v666_v44 = vpop.f32.mrf.mxu0  ;;  %5790 = vmatmul.mubr.msk.bf16.gmra.mxu0 %vm218_vm1, %v8081_v43 }
 0x1a7   :  { %v1096_v8 = vpack.c.bf16 %v999_v41, %v998_v59  ;;  %v5860_v60 = vpop.f32.mrf.mxu1  ;;  %5793 = vmatprep.mubr.msk.bf16.mxu0 %vm7227_vm0, %v10913_v0  ;;  %v667_v36 = vadd.f32 %v7609_v35, %v666_v44  ;;  %v8101_v59 = vpack.c.bf16 %v122_v17, %v121_v5 }
 0x1a8   :  { %v1746_v48 = vmax.f32 %v1259_v11, 0.0  ;;  %v5695_v63 = vpop.f32.mrf.mxu0 }
 0x1a9   :  { %v1263_v28 = vpop.f32.mrf.mxu1  ;;  %5958 = vmatmul.mubr.bf16.gmra.mxu1 %v1096_v8  ;;  %10938 = vst [vmem:[#allocation23_spill] sm:$0xff] %v8101_v59  ;;  %v1000_v11 = vmax.f32 %v667_v36, 0.0 }
 0x1aa   :  { %v8099_v50 = vpack.c.bf16 %v1746_v48, %v1745_v24  ;;  %v669_v15 = vpop.f32.mrf.mxu0  ;;  %5961 = vmatprep.mubr.msk.bf16.mxu1 %vm7227_vm0, %v10913_v0  ;;  %v1264_v43 = vadd.f32 %v8039_v57, %v1263_v28  ;;  %v124_v24 = vld [vmem:[%s10881_s0 + $0x368] sm:$0xff]  ;;  %v8121_v28 = vld [vmem:[%s10882_s2] ss:$0 sm:$0xff] }
 0x1ab   :  { %v670_v41 = vadd.f32 %v7609_v35, %v669_v15  ;;  %v5863_v60 = vpop.f32.mrf.mxu1  ;;  %v123_v35 = vld [vmem:[%s10881_s0 + $0x360] sm:$0xff] }
 0x1ac   :  { %v5696_v38 = vpop.f32.mrf.mxu0  ;;  %v1747_v48 = vmax.f32 %v1264_v43, 0.0 }
 0x1ad   :  { %v1001_v63 = vmax.f32 %v670_v41, 0.0  ;;  %v1266_v33 = vpop.f32.mrf.mxu1 }
 0x1ae   :  { %v1267_v44 = vadd.f32 %v8039_v57, %v1266_v33  ;;  %v674_v8 = vpop.f32.mrf.mxu0  ;;  %5794 = vmatmul.mubr.msk.bf16.gmra.mxu0 %vm218_vm1, %v8101_v59 }
 0x1af   :  { %v1097_v5 = vpack.c.bf16 %v1001_v63, %v1000_v11  ;;  %v5864_v17 = vpop.f32.mrf.mxu1  ;;  %5797 = vmatprep.mubr.msk.bf16.mxu0 %vm7227_vm0, %v10913_v0  ;;  %v675_v15 = vadd.f32 %v8121_v28, %v674_v8  ;;  %v8126_v11 = vpack.c.bf16 %v124_v24, %v123_v35 }
 0x1b0   :  { %v1748_v36 = vmax.f32 %v1267_v44, 0.0  ;;  %v5699_v33 = vpop.f32.mrf.mxu0 }
 0x1b1   :  { %v1271_v41 = vpop.f32.mrf.mxu1  ;;  %5962 = vmatmul.mubr.bf16.gmra.mxu1 %v1097_v5  ;;  %10939 = vst [vmem:[#allocation24_spill] sm:$0xff] %v8126_v11  ;;  %v1002_v33 = vmax.f32 %v675_v15, 0.0 }
 0x1b2   :  { %v8124_v60 = vpack.c.bf16 %v1748_v36, %v1747_v48  ;;  %v677_v38 = vpop.f32.mrf.mxu0  ;;  %5965 = vmatprep.mubr.msk.bf16.mxu1 %vm7227_vm0, %v10913_v0  ;;  %v1272_v44 = vadd.f32 %v8039_v57, %v1271_v41  ;;  %v125_v48 = vld [vmem:[%s10881_s0 + $0x370] sm:$0xff]  ;;  %v126_v36 = vld [vmem:[%s10881_s0 + $0x378] sm:$0xff] }
 0x1b3   :  { %v678_v43 = vadd.f32 %v8121_v28, %v677_v38  ;;  %v5867_v63 = vpop.f32.mrf.mxu1 }
 0x1b4   :  { %v5700_v17 = vpop.f32.mrf.mxu0  ;;  %v1749_v15 = vmax.f32 %v1272_v44, 0.0 }
 0x1b5   :  { %v1003_v59 = vmax.f32 %v678_v43, 0.0  ;;  %v1274_v54 = vpop.f32.mrf.mxu1  ;;  %v8146_v17 = vpack.c.bf16 %v126_v36, %v125_v48 }
 0x1b6   :  { %v1275_v8 = vadd.f32 %v8039_v57, %v1274_v54  ;;  %v682_v5 = vpop.f32.mrf.mxu0  ;;  %5798 = vmatmul.mubr.msk.bf16.gmra.mxu0 %vm218_vm1, %v8126_v11 }
 0x1b7   :  { %v1098_v35 = vpack.c.bf16 %v1003_v59, %v1002_v33  ;;  %v5868_v24 = vpop.f32.mrf.mxu1  ;;  %5801 = vmatprep.mubr.msk.bf16.mxu0 %vm7227_vm0, %v10913_v0  ;;  %v683_v38 = vadd.f32 %v8121_v28, %v682_v5  ;;  %10940 = vst [vmem:[#allocation25_spill] sm:$0xff] %v8146_v17 }
 0x1b8   :  { %v1750_v41 = vmax.f32 %v1275_v8, 0.0  ;;  %v5703_v54 = vpop.f32.mrf.mxu0 }
 0x1b9   :  { %v1279_v43 = vpop.f32.mrf.mxu1  ;;  %5966 = vmatmul.mubr.bf16.gmra.mxu1 %v1098_v35  ;;  %v1004_v8 = vmax.f32 %v683_v38, 0.0 }
 0x1ba   :  { %v8144_v59 = vpack.c.bf16 %v1750_v41, %v1749_v15  ;;  %v685_v63 = vpop.f32.mrf.mxu0  ;;  %5969 = vmatprep.mubr.msk.bf16.mxu1 %vm7227_vm0, %v10913_v0  ;;  %v1280_v11 = vadd.f32 %v8039_v57, %v1279_v43  ;;  %v127_v15 = vld [vmem:[%s10881_s0 + $0x380] sm:$0xff]  ;;  %v128_v41 = vld [vmem:[%s10881_s0 + $0x388] sm:$0xff] }
 0x1bb   :  { %v686_v33 = vadd.f32 %v8121_v28, %v685_v63  ;;  %v5871_v24 = vpop.f32.mrf.mxu1 }
 0x1bc   :  { %v5704_v44 = vpop.f32.mrf.mxu0  ;;  %v1751_v38 = vmax.f32 %v1280_v11, 0.0 }
 0x1bd   :  { %v1005_v54 = vmax.f32 %v686_v33, 0.0  ;;  %v1282_v20 = vpop.f32.mrf.mxu1 }
 0x1be   :  { %v1283_v5 = vadd.f32 %v8039_v57, %v1282_v20  ;;  %v690_v35 = vpop.f32.mrf.mxu0  ;;  %5802 = vmatmul.mubr.msk.bf16.gmra.mxu0 %vm218_vm1, %v8146_v17 }
 0x1bf   :  { %v1099_v48 = vpack.c.bf16 %v1005_v54, %v1004_v8  ;;  %v5872_v36 = vpop.f32.mrf.mxu1  ;;  %5805 = vmatprep.mubr.msk.bf16.mxu0 %vm7227_vm0, %v10913_v0  ;;  %v691_v63 = vadd.f32 %v8121_v28, %v690_v35  ;;  %v8166_v8 = vpack.c.bf16 %v128_v41, %v127_v15 }
 0x1c0   :  { %v1752_v43 = vmax.f32 %v1283_v5, 0.0  ;;  %v5707_v20 = vpop.f32.mrf.mxu0 }
 0x1c1   :  { %v1287_v33 = vpop.f32.mrf.mxu1  ;;  %5970 = vmatmul.mubr.bf16.gmra.mxu1 %v1099_v48  ;;  %10941 = vst [vmem:[#allocation26_spill] sm:$0xff] %v8166_v8  ;;  %v1006_v5 = vmax.f32 %v691_v63, 0.0 }
 0x1c2   :  { %v8164_v24 = vpack.c.bf16 %v1752_v43, %v1751_v38  ;;  %v693_v44 = vpop.f32.mrf.mxu0  ;;  %5973 = vmatprep.mubr.msk.bf16.mxu1 %vm7227_vm0, %v10913_v0  ;;  %v1288_v17 = vadd.f32 %v8039_v57, %v1287_v33  ;;  %v129_v38 = vld [vmem:[%s10881_s0 + $0x390] sm:$0xff]  ;;  %v130_v43 = vld [vmem:[%s10881_s0 + $0x398] sm:$0xff] }
 0x1c3   :  { %v694_v54 = vadd.f32 %v8121_v28, %v693_v44  ;;  %v5875_v36 = vpop.f32.mrf.mxu1 }
 0x1c4   :  { %v5708_v11 = vpop.f32.mrf.mxu0  ;;  %v1753_v63 = vmax.f32 %v1288_v17, 0.0 }
 0x1c5   :  { %v1007_v20 = vmax.f32 %v694_v54, 0.0  ;;  %v1290_v53 = vpop.f32.mrf.mxu1 }
 0x1c6   :  { %v1291_v35 = vadd.f32 %v8039_v57, %v1290_v53  ;;  %v698_v48 = vpop.f32.mrf.mxu0  ;;  %5806 = vmatmul.mubr.msk.bf16.gmra.mxu0 %vm218_vm1, %v8166_v8 }
 0x1c7   :  { %v1100_v15 = vpack.c.bf16 %v1007_v20, %v1006_v5  ;;  %v5876_v41 = vpop.f32.mrf.mxu1  ;;  %5809 = vmatprep.mubr.msk.bf16.mxu0 %vm7227_vm0, %v10913_v0  ;;  %v699_v44 = vadd.f32 %v8121_v28, %v698_v48  ;;  %v8186_v5 = vpack.c.bf16 %v130_v43, %v129_v38 }
 0x1c8   :  { %v1754_v33 = vmax.f32 %v1291_v35, 0.0  ;;  %v5711_v53 = vpop.f32.mrf.mxu0 }
 0x1c9   :  { %v1295_v54 = vpop.f32.mrf.mxu1  ;;  %5974 = vmatmul.mubr.bf16.gmra.mxu1 %v1100_v15  ;;  %10942 = vst [vmem:[#allocation27_spill] sm:$0xff] %v8186_v5  ;;  %v1008_v35 = vmax.f32 %v699_v44, 0.0 }
 0x1ca   :  { %v8184_v36 = vpack.c.bf16 %v1754_v33, %v1753_v63  ;;  %v701_v11 = vpop.f32.mrf.mxu0  ;;  %5977 = vmatprep.mubr.msk.bf16.mxu1 %vm7227_vm0, %v10913_v0  ;;  %v1296_v8 = vadd.f32 %v8039_v57, %v1295_v54  ;;  %v131_v63 = vld [vmem:[%s10881_s0 + $0x3a0] sm:$0xff]  ;;  %v132_v33 = vld [vmem:[%s10881_s0 + $0x3a8] sm:$0xff] }
 0x1cb   :  { %v702_v20 = vadd.f32 %v8121_v28, %v701_v11  ;;  %v5879_v41 = vpop.f32.mrf.mxu1 }
 0x1cc   :  { %v5712_v17 = vpop.f32.mrf.mxu0  ;;  %v1755_v44 = vmax.f32 %v1296_v8, 0.0 }
 0x1cd   :  { %v1009_v53 = vmax.f32 %v702_v20, 0.0  ;;  %v1298_v21 = vpop.f32.mrf.mxu1 }
 0x1ce   :  { %v1299_v48 = vadd.f32 %v8039_v57, %v1298_v21  ;;  %v706_v15 = vpop.f32.mrf.mxu0  ;;  %5810 = vmatmul.mubr.msk.bf16.gmra.mxu0 %vm218_vm1, %v8186_v5 }
 0x1cf   :  { %v1101_v38 = vpack.c.bf16 %v1009_v53, %v1008_v35  ;;  %v5880_v43 = vpop.f32.mrf.mxu1  ;;  %5813 = vmatprep.mubr.msk.bf16.mxu0 %vm7227_vm0, %v10913_v0  ;;  %v707_v11 = vadd.f32 %v8121_v28, %v706_v15  ;;  %v8206_v35 = vpack.c.bf16 %v132_v33, %v131_v63 }
 0x1d0   :  { %v1756_v54 = vmax.f32 %v1299_v48, 0.0  ;;  %v5715_v21 = vpop.f32.mrf.mxu0 }
 0x1d1   :  { %v1303_v20 = vpop.f32.mrf.mxu1  ;;  %5978 = vmatmul.mubr.bf16.gmra.mxu1 %v1101_v38  ;;  %10943 = vst [vmem:[#allocation28_spill] sm:$0xff] %v8206_v35  ;;  %v1010_v48 = vmax.f32 %v707_v11, 0.0 }
 0x1d2   :  { %v8204_v41 = vpack.c.bf16 %v1756_v54, %v1755_v44  ;;  %v709_v17 = vpop.f32.mrf.mxu0  ;;  %5981 = vmatprep.mubr.msk.bf16.mxu1 %vm7227_vm0, %v10913_v0  ;;  %v1304_v5 = vadd.f32 %v8039_v57, %v1303_v20  ;;  %v133_v44 = vld [vmem:[%s10881_s0 + $0x3b0] sm:$0xff]  ;;  %v134_v54 = vld [vmem:[%s10881_s0 + $0x3b8] sm:$0xff] }
 0x1d3   :  { %v710_v53 = vadd.f32 %v8121_v28, %v709_v17  ;;  %v5883_v43 = vpop.f32.mrf.mxu1 }
 0x1d4   :  { %v5716_v8 = vpop.f32.mrf.mxu0  ;;  %v1757_v11 = vmax.f32 %v1304_v5, 0.0 }
 0x1d5   :  { %v1011_v21 = vmax.f32 %v710_v53, 0.0  ;;  %v1306_v56 = vpop.f32.mrf.mxu1 }
 0x1d6   :  { %v1307_v15 = vadd.f32 %v8039_v57, %v1306_v56  ;;  %v714_v38 = vpop.f32.mrf.mxu0  ;;  %5814 = vmatmul.mubr.msk.bf16.gmra.mxu0 %vm218_vm1, %v8206_v35 }
 0x1d7   :  { %v1102_v63 = vpack.c.bf16 %v1011_v21, %v1010_v48  ;;  %v5884_v33 = vpop.f32.mrf.mxu1  ;;  %5817 = vmatprep.mubr.msk.bf16.mxu0 %vm7227_vm0, %v10913_v0  ;;  %v715_v17 = vadd.f32 %v8121_v28, %v714_v38  ;;  %v8226_v48 = vpack.c.bf16 %v134_v54, %v133_v44 }
 0x1d8   :  { %v1758_v20 = vmax.f32 %v1307_v15, 0.0  ;;  %v5719_v56 = vpop.f32.mrf.mxu0 }
 0x1d9   :  { %v1311_v53 = vpop.f32.mrf.mxu1  ;;  %5982 = vmatmul.mubr.bf16.gmra.mxu1 %v1102_v63  ;;  %10944 = vst [vmem:[#allocation29_spill] sm:$0xff] %v8226_v48  ;;  %v1012_v15 = vmax.f32 %v715_v17, 0.0 }
 0x1da   :  { %v8224_v43 = vpack.c.bf16 %v1758_v20, %v1757_v11  ;;  %v717_v8 = vpop.f32.mrf.mxu0  ;;  %5985 = vmatprep.mubr.msk.bf16.mxu1 %vm7227_vm0, %v10913_v0  ;;  %v1312_v35 = vadd.f32 %v8039_v57, %v1311_v53  ;;  %v135_v11 = vld [vmem:[%s10881_s0 + $0x3c0] sm:$0xff]  ;;  %v136_v20 = vld [vmem:[%s10881_s0 + $0x3c8] sm:$0xff] }
 0x1db   :  { %v718_v21 = vadd.f32 %v8121_v28, %v717_v8  ;;  %v5887_v33 = vpop.f32.mrf.mxu1 }
 0x1dc   :  { %v5720_v5 = vpop.f32.mrf.mxu0  ;;  %v1759_v17 = vmax.f32 %v1312_v35, 0.0 }
 0x1dd   :  { %v1013_v56 = vmax.f32 %v718_v21, 0.0  ;;  %v1314_v32 = vpop.f32.mrf.mxu1 }
 0x1de   :  { %v1315_v38 = vadd.f32 %v8039_v57, %v1314_v32  ;;  %v722_v63 = vpop.f32.mrf.mxu0  ;;  %5818 = vmatmul.mubr.msk.bf16.gmra.mxu0 %vm218_vm1, %v8226_v48 }
 0x1df   :  { %v1103_v44 = vpack.c.bf16 %v1013_v56, %v1012_v15  ;;  %v5888_v54 = vpop.f32.mrf.mxu1  ;;  %5821 = vmatprep.mubr.msk.bf16.mxu0 %vm7227_vm0, %v10913_v0  ;;  %v723_v8 = vadd.f32 %v8121_v28, %v722_v63  ;;  %v8246_v15 = vpack.c.bf16 %v136_v20, %v135_v11 }
 0x1e0   :  { %v1760_v53 = vmax.f32 %v1315_v38, 0.0  ;;  %v5723_v32 = vpop.f32.mrf.mxu0 }
 0x1e1   :  { %v1319_v21 = vpop.f32.mrf.mxu1  ;;  %5986 = vmatmul.mubr.bf16.gmra.mxu1 %v1103_v44  ;;  %10945 = vst [vmem:[#allocation30_spill] sm:$0xff] %v8246_v15  ;;  %v1014_v38 = vmax.f32 %v723_v8, 0.0 }
 0x1e2   :  { %v8244_v33 = vpack.c.bf16 %v1760_v53, %v1759_v17  ;;  %v725_v5 = vpop.f32.mrf.mxu0  ;;  %5989 = vmatprep.mubr.msk.bf16.mxu1 %vm7227_vm0, %v10913_v0  ;;  %v1320_v48 = vadd.f32 %v8039_v57, %v1319_v21  ;;  %v137_v17 = vld [vmem:[%s10881_s0 + $0x3d0] sm:$0xff]  ;;  %v138_v53 = vld [vmem:[%s10881_s0 + $0x3d8] sm:$0xff] }
 0x1e3   :  { %v726_v56 = vadd.f32 %v8121_v28, %v725_v5  ;;  %v5891_v54 = vpop.f32.mrf.mxu1 }
 0x1e4   :  { %v5724_v35 = vpop.f32.mrf.mxu0  ;;  %v1761_v8 = vmax.f32 %v1320_v48, 0.0 }
 0x1e5   :  { %v1015_v32 = vmax.f32 %v726_v56, 0.0  ;;  %v1322_v62 = vpop.f32.mrf.mxu1 }
 0x1e6   :  { %v1323_v63 = vadd.f32 %v8039_v57, %v1322_v62  ;;  %v730_v44 = vpop.f32.mrf.mxu0  ;;  %5822 = vmatmul.mubr.msk.bf16.gmra.mxu0 %vm218_vm1, %v8246_v15 }
 0x1e7   :  { %v1104_v11 = vpack.c.bf16 %v1015_v32, %v1014_v38  ;;  %v5892_v20 = vpop.f32.mrf.mxu1  ;;  %5825 = vmatprep.mubr.msk.bf16.mxu0 %vm7227_vm0, %v10913_v0  ;;  %v731_v5 = vadd.f32 %v8121_v28, %v730_v44  ;;  %v8266_v38 = vpack.c.bf16 %v138_v53, %v137_v17 }
 0x1e8   :  { %v1762_v21 = vmax.f32 %v1323_v63, 0.0  ;;  %v5727_v62 = vpop.f32.mrf.mxu0 }
 0x1e9   :  { %v1327_v56 = vpop.f32.mrf.mxu1  ;;  %5990 = vmatmul.mubr.bf16.gmra.mxu1 %v1104_v11  ;;  %10946 = vst [vmem:[#allocation31_spill] sm:$0xff] %v8266_v38  ;;  %v1016_v63 = vmax.f32 %v731_v5, 0.0 }
 0x1ea   :  { %v8264_v54 = vpack.c.bf16 %v1762_v21, %v1761_v8  ;;  %v733_v35 = vpop.f32.mrf.mxu0  ;;  %5993 = vmatprep.mubr.msk.bf16.mxu1 %vm7227_vm0, %v10913_v0  ;;  %v1328_v15 = vadd.f32 %v8039_v57, %v1327_v56  ;;  %v139_v8 = vld [vmem:[%s10881_s0 + $0x3e0] sm:$0xff] }
 0x1eb   :  { %v734_v32 = vadd.f32 %v8121_v28, %v733_v35  ;;  %v5895_v20 = vpop.f32.mrf.mxu1 }
 0x1ec   :  { %v5728_v48 = vpop.f32.mrf.mxu0  ;;  %v1763_v21 = vmax.f32 %v1328_v15, 0.0 }
 0x1ed   :  { %v1017_v62 = vmax.f32 %v734_v32, 0.0  ;;  %v1330_v40 = vpop.f32.mrf.mxu1  ;;  %v8283_v48 = vpack.c.bf16 %v139_v8, %v139_v8 }
 0x1ee   :  { %v1331_v44 = vadd.f32 %v8039_v57, %v1330_v40  ;;  %v738_v11 = vpop.f32.mrf.mxu0  ;;  %5826 = vmatmul.mubr.msk.bf16.gmra.mxu0 %vm218_vm1, %v8266_v38 }
 0x1ef   :  { %v1105_v17 = vpack.c.bf16 %v1017_v62, %v1016_v63  ;;  %v5896_v53 = vpop.f32.mrf.mxu1  ;;  %5829 = vmatprep.mubr.msk.bf16.mxu0 %vm7227_vm0, %v10913_v0  ;;  %v739_v35 = vadd.f32 %v8121_v28, %v738_v11  ;;  %10947 = vst [vmem:[#allocation32_spill] sm:$0xff] %v8283_v48 }
 0x1f0   :  { %v1764_v56 = vmax.f32 %v1331_v44, 0.0  ;;  %v5731_v5 = vpop.f32.mrf.mxu0 }
 0x1f1   :  { %v1335_v32 = vpop.f32.mrf.mxu1  ;;  %5994 = vmatmul.mubr.bf16.gmra.mxu1 %v1105_v17  ;;  %v1018_v44 = vmax.f32 %v739_v35, 0.0 }
 0x1f2   :  { %v8281_v40 = vpack.c.bf16 %v1764_v56, %v1763_v21  ;;  %v741_v20 = vpop.f32.mrf.mxu0  ;;  %5997 = vmatprep.mubr.msk.bf16.mxu1 %vm7227_vm0, %v10913_v0  ;;  %v1336_v53 = vadd.f32 %v8039_v57, %v1335_v32 }
 0x1f3   :  { %v742_v63 = vadd.f32 %v8121_v28, %v741_v20  ;;  %v5899_v62 = vpop.f32.mrf.mxu1 }
 0x1f4   :  { %v5732_v15 = vpop.f32.mrf.mxu0  ;;  %v1765_v56 = vmax.f32 %v1336_v53, 0.0 }
 0x1f5   :  { %v1019_v5 = vmax.f32 %v742_v63, 0.0  ;;  %v1338_v38 = vpop.f32.mrf.mxu1 }
 0x1f6   :  { %v1339_v11 = vadd.f32 %v8039_v57, %v1338_v38  ;;  %v746_v17 = vpop.f32.mrf.mxu0  ;;  %5830 = vmatmul.mubr.msk.bf16.gmra.mxu0 %vm218_vm1, %v8283_v48 }
 0x1f7   :  { %v1106_v8 = vpack.c.bf16 %v1019_v5, %v1018_v44  ;;  %v5900_v21 = vpop.f32.mrf.mxu1  ;;  %6117 = vmatprep.mubr.msk.bf16.mxu0 %vm7227_vm0, %v10913_v0  ;;  %v747_v32 = vadd.f32 %v8121_v28, %v746_v17  ;;  %v7195_v5 = vld [vmem:[%s10880_s1 + $0xf8] sm:$0xff]  }
 0x1f8   :  { %v1766_v20 = vmax.f32 %v1339_v11, 0.0  ;;  %v5735_v62 = vpop.f32.mrf.mxu0 }
 0x1f9   :  { %v1343_v15 = vpop.f32.mrf.mxu1  ;;  %5998 = vmatmul.mubr.bf16.gmra.mxu1 %v1106_v8  ;;  %v1020_v21 = vmax.f32 %v747_v32, 0.0 }
 0x1fa   :  { %v8295_v35 = vpack.c.bf16 %v1766_v20, %v1765_v56  ;;  %v749_v63 = vpop.f32.mrf.mxu0  ;;  %6001 = vmatprep.mubr.msk.bf16.mxu1 %vm7227_vm0, %v10913_v0  ;;  %v1344_v53 = vadd.f32 %v8039_v57, %v1343_v15 }
 0x1fb   :  { %v750_v38 = vadd.f32 %v8121_v28, %v749_v63  ;;  %v5903_v44 = vpop.f32.mrf.mxu1  ;;  %v10948_v63 = vmov 0.0  }
 0x1fc   :  { %v5736_v11 = vpop.f32.mrf.mxu0  ;;  %v7196_v44 = vld [vmem:[%s10880_s1 + $0xf0] sm:$0xff]   ;;  %v1767_v15 = vmax.f32 %v1344_v53, 0.0  ;;  %v7197_v53 = vld [vmem:[%s10880_s1 + $0xe8] sm:$0xff]  }
 0x1fd   :  { %v1021_v17 = vmax.f32 %v750_v38, 0.0  ;;  %v1346_v62 = vpop.f32.mrf.mxu1 }
 0x1fe   :  { %v1347_v8 = vadd.f32 %v8039_v57, %v1346_v62  ;;  %v754_v56 = vpop.f32.mrf.mxu0  ;;  %6118 = vmatmul.mubr.bf16.vlgmr.msra.gmra.mxu0 %v8059_v7 }
 0x1ff   :  { %v1107_v20 = vpack.c.bf16 %v1021_v17, %v1020_v21  ;;  %v5904_v0 = vpop.f32.mrf.mxu1  ;;  %6624 = vmatpush3.bf16.msra.mxu0 %v7195_v5  ;;  %6121 = vmatprep.mubr.msk.bf16.mxu0 %vm7227_vm0, %v10948_v63  ;;  %v755_v38 = vadd.f32 %v8121_v28, %v754_v56 }
 0x200   :  { %v1768_v11 = vmax.f32 %v1347_v8, 0.0  ;;  %v5739_v32 = vpop.f32.mrf.mxu0  ;;  %6625 = vmatprep.subr.bf16.mxu0 %v10948_v63 }
 0x201   :  { %v1351_v62 = vpop.f32.mrf.mxu1  ;;  %6002 = vmatmul.mubr.bf16.gmra.mxu1 %v1107_v20  ;;  %v1022_v56 = vmax.f32 %v755_v38, 0.0 }
 0x202   :  { %v8313_v7 = vpack.c.bf16 %v1768_v11, %v1767_v15  ;;  %v757_v0 = vpop.f32.mrf.mxu0  ;;  %6005 = vmatprep.mubr.msk.bf16.mxu1 %vm7227_vm0, %v10948_v63  ;;  %v1352_v17 = vadd.f32 %v8039_v57, %v1351_v62 }
 0x203   :  { %v758_v5 = vadd.f32 %v8121_v28, %v757_v0  ;;  %v5907_v21 = vpop.f32.mrf.mxu1  ;;  %6626 = vmatpush3.bf16.msra.mxu0 %v7196_v44 }
 0x204   :  { %v5740_v8 = vpop.f32.mrf.mxu0  ;;  %6627 = vmatprep.subr.bf16.mxu0 %v10948_v63  ;;  %v1769_v44 = vmax.f32 %v1352_v17, 0.0 }
 0x205   :  { %v1023_v20 = vmax.f32 %v758_v5, 0.0  ;;  %v1354_v15 = vpop.f32.mrf.mxu1 }
 0x206   :  { %v1355_v11 = vadd.f32 %v8039_v57, %v1354_v15  ;;  %v762_v32 = vpop.f32.mrf.mxu0  ;;  %6122 = vmatmul.mubr.bf16.gmra.mxu0 %v8079_v39 }
 0x207   :  { %v1108_v0 = vpack.c.bf16 %v1023_v20, %v1022_v56  ;;  %v5908_v21 = vpop.f32.mrf.mxu1  ;;  %6125 = vmatprep.mubr.msk.bf16.mxu0 %vm7227_vm0, %v10948_v63  ;;  %6628 = vmatpush3.bf16.msra.mxu0 %v7197_v53  ;;  %v763_v38 = vadd.f32 %v8121_v28, %v762_v32 }
 0x208   :  { %v1770_v48 = vmax.f32 %v1355_v11, 0.0  ;;  %v5743_v62 = vpop.f32.mrf.mxu0  ;;  %6629 = vmatprep.subr.bf16.mxu0 %v10948_v63 }
 0x209   :  { %v1359_v5 = vpop.f32.mrf.mxu1  ;;  %6006 = vmatmul.mubr.bf16.gmra.mxu1 %v1108_v0  ;;  %v1024_v20 = vmax.f32 %v763_v38, 0.0 }
 0x20a   :  { %v8329_v8 = vpack.c.bf16 %v1770_v48, %v1769_v44  ;;  %v765_v15 = vpop.f32.mrf.mxu0  ;;  %6009 = vmatprep.mubr.msk.bf16.mxu1 %vm7227_vm0, %v10948_v63  ;;  %v1360_v53 = vadd.f32 %v8039_v57, %v1359_v5 }
 0x20b   :  { %v766_v39 = vadd.f32 %v8121_v28, %v765_v15  ;;  %v5911_v56 = vpop.f32.mrf.mxu1 }
 0x20c   :  { %v5744_v17 = vpop.f32.mrf.mxu0  ;;  %v1771_v44 = vmax.f32 %v1360_v53, 0.0 }
 0x20d   :  { %v1025_v11 = vmax.f32 %v766_v39, 0.0  ;;  %v1362_v21 = vpop.f32.mrf.mxu1 }
 0x20e   :  { %v1363_v62 = vadd.f32 %v8039_v57, %v1362_v21  ;;  %v770_v32 = vpop.f32.mrf.mxu0  ;;  %6126 = vmatmul.mubr.bf16.gmra.mxu0 %v8099_v50 }
 0x20f   :  { %v1109_v48 = vpack.c.bf16 %v1025_v11, %v1024_v20  ;;  %v5912_v0 = vpop.f32.mrf.mxu1  ;;  %6129 = vmatprep.mubr.msk.bf16.mxu0 %vm7227_vm0, %v10948_v63  ;;  %v771_v56 = vadd.f32 %v8121_v28, %v770_v32 }
 0x210   :  { %v1772_v12 = vmax.f32 %v1363_v62, 0.0  ;;  %v5747_v15 = vpop.f32.mrf.mxu0 }
 0x211   :  { %v1367_v5 = vpop.f32.mrf.mxu1  ;;  %6010 = vmatmul.mubr.bf16.gmra.mxu1 %v1109_v48  ;;  %v1026_v21 = vmax.f32 %v771_v56, 0.0 }
 0x212   :  { %v8340_v38 = vpack.c.bf16 %v1772_v12, %v1771_v44  ;;  %v773_v39 = vpop.f32.mrf.mxu0  ;;  %6013 = vmatprep.mubr.msk.bf16.mxu1 %vm7227_vm0, %v10948_v63  ;;  %v1368_v20 = vadd.f32 %v8039_v57, %v1367_v5 }
 0x213   :  { %v774_v50 = vadd.f32 %v8121_v28, %v773_v39  ;;  %v5915_v17 = vpop.f32.mrf.mxu1 }
 0x214   :  { %v5748_v11 = vpop.f32.mrf.mxu0  ;;  %v1773_v44 = vmax.f32 %v1368_v20, 0.0 }
 0x215   :  { %v1027_v53 = vmax.f32 %v774_v50, 0.0  ;;  %v1370_v62 = vpop.f32.mrf.mxu1 }
 0x216   :  { %v1371_v0 = vadd.f32 %v8039_v57, %v1370_v62  ;;  %v778_v32 = vpop.f32.mrf.mxu0  ;;  %6130 = vmatmul.mubr.bf16.gmra.mxu0 %v8124_v60 }
 0x217   :  { %v1110_v12 = vpack.c.bf16 %v1027_v53, %v1026_v21  ;;  %v5916_v48 = vpop.f32.mrf.mxu1  ;;  %6133 = vmatprep.mubr.msk.bf16.mxu0 %vm7227_vm0, %v10948_v63  ;;  %v779_v17 = vadd.f32 %v8121_v28, %v778_v32 }
 0x218   :  { %v1774_v15 = vmax.f32 %v1371_v0, 0.0  ;;  %v5751_v39 = vpop.f32.mrf.mxu0 }
 0x219   :  { %v1375_v5 = vpop.f32.mrf.mxu1  ;;  %6014 = vmatmul.mubr.bf16.gmra.mxu1 %v1110_v12  ;;  %v1028_v62 = vmax.f32 %v779_v17, 0.0 }
 0x21a   :  { %v8351_v56 = vpack.c.bf16 %v1774_v15, %v1773_v44  ;;  %v781_v50 = vpop.f32.mrf.mxu0  ;;  %6017 = vmatprep.mubr.msk.bf16.mxu1 %vm7227_vm0, %v10948_v63  ;;  %v1376_v21 = vadd.f32 %v8039_v57, %v1375_v5 }
 0x21b   :  { %v782_v60 = vadd.f32 %v8121_v28, %v781_v50  ;;  %v5919_v11 = vpop.f32.mrf.mxu1 }
 0x21c   :  { %v5752_v53 = vpop.f32.mrf.mxu0  ;;  %v1775_v15 = vmax.f32 %v1376_v21, 0.0 }
 0x21d   :  { %v1029_v20 = vmax.f32 %v782_v60, 0.0  ;;  %v1378_v0 = vpop.f32.mrf.mxu1 }
 0x21e   :  { %v1379_v48 = vadd.f32 %v8039_v57, %v1378_v0  ;;  %v786_v32 = vpop.f32.mrf.mxu0  ;;  %6134 = vmatmul.mubr.bf16.gmra.mxu0 %v8144_v59 }
 0x21f   :  { %v1111_v12 = vpack.c.bf16 %v1029_v20, %v1028_v62  ;;  %v5920_v44 = vpop.f32.mrf.mxu1  ;;  %6137 = vmatprep.mubr.msk.bf16.mxu0 %vm7227_vm0, %v10948_v63  ;;  %v787_v11 = vadd.f32 %v8121_v28, %v786_v32 }
 0x220   :  { %v1776_v39 = vmax.f32 %v1379_v48, 0.0  ;;  %v5755_v50 = vpop.f32.mrf.mxu0 }
 0x221   :  { %v1383_v5 = vpop.f32.mrf.mxu1  ;;  %6018 = vmatmul.mubr.bf16.gmra.mxu1 %v1111_v12  ;;  %v1030_v0 = vmax.f32 %v787_v11, 0.0 }
 0x222   :  { %v8362_v17 = vpack.c.bf16 %v1776_v39, %v1775_v15  ;;  %v789_v60 = vpop.f32.mrf.mxu0  ;;  %6021 = vmatprep.mubr.msk.bf16.mxu1 %vm7227_vm0, %v10948_v63  ;;  %v1384_v62 = vadd.f32 %v8039_v57, %v1383_v5 }
 0x223   :  { %v790_v59 = vadd.f32 %v8121_v28, %v789_v60  ;;  %v5923_v53 = vpop.f32.mrf.mxu1 }
 0x224   :  { %v5756_v20 = vpop.f32.mrf.mxu0  ;;  %v1777_v39 = vmax.f32 %v1384_v62, 0.0 }
 0x225   :  { %v1031_v21 = vmax.f32 %v790_v59, 0.0  ;;  %v1386_v48 = vpop.f32.mrf.mxu1 }
 0x226   :  { %v1387_v44 = vadd.f32 %v8039_v57, %v1386_v48  ;;  %v794_v32 = vpop.f32.mrf.mxu0  ;;  %6138 = vmatmul.mubr.bf16.gmra.mxu0 %v8164_v24 }
 0x227   :  { %v1112_v12 = vpack.c.bf16 %v1031_v21, %v1030_v0  ;;  %v5924_v15 = vpop.f32.mrf.mxu1  ;;  %6141 = vmatprep.mubr.msk.bf16.mxu0 %vm7227_vm0, %v10948_v63  ;;  %v795_v53 = vadd.f32 %v8121_v28, %v794_v32 }
 0x228   :  { %v1778_v50 = vmax.f32 %v1387_v44, 0.0  ;;  %v5759_v60 = vpop.f32.mrf.mxu0 }
 0x229   :  { %v1391_v5 = vpop.f32.mrf.mxu1  ;;  %6022 = vmatmul.mubr.bf16.gmra.mxu1 %v1112_v12  ;;  %v1032_v48 = vmax.f32 %v795_v53, 0.0 }
 0x22a   :  { %v8373_v11 = vpack.c.bf16 %v1778_v50, %v1777_v39  ;;  %v797_v59 = vpop.f32.mrf.mxu0  ;;  %6025 = vmatprep.mubr.msk.bf16.mxu1 %vm7227_vm0, %v10948_v63  ;;  %v1392_v0 = vadd.f32 %v8039_v57, %v1391_v5 }
 0x22b   :  { %v798_v24 = vadd.f32 %v8121_v28, %v797_v59  ;;  %v5927_v20 = vpop.f32.mrf.mxu1 }
 0x22c   :  { %v5760_v21 = vpop.f32.mrf.mxu0  ;;  %v1779_v50 = vmax.f32 %v1392_v0, 0.0 }
 0x22d   :  { %v1033_v62 = vmax.f32 %v798_v24, 0.0  ;;  %v1394_v44 = vpop.f32.mrf.mxu1 }
 0x22e   :  { %v1395_v15 = vadd.f32 %v8039_v57, %v1394_v44  ;;  %v802_v32 = vpop.f32.mrf.mxu0  ;;  %6142 = vmatmul.mubr.bf16.gmra.mxu0 %v8184_v36 }
 0x22f   :  { %v1113_v12 = vpack.c.bf16 %v1033_v62, %v1032_v48  ;;  %v5928_v39 = vpop.f32.mrf.mxu1  ;;  %6145 = vmatprep.mubr.msk.bf16.mxu0 %vm7227_vm0, %v10948_v63  ;;  %v803_v20 = vadd.f32 %v8121_v28, %v802_v32 }
 0x230   :  { %v1780_v60 = vmax.f32 %v1395_v15, 0.0  ;;  %v5763_v59 = vpop.f32.mrf.mxu0 }
 0x231   :  { %v1399_v5 = vpop.f32.mrf.mxu1  ;;  %6026 = vmatmul.mubr.bf16.gmra.mxu1 %v1113_v12  ;;  %v1034_v44 = vmax.f32 %v803_v20, 0.0 }
 0x232   :  { %v8384_v53 = vpack.c.bf16 %v1780_v60, %v1779_v50  ;;  %v805_v24 = vpop.f32.mrf.mxu0  ;;  %6029 = vmatprep.mubr.msk.bf16.mxu1 %vm7227_vm0, %v10948_v63  ;;  %v1400_v48 = vadd.f32 %v8039_v57, %v1399_v5 }
 0x233   :  { %v806_v36 = vadd.f32 %v8121_v28, %v805_v24  ;;  %v5931_v21 = vpop.f32.mrf.mxu1 }
 0x234   :  { %v5764_v62 = vpop.f32.mrf.mxu0  ;;  %v1781_v60 = vmax.f32 %v1400_v48, 0.0 }
 0x235   :  { %v1035_v0 = vmax.f32 %v806_v36, 0.0  ;;  %v1402_v15 = vpop.f32.mrf.mxu1  ;;  %v8403_v62 = vld [vmem:[%s10882_s2 + $0x1] ss:$0 sm:$0xff] }
 0x236   :  { %v1403_v39 = vadd.f32 %v8039_v57, %v1402_v15  ;;  %v810_v32 = vpop.f32.mrf.mxu0  ;;  %6146 = vmatmul.mubr.bf16.gmra.mxu0 %v8204_v41 }
 0x237   :  { %v1114_v12 = vpack.c.bf16 %v1035_v0, %v1034_v44  ;;  %v5932_v50 = vpop.f32.mrf.mxu1  ;;  %6149 = vmatprep.mubr.msk.bf16.mxu0 %vm7227_vm0, %v10948_v63  ;;  %v811_v21 = vadd.f32 %v8121_v28, %v810_v32  ;;  %v7198_v0 = vld [vmem:[%s10880_s1 + $0xe0] sm:$0xff]  }
 0x238   :  { %v1782_v59 = vmax.f32 %v1403_v39, 0.0  ;;  %v5767_v24 = vpop.f32.mrf.mxu0  ;;  %6630 = vmatpush3.bf16.msra.mxu0 %v7198_v0 }
 0x239   :  { %v1407_v5 = vpop.f32.mrf.mxu1  ;;  %6030 = vmatmul.mubr.bf16.gmra.mxu1 %v1114_v12  ;;  %v1036_v15 = vmax.f32 %v811_v21, 0.0  ;;  %6631 = vmatprep.subr.bf16.mxu0 %v10948_v63 }
 0x23a   :  { %v8395_v20 = vpack.c.bf16 %v1782_v59, %v1781_v60  ;;  %v813_v36 = vpop.f32.mrf.mxu0  ;;  %6033 = vmatprep.mubr.msk.bf16.mxu1 %vm7227_vm0, %v10948_v63  ;;  %v1408_v48 = vadd.f32 %v8403_v62, %v1407_v5 }
 0x23b   :  { %v814_v57 = vadd.f32 %v8121_v28, %v813_v36  ;;  %v5935_v41 = vpop.f32.mrf.mxu1 }
 0x23c   :  { %v5768_v44 = vpop.f32.mrf.mxu0  ;;  %v1783_v24 = vmax.f32 %v1408_v48, 0.0 }
 0x23d   :  { %v1037_v39 = vmax.f32 %v814_v57, 0.0  ;;  %v1410_v32 = vpop.f32.mrf.mxu1 }
 0x23e   :  { %v1411_v12 = vadd.f32 %v8403_v62, %v1410_v32  ;;  %v818_v50 = vpop.f32.mrf.mxu0  ;;  %6150 = vmatmul.mubr.bf16.gmra.mxu0 %v8224_v43 }
 0x23f   :  { %v1115_v60 = vpack.c.bf16 %v1037_v39, %v1036_v15  ;;  %v5936_v59 = vpop.f32.mrf.mxu1  ;;  %6153 = vmatprep.mubr.msk.bf16.mxu0 %vm7227_vm0, %v10948_v63  ;;  %v819_v21 = vadd.f32 %v8121_v28, %v818_v50 }
 0x240   :  { %v1784_v5 = vmax.f32 %v1411_v12, 0.0  ;;  %v5771_v36 = vpop.f32.mrf.mxu0 }
 0x241   :  { %v1415_v57 = vpop.f32.mrf.mxu1  ;;  %6034 = vmatmul.mubr.bf16.gmra.mxu1 %v1115_v60  ;;  %v1038_v39 = vmax.f32 %v819_v21, 0.0 }
 0x242   :  { %v8415_v41 = vpack.c.bf16 %v1784_v5, %v1783_v24  ;;  %v821_v44 = vpop.f32.mrf.mxu0  ;;  %6037 = vmatprep.mubr.msk.bf16.mxu1 %vm7227_vm0, %v10948_v63  ;;  %v1416_v0 = vadd.f32 %v8403_v62, %v1415_v57 }
 0x243   :  { %v822_v43 = vadd.f32 %v8121_v28, %v821_v44  ;;  %v5939_v15 = vpop.f32.mrf.mxu1 }
 0x244   :  { %v5772_v48 = vpop.f32.mrf.mxu0  ;;  %v1785_v5 = vmax.f32 %v1416_v0, 0.0 }
 0x245   :  { %v1039_v32 = vmax.f32 %v822_v43, 0.0  ;;  %v1418_v12 = vpop.f32.mrf.mxu1 }
 0x246   :  { %v1419_v59 = vadd.f32 %v8403_v62, %v1418_v12  ;;  %v826_v50 = vpop.f32.mrf.mxu0  ;;  %6154 = vmatmul.mubr.bf16.gmra.mxu0 %v8244_v33 }
 0x247   :  { %v1116_v60 = vpack.c.bf16 %v1039_v32, %v1038_v39  ;;  %v5940_v24 = vpop.f32.mrf.mxu1  ;;  %6157 = vmatprep.mubr.msk.bf16.mxu0 %vm7227_vm0, %v10948_v63  ;;  %v827_v15 = vadd.f32 %v8121_v28, %v826_v50 }
 0x248   :  { %v1786_v36 = vmax.f32 %v1419_v59, 0.0  ;;  %v5775_v44 = vpop.f32.mrf.mxu0 }
 0x249   :  { %v1423_v57 = vpop.f32.mrf.mxu1  ;;  %6038 = vmatmul.mubr.bf16.gmra.mxu1 %v1116_v60  ;;  %v1040_v12 = vmax.f32 %v827_v15, 0.0 }
 0x24a   :  { %v8426_v21 = vpack.c.bf16 %v1786_v36, %v1785_v5  ;;  %v829_v43 = vpop.f32.mrf.mxu0  ;;  %6041 = vmatprep.mubr.msk.bf16.mxu1 %vm7227_vm0, %v10948_v63  ;;  %v1424_v39 = vadd.f32 %v8403_v62, %v1423_v57 }
 0x24b   :  { %v830_v33 = vadd.f32 %v8121_v28, %v829_v43  ;;  %v5943_v48 = vpop.f32.mrf.mxu1 }
 0x24c   :  { %v5776_v32 = vpop.f32.mrf.mxu0  ;;  %v1787_v36 = vmax.f32 %v1424_v39, 0.0 }
 0x24d   :  { %v1041_v0 = vmax.f32 %v830_v33, 0.0  ;;  %v1426_v59 = vpop.f32.mrf.mxu1 }
 0x24e   :  { %v1427_v24 = vadd.f32 %v8403_v62, %v1426_v59  ;;  %v834_v50 = vpop.f32.mrf.mxu0  ;;  %6158 = vmatmul.mubr.bf16.gmra.mxu0 %v8264_v54 }
 0x24f   :  { %v1117_v60 = vpack.c.bf16 %v1041_v0, %v1040_v12  ;;  %v5944_v5 = vpop.f32.mrf.mxu1  ;;  %6161 = vmatprep.mubr.msk.bf16.mxu0 %vm7227_vm0, %v10948_v63  ;;  %v835_v48 = vadd.f32 %v8121_v28, %v834_v50 }
 0x250   :  { %v1788_v44 = vmax.f32 %v1427_v24, 0.0  ;;  %v5779_v43 = vpop.f32.mrf.mxu0 }
 0x251   :  { %v1431_v57 = vpop.f32.mrf.mxu1  ;;  %6042 = vmatmul.mubr.bf16.gmra.mxu1 %v1117_v60  ;;  %v1042_v59 = vmax.f32 %v835_v48, 0.0 }
 0x252   :  { %v8437_v15 = vpack.c.bf16 %v1788_v44, %v1787_v36  ;;  %v837_v33 = vpop.f32.mrf.mxu0  ;;  %6045 = vmatprep.mubr.msk.bf16.mxu1 %vm7227_vm0, %v10948_v63  ;;  %v1432_v12 = vadd.f32 %v8403_v62, %v1431_v57 }
 0x253   :  { %v838_v54 = vadd.f32 %v8121_v28, %v837_v33  ;;  %v5947_v32 = vpop.f32.mrf.mxu1 }
 0x254   :  { %v5780_v0 = vpop.f32.mrf.mxu0  ;;  %v1789_v44 = vmax.f32 %v1432_v12, 0.0 }
 0x255   :  { %v1043_v39 = vmax.f32 %v838_v54, 0.0  ;;  %v1434_v24 = vpop.f32.mrf.mxu1 }
 0x256   :  { %v1435_v5 = vadd.f32 %v8403_v62, %v1434_v24  ;;  %v842_v50 = vpop.f32.mrf.mxu0  ;;  %6162 = vmatmul.mubr.bf16.gmra.mxu0 %v8281_v40 }
 0x257   :  { %v1118_v60 = vpack.c.bf16 %v1043_v39, %v1042_v59  ;;  %v5948_v36 = vpop.f32.mrf.mxu1  ;;  %6165 = vmatprep.mubr.msk.bf16.mxu0 %vm7227_vm0, %v10948_v63  ;;  %v843_v32 = vadd.f32 %v8121_v28, %v842_v50 }
 0x258   :  { %v1790_v43 = vmax.f32 %v1435_v5, 0.0  ;;  %v5783_v33 = vpop.f32.mrf.mxu0 }
 0x259   :  { %v1439_v57 = vpop.f32.mrf.mxu1  ;;  %6046 = vmatmul.mubr.bf16.gmra.mxu1 %v1118_v60  ;;  %v1044_v24 = vmax.f32 %v843_v32, 0.0 }
 0x25a   :  { %v8448_v48 = vpack.c.bf16 %v1790_v43, %v1789_v44  ;;  %v845_v54 = vpop.f32.mrf.mxu0  ;;  %6049 = vmatprep.mubr.msk.bf16.mxu1 %vm7227_vm0, %v10948_v63  ;;  %v1440_v59 = vadd.f32 %v8403_v62, %v1439_v57  ;;  %v8461_v57 = vld [vmem:[%s10882_s2] ss:$0 sm:$0xff] }
 0x25b   :  { %v846_v40 = vadd.f32 %v8121_v28, %v845_v54  ;;  %v5951_v0 = vpop.f32.mrf.mxu1 }
 0x25c   :  { %v5784_v39 = vpop.f32.mrf.mxu0  ;;  %v1791_v43 = vmax.f32 %v1440_v59, 0.0 }
 0x25d   :  { %v1045_v12 = vmax.f32 %v846_v40, 0.0  ;;  %v1442_v5 = vpop.f32.mrf.mxu1 }
 0x25e   :  { %v1443_v36 = vadd.f32 %v8403_v62, %v1442_v5  ;;  %v850_v50 = vpop.f32.mrf.mxu0  ;;  %6166 = vmatmul.mubr.bf16.gmra.mxu0 %v8295_v35 }
 0x25f   :  { %v1119_v60 = vpack.c.bf16 %v1045_v12, %v1044_v24  ;;  %v5952_v44 = vpop.f32.mrf.mxu1  ;;  %6169 = vmatprep.mubr.msk.bf16.mxu0 %vm7227_vm0, %v10948_v63  ;;  %v851_v32 = vadd.f32 %v8461_v57, %v850_v50 }
 0x260   :  { %v1792_v33 = vmax.f32 %v1443_v36, 0.0  ;;  %v5787_v28 = vpop.f32.mrf.mxu0 }
 0x261   :  { %v1447_v54 = vpop.f32.mrf.mxu1  ;;  %6050 = vmatmul.mubr.bf16.gmra.mxu1 %v1119_v60  ;;  %v1046_v12 = vmax.f32 %v851_v32, 0.0 }
 0x262   :  { %v8464_v40 = vpack.c.bf16 %v1792_v33, %v1791_v43  ;;  %v853_v35 = vpop.f32.mrf.mxu0  ;;  %6053 = vmatprep.mubr.msk.bf16.mxu1 %vm7227_vm0, %v10948_v63  ;;  %v1448_v39 = vadd.f32 %v8403_v62, %v1447_v54 }
 0x263   :  { %v854_v0 = vadd.f32 %v8461_v57, %v853_v35  ;;  %v5955_v59 = vpop.f32.mrf.mxu1 }
 0x264   :  { %v5788_v24 = vpop.f32.mrf.mxu0  ;;  %v1793_v33 = vmax.f32 %v1448_v39, 0.0 }
 0x265   :  { %v1047_v5 = vmax.f32 %v854_v0, 0.0  ;;  %v1450_v36 = vpop.f32.mrf.mxu1 }
 0x266   :  { %v1451_v44 = vadd.f32 %v8403_v62, %v1450_v36  ;;  %v858_v50 = vpop.f32.mrf.mxu0  ;;  %6170 = vmatmul.mubr.bf16.gmra.mxu0 %v8313_v7 }
 0x267   :  { %v1120_v60 = vpack.c.bf16 %v1047_v5, %v1046_v12  ;;  %v5956_v43 = vpop.f32.mrf.mxu1  ;;  %6173 = vmatprep.mubr.msk.bf16.mxu0 %vm7227_vm0, %v10948_v63  ;;  %v859_v59 = vadd.f32 %v8461_v57, %v858_v50 }
 0x268   :  { %v1794_v28 = vmax.f32 %v1451_v44, 0.0  ;;  %v5791_v35 = vpop.f32.mrf.mxu0 }
 0x269   :  { %v1455_v54 = vpop.f32.mrf.mxu1  ;;  %6054 = vmatmul.mubr.bf16.gmra.mxu1 %v1120_v60  ;;  %v1048_v36 = vmax.f32 %v859_v59, 0.0 }
 0x26a   :  { %v8475_v32 = vpack.c.bf16 %v1794_v28, %v1793_v33  ;;  %v861_v0 = vpop.f32.mrf.mxu0  ;;  %6057 = vmatprep.mubr.msk.bf16.mxu1 %vm7227_vm0, %v10948_v63  ;;  %v1456_v12 = vadd.f32 %v8403_v62, %v1455_v54 }
 0x26b   :  { %v862_v7 = vadd.f32 %v8461_v57, %v861_v0  ;;  %v5959_v24 = vpop.f32.mrf.mxu1 }
 0x26c   :  { %v5792_v5 = vpop.f32.mrf.mxu0  ;;  %v1795_v28 = vmax.f32 %v1456_v12, 0.0 }
 0x26d   :  { %v1049_v39 = vmax.f32 %v862_v7, 0.0  ;;  %v1458_v44 = vpop.f32.mrf.mxu1 }
 0x26e   :  { %v1459_v43 = vadd.f32 %v8403_v62, %v1458_v44  ;;  %v866_v50 = vpop.f32.mrf.mxu0  ;;  %6174 = vmatmul.mubr.bf16.gmra.mxu0 %v8329_v8 }
 0x26f   :  { %v1121_v60 = vpack.c.bf16 %v1049_v39, %v1048_v36  ;;  %v5960_v33 = vpop.f32.mrf.mxu1  ;;  %6177 = vmatprep.mubr.msk.bf16.mxu0 %vm7227_vm0, %v10948_v63  ;;  %v867_v24 = vadd.f32 %v8461_v57, %v866_v50 }
 0x270   :  { %v1796_v35 = vmax.f32 %v1459_v43, 0.0  ;;  %v5795_v0 = vpop.f32.mrf.mxu0 }
 0x271   :  { %v1463_v54 = vpop.f32.mrf.mxu1  ;;  %6058 = vmatmul.mubr.bf16.gmra.mxu1 %v1121_v60  ;;  %v1050_v44 = vmax.f32 %v867_v24, 0.0 }
 0x272   :  { %v8486_v59 = vpack.c.bf16 %v1796_v35, %v1795_v28  ;;  %v869_v7 = vpop.f32.mrf.mxu0  ;;  %6061 = vmatprep.mubr.msk.bf16.mxu1 %vm7227_vm0, %v10948_v63  ;;  %v1464_v36 = vadd.f32 %v8403_v62, %v1463_v54 }
 0x273   :  { %v870_v8 = vadd.f32 %v8461_v57, %v869_v7  ;;  %v5963_v5 = vpop.f32.mrf.mxu1 }
 0x274   :  { %v5796_v39 = vpop.f32.mrf.mxu0  ;;  %v1797_v35 = vmax.f32 %v1464_v36, 0.0 }
 0x275   :  { %v1051_v12 = vmax.f32 %v870_v8, 0.0  ;;  %v1466_v43 = vpop.f32.mrf.mxu1 }
 0x276   :  { %v1467_v33 = vadd.f32 %v8403_v62, %v1466_v43  ;;  %v874_v50 = vpop.f32.mrf.mxu0  ;;  %6178 = vmatmul.mubr.bf16.gmra.mxu0 %v8340_v38 }
 0x277   :  { %v1122_v60 = vpack.c.bf16 %v1051_v12, %v1050_v44  ;;  %v5964_v28 = vpop.f32.mrf.mxu1  ;;  %6181 = vmatprep.mubr.msk.bf16.mxu0 %vm7227_vm0, %v10948_v63  ;;  %v875_v5 = vadd.f32 %v8461_v57, %v874_v50 }
 0x278   :  { %v1798_v0 = vmax.f32 %v1467_v33, 0.0  ;;  %v5799_v7 = vpop.f32.mrf.mxu0 }
 0x279   :  { %v1471_v54 = vpop.f32.mrf.mxu1  ;;  %6062 = vmatmul.mubr.bf16.gmra.mxu1 %v1122_v60  ;;  %v1052_v43 = vmax.f32 %v875_v5, 0.0 }
 0x27a   :  { %v8497_v24 = vpack.c.bf16 %v1798_v0, %v1797_v35  ;;  %v877_v8 = vpop.f32.mrf.mxu0  ;;  %6065 = vmatprep.mubr.msk.bf16.mxu1 %vm7227_vm0, %v10948_v63  ;;  %v1472_v44 = vadd.f32 %v8403_v62, %v1471_v54  ;;  %v7200_v0 = vld [vmem:[%s10880_s1 + $0xd8] sm:$0xff]  }
 0x27b   :  { %v878_v38 = vadd.f32 %v8461_v57, %v877_v8  ;;  %v5967_v39 = vpop.f32.mrf.mxu1  ;;  %6632 = vmatpush3.bf16.msra.mxu0 %v7200_v0 }
 0x27c   :  { %v5800_v12 = vpop.f32.mrf.mxu0  ;;  %v1799_v7 = vmax.f32 %v1472_v44, 0.0  ;;  %6633 = vmatprep.subr.bf16.mxu0 %v10948_v63 }
 0x27d   :  { %v1053_v36 = vmax.f32 %v878_v38, 0.0  ;;  %v1474_v33 = vpop.f32.mrf.mxu1 }
 0x27e   :  { %v1475_v28 = vadd.f32 %v8403_v62, %v1474_v33  ;;  %v882_v50 = vpop.f32.mrf.mxu0  ;;  %6182 = vmatmul.mubr.bf16.gmra.mxu0 %v8351_v56 }
 0x27f   :  { %v1123_v60 = vpack.c.bf16 %v1053_v36, %v1052_v43  ;;  %v5968_v35 = vpop.f32.mrf.mxu1  ;;  %6185 = vmatprep.mubr.msk.bf16.mxu0 %vm7227_vm0, %v10948_v63  ;;  %v883_v5 = vadd.f32 %v8461_v57, %v882_v50 }
 0x280   :  { %v1800_v54 = vmax.f32 %v1475_v28, 0.0  ;;  %v5803_v8 = vpop.f32.mrf.mxu0 }
 0x281   :  { %v1479_v38 = vpop.f32.mrf.mxu1  ;;  %6066 = vmatmul.mubr.bf16.gmra.mxu1 %v1123_v60  ;;  %v1054_v33 = vmax.f32 %v883_v5, 0.0 }
 0x282   :  { %v8511_v39 = vpack.c.bf16 %v1800_v54, %v1799_v7  ;;  %v885_v56 = vpop.f32.mrf.mxu0  ;;  %6069 = vmatprep.mubr.msk.bf16.mxu1 %vm7227_vm0, %v10948_v63  ;;  %v1480_v44 = vadd.f32 %v8403_v62, %v1479_v38 }
 0x283   :  { %v886_v12 = vadd.f32 %v8461_v57, %v885_v56  ;;  %v5971_v43 = vpop.f32.mrf.mxu1 }
 0x284   :  { %v5804_v36 = vpop.f32.mrf.mxu0  ;;  %v1801_v54 = vmax.f32 %v1480_v44, 0.0 }
 0x285   :  { %v1055_v28 = vmax.f32 %v886_v12, 0.0  ;;  %v1482_v50 = vpop.f32.mrf.mxu1 }
 0x286   :  { %v1483_v60 = vadd.f32 %v8403_v62, %v1482_v50  ;;  %v890_v35 = vpop.f32.mrf.mxu0  ;;  %6186 = vmatmul.mubr.bf16.gmra.mxu0 %v8362_v17 }
 0x287   :  { %v1124_v0 = vpack.c.bf16 %v1055_v28, %v1054_v33  ;;  %v5972_v7 = vpop.f32.mrf.mxu1  ;;  %6189 = vmatprep.mubr.msk.bf16.mxu0 %vm7227_vm0, %v10948_v63  ;;  %v891_v43 = vadd.f32 %v8461_v57, %v890_v35 }
 0x288   :  { %v1802_v8 = vmax.f32 %v1483_v60, 0.0  ;;  %v5807_v56 = vpop.f32.mrf.mxu0 }
 0x289   :  { %v1487_v38 = vpop.f32.mrf.mxu1  ;;  %6070 = vmatmul.mubr.bf16.gmra.mxu1 %v1124_v0  ;;  %v1056_v50 = vmax.f32 %v891_v43, 0.0 }
 0x28a   :  { %v8523_v5 = vpack.c.bf16 %v1802_v8, %v1801_v54  ;;  %v893_v12 = vpop.f32.mrf.mxu0  ;;  %6073 = vmatprep.mubr.msk.bf16.mxu1 %vm7227_vm0, %v10948_v63  ;;  %v1488_v33 = vadd.f32 %v8403_v62, %v1487_v38 }
 0x28b   :  { %v894_v17 = vadd.f32 %v8461_v57, %v893_v12  ;;  %v5975_v36 = vpop.f32.mrf.mxu1 }
 0x28c   :  { %v5808_v28 = vpop.f32.mrf.mxu0  ;;  %v1803_v8 = vmax.f32 %v1488_v33, 0.0 }
 0x28d   :  { %v1057_v44 = vmax.f32 %v894_v17, 0.0  ;;  %v1490_v60 = vpop.f32.mrf.mxu1 }
 0x28e   :  { %v1491_v7 = vadd.f32 %v8403_v62, %v1490_v60  ;;  %v898_v35 = vpop.f32.mrf.mxu0  ;;  %6190 = vmatmul.mubr.bf16.gmra.mxu0 %v8373_v11 }
 0x28f   :  { %v1125_v0 = vpack.c.bf16 %v1057_v44, %v1056_v50  ;;  %v5976_v54 = vpop.f32.mrf.mxu1  ;;  %6193 = vmatprep.mubr.msk.bf16.mxu0 %vm7227_vm0, %v10948_v63  ;;  %v899_v36 = vadd.f32 %v8461_v57, %v898_v35 }
 0x290   :  { %v1804_v56 = vmax.f32 %v1491_v7, 0.0  ;;  %v5811_v12 = vpop.f32.mrf.mxu0 }
 0x291   :  { %v1495_v38 = vpop.f32.mrf.mxu1  ;;  %6074 = vmatmul.mubr.bf16.gmra.mxu1 %v1125_v0  ;;  %v1058_v60 = vmax.f32 %v899_v36, 0.0 }
 0x292   :  { %v8534_v43 = vpack.c.bf16 %v1804_v56, %v1803_v8  ;;  %v901_v17 = vpop.f32.mrf.mxu0  ;;  %6077 = vmatprep.mubr.msk.bf16.mxu1 %vm7227_vm0, %v10948_v63  ;;  %v1496_v50 = vadd.f32 %v8403_v62, %v1495_v38 }
 0x293   :  { %v902_v11 = vadd.f32 %v8461_v57, %v901_v17  ;;  %v5979_v28 = vpop.f32.mrf.mxu1 }
 0x294   :  { %v5812_v44 = vpop.f32.mrf.mxu0  ;;  %v1805_v56 = vmax.f32 %v1496_v50, 0.0 }
 0x295   :  { %v1059_v33 = vmax.f32 %v902_v11, 0.0  ;;  %v1498_v7 = vpop.f32.mrf.mxu1 }
 0x296   :  { %v1499_v54 = vadd.f32 %v8403_v62, %v1498_v7  ;;  %v906_v35 = vpop.f32.mrf.mxu0  ;;  %6194 = vmatmul.mubr.bf16.gmra.mxu0 %v8384_v53 }
 0x297   :  { %v1126_v0 = vpack.c.bf16 %v1059_v33, %v1058_v60  ;;  %v5980_v8 = vpop.f32.mrf.mxu1  ;;  %6197 = vmatprep.mubr.msk.bf16.mxu0 %vm7227_vm0, %v10948_v63  ;;  %v907_v28 = vadd.f32 %v8461_v57, %v906_v35 }
 0x298   :  { %v1806_v12 = vmax.f32 %v1499_v54, 0.0  ;;  %v5815_v17 = vpop.f32.mrf.mxu0 }
 0x299   :  { %v1503_v38 = vpop.f32.mrf.mxu1  ;;  %6078 = vmatmul.mubr.bf16.gmra.mxu1 %v1126_v0  ;;  %v1060_v7 = vmax.f32 %v907_v28, 0.0 }
 0x29a   :  { %v8545_v36 = vpack.c.bf16 %v1806_v12, %v1805_v56  ;;  %v909_v11 = vpop.f32.mrf.mxu0  ;;  %6081 = vmatprep.mubr.msk.bf16.mxu1 %vm7227_vm0, %v10948_v63  ;;  %v1504_v60 = vadd.f32 %v8403_v62, %v1503_v38 }
 0x29b   :  { %v910_v53 = vadd.f32 %v8461_v57, %v909_v11  ;;  %v5983_v44 = vpop.f32.mrf.mxu1 }
 0x29c   :  { %v5816_v33 = vpop.f32.mrf.mxu0  ;;  %v1807_v12 = vmax.f32 %v1504_v60, 0.0 }
 0x29d   :  { %v1061_v50 = vmax.f32 %v910_v53, 0.0  ;;  %v1506_v54 = vpop.f32.mrf.mxu1 }
 0x29e   :  { %v1507_v8 = vadd.f32 %v8403_v62, %v1506_v54  ;;  %v914_v35 = vpop.f32.mrf.mxu0  ;;  %6198 = vmatmul.mubr.bf16.gmra.mxu0 %v8395_v20 }
 0x29f   :  { %v1127_v0 = vpack.c.bf16 %v1061_v50, %v1060_v7  ;;  %v5984_v56 = vpop.f32.mrf.mxu1  ;;  %6201 = vmatprep.mubr.msk.bf16.mxu0 %vm7227_vm0, %v10948_v63  ;;  %v915_v44 = vadd.f32 %v8461_v57, %v914_v35 }
 0x2a0   :  { %v1808_v17 = vmax.f32 %v1507_v8, 0.0  ;;  %v5819_v11 = vpop.f32.mrf.mxu0 }
 0x2a1   :  { %v1511_v38 = vpop.f32.mrf.mxu1  ;;  %6082 = vmatmul.mubr.bf16.gmra.mxu1 %v1127_v0  ;;  %v1062_v54 = vmax.f32 %v915_v44, 0.0 }
 0x2a2   :  { %v8556_v28 = vpack.c.bf16 %v1808_v17, %v1807_v12  ;;  %v917_v53 = vpop.f32.mrf.mxu0  ;;  %6085 = vmatprep.mubr.msk.bf16.mxu1 %vm7227_vm0, %v10948_v63  ;;  %v1512_v7 = vadd.f32 %v8403_v62, %v1511_v38 }
 0x2a3   :  { %v918_v20 = vadd.f32 %v8461_v57, %v917_v53  ;;  %v5987_v33 = vpop.f32.mrf.mxu1 }
 0x2a4   :  { %v5820_v50 = vpop.f32.mrf.mxu0  ;;  %v1809_v17 = vmax.f32 %v1512_v7, 0.0 }
 0x2a5   :  { %v1063_v60 = vmax.f32 %v918_v20, 0.0  ;;  %v1514_v8 = vpop.f32.mrf.mxu1 }
 0x2a6   :  { %v1515_v56 = vadd.f32 %v8403_v62, %v1514_v8  ;;  %v922_v35 = vpop.f32.mrf.mxu0  ;;  %6202 = vmatmul.mubr.bf16.gmra.mxu0 %v8415_v41 }
 0x2a7   :  { %v1128_v0 = vpack.c.bf16 %v1063_v60, %v1062_v54  ;;  %v5988_v12 = vpop.f32.mrf.mxu1  ;;  %6205 = vmatprep.mubr.msk.bf16.mxu0 %vm7227_vm0, %v10948_v63  ;;  %v923_v33 = vadd.f32 %v8461_v57, %v922_v35 }
 0x2a8   :  { %v1810_v11 = vmax.f32 %v1515_v56, 0.0  ;;  %v5823_v53 = vpop.f32.mrf.mxu0 }
 0x2a9   :  { %v1519_v38 = vpop.f32.mrf.mxu1  ;;  %6086 = vmatmul.mubr.bf16.gmra.mxu1 %v1128_v0  ;;  %v1064_v8 = vmax.f32 %v923_v33, 0.0 }
 0x2aa   :  { %v8567_v44 = vpack.c.bf16 %v1810_v11, %v1809_v17  ;;  %v925_v20 = vpop.f32.mrf.mxu0  ;;  %6089 = vmatprep.mubr.msk.bf16.mxu1 %vm7227_vm0, %v10948_v63  ;;  %v1520_v54 = vadd.f32 %v8403_v62, %v1519_v38 }
 0x2ab   :  { %v926_v41 = vadd.f32 %v8461_v57, %v925_v20  ;;  %v5991_v50 = vpop.f32.mrf.mxu1 }
 0x2ac   :  { %v5824_v60 = vpop.f32.mrf.mxu0  ;;  %v1811_v11 = vmax.f32 %v1520_v54, 0.0 }
 0x2ad   :  { %v1065_v7 = vmax.f32 %v926_v41, 0.0  ;;  %v1522_v56 = vpop.f32.mrf.mxu1 }
 0x2ae   :  { %v1523_v12 = vadd.f32 %v8403_v62, %v1522_v56  ;;  %v930_v35 = vpop.f32.mrf.mxu0  ;;  %6206 = vmatmul.mubr.bf16.gmra.mxu0 %v8426_v21 }
 0x2af   :  { %v1129_v0 = vpack.c.bf16 %v1065_v7, %v1064_v8  ;;  %v5992_v17 = vpop.f32.mrf.mxu1  ;;  %6209 = vmatprep.mubr.msk.bf16.mxu0 %vm7227_vm0, %v10948_v63  ;;  %v931_v50 = vadd.f32 %v8461_v57, %v930_v35 }
 0x2b0   :  { %v1812_v53 = vmax.f32 %v1523_v12, 0.0  ;;  %v5827_v20 = vpop.f32.mrf.mxu0 }
 0x2b1   :  { %v1527_v38 = vpop.f32.mrf.mxu1  ;;  %6090 = vmatmul.mubr.bf16.gmra.mxu1 %v1129_v0  ;;  %v1066_v56 = vmax.f32 %v931_v50, 0.0 }
 0x2b2   :  { %v8578_v33 = vpack.c.bf16 %v1812_v53, %v1811_v11  ;;  %v933_v41 = vpop.f32.mrf.mxu0  ;;  %6093 = vmatprep.mubr.msk.bf16.mxu1 %vm7227_vm0, %v10948_v63  ;;  %v1528_v8 = vadd.f32 %v8403_v62, %v1527_v38 }
 0x2b3   :  { %v934_v21 = vadd.f32 %v8461_v57, %v933_v41  ;;  %v5995_v60 = vpop.f32.mrf.mxu1 }
 0x2b4   :  { %v5828_v7 = vpop.f32.mrf.mxu0  ;;  %v1813_v20 = vmax.f32 %v1528_v8, 0.0  ;;  %v8598_v8 = vld [vmem:[%s10882_s2 + $0x2] ss:$0 sm:$0xff] }
 0x2b5   :  { %v1067_v54 = vmax.f32 %v934_v21, 0.0  ;;  %v1530_v12 = vpop.f32.mrf.mxu1 }
 0x2b6   :  { %v1531_v17 = vadd.f32 %v8403_v62, %v1530_v12  ;;  %v938_v35 = vpop.f32.mrf.mxu0  ;;  %6210 = vmatmul.mubr.bf16.gmra.mxu0 %v8437_v15 }
 0x2b7   :  { %v1130_v0 = vpack.c.bf16 %v1067_v54, %v1066_v56  ;;  %v939_v11 = vadd.f32 %v8461_v57, %v938_v35  ;;  %v5996_v53 = vpop.f32.mrf.mxu1  ;;  %6213 = vmatprep.mubr.msk.bf16.mxu0 %vm7227_vm0, %v10948_v63 }
 0x2b8   :  { %v1814_v41 = vmax.f32 %v1531_v17, 0.0  ;;  %v5831_v60 = vpop.f32.mrf.mxu0 }
 0x2b9   :  { %v1535_v38 = vpop.f32.mrf.mxu1  ;;  %6094 = vmatmul.mubr.bf16.gmra.mxu1 %v1130_v0  ;;  %v1068_v7 = vmax.f32 %v939_v11, 0.0  ;;  %v7202_v11 = vld [vmem:[%s10880_s1 + $0xd0] sm:$0xff]  }
 0x2ba   :  { %v8589_v50 = vpack.c.bf16 %v1814_v41, %v1813_v20  ;;  %v941_v21 = vpop.f32.mrf.mxu0  ;;  %6097 = vmatprep.mubr.msk.bf16.mxu1 %vm7227_vm0, %v10948_v63  ;;  %v1536_v56 = vadd.f32 %v8403_v62, %v1535_v38  ;;  %6634 = vmatpush3.bf16.msra.mxu0 %v7202_v11  ;;  %v7199_v11 = vld [vmem:[%s10880_s1 + $0x138] sm:$0xff]  }
 0x2bb   :  { %v5999_v15 = vpop.f32.mrf.mxu1  ;;  %v1131_v35 = vpack.c.bf16 %v1068_v7, %v1068_v7  ;;  %6635 = vmatprep.subr.bf16.mxu0 %v10948_v63 }
 0x2bc   :  { %v5832_v57 = vpop.f32.mrf.mxu0  ;;  %v1815_v53 = vmax.f32 %v1536_v56, 0.0 }
 0x2bd   :  { %v1538_v54 = vpop.f32.mrf.mxu1 }
 0x2be   :  { %v1539_v12 = vadd.f32 %v8403_v62, %v1538_v54  ;;  %v2036_v17 = vpop.f32.mrf.mxu0  ;;  %6214 = vmatmul.mubr.bf16.gmra.mxu0 %v8448_v48 }
 0x2bf   :  { %v6000_v0 = vpop.f32.mrf.mxu1  ;;  %6217 = vmatprep.mubr.msk.bf16.mxu0 %vm7227_vm0, %v10948_v63  ;;  %v2037_v60 = vadd.f32 %v8598_v8, %v2036_v17 }
 0x2c0   :  { %v1816_v20 = vmax.f32 %v1539_v12, 0.0  ;;  %v6119_v41 = vpop.f32.mrf.mxu0 }
 0x2c1   :  { %v1543_v38 = vpop.f32.mrf.mxu1  ;;  %6098 = vmatmul.mubr.bf16.gmra.mxu1 %v1131_v35  ;;  %v2538_v54 = vmax.f32 %v2037_v60, 0.0 }
 0x2c2   :  { %v8607_v21 = vpack.c.bf16 %v1816_v20, %v1815_v53  ;;  %v2039_v48 = vpop.f32.mrf.mxu0  ;;  %6371 = vmatprep.mubr.msk.bf16.mxu1 %vm7227_vm0, %v10948_v63  ;;  %v1544_v56 = vadd.f32 %v8403_v62, %v1543_v38 }
 0x2c3   :  { %v2040_v7 = vadd.f32 %v8598_v8, %v2039_v48  ;;  %v6003_v15 = vpop.f32.mrf.mxu1 }
 0x2c4   :  { %v6120_v57 = vpop.f32.mrf.mxu0  ;;  %v1817_v41 = vmax.f32 %v1544_v56, 0.0 }
 0x2c5   :  { %v2539_v12 = vmax.f32 %v2040_v7, 0.0  ;;  %v1546_v17 = vpop.f32.mrf.mxu1  ;;  %v7201_v57 = vld [vmem:[%s10880_s1 + $0x130] sm:$0xff]  }
 0x2c6   :  { %v1547_v35 = vadd.f32 %v8403_v62, %v1546_v17  ;;  %v2044_v0 = vpop.f32.mrf.mxu0  ;;  %6218 = vmatmul.mubr.bf16.gmra.mxu0 %v8464_v40 }
 0x2c7   :  { %v8619_v53 = vpack.c.bf16 %v2539_v12, %v2538_v54  ;;  %v6004_v20 = vpop.f32.mrf.mxu1  ;;  %6221 = vmatprep.mubr.msk.bf16.mxu0 %vm7227_vm0, %v10948_v63  ;;  %v2045_v48 = vadd.f32 %v8598_v8, %v2044_v0 }
 0x2c8   :  { %v1818_v38 = vmax.f32 %v1547_v35, 0.0  ;;  %v6123_v60 = vpop.f32.mrf.mxu0 }
 0x2c9   :  { %v1551_v7 = vpop.f32.mrf.mxu1  ;;  %6372 = vmatmul.mubr.msk.bf16.vlgmr.msra.gmra.mxu1 %vm218_vm1, %v7263_v4  ;;  %v2540_v4 = vmax.f32 %v2045_v48, 0.0 }
 0x2ca   :  { %v8626_v40 = vpack.c.bf16 %v1818_v38, %v1817_v41  ;;  %v2047_v15 = vpop.f32.mrf.mxu0  ;;  %7167 = vmatpush3.bf16.msra.mxu1 %v7199_v11  ;;  %6375 = vmatprep.mubr.msk.bf16.mxu1 %vm7227_vm0, %v10948_v63  ;;  %v1552_v12 = vadd.f32 %v8403_v62, %v1551_v7 }
 0x2cb   :  { %v2048_v56 = vadd.f32 %v8598_v8, %v2047_v15  ;;  %v6007_v54 = vpop.f32.mrf.mxu1  ;;  %7160 = vmatprep.subr.bf16.mxu1 %v10948_v63 }
 0x2cc   :  { %v6124_v17 = vpop.f32.mrf.mxu0  ;;  %v1819_v60 = vmax.f32 %v1552_v12, 0.0 }
 0x2cd   :  { %v2541_v35 = vmax.f32 %v2048_v56, 0.0  ;;  %v1554_v0 = vpop.f32.mrf.mxu1 }
 0x2ce   :  { %v1555_v11 = vadd.f32 %v8403_v62, %v1554_v0  ;;  %v2052_v20 = vpop.f32.mrf.mxu0  ;;  %6222 = vmatmul.mubr.bf16.gmra.mxu0 %v8475_v32  ;;  %7168 = vmatpush3.bf16.msra.mxu1 %v7201_v57 }
 0x2cf   :  { %v8638_v41 = vpack.c.bf16 %v2541_v35, %v2540_v4  ;;  %v6008_v38 = vpop.f32.mrf.mxu1  ;;  %6225 = vmatprep.mubr.msk.bf16.mxu0 %vm7227_vm0, %v10948_v63  ;;  %7161 = vmatprep.subr.bf16.mxu1 %v10948_v63  ;;  %v2053_v48 = vadd.f32 %v8598_v8, %v2052_v20 }
 0x2d0   :  { %v1820_v7 = vmax.f32 %v1555_v11, 0.0  ;;  %v6127_v15 = vpop.f32.mrf.mxu0 }
 0x2d1   :  { %v1559_v56 = vpop.f32.mrf.mxu1  ;;  %6376 = vmatmul.mubr.msk.bf16.gmra.mxu1 %vm218_vm1, %v7283_v9  ;;  %v2542_v35 = vmax.f32 %v2053_v48, 0.0 }
 0x2d2   :  { %v8646_v54 = vpack.c.bf16 %v1820_v7, %v1819_v60  ;;  %v2055_v32 = vpop.f32.mrf.mxu0  ;;  %6379 = vmatprep.mubr.msk.bf16.mxu1 %vm7227_vm0, %v10948_v63  ;;  %v1560_v4 = vadd.f32 %v8403_v62, %v1559_v56  ;;  %v7203_v7 = vld [vmem:[%s10880_s1 + $0x128] sm:$0xff]  }
 0x2d3   :  { %v2056_v57 = vadd.f32 %v8598_v8, %v2055_v32  ;;  %v6011_v17 = vpop.f32.mrf.mxu1  ;;  %7169 = vmatpush3.bf16.msra.mxu1 %v7203_v7 }
 0x2d4   :  { %v6128_v12 = vpop.f32.mrf.mxu0  ;;  %v1821_v15 = vmax.f32 %v1560_v4, 0.0  ;;  %7162 = vmatprep.subr.bf16.mxu1 %v10948_v63 }
 0x2d5   :  { %v2543_v0 = vmax.f32 %v2056_v57, 0.0  ;;  %v1562_v11 = vpop.f32.mrf.mxu1 }
 0x2d6   :  { %v1563_v20 = vadd.f32 %v8403_v62, %v1562_v11  ;;  %v2060_v38 = vpop.f32.mrf.mxu0  ;;  %6226 = vmatmul.mubr.bf16.gmra.mxu0 %v8486_v59 }
 0x2d7   :  { %v8654_v9 = vpack.c.bf16 %v2543_v0, %v2542_v35  ;;  %v6012_v60 = vpop.f32.mrf.mxu1  ;;  %6229 = vmatprep.mubr.msk.bf16.mxu0 %vm7227_vm0, %v10948_v63  ;;  %v2061_v32 = vadd.f32 %v8598_v8, %v2060_v38 }
 0x2d8   :  { %v1822_v56 = vmax.f32 %v1563_v20, 0.0  ;;  %v6131_v48 = vpop.f32.mrf.mxu0 }
 0x2d9   :  { %v1567_v57 = vpop.f32.mrf.mxu1  ;;  %6380 = vmatmul.mubr.msk.bf16.gmra.mxu1 %vm218_vm1, %v7299_v13  ;;  %v2544_v11 = vmax.f32 %v2061_v32, 0.0 }
 0x2da   :  { %v8664_v59 = vpack.c.bf16 %v1822_v56, %v1821_v15  ;;  %v2063_v17 = vpop.f32.mrf.mxu0  ;;  %6383 = vmatprep.mubr.msk.bf16.mxu1 %vm7227_vm0, %v10948_v63  ;;  %v1568_v4 = vadd.f32 %v8403_v62, %v1567_v57 }
 0x2db   :  { %v2064_v12 = vadd.f32 %v8598_v8, %v2063_v17  ;;  %v6015_v35 = vpop.f32.mrf.mxu1 }
 0x2dc   :  { %v6132_v0 = vpop.f32.mrf.mxu0  ;;  %v1823_v7 = vmax.f32 %v1568_v4, 0.0 }
 0x2dd   :  { %v2545_v20 = vmax.f32 %v2064_v12, 0.0  ;;  %v1570_v38 = vpop.f32.mrf.mxu1 }
 0x2de   :  { %v1571_v13 = vadd.f32 %v8403_v62, %v1570_v38  ;;  %v2068_v60 = vpop.f32.mrf.mxu0  ;;  %6230 = vmatmul.mubr.bf16.gmra.mxu0 %v8497_v24 }
 0x2df   :  { %v8673_v15 = vpack.c.bf16 %v2545_v20, %v2544_v11  ;;  %v6016_v56 = vpop.f32.mrf.mxu1  ;;  %6233 = vmatprep.mubr.msk.bf16.mxu0 %vm7227_vm0, %v10948_v63  ;;  %v2069_v57 = vadd.f32 %v8598_v8, %v2068_v60 }
 0x2e0   :  { %v1824_v48 = vmax.f32 %v1571_v13, 0.0  ;;  %v6135_v17 = vpop.f32.mrf.mxu0 }
 0x2e1   :  { %v1575_v35 = vpop.f32.mrf.mxu1  ;;  %6384 = vmatmul.mubr.msk.bf16.gmra.mxu1 %vm218_vm1, %v7312_v16  ;;  %v2546_v20 = vmax.f32 %v2069_v57, 0.0 }
 0x2e2   :  { %v8680_v32 = vpack.c.bf16 %v1824_v48, %v1823_v7  ;;  %v2071_v12 = vpop.f32.mrf.mxu0  ;;  %6387 = vmatprep.mubr.msk.bf16.mxu1 %vm7227_vm0, %v10948_v63  ;;  %v1576_v11 = vadd.f32 %v8403_v62, %v1575_v35 }
 0x2e3   :  { %v2072_v24 = vadd.f32 %v8598_v8, %v2071_v12  ;;  %v6019_v0 = vpop.f32.mrf.mxu1 }
 0x2e4   :  { %v6136_v4 = vpop.f32.mrf.mxu0  ;;  %v1825_v48 = vmax.f32 %v1576_v11, 0.0 }
 0x2e5   :  { %v2547_v38 = vmax.f32 %v2072_v24, 0.0  ;;  %v1578_v13 = vpop.f32.mrf.mxu1 }
 0x2e6   :  { %v1579_v60 = vadd.f32 %v8403_v62, %v1578_v13  ;;  %v2076_v56 = vpop.f32.mrf.mxu0  ;;  %6234 = vmatmul.mubr.bf16.gmra.mxu0 %v8511_v39 }
 0x2e7   :  { %v8688_v16 = vpack.c.bf16 %v2547_v38, %v2546_v20  ;;  %v6020_v7 = vpop.f32.mrf.mxu1  ;;  %6237 = vmatprep.mubr.msk.bf16.mxu0 %vm7227_vm0, %v10948_v63  ;;  %v2077_v35 = vadd.f32 %v8598_v8, %v2076_v56 }
 0x2e8   :  { %v1826_v17 = vmax.f32 %v1579_v60, 0.0  ;;  %v6139_v12 = vpop.f32.mrf.mxu0 }
 0x2e9   :  { %v1583_v0 = vpop.f32.mrf.mxu1  ;;  %6388 = vmatmul.mubr.msk.bf16.gmra.mxu1 %vm218_vm1, %v7324_v19  ;;  %v2548_v38 = vmax.f32 %v2077_v35, 0.0 }
 0x2ea   :  { %v8695_v57 = vpack.c.bf16 %v1826_v17, %v1825_v48  ;;  %v2079_v24 = vpop.f32.mrf.mxu0  ;;  %6391 = vmatprep.mubr.msk.bf16.mxu1 %vm7227_vm0, %v10948_v63  ;;  %v1584_v20 = vadd.f32 %v8403_v62, %v1583_v0 }
 0x2eb   :  { %v2080_v39 = vadd.f32 %v8598_v8, %v2079_v24  ;;  %v6023_v4 = vpop.f32.mrf.mxu1 }
 0x2ec   :  { %v6140_v11 = vpop.f32.mrf.mxu0  ;;  %v1827_v17 = vmax.f32 %v1584_v20, 0.0  ;;  %v8718_v20 = vld [vmem:[%s10882_s2 + $0x1] ss:$0 sm:$0xff] }
 0x2ed   :  { %v2549_v13 = vmax.f32 %v2080_v39, 0.0  ;;  %v1586_v60 = vpop.f32.mrf.mxu1 }
 0x2ee   :  { %v1587_v56 = vadd.f32 %v8403_v62, %v1586_v60  ;;  %v2084_v7 = vpop.f32.mrf.mxu0  ;;  %6238 = vmatmul.mubr.bf16.gmra.mxu0 %v8523_v5 }
 0x2ef   :  { %v8703_v19 = vpack.c.bf16 %v2549_v13, %v2548_v38  ;;  %v6024_v48 = vpop.f32.mrf.mxu1  ;;  %6241 = vmatprep.mubr.msk.bf16.mxu0 %vm7227_vm0, %v10948_v63  ;;  %v2085_v0 = vadd.f32 %v8598_v8, %v2084_v7 }
 0x2f0   :  { %v1828_v12 = vmax.f32 %v1587_v56, 0.0  ;;  %v6143_v24 = vpop.f32.mrf.mxu0 }
 0x2f1   :  { %v1591_v4 = vpop.f32.mrf.mxu1  ;;  %6392 = vmatmul.mubr.msk.bf16.gmra.mxu1 %vm218_vm1, %v7336_v22  ;;  %v2550_v13 = vmax.f32 %v2085_v0, 0.0 }
 0x2f2   :  { %v8710_v35 = vpack.c.bf16 %v1828_v12, %v1827_v17  ;;  %v2087_v62 = vpop.f32.mrf.mxu0  ;;  %6395 = vmatprep.mubr.msk.bf16.mxu1 %vm7227_vm0, %v10948_v63  ;;  %v1592_v11 = vadd.f32 %v8718_v20, %v1591_v4 }
 0x2f3   :  { %v2088_v5 = vadd.f32 %v8598_v8, %v2087_v62  ;;  %v6027_v39 = vpop.f32.mrf.mxu1 }
 0x2f4   :  { %v6144_v38 = vpop.f32.mrf.mxu0  ;;  %v1829_v12 = vmax.f32 %v1592_v11, 0.0 }
 0x2f5   :  { %v2551_v60 = vmax.f32 %v2088_v5, 0.0  ;;  %v1594_v22 = vpop.f32.mrf.mxu1 }
 0x2f6   :  { %v1595_v56 = vadd.f32 %v8718_v20, %v1594_v22  ;;  %v2092_v7 = vpop.f32.mrf.mxu0  ;;  %6242 = vmatmul.mubr.bf16.gmra.mxu0 %v8534_v43 }
 0x2f7   :  { %v8723_v48 = vpack.c.bf16 %v2551_v60, %v2550_v13  ;;  %v6028_v17 = vpop.f32.mrf.mxu1  ;;  %6245 = vmatprep.mubr.msk.bf16.mxu0 %vm7227_vm0, %v10948_v63  ;;  %v2093_v4 = vadd.f32 %v8598_v8, %v2092_v7  ;;  %v7204_v60 = vld [vmem:[%s10880_s1 + $0xc8] sm:$0xff]  }
 0x2f8   :  { %v1830_v24 = vmax.f32 %v1595_v56, 0.0  ;;  %v6147_v62 = vpop.f32.mrf.mxu0  ;;  %6636 = vmatpush3.bf16.msra.mxu0 %v7204_v60 }
 0x2f9   :  { %v1599_v39 = vpop.f32.mrf.mxu1  ;;  %6396 = vmatmul.mubr.msk.bf16.gmra.mxu1 %vm218_vm1, %v7352_v26  ;;  %v2552_v22 = vmax.f32 %v2093_v4, 0.0  ;;  %6637 = vmatprep.subr.bf16.mxu0 %v10948_v63 }
 0x2fa   :  { %v8730_v0 = vpack.c.bf16 %v1830_v24, %v1829_v12  ;;  %v2095_v5 = vpop.f32.mrf.mxu0  ;;  %6399 = vmatprep.mubr.msk.bf16.mxu1 %vm7227_vm0, %v10948_v63  ;;  %v1600_v13 = vadd.f32 %v8718_v20, %v1599_v39 }
 0x2fb   :  { %v2096_v43 = vadd.f32 %v8598_v8, %v2095_v5  ;;  %v6031_v38 = vpop.f32.mrf.mxu1 }
 0x2fc   :  { %v6148_v11 = vpop.f32.mrf.mxu0  ;;  %v1831_v62 = vmax.f32 %v1600_v13, 0.0 }
 0x2fd   :  { %v2553_v56 = vmax.f32 %v2096_v43, 0.0  ;;  %v1602_v7 = vpop.f32.mrf.mxu1 }
 0x2fe   :  { %v1603_v26 = vadd.f32 %v8718_v20, %v1602_v7  ;;  %v2100_v17 = vpop.f32.mrf.mxu0  ;;  %6246 = vmatmul.mubr.bf16.gmra.mxu0 %v8545_v36 }
 0x2ff   :  { %v8741_v12 = vpack.c.bf16 %v2553_v56, %v2552_v22  ;;  %v6032_v24 = vpop.f32.mrf.mxu1  ;;  %6249 = vmatprep.mubr.msk.bf16.mxu0 %vm7227_vm0, %v10948_v63  ;;  %v2101_v4 = vadd.f32 %v8598_v8, %v2100_v17 }
 0x300   :  { %v1832_v39 = vmax.f32 %v1603_v26, 0.0  ;;  %v6151_v5 = vpop.f32.mrf.mxu0 }
 0x301   :  { %v1607_v43 = vpop.f32.mrf.mxu1  ;;  %6400 = vmatmul.mubr.msk.bf16.gmra.mxu1 %vm218_vm1, %v7371_v31  ;;  %v2554_v56 = vmax.f32 %v2101_v4, 0.0 }
 0x302   :  { %v8749_v38 = vpack.c.bf16 %v1832_v39, %v1831_v62  ;;  %v2103_v36 = vpop.f32.mrf.mxu0  ;;  %6403 = vmatprep.mubr.msk.bf16.mxu1 %vm7227_vm0, %v10948_v63  ;;  %v1608_v13 = vadd.f32 %v8718_v20, %v1607_v43 }
 0x303   :  { %v2104_v11 = vadd.f32 %v8598_v8, %v2103_v36  ;;  %v6035_v60 = vpop.f32.mrf.mxu1 }
 0x304   :  { %v6152_v22 = vpop.f32.mrf.mxu0  ;;  %v1833_v39 = vmax.f32 %v1608_v13, 0.0 }
 0x305   :  { %v2555_v7 = vmax.f32 %v2104_v11, 0.0  ;;  %v1610_v26 = vpop.f32.mrf.mxu1 }
 0x306   :  { %v1611_v17 = vadd.f32 %v8718_v20, %v1610_v26  ;;  %v2108_v24 = vpop.f32.mrf.mxu0  ;;  %6250 = vmatmul.mubr.bf16.gmra.mxu0 %v8556_v28 }
 0x307   :  { %v8757_v31 = vpack.c.bf16 %v2555_v7, %v2554_v56  ;;  %v6036_v62 = vpop.f32.mrf.mxu1  ;;  %6253 = vmatprep.mubr.msk.bf16.mxu0 %vm7227_vm0, %v10948_v63  ;;  %v2109_v43 = vadd.f32 %v8598_v8, %v2108_v24 }
 0x308   :  { %v1834_v5 = vmax.f32 %v1611_v17, 0.0  ;;  %v6155_v36 = vpop.f32.mrf.mxu0 }
 0x309   :  { %v1615_v60 = vpop.f32.mrf.mxu1  ;;  %6404 = vmatmul.mubr.msk.bf16.gmra.mxu1 %vm218_vm1, %v7395_v37  ;;  %v2556_v7 = vmax.f32 %v2109_v43, 0.0  ;;  %v7205_v43 = vld [vmem:[%s10880_s1 + $0x120] sm:$0xff]  }
 0x30a   :  { %v8764_v4 = vpack.c.bf16 %v1834_v5, %v1833_v39  ;;  %v2111_v11 = vpop.f32.mrf.mxu0  ;;  %6407 = vmatprep.mubr.msk.bf16.mxu1 %vm7227_vm0, %v10948_v63  ;;  %v1616_v56 = vadd.f32 %v8718_v20, %v1615_v60  ;;  %7170 = vmatpush3.bf16.msra.mxu1 %v7205_v43 }
 0x30b   :  { %v2112_v28 = vadd.f32 %v8598_v8, %v2111_v11  ;;  %v6039_v22 = vpop.f32.mrf.mxu1  ;;  %7163 = vmatprep.subr.bf16.mxu1 %v10948_v63 }
 0x30c   :  { %v6156_v13 = vpop.f32.mrf.mxu0  ;;  %v1835_v5 = vmax.f32 %v1616_v56, 0.0 }
 0x30d   :  { %v2557_v26 = vmax.f32 %v2112_v28, 0.0  ;;  %v1618_v17 = vpop.f32.mrf.mxu1 }
 0x30e   :  { %v1619_v24 = vadd.f32 %v8718_v20, %v1618_v17  ;;  %v2116_v62 = vpop.f32.mrf.mxu0  ;;  %6254 = vmatmul.mubr.bf16.gmra.mxu0 %v8567_v44 }
 0x30f   :  { %v8772_v37 = vpack.c.bf16 %v2557_v26, %v2556_v7  ;;  %v6040_v39 = vpop.f32.mrf.mxu1  ;;  %6257 = vmatprep.mubr.msk.bf16.mxu0 %vm7227_vm0, %v10948_v63  ;;  %v2117_v60 = vadd.f32 %v8598_v8, %v2116_v62 }
 0x310   :  { %v1836_v36 = vmax.f32 %v1619_v24, 0.0  ;;  %v6159_v11 = vpop.f32.mrf.mxu0 }
 0x311   :  { %v1623_v22 = vpop.f32.mrf.mxu1  ;;  %6408 = vmatmul.mubr.msk.bf16.gmra.mxu1 %vm218_vm1, %v7415_v42  ;;  %v2558_v42 = vmax.f32 %v2117_v60, 0.0 }
 0x312   :  { %v8782_v44 = vpack.c.bf16 %v1836_v36, %v1835_v5  ;;  %v2119_v28 = vpop.f32.mrf.mxu0  ;;  %6411 = vmatprep.mubr.msk.bf16.mxu1 %vm7227_vm0, %v10948_v63  ;;  %v1624_v7 = vadd.f32 %v8718_v20, %v1623_v22 }
 0x313   :  { %v2120_v56 = vadd.f32 %v8598_v8, %v2119_v28  ;;  %v6043_v13 = vpop.f32.mrf.mxu1 }
 0x314   :  { %v6160_v26 = vpop.f32.mrf.mxu0  ;;  %v1837_v11 = vmax.f32 %v1624_v7, 0.0 }
 0x315   :  { %v2559_v17 = vmax.f32 %v2120_v56, 0.0  ;;  %v1626_v24 = vpop.f32.mrf.mxu1 }
 0x316   :  { %v1627_v62 = vadd.f32 %v8718_v20, %v1626_v24  ;;  %v2124_v39 = vpop.f32.mrf.mxu0  ;;  %6258 = vmatmul.mubr.bf16.gmra.mxu0 %v8578_v33 }
 0x317   :  { %v8791_v5 = vpack.c.bf16 %v2559_v17, %v2558_v42  ;;  %v6044_v36 = vpop.f32.mrf.mxu1  ;;  %6261 = vmatprep.mubr.msk.bf16.mxu0 %vm7227_vm0, %v10948_v63  ;;  %v2125_v28 = vadd.f32 %v8598_v8, %v2124_v39 }
 0x318   :  { %v1838_v43 = vmax.f32 %v1627_v62, 0.0  ;;  %v6163_v22 = vpop.f32.mrf.mxu0 }
 0x319   :  { %v1631_v13 = vpop.f32.mrf.mxu1  ;;  %6412 = vmatmul.mubr.msk.bf16.gmra.mxu1 %vm218_vm1, %v7432_v46  ;;  %v2560_v17 = vmax.f32 %v2125_v28, 0.0 }
 0x31a   :  { %v8798_v60 = vpack.c.bf16 %v1838_v43, %v1837_v11  ;;  %v2127_v56 = vpop.f32.mrf.mxu0  ;;  %6415 = vmatprep.mubr.msk.bf16.mxu1 %vm7227_vm0, %v10948_v63  ;;  %v1632_v42 = vadd.f32 %v8718_v20, %v1631_v13 }
 0x31b   :  { %v2128_v33 = vadd.f32 %v8598_v8, %v2127_v56  ;;  %v6047_v26 = vpop.f32.mrf.mxu1 }
 0x31c   :  { %v6164_v7 = vpop.f32.mrf.mxu0  ;;  %v1839_v43 = vmax.f32 %v1632_v42, 0.0 }
 0x31d   :  { %v2561_v24 = vmax.f32 %v2128_v33, 0.0  ;;  %v1634_v62 = vpop.f32.mrf.mxu1 }
 0x31e   :  { %v1635_v39 = vadd.f32 %v8718_v20, %v1634_v62  ;;  %v2132_v36 = vpop.f32.mrf.mxu0  ;;  %6262 = vmatmul.mubr.bf16.gmra.mxu0 %v8589_v50 }
 0x31f   :  { %v8806_v46 = vpack.c.bf16 %v2561_v24, %v2560_v17  ;;  %v6048_v11 = vpop.f32.mrf.mxu1  ;;  %6265 = vmatprep.mubr.msk.bf16.mxu0 %vm7227_vm0, %v10948_v63  ;;  %v2133_v13 = vadd.f32 %v8598_v8, %v2132_v36 }
 0x320   :  { %v1840_v22 = vmax.f32 %v1635_v39, 0.0  ;;  %v6167_v56 = vpop.f32.mrf.mxu0 }
 0x321   :  { %v1639_v26 = vpop.f32.mrf.mxu1  ;;  %6416 = vmatmul.mubr.msk.bf16.gmra.mxu1 %vm218_vm1, %v7444_v49  ;;  %v2562_v24 = vmax.f32 %v2133_v13, 0.0 }
 0x322   :  { %v8813_v28 = vpack.c.bf16 %v1840_v22, %v1839_v43  ;;  %v2135_v33 = vpop.f32.mrf.mxu0  ;;  %6419 = vmatprep.mubr.msk.bf16.mxu1 %vm7227_vm0, %v10948_v63  ;;  %v1640_v17 = vadd.f32 %v8718_v20, %v1639_v26 }
 0x323   :  { %v2136_v50 = vadd.f32 %v8598_v8, %v2135_v33  ;;  %v6051_v7 = vpop.f32.mrf.mxu1 }
 0x324   :  { %v6168_v42 = vpop.f32.mrf.mxu0  ;;  %v1841_v22 = vmax.f32 %v1640_v17, 0.0 }
 0x325   :  { %v2563_v62 = vmax.f32 %v2136_v50, 0.0  ;;  %v1642_v39 = vpop.f32.mrf.mxu1 }
 0x326   :  { %v1643_v36 = vadd.f32 %v8718_v20, %v1642_v39  ;;  %v2140_v11 = vpop.f32.mrf.mxu0  ;;  %6266 = vmatmul.mubr.bf16.gmra.mxu0 %v8607_v21 }
 0x327   :  { %v8821_v49 = vpack.c.bf16 %v2563_v62, %v2562_v24  ;;  %v6052_v43 = vpop.f32.mrf.mxu1  ;;  %6269 = vmatprep.mubr.msk.bf16.mxu0 %vm7227_vm0, %v10948_v63  ;;  %v2141_v26 = vadd.f32 %v8598_v8, %v2140_v11 }
 0x328   :  { %v1842_v56 = vmax.f32 %v1643_v36, 0.0  ;;  %v6171_v33 = vpop.f32.mrf.mxu0 }
 0x329   :  { %v1647_v7 = vpop.f32.mrf.mxu1  ;;  %6420 = vmatmul.mubr.msk.bf16.gmra.mxu1 %vm218_vm1, %v7456_v52  ;;  %v2564_v62 = vmax.f32 %v2141_v26, 0.0 }
 0x32a   :  { %v8828_v13 = vpack.c.bf16 %v1842_v56, %v1841_v22  ;;  %v2143_v50 = vpop.f32.mrf.mxu0  ;;  %6423 = vmatprep.mubr.msk.bf16.mxu1 %vm7227_vm0, %v10948_v63  ;;  %v1648_v24 = vadd.f32 %v8718_v20, %v1647_v7 }
 0x32b   :  { %v2144_v21 = vadd.f32 %v8598_v8, %v2143_v50  ;;  %v6055_v42 = vpop.f32.mrf.mxu1 }
 0x32c   :  { %v6172_v17 = vpop.f32.mrf.mxu0  ;;  %v1843_v56 = vmax.f32 %v1648_v24, 0.0 }
 0x32d   :  { %v2565_v39 = vmax.f32 %v2144_v21, 0.0  ;;  %v1650_v36 = vpop.f32.mrf.mxu1 }
 0x32e   :  { %v1651_v11 = vadd.f32 %v8718_v20, %v1650_v36  ;;  %v2148_v43 = vpop.f32.mrf.mxu0  ;;  %6270 = vmatmul.mubr.bf16.gmra.mxu0 %v8626_v40 }
 0x32f   :  { %v8836_v52 = vpack.c.bf16 %v2565_v39, %v2564_v62  ;;  %v6056_v22 = vpop.f32.mrf.mxu1  ;;  %6273 = vmatprep.mubr.msk.bf16.mxu0 %vm7227_vm0, %v10948_v63  ;;  %v2149_v7 = vadd.f32 %v8598_v8, %v2148_v43 }
 0x330   :  { %v1844_v33 = vmax.f32 %v1651_v11, 0.0  ;;  %v6175_v50 = vpop.f32.mrf.mxu0 }
 0x331   :  { %v1655_v42 = vpop.f32.mrf.mxu1  ;;  %6424 = vmatmul.mubr.msk.bf16.gmra.mxu1 %vm218_vm1, %v7468_v55  ;;  %v2566_v39 = vmax.f32 %v2149_v7, 0.0  ;;  %v7206_v7 = vld [vmem:[%s10880_s1 + $0xc0] sm:$0xff]  }
 0x332   :  { %v8843_v26 = vpack.c.bf16 %v1844_v33, %v1843_v56  ;;  %v2151_v21 = vpop.f32.mrf.mxu0  ;;  %6427 = vmatprep.mubr.msk.bf16.mxu1 %vm7227_vm0, %v10948_v63  ;;  %v1656_v62 = vadd.f32 %v8718_v20, %v1655_v42  ;;  %6638 = vmatpush3.bf16.msra.mxu0 %v7206_v7 }
 0x333   :  { %v2152_v40 = vadd.f32 %v8598_v8, %v2151_v21  ;;  %v6059_v17 = vpop.f32.mrf.mxu1  ;;  %6891 = vmatprep.subr.bf16.mxu0 %v10948_v63 }
 0x334   :  { %v6176_v24 = vpop.f32.mrf.mxu0  ;;  %v1845_v33 = vmax.f32 %v1656_v62, 0.0 }
 0x335   :  { %v2567_v36 = vmax.f32 %v2152_v40, 0.0  ;;  %v1658_v11 = vpop.f32.mrf.mxu1 }
 0x336   :  { %v1659_v43 = vadd.f32 %v8718_v20, %v1658_v11  ;;  %v2156_v22 = vpop.f32.mrf.mxu0  ;;  %6274 = vmatmul.mubr.bf16.gmra.mxu0 %v8646_v54 }
 0x337   :  { %v8851_v55 = vpack.c.bf16 %v2567_v36, %v2566_v39  ;;  %v6060_v56 = vpop.f32.mrf.mxu1  ;;  %6277 = vmatprep.mubr.msk.bf16.mxu0 %vm7227_vm0, %v10948_v63  ;;  %v2157_v42 = vadd.f32 %v8598_v8, %v2156_v22 }
 0x338   :  { %v1846_v50 = vmax.f32 %v1659_v43, 0.0  ;;  %v6179_v21 = vpop.f32.mrf.mxu0 }
 0x339   :  { %v1663_v17 = vpop.f32.mrf.mxu1  ;;  %6428 = vmatmul.mubr.msk.bf16.gmra.mxu1 %vm218_vm1, %v7480_v58  ;;  %v2568_v58 = vmax.f32 %v2157_v42, 0.0 }
 0x33a   :  { %v8861_v54 = vpack.c.bf16 %v1846_v50, %v1845_v33  ;;  %v2159_v40 = vpop.f32.mrf.mxu0  ;;  %6431 = vmatprep.mubr.msk.bf16.mxu1 %vm7227_vm0, %v10948_v63  ;;  %v1664_v39 = vadd.f32 %v8718_v20, %v1663_v17 }
 0x33b   :  { %v2160_v62 = vadd.f32 %v8598_v8, %v2159_v40  ;;  %v6063_v24 = vpop.f32.mrf.mxu1 }
 0x33c   :  { %v6180_v36 = vpop.f32.mrf.mxu0  ;;  %v1847_v21 = vmax.f32 %v1664_v39, 0.0 }
 0x33d   :  { %v2569_v11 = vmax.f32 %v2160_v62, 0.0  ;;  %v1666_v43 = vpop.f32.mrf.mxu1 }
 0x33e   :  { %v1667_v22 = vadd.f32 %v8718_v20, %v1666_v43  ;;  %v2164_v56 = vpop.f32.mrf.mxu0  ;;  %6278 = vmatmul.mubr.bf16.gmra.mxu0 %v8664_v59 }
 0x33f   :  { %v8870_v33 = vpack.c.bf16 %v2569_v11, %v2568_v58  ;;  %v6064_v50 = vpop.f32.mrf.mxu1  ;;  %6281 = vmatprep.mubr.msk.bf16.mxu0 %vm7227_vm0, %v10948_v63  ;;  %v2165_v40 = vadd.f32 %v8598_v8, %v2164_v56 }
 0x340   :  { %v1848_v7 = vmax.f32 %v1667_v22, 0.0  ;;  %v6183_v17 = vpop.f32.mrf.mxu0 }
 0x341   :  { %v1671_v24 = vpop.f32.mrf.mxu1  ;;  %6432 = vmatmul.mubr.msk.bf16.gmra.mxu1 %vm218_vm1, %v7492_v61  ;;  %v2570_v11 = vmax.f32 %v2165_v40, 0.0 }
 0x342   :  { %v8877_v42 = vpack.c.bf16 %v1848_v7, %v1847_v21  ;;  %v2167_v62 = vpop.f32.mrf.mxu0  ;;  %6435 = vmatprep.mubr.msk.bf16.mxu1 %vm7227_vm0, %v10948_v63  ;;  %v1672_v58 = vadd.f32 %v8718_v20, %v1671_v24 }
 0x343   :  { %v2168_v59 = vadd.f32 %v8598_v8, %v2167_v62  ;;  %v6067_v36 = vpop.f32.mrf.mxu1 }
 0x344   :  { %v6184_v39 = vpop.f32.mrf.mxu0  ;;  %v1849_v7 = vmax.f32 %v1672_v58, 0.0 }
 0x345   :  { %v2571_v43 = vmax.f32 %v2168_v59, 0.0  ;;  %v1674_v22 = vpop.f32.mrf.mxu1 }
 0x346   :  { %v1675_v56 = vadd.f32 %v8718_v20, %v1674_v22  ;;  %v2172_v50 = vpop.f32.mrf.mxu0  ;;  %6282 = vmatmul.mubr.bf16.gmra.mxu0 %v8680_v32 }
 0x347   :  { %v8885_v61 = vpack.c.bf16 %v2571_v43, %v2570_v11  ;;  %v6068_v21 = vpop.f32.mrf.mxu1  ;;  %6285 = vmatprep.mubr.msk.bf16.mxu0 %vm7227_vm0, %v10948_v63  ;;  %v2173_v24 = vadd.f32 %v8598_v8, %v2172_v50 }
 0x348   :  { %v1850_v17 = vmax.f32 %v1675_v56, 0.0  ;;  %v6187_v62 = vpop.f32.mrf.mxu0 }
 0x349   :  { %v1679_v36 = vpop.f32.mrf.mxu1  ;;  %6436 = vmatmul.mubr.msk.bf16.gmra.mxu1 %vm218_vm1, %v7504_v1  ;;  %v2572_v43 = vmax.f32 %v2173_v24, 0.0  ;;  %v8910_v24 = vld [vmem:[%s10880_s1 + $0x118] sm:$0xff]  }
 0x34a   :  { %v8892_v40 = vpack.c.bf16 %v1850_v17, %v1849_v7  ;;  %v2175_v59 = vpop.f32.mrf.mxu0  ;;  %6439 = vmatprep.mubr.msk.bf16.mxu1 %vm7227_vm0, %v10948_v63  ;;  %v1680_v11 = vadd.f32 %v8718_v20, %v1679_v36  ;;  %7171 = vmatpush3.bf16.msra.mxu1 %v8910_v24 }
 0x34b   :  { %v2176_v32 = vadd.f32 %v8598_v8, %v2175_v59  ;;  %v6071_v39 = vpop.f32.mrf.mxu1  ;;  %7164 = vmatprep.subr.bf16.mxu1 %v10948_v63 }
 0x34c   :  { %v6188_v58 = vpop.f32.mrf.mxu0  ;;  %v1851_v17 = vmax.f32 %v1680_v11, 0.0 }
 0x34d   :  { %v2573_v22 = vmax.f32 %v2176_v32, 0.0  ;;  %v1682_v56 = vpop.f32.mrf.mxu1 }
 0x34e   :  { %v1683_v50 = vadd.f32 %v8718_v20, %v1682_v56  ;;  %v2180_v21 = vpop.f32.mrf.mxu0  ;;  %6286 = vmatmul.mubr.bf16.gmra.mxu0 %v8695_v57 }
 0x34f   :  { %v8900_v1 = vpack.c.bf16 %v2573_v22, %v2572_v43  ;;  %v6072_v7 = vpop.f32.mrf.mxu1  ;;  %6289 = vmatprep.mubr.msk.bf16.mxu0 %vm7227_vm0, %v10948_v63  ;;  %v2181_v36 = vadd.f32 %v8598_v8, %v2180_v21 }
 0x350   :  { %v1852_v62 = vmax.f32 %v1683_v50, 0.0  ;;  %v6191_v59 = vpop.f32.mrf.mxu0 }
 0x351   :  { %v1687_v39 = vpop.f32.mrf.mxu1  ;;  %6440 = vmatmul.mubr.msk.bf16.gmra.mxu1 %vm218_vm1, %v7519_v6  ;;  %v2574_v6 = vmax.f32 %v2181_v36, 0.0 }
 0x352   :  { %v8912_v57 = vpack.c.bf16 %v1852_v62, %v1851_v17  ;;  %v2183_v32 = vpop.f32.mrf.mxu0  ;;  %6443 = vmatprep.mubr.msk.bf16.mxu1 %vm7227_vm0, %v10948_v63  ;;  %v1688_v43 = vadd.f32 %v8718_v20, %v1687_v39 }
 0x353   :  { %v2184_v11 = vadd.f32 %v8598_v8, %v2183_v32  ;;  %v6075_v58 = vpop.f32.mrf.mxu1 }
 0x354   :  { %v6192_v22 = vpop.f32.mrf.mxu0  ;;  %v1853_v59 = vmax.f32 %v1688_v43, 0.0 }
 0x355   :  { %v2575_v56 = vmax.f32 %v2184_v11, 0.0  ;;  %v1690_v50 = vpop.f32.mrf.mxu1 }
 0x356   :  { %v1691_v21 = vadd.f32 %v8718_v20, %v1690_v50  ;;  %v2188_v7 = vpop.f32.mrf.mxu0  ;;  %6290 = vmatmul.mubr.bf16.gmra.mxu0 %v8710_v35 }
 0x357   :  { %v8922_v17 = vpack.c.bf16 %v2575_v56, %v2574_v6  ;;  %v6076_v62 = vpop.f32.mrf.mxu1  ;;  %6293 = vmatprep.mubr.msk.bf16.mxu0 %vm7227_vm0, %v10948_v63  ;;  %v2189_v58 = vadd.f32 %v8598_v8, %v2188_v7 }
 0x358   :  { %v1854_v32 = vmax.f32 %v1691_v21, 0.0  ;;  %v6195_v39 = vpop.f32.mrf.mxu0 }
 0x359   :  { %v1695_v22 = vpop.f32.mrf.mxu1  ;;  %6444 = vmatmul.mubr.msk.bf16.gmra.mxu1 %vm218_vm1, %v7532_v10  ;;  %v2576_v50 = vmax.f32 %v2189_v58, 0.0 }
 0x35a   :  { %v8929_v36 = vpack.c.bf16 %v1854_v32, %v1853_v59  ;;  %v2191_v11 = vpop.f32.mrf.mxu0  ;;  %6447 = vmatprep.mubr.msk.bf16.mxu1 %vm7227_vm0, %v10948_v63  ;;  %v1696_v56 = vadd.f32 %v8718_v20, %v1695_v22 }
 0x35b   :  { %v2192_v35 = vadd.f32 %v8598_v8, %v2191_v11  ;;  %v6079_v6 = vpop.f32.mrf.mxu1 }
 0x35c   :  { %v6196_v43 = vpop.f32.mrf.mxu0  ;;  %v1855_v32 = vmax.f32 %v1696_v56, 0.0 }
 0x35d   :  { %v2577_v21 = vmax.f32 %v2192_v35, 0.0  ;;  %v1698_v62 = vpop.f32.mrf.mxu1 }
 0x35e   :  { %v1699_v7 = vadd.f32 %v8718_v20, %v1698_v62  ;;  %v2196_v39 = vpop.f32.mrf.mxu0  ;;  %6294 = vmatmul.mubr.bf16.gmra.mxu0 %v8730_v0 }
 0x35f   :  { %v8937_v10 = vpack.c.bf16 %v2577_v21, %v2576_v50  ;;  %v6080_v59 = vpop.f32.mrf.mxu1  ;;  %6297 = vmatprep.mubr.msk.bf16.mxu0 %vm7227_vm0, %v10948_v63  ;;  %v2197_v22 = vadd.f32 %v8598_v8, %v2196_v39 }
 0x360   :  { %v1856_v11 = vmax.f32 %v1699_v7, 0.0  ;;  %v6199_v6 = vpop.f32.mrf.mxu0 }
 0x361   :  { %v1703_v43 = vpop.f32.mrf.mxu1  ;;  %6448 = vmatmul.mubr.msk.bf16.gmra.mxu1 %vm218_vm1, %v7544_v14  ;;  %v2578_v62 = vmax.f32 %v2197_v22, 0.0 }
 0x362   :  { %v8944_v58 = vpack.c.bf16 %v1856_v11, %v1855_v32  ;;  %v2199_v35 = vpop.f32.mrf.mxu0  ;;  %6451 = vmatprep.mubr.msk.bf16.mxu1 %vm7227_vm0, %v10948_v63  ;;  %v1704_v21 = vadd.f32 %v8718_v20, %v1703_v43 }
 0x363   :  { %v2200_v0 = vadd.f32 %v8598_v8, %v2199_v35  ;;  %v6083_v50 = vpop.f32.mrf.mxu1 }
 0x364   :  { %v6200_v56 = vpop.f32.mrf.mxu0  ;;  %v1857_v11 = vmax.f32 %v1704_v21, 0.0 }
 0x365   :  { %v2579_v7 = vmax.f32 %v2200_v0, 0.0  ;;  %v1706_v59 = vpop.f32.mrf.mxu1 }
 0x366   :  { %v1707_v39 = vadd.f32 %v8718_v20, %v1706_v59  ;;  %v2204_v6 = vpop.f32.mrf.mxu0  ;;  %6298 = vmatmul.mubr.bf16.gmra.mxu0 %v8749_v38 }
 0x367   :  { %v8952_v14 = vpack.c.bf16 %v2579_v7, %v2578_v62  ;;  %v6084_v32 = vpop.f32.mrf.mxu1  ;;  %6301 = vmatprep.mubr.msk.bf16.mxu0 %vm7227_vm0, %v10948_v63  ;;  %v2205_v43 = vadd.f32 %v8598_v8, %v2204_v6 }
 0x368   :  { %v1858_v35 = vmax.f32 %v1707_v39, 0.0  ;;  %v6203_v50 = vpop.f32.mrf.mxu0 }
 0x369   :  { %v1711_v56 = vpop.f32.mrf.mxu1  ;;  %6452 = vmatmul.mubr.msk.bf16.gmra.mxu1 %vm218_vm1, %v7556_v18  ;;  %v2580_v59 = vmax.f32 %v2205_v43, 0.0  ;;  %v8974_v43 = vld [vmem:[%s10882_s2 + $0x2] ss:$0 sm:$0xff] }
 0x36a   :  { %v8959_v22 = vpack.c.bf16 %v1858_v35, %v1857_v11  ;;  %v2207_v0 = vpop.f32.mrf.mxu0  ;;  %6455 = vmatprep.mubr.msk.bf16.mxu1 %vm7227_vm0, %v10948_v63  ;;  %v1712_v7 = vadd.f32 %v8718_v20, %v1711_v56 }
 0x36b   :  { %v2208_v38 = vadd.f32 %v8598_v8, %v2207_v0  ;;  %v6087_v62 = vpop.f32.mrf.mxu1 }
 0x36c   :  { %v6204_v21 = vpop.f32.mrf.mxu0  ;;  %v1859_v35 = vmax.f32 %v1712_v7, 0.0 }
 0x36d   :  { %v2581_v39 = vmax.f32 %v2208_v38, 0.0  ;;  %v1714_v32 = vpop.f32.mrf.mxu1 }
 0x36e   :  { %v1715_v6 = vadd.f32 %v8718_v20, %v1714_v32  ;;  %v2212_v50 = vpop.f32.mrf.mxu0  ;;  %6302 = vmatmul.mubr.bf16.gmra.mxu0 %v8764_v4 }
 0x36f   :  { %v8967_v18 = vpack.c.bf16 %v2581_v39, %v2580_v59  ;;  %v6088_v11 = vpop.f32.mrf.mxu1  ;;  %6305 = vmatprep.mubr.msk.bf16.mxu0 %vm7227_vm0, %v10948_v63  ;;  %v2213_v56 = vadd.f32 %v8974_v43, %v2212_v50 }
 0x370   :  { %v1860_v8 = vmax.f32 %v1715_v6, 0.0  ;;  %v6207_v0 = vpop.f32.mrf.mxu0 }
 0x371   :  { %v1719_v38 = vpop.f32.mrf.mxu1  ;;  %6456 = vmatmul.mubr.msk.bf16.gmra.mxu1 %vm218_vm1, %v7568_v23  ;;  %v2582_v32 = vmax.f32 %v2213_v56, 0.0 }
 0x372   :  { %v8979_v4 = vpack.c.bf16 %v1860_v8, %v1859_v35  ;;  %v2215_v62 = vpop.f32.mrf.mxu0  ;;  %6459 = vmatprep.mubr.msk.bf16.mxu1 %vm7227_vm0, %v10948_v63  ;;  %v1720_v59 = vadd.f32 %v8718_v20, %v1719_v38 }
 0x373   :  { %v2216_v7 = vadd.f32 %v8974_v43, %v2215_v62  ;;  %v6091_v21 = vpop.f32.mrf.mxu1 }
 0x374   :  { %v6208_v39 = vpop.f32.mrf.mxu0  ;;  %v1861_v8 = vmax.f32 %v1720_v59, 0.0 }
 0x375   :  { %v2583_v6 = vmax.f32 %v2216_v7, 0.0  ;;  %v1722_v11 = vpop.f32.mrf.mxu1 }
 0x376   :  { %v1723_v50 = vadd.f32 %v8718_v20, %v1722_v11  ;;  %v2220_v0 = vpop.f32.mrf.mxu0  ;;  %6306 = vmatmul.mubr.bf16.gmra.mxu0 %v8782_v44 }
 0x377   :  { %v8987_v23 = vpack.c.bf16 %v2583_v6, %v2582_v32  ;;  %v6092_v35 = vpop.f32.mrf.mxu1  ;;  %6309 = vmatprep.mubr.msk.bf16.mxu0 %vm7227_vm0, %v10948_v63  ;;  %v2221_v38 = vadd.f32 %v8974_v43, %v2220_v0 }
 0x378   :  { %v1862_v62 = vmax.f32 %v1723_v50, 0.0  ;;  %v6211_v21 = vpop.f32.mrf.mxu0 }
 0x379   :  { %v1727_v39 = vpop.f32.mrf.mxu1  ;;  %6460 = vmatmul.mubr.msk.bf16.gmra.mxu1 %vm218_vm1, %v7580_v27  ;;  %v2584_v11 = vmax.f32 %v2221_v38, 0.0 }
 0x37a   :  { %v8994_v56 = vpack.c.bf16 %v1862_v62, %v1861_v8  ;;  %v2223_v7 = vpop.f32.mrf.mxu0  ;;  %6463 = vmatprep.mubr.msk.bf16.mxu1 %vm7227_vm0, %v10948_v63  ;;  %v1728_v6 = vadd.f32 %v8718_v20, %v1727_v39 }
 0x37b   :  { %v2224_v44 = vadd.f32 %v8974_v43, %v2223_v7  ;;  %v6095_v32 = vpop.f32.mrf.mxu1 }
 0x37c   :  { %v6212_v59 = vpop.f32.mrf.mxu0  ;;  %v1863_v62 = vmax.f32 %v1728_v6, 0.0 }
 0x37d   :  { %v2585_v50 = vmax.f32 %v2224_v44, 0.0  ;;  %v1730_v35 = vpop.f32.mrf.mxu1 }
 0x37e   :  { %v1731_v0 = vadd.f32 %v8718_v20, %v1730_v35  ;;  %v2228_v21 = vpop.f32.mrf.mxu0  ;;  %6310 = vmatmul.mubr.bf16.gmra.mxu0 %v8798_v60 }
 0x37f   :  { %v9002_v27 = vpack.c.bf16 %v2585_v50, %v2584_v11  ;;  %v6096_v8 = vpop.f32.mrf.mxu1  ;;  %6313 = vmatprep.mubr.msk.bf16.mxu0 %vm7227_vm0, %v10948_v63  ;;  %v2229_v39 = vadd.f32 %v8974_v43, %v2228_v21 }
 0x380   :  { %v1864_v7 = vmax.f32 %v1731_v0, 0.0  ;;  %v6215_v32 = vpop.f32.mrf.mxu0 }
 0x381   :  { %v9007_v59 = vpop.f32.mrf.mxu1  ;;  %6464 = vmatmul.mubr.msk.bf16.gmra.mxu1 %vm218_vm1, %v7592_v30  ;;  %v2586_v6 = vmax.f32 %v2229_v39, 0.0 }
 0x382   :  { %v9011_v20 = vpack.c.bf16 %v1864_v7, %v1863_v62  ;;  %v2231_v38 = vpop.f32.mrf.mxu0  ;;  %6467 = vmatprep.mubr.msk.bf16.mxu1 %vm7227_vm0, %v10948_v63 }
 0x383   :  { %v2232_v60 = vadd.f32 %v8974_v43, %v2231_v38  ;;  %v6099_v44 = vpop.f32.mrf.mxu1 }
 0x384   :  { %v6216_v11 = vpop.f32.mrf.mxu0 }
 0x385   :  { %v2587_v50 = vmax.f32 %v2232_v60, 0.0  ;;  %v1738_v35 = vpop.f32.mrf.mxu1 }
 0x386   :  { %v2236_v0 = vpop.f32.mrf.mxu0  ;;  %6314 = vmatmul.mubr.bf16.gmra.mxu0 %v8813_v28 }
 0x387   :  { %v9017_v21 = vpack.c.bf16 %v2587_v50, %v2586_v6  ;;  %v6100_v8 = vpop.f32.mrf.mxu1  ;;  %6317 = vmatprep.mubr.msk.bf16.mxu0 %vm7227_vm0, %v10948_v63  ;;  %v2237_v62 = vadd.f32 %v8974_v43, %v2236_v0 }
 0x388   :  { %v6219_v30 = vpop.f32.mrf.mxu0 }
 0x389   :  { %v9022_v7 = vpop.f32.mrf.mxu1  ;;  %6468 = vmatmul.mubr.msk.bf16.gmra.mxu1 %vm218_vm1, %v7604_v34  ;;  %v2588_v60 = vmax.f32 %v2237_v62, 0.0  ;;  %v9044_v30 = vld [vmem:[%s10880_s1 + $0x110] sm:$0xff]  }
 0x38a   :  { %v2239_v32 = vpop.f32.mrf.mxu0  ;;  %6471 = vmatprep.mubr.msk.bf16.mxu1 %vm7227_vm0, %v10948_v63  ;;  %7172 = vmatpush3.bf16.msra.mxu1 %v9044_v30 }
 0x38b   :  { %v2240_v28 = vadd.f32 %v8974_v43, %v2239_v32  ;;  %v6373_v39 = vpop.f32.mrf.mxu1  ;;  %7165 = vmatprep.subr.bf16.mxu1 %v10948_v63 }
 0x38c   :  { %v6220_v38 = vpop.f32.mrf.mxu0 }
 0x38d   :  { %v2589_v44 = vmax.f32 %v2240_v28, 0.0  ;;  %v9029_v11 = vpop.f32.mrf.mxu1 }
 0x38e   :  { %v2244_v6 = vpop.f32.mrf.mxu0  ;;  %6318 = vmatmul.mubr.bf16.gmra.mxu0 %v8828_v13 }
 0x38f   :  { %v9032_v50 = vpack.c.bf16 %v2589_v44, %v2588_v60  ;;  %v6374_v35 = vpop.f32.mrf.mxu1  ;;  %6321 = vmatprep.mubr.msk.bf16.mxu0 %vm7227_vm0, %v10948_v63  ;;  %v2245_v0 = vadd.f32 %v8974_v43, %v2244_v6 }
 0x390   :  { %v6223_v34 = vpop.f32.mrf.mxu0 }
 0x391   :  { %v9037_v8 = vpop.f32.mrf.mxu1  ;;  %6472 = vmatmul.mubr.msk.bf16.gmra.mxu1 %vm218_vm1, %v7625_v45  ;;  %v2590_v39 = vmax.f32 %v2245_v0, 0.0 }
 0x392   :  { %v2247_v13 = vpop.f32.mrf.mxu0  ;;  %6475 = vmatprep.mubr.msk.bf16.mxu1 %vm7227_vm0, %v10948_v63 }
 0x393   :  { %v2248_v62 = vadd.f32 %v8974_v43, %v2247_v13  ;;  %v6377_v32 = vpop.f32.mrf.mxu1 }
 0x394   :  { %v6224_v28 = vpop.f32.mrf.mxu0 }
 0x395   :  { %v2591_v38 = vmax.f32 %v2248_v62, 0.0  ;;  %v9051_v45 = vpop.f32.mrf.mxu1 }
 0x396   :  { %v2252_v60 = vpop.f32.mrf.mxu0  ;;  %6322 = vmatmul.mubr.bf16.gmra.mxu0 %v8843_v26 }
 0x397   :  { %v9054_v44 = vpack.c.bf16 %v2591_v38, %v2590_v39  ;;  %v6378_v6 = vpop.f32.mrf.mxu1  ;;  %6325 = vmatprep.mubr.msk.bf16.mxu0 %vm7227_vm0, %v10948_v63  ;;  %v2253_v34 = vadd.f32 %v8974_v43, %v2252_v60 }
 0x398   :  { %v6227_v35 = vpop.f32.mrf.mxu0 }
 0x399   :  { %10949 = vst [vmem:[#allocation33_spill] sm:$0xff] %v9054_v44  ;;  %v9059_v13 = vpop.f32.mrf.mxu1  ;;  %6476 = vmatmul.mubr.msk.bf16.gmra.mxu1 %vm218_vm1, %v7643_v2  ;;  %v2592_v28 = vmax.f32 %v2253_v34, 0.0 }
 0x39a   :  { %10950 = vst [vmem:[#allocation34_spill] sm:$0xff] %v9059_v13  ;;  %v2255_v0 = vpop.f32.mrf.mxu0  ;;  %6479 = vmatprep.mubr.msk.bf16.mxu1 %vm7227_vm0, %v10948_v63 }
 0x39b   :  { %v2256_v26 = vadd.f32 %v8974_v43, %v2255_v0  ;;  %v6381_v62 = vpop.f32.mrf.mxu1 }
 0x39c   :  { %v6228_v32 = vpop.f32.mrf.mxu0 }
 0x39d   :  { %v2593_v39 = vmax.f32 %v2256_v26, 0.0  ;;  %v9066_v38 = vpop.f32.mrf.mxu1 }
 0x39e   :  { %v2260_v6 = vpop.f32.mrf.mxu0  ;;  %6326 = vmatmul.mubr.bf16.gmra.mxu0 %v8861_v54 }
 0x39f   :  { %v9069_v60 = vpack.c.bf16 %v2593_v39, %v2592_v28  ;;  %v6382_v35 = vpop.f32.mrf.mxu1  ;;  %6329 = vmatprep.mubr.msk.bf16.mxu0 %vm7227_vm0, %v10948_v63  ;;  %v2261_v13 = vadd.f32 %v8974_v43, %v2260_v6 }
 0x3a0   :  { %v6231_v2 = vpop.f32.mrf.mxu0 }
 0x3a1   :  { %v9074_v44 = vpop.f32.mrf.mxu1  ;;  %6480 = vmatmul.mubr.msk.bf16.gmra.mxu1 %vm218_vm1, %v7660_v25  ;;  %v2594_v62 = vmax.f32 %v2261_v13, 0.0 }
 0x3a2   :  { %10951 = vst [vmem:[#allocation35_spill] sm:$0xff] %v9074_v44  ;;  %v2263_v34 = vpop.f32.mrf.mxu0  ;;  %6483 = vmatprep.mubr.msk.bf16.mxu1 %vm7227_vm0, %v10948_v63 }
 0x3a3   :  { %v2264_v54 = vadd.f32 %v8974_v43, %v2263_v34  ;;  %v6385_v0 = vpop.f32.mrf.mxu1 }
 0x3a4   :  { %v6232_v26 = vpop.f32.mrf.mxu0 }
 0x3a5   :  { %v2595_v32 = vmax.f32 %v2264_v54, 0.0  ;;  %v9081_v28 = vpop.f32.mrf.mxu1 }
 0x3a6   :  { %v2268_v39 = vpop.f32.mrf.mxu0  ;;  %6330 = vmatmul.mubr.bf16.gmra.mxu0 %v8877_v42 }
 0x3a7   :  { %v9084_v6 = vpack.c.bf16 %v2595_v32, %v2594_v62  ;;  %v6386_v35 = vpop.f32.mrf.mxu1  ;;  %6333 = vmatprep.mubr.msk.bf16.mxu0 %vm7227_vm0, %v10948_v63  ;;  %v2269_v2 = vadd.f32 %v8974_v43, %v2268_v39 }
 0x3a8   :  { %v6235_v25 = vpop.f32.mrf.mxu0 }
 0x3a9   :  { %v9089_v44 = vpop.f32.mrf.mxu1  ;;  %6484 = vmatmul.mubr.msk.bf16.gmra.mxu1 %vm218_vm1, %v7676_v47  ;;  %v2596_v0 = vmax.f32 %v2269_v2, 0.0 }
 0x3aa   :  { %10952 = vst [vmem:[#allocation36_spill] sm:$0xff] %v9089_v44  ;;  %v2271_v13 = vpop.f32.mrf.mxu0  ;;  %6487 = vmatprep.mubr.msk.bf16.mxu1 %vm7227_vm0, %v10948_v63 }
 0x3ab   :  { %v2272_v42 = vadd.f32 %v8974_v43, %v2271_v13  ;;  %v6389_v34 = vpop.f32.mrf.mxu1 }
 0x3ac   :  { %v6236_v54 = vpop.f32.mrf.mxu0 }
 0x3ad   :  { %v2597_v26 = vmax.f32 %v2272_v42, 0.0  ;;  %v9096_v62 = vpop.f32.mrf.mxu1 }
 0x3ae   :  { %v2276_v32 = vpop.f32.mrf.mxu0  ;;  %6334 = vmatmul.mubr.bf16.gmra.mxu0 %v8892_v40 }
 0x3af   :  { %v9099_v39 = vpack.c.bf16 %v2597_v26, %v2596_v0  ;;  %v6390_v35 = vpop.f32.mrf.mxu1  ;;  %6337 = vmatprep.mubr.msk.bf16.mxu0 %vm7227_vm0, %v10948_v63  ;;  %v2277_v25 = vadd.f32 %v8974_v43, %v2276_v32 }
 0x3b0   :  { %v6239_v47 = vpop.f32.mrf.mxu0 }
 0x3b1   :  { %v9104_v44 = vpop.f32.mrf.mxu1  ;;  %6488 = vmatmul.mubr.msk.bf16.gmra.mxu1 %vm218_vm1, %v7692_v3  ;;  %v2598_v34 = vmax.f32 %v2277_v25, 0.0 }
 0x3b2   :  { %10953 = vst [vmem:[#allocation37_spill] sm:$0xff] %v9104_v44  ;;  %v2279_v2 = vpop.f32.mrf.mxu0  ;;  %6491 = vmatprep.mubr.msk.bf16.mxu1 %vm7227_vm0, %v10948_v63 }
 0x3b3   :  { %v2280_v40 = vadd.f32 %v8974_v43, %v2279_v2  ;;  %v6393_v13 = vpop.f32.mrf.mxu1 }
 0x3b4   :  { %v6240_v42 = vpop.f32.mrf.mxu0 }
 0x3b5   :  { %v2599_v54 = vmax.f32 %v2280_v40, 0.0  ;;  %v9111_v0 = vpop.f32.mrf.mxu1 }
 0x3b6   :  { %v2284_v26 = vpop.f32.mrf.mxu0  ;;  %6338 = vmatmul.mubr.bf16.gmra.mxu0 %v8912_v57 }
 0x3b7   :  { %v9114_v32 = vpack.c.bf16 %v2599_v54, %v2598_v34  ;;  %v6394_v35 = vpop.f32.mrf.mxu1  ;;  %6341 = vmatprep.mubr.msk.bf16.mxu0 %vm7227_vm0, %v10948_v63  ;;  %v2285_v47 = vadd.f32 %v8974_v43, %v2284_v26 }
 0x3b8   :  { %v6243_v3 = vpop.f32.mrf.mxu0 }
 0x3b9   :  { %v9119_v44 = vpop.f32.mrf.mxu1  ;;  %6492 = vmatmul.mubr.msk.bf16.gmra.mxu1 %vm218_vm1, %v7708_v29  ;;  %v2600_v13 = vmax.f32 %v2285_v47, 0.0 }
 0x3ba   :  { %10954 = vst [vmem:[#allocation38_spill] sm:$0xff] %v9119_v44  ;;  %v2287_v25 = vpop.f32.mrf.mxu0  ;;  %6495 = vmatprep.mubr.msk.bf16.mxu1 %vm7227_vm0, %v10948_v63 }
 0x3bb   :  { %v2288_v57 = vadd.f32 %v8974_v43, %v2287_v25  ;;  %v6397_v2 = vpop.f32.mrf.mxu1 }
 0x3bc   :  { %v6244_v40 = vpop.f32.mrf.mxu0 }
 0x3bd   :  { %v2601_v42 = vmax.f32 %v2288_v57, 0.0  ;;  %v9126_v34 = vpop.f32.mrf.mxu1 }
 0x3be   :  { %v2292_v54 = vpop.f32.mrf.mxu0  ;;  %6342 = vmatmul.mubr.bf16.gmra.mxu0 %v8929_v36 }
 0x3bf   :  { %v9129_v26 = vpack.c.bf16 %v2601_v42, %v2600_v13  ;;  %v6398_v35 = vpop.f32.mrf.mxu1  ;;  %6345 = vmatprep.mubr.msk.bf16.mxu0 %vm7227_vm0, %v10948_v63  ;;  %v2293_v3 = vadd.f32 %v8974_v43, %v2292_v54 }
 0x3c0   :  { %v6247_v29 = vpop.f32.mrf.mxu0 }
 0x3c1   :  { %v9134_v44 = vpop.f32.mrf.mxu1  ;;  %6496 = vmatmul.mubr.msk.bf16.gmra.mxu1 %vm218_vm1, %v7724_v51  ;;  %v2602_v2 = vmax.f32 %v2293_v3, 0.0 }
 0x3c2   :  { %10955 = vst [vmem:[#allocation39_spill] sm:$0xff] %v9134_v44  ;;  %v2295_v47 = vpop.f32.mrf.mxu0  ;;  %6499 = vmatprep.mubr.msk.bf16.mxu1 %vm7227_vm0, %v10948_v63 }
 0x3c3   :  { %v2296_v36 = vadd.f32 %v8974_v43, %v2295_v47  ;;  %v6401_v25 = vpop.f32.mrf.mxu1  ;;  %v10958_v47 = vld [vmem:[#allocation2_spill] sm:$0xff] }
 0x3c4   :  { %v6248_v57 = vpop.f32.mrf.mxu0 }
 0x3c5   :  { %v2603_v40 = vmax.f32 %v2296_v36, 0.0  ;;  %v9141_v13 = vpop.f32.mrf.mxu1 }
 0x3c6   :  { %v2300_v42 = vpop.f32.mrf.mxu0  ;;  %6346 = vmatmul.mubr.bf16.gmra.mxu0 %v8944_v58 }
 0x3c7   :  { %v9144_v54 = vpack.c.bf16 %v2603_v40, %v2602_v2  ;;  %v6402_v35 = vpop.f32.mrf.mxu1  ;;  %6349 = vmatprep.mubr.msk.bf16.mxu0 %vm7227_vm0, %v10948_v63  ;;  %v2301_v29 = vadd.f32 %v8974_v43, %v2300_v42 }
 0x3c8   :  { %v6251_v51 = vpop.f32.mrf.mxu0 }
 0x3c9   :  { %10956 = vst [vmem:[#allocation40_spill] sm:$0xff] %v9144_v54  ;;  %v9149_v44 = vpop.f32.mrf.mxu1  ;;  %6500 = vmatmul.mubr.msk.bf16.gmra.mxu1 %vm218_vm1, %v10958_v47  ;;  %v2604_v57 = vmax.f32 %v2301_v29, 0.0  ;;  %v9171_v29 = vld [vmem:[%s10880_s1 + $0x108] sm:$0xff]  }
 0x3ca   :  { %10957 = vst [vmem:[#allocation41_spill] sm:$0xff] %v9149_v44  ;;  %v2303_v3 = vpop.f32.mrf.mxu0  ;;  %6503 = vmatprep.mubr.msk.bf16.mxu1 %vm7227_vm0, %v10948_v63  ;;  %7173 = vmatpush3.bf16.msra.mxu1 %v9171_v29 }
 0x3cb   :  { %v2304_v58 = vadd.f32 %v8974_v43, %v2303_v3  ;;  %v6405_v36 = vpop.f32.mrf.mxu1  ;;  %v10961_v3 = vld [vmem:[#allocation3_spill] sm:$0xff]  ;;  %7166 = vmatprep.subr.bf16.mxu1 %v10948_v63 }
 0x3cc   :  { %v6252_v25 = vpop.f32.mrf.mxu0 }
 0x3cd   :  { %v2605_v2 = vmax.f32 %v2304_v58, 0.0  ;;  %v9156_v40 = vpop.f32.mrf.mxu1 }
 0x3ce   :  { %v2308_v35 = vpop.f32.mrf.mxu0  ;;  %6350 = vmatmul.mubr.bf16.gmra.mxu0 %v8959_v22 }
 0x3cf   :  { %v9159_v42 = vpack.c.bf16 %v2605_v2, %v2604_v57  ;;  %v6406_v51 = vpop.f32.mrf.mxu1  ;;  %6353 = vmatprep.mubr.msk.bf16.mxu0 %vm7227_vm0, %v10948_v63  ;;  %v2309_v44 = vadd.f32 %v8974_v43, %v2308_v35 }
 0x3d0   :  { %v6255_v47 = vpop.f32.mrf.mxu0 }
 0x3d1   :  { %10959 = vst [vmem:[#allocation2_spill] sm:$0xff] %v9159_v42  ;;  %v9164_v54 = vpop.f32.mrf.mxu1  ;;  %6504 = vmatmul.mubr.msk.bf16.gmra.mxu1 %vm218_vm1, %v10961_v3  ;;  %v2606_v57 = vmax.f32 %v2309_v44, 0.0 }
 0x3d2   :  { %10960 = vst [vmem:[#allocation42_spill] sm:$0xff] %v9164_v54  ;;  %v2311_v22 = vpop.f32.mrf.mxu0  ;;  %6507 = vmatprep.mubr.msk.bf16.mxu1 %vm7227_vm0, %v10948_v63 }
 0x3d3   :  { %v2312_v58 = vadd.f32 %v8974_v43, %v2311_v22  ;;  %v6409_v36 = vpop.f32.mrf.mxu1 }
 0x3d4   :  { %v6256_v25 = vpop.f32.mrf.mxu0 }
 0x3d5   :  { %v2607_v2 = vmax.f32 %v2312_v58, 0.0  ;;  %v9178_v35 = vpop.f32.mrf.mxu1  ;;  %v10965_v25 = vld [vmem:[#allocation4_spill] sm:$0xff] }
 0x3d6   :  { %10962 = vst [vmem:[#allocation3_spill] sm:$0xff] %v9178_v35  ;;  %v2316_v51 = vpop.f32.mrf.mxu0  ;;  %6354 = vmatmul.mubr.bf16.gmra.mxu0 %v8979_v4 }
 0x3d7   :  { %v9181_v47 = vpack.c.bf16 %v2607_v2, %v2606_v57  ;;  %v6410_v3 = vpop.f32.mrf.mxu1  ;;  %6357 = vmatprep.mubr.msk.bf16.mxu0 %vm7227_vm0, %v10948_v63  ;;  %v2317_v36 = vadd.f32 %v8974_v43, %v2316_v51 }
 0x3d8   :  { %v6259_v22 = vpop.f32.mrf.mxu0 }
 0x3d9   :  { %10963 = vst [vmem:[#allocation43_spill] sm:$0xff] %v9181_v47  ;;  %v9186_v54 = vpop.f32.mrf.mxu1  ;;  %6508 = vmatmul.mubr.msk.bf16.gmra.mxu1 %vm218_vm1, %v10965_v25  ;;  %v2608_v2 = vmax.f32 %v2317_v36, 0.0 }
 0x3da   :  { %10964 = vst [vmem:[#allocation44_spill] sm:$0xff] %v9186_v54  ;;  %v2319_v44 = vpop.f32.mrf.mxu0  ;;  %6511 = vmatprep.mubr.msk.bf16.mxu1 %vm7227_vm0, %v10948_v63 }
 0x3db   :  { %v2320_v4 = vadd.f32 %v8974_v43, %v2319_v44  ;;  %v6413_v58 = vpop.f32.mrf.mxu1  ;;  %v10969_v44 = vld [vmem:[#allocation5_spill] sm:$0xff] }
 0x3dc   :  { %v6260_v57 = vpop.f32.mrf.mxu0 }
 0x3dd   :  { %v2609_v3 = vmax.f32 %v2320_v4, 0.0  ;;  %v9193_v47 = vpop.f32.mrf.mxu1 }
 0x3de   :  { %10966 = vst [vmem:[#allocation4_spill] sm:$0xff] %v9193_v47  ;;  %v2324_v22 = vpop.f32.mrf.mxu0  ;;  %6358 = vmatmul.mubr.bf16.gmra.mxu0 %v8994_v56 }
 0x3df   :  { %v9196_v51 = vpack.c.bf16 %v2609_v3, %v2608_v2  ;;  %v6414_v54 = vpop.f32.mrf.mxu1  ;;  %6361 = vmatprep.mubr.msk.bf16.mxu0 %vm7227_vm0, %v10948_v63  ;;  %v2325_v35 = vadd.f32 %v8974_v43, %v2324_v22 }
 0x3e0   :  { %v6263_v25 = vpop.f32.mrf.mxu0  ;;  %v7216_v54 = vld [vmem:[%s10882_s2 + $0x1] ss:$0 sm:$0xff] }
 0x3e1   :  { %10967 = vst [vmem:[#allocation45_spill] sm:$0xff] %v9196_v51  ;;  %v9201_v42 = vpop.f32.mrf.mxu1  ;;  %6512 = vmatmul.mubr.msk.bf16.gmra.mxu1 %vm218_vm1, %v10969_v44  ;;  %v1736_v58 = vadd.f32 %v7216_v54, %v9007_v59  ;;  %v2610_v2 = vmax.f32 %v2325_v35, 0.0  ;;  %v10972_v59 = vld [vmem:[#allocation6_spill] sm:$0xff] }
 0x3e2   :  { %10968 = vst [vmem:[#allocation46_spill] sm:$0xff] %v9201_v42  ;;  %v2327_v36 = vpop.f32.mrf.mxu0  ;;  %6515 = vmatprep.mubr.msk.bf16.mxu1 %vm7227_vm0, %v10948_v63 }
 0x3e3   :  { %v2328_v56 = vadd.f32 %v8974_v43, %v2327_v36  ;;  %v6417_v4 = vpop.f32.mrf.mxu1  ;;  %v1865_v36 = vmax.f32 %v1736_v58, 0.0 }
 0x3e4   :  { %v6264_v57 = vpop.f32.mrf.mxu0 }
 0x3e5   :  { %v2611_v3 = vmax.f32 %v2328_v56, 0.0  ;;  %v9212_v22 = vpop.f32.mrf.mxu1 }
 0x3e6   :  { %v2332_v25 = vpop.f32.mrf.mxu0  ;;  %6362 = vmatmul.mubr.bf16.gmra.mxu0 %v9011_v20 }
 0x3e7   :  { %v9215_v44 = vpack.c.bf16 %v2611_v3, %v2610_v2  ;;  %v6418_v42 = vpop.f32.mrf.mxu1  ;;  %6365 = vmatprep.mubr.msk.bf16.mxu0 %vm7227_vm0, %v10948_v63  ;;  %v2333_v51 = vadd.f32 %v8974_v43, %v2332_v25 }
 0x3e8   :  { %v6267_v4 = vpop.f32.mrf.mxu0  ;;  %v1928_v42 = vpack.c.bf16 %v1865_v36, %v1865_v36 }
 0x3e9   :  { %10970 = vst [vmem:[#allocation5_spill] sm:$0xff] %v9215_v44  ;;  %v9220_v47 = vpop.f32.mrf.mxu1  ;;  %6516 = vmatmul.mubr.msk.bf16.gmra.mxu1 %vm218_vm1, %v10972_v59  ;;  %v2612_v57 = vmax.f32 %v2333_v51, 0.0 }
 0x3ea   :  { %10971 = vst [vmem:[#allocation47_spill] sm:$0xff] %v9220_v47  ;;  %v2335_v35 = vpop.f32.mrf.mxu0  ;;  %6519 = vmatprep.mubr.msk.bf16.mxu1 %vm7227_vm0, %v10948_v63 }
 0x3eb   :  { %v2336_v20 = vadd.f32 %v8974_v43, %v2335_v35  ;;  %v6421_v56 = vpop.f32.mrf.mxu1  ;;  %v10973_v35 = vld [vmem:[#allocation7_spill] sm:$0xff] }
 0x3ec   :  { %v6268_v54 = vpop.f32.mrf.mxu0 }
 0x3ed   :  { %v2613_v2 = vmax.f32 %v2336_v20, 0.0  ;;  %v9227_v58 = vpop.f32.mrf.mxu1 }
 0x3ee   :  { %v2340_v3 = vpop.f32.mrf.mxu0  ;;  %6366 = vmatmul.mubr.bf16.gmra.mxu0 %v1928_v42 }
 0x3ef   :  { %v9229_v25 = vpack.c.bf16 %v2613_v2, %v2612_v57  ;;  %v6422_v4 = vpop.f32.mrf.mxu1  ;;  %6639 = vmatprep.mubr.msk.bf16.mxu0 %vm7227_vm0, %v10948_v63  ;;  %v2341_v47 = vadd.f32 %v8974_v43, %v2340_v3 }
 0x3f0   :  { %v6271_v59 = vpop.f32.mrf.mxu0 }
 0x3f1   :  { %v9234_v44 = vpop.f32.mrf.mxu1  ;;  %6520 = vmatmul.mubr.msk.bf16.gmra.mxu1 %vm218_vm1, %v10973_v35  ;;  %v2614_v42 = vmax.f32 %v2341_v47, 0.0  ;;  %v7217_v59 = vld [vmem:[%s10880_s1 + $0x138] sm:$0xff]  }
 0x3f2   :  { %v2343_v51 = vpop.f32.mrf.mxu0  ;;  %6523 = vmatprep.mubr.msk.bf16.mxu1 %vm7227_vm0, %v10948_v63 }
 0x3f3   :  { %v2344_v36 = vadd.f32 %v8974_v43, %v2343_v51  ;;  %v6425_v20 = vpop.f32.mrf.mxu1 }
 0x3f4   :  { %v6272_v56 = vpop.f32.mrf.mxu0 }
 0x3f5   :  { %v2615_v54 = vmax.f32 %v2344_v36, 0.0  ;;  %v9241_v57 = vpop.f32.mrf.mxu1  ;;  %v10975_v36 = vld [vmem:[#allocation8_spill] sm:$0xff] }
 0x3f6   :  { %v2348_v2 = vpop.f32.mrf.mxu0  ;;  %6640 = vmatmul.mubr.bf16.vlgmr.msra.gmra.mxu0 %v8619_v53 }
 0x3f7   :  { %v9244_v3 = vpack.c.bf16 %v2615_v54, %v2614_v42  ;;  %v6426_v4 = vpop.f32.mrf.mxu1  ;;  %6643 = vmatprep.mubr.msk.bf16.mxu0 %vm7227_vm0, %v10948_v63  ;;  %6892 = vmatpush3.bf16.msra.mxu0 %v7217_v59  ;;  %v2349_v47 = vadd.f32 %v8974_v43, %v2348_v2  ;;  %v7218_v42 = vld [vmem:[%s10880_s1 + $0x130] sm:$0xff]  }
 0x3f8   :  { %v6275_v35 = vpop.f32.mrf.mxu0  ;;  %6893 = vmatprep.subr.bf16.mxu0 %v10948_v63 }
 0x3f9   :  { %v9253_v51 = vpop.f32.mrf.mxu1  ;;  %6524 = vmatmul.mubr.msk.bf16.gmra.mxu1 %vm218_vm1, %v10975_v36  ;;  %v2616_v2 = vmax.f32 %v2349_v47, 0.0 }
 0x3fa   :  { %10974 = vst [vmem:[#allocation6_spill] sm:$0xff] %v9253_v51  ;;  %v2351_v53 = vpop.f32.mrf.mxu0  ;;  %6527 = vmatprep.mubr.msk.bf16.mxu1 %vm7227_vm0, %v10948_v63 }
 0x3fb   :  { %v2352_v20 = vadd.f32 %v8974_v43, %v2351_v53  ;;  %v6429_v56 = vpop.f32.mrf.mxu1  ;;  %6894 = vmatpush3.bf16.msra.mxu0 %v7218_v42  ;;  %v7219_v53 = vld [vmem:[%s10880_s1 + $0x128] sm:$0xff]   ;;  %v10978_v42 = vld [vmem:[#allocation9_spill] sm:$0xff] }
 0x3fc   :  { %v6276_v54 = vpop.f32.mrf.mxu0  ;;  %6895 = vmatprep.subr.bf16.mxu0 %v10948_v63 }
 0x3fd   :  { %v2617_v4 = vmax.f32 %v2352_v20, 0.0  ;;  %v9264_v59 = vpop.f32.mrf.mxu1 }
 0x3fe   :  { %v2356_v35 = vpop.f32.mrf.mxu0  ;;  %6644 = vmatmul.mubr.bf16.gmra.mxu0 %v8638_v41 }
 0x3ff   :  { %v9267_v36 = vpack.c.bf16 %v2617_v4, %v2616_v2  ;;  %v6430_v51 = vpop.f32.mrf.mxu1  ;;  %6647 = vmatprep.mubr.msk.bf16.mxu0 %vm7227_vm0, %v10948_v63  ;;  %6896 = vmatpush3.bf16.msra.mxu0 %v7219_v53  ;;  %v2357_v47 = vadd.f32 %v8974_v43, %v2356_v35  ;;  %v7220_v2 = vld [vmem:[%s10880_s1 + $0x120] sm:$0xff]  }
 0x400   :  { %v6279_v56 = vpop.f32.mrf.mxu0  ;;  %6897 = vmatprep.subr.bf16.mxu0 %v10948_v63 }
 0x401   :  { %10976 = vst [vmem:[#allocation7_spill] sm:$0xff] %v9267_v36  ;;  %v9276_v20 = vpop.f32.mrf.mxu1  ;;  %6528 = vmatmul.mubr.msk.bf16.gmra.mxu1 %vm218_vm1, %v10978_v42  ;;  %v2618_v35 = vmax.f32 %v2357_v47, 0.0 }
 0x402   :  { %10977 = vst [vmem:[#allocation8_spill] sm:$0xff] %v9276_v20  ;;  %v2359_v41 = vpop.f32.mrf.mxu0  ;;  %6531 = vmatprep.mubr.msk.bf16.mxu1 %vm7227_vm0, %v10948_v63 }
 0x403   :  { %v2360_v51 = vadd.f32 %v8974_v43, %v2359_v41  ;;  %v6433_v54 = vpop.f32.mrf.mxu1  ;;  %6898 = vmatpush3.bf16.msra.mxu0 %v7220_v2 }
 0x404   :  { %v6280_v4 = vpop.f32.mrf.mxu0  ;;  %6899 = vmatprep.subr.bf16.mxu0 %v10948_v63 }
 0x405   :  { %v2619_v53 = vmax.f32 %v2360_v51, 0.0  ;;  %v9287_v56 = vpop.f32.mrf.mxu1  ;;  %v10979_v51 = vld [vmem:[#allocation10_spill] sm:$0xff] }
 0x406   :  { %v2364_v42 = vpop.f32.mrf.mxu0  ;;  %6648 = vmatmul.mubr.bf16.gmra.mxu0 %v8654_v9 }
 0x407   :  { %v9290_v20 = vpack.c.bf16 %v2619_v53, %v2618_v35  ;;  %v6434_v36 = vpop.f32.mrf.mxu1  ;;  %6651 = vmatprep.mubr.msk.bf16.mxu0 %vm7227_vm0, %v10948_v63  ;;  %6900 = vmatpush3.bf16.msra.mxu0 %v8910_v24  ;;  %v2365_v54 = vadd.f32 %v8974_v43, %v2364_v42 }
 0x408   :  { %v6283_v41 = vpop.f32.mrf.mxu0  ;;  %6901 = vmatprep.subr.bf16.mxu0 %v10948_v63 }
 0x409   :  { %v9297_v47 = vpop.f32.mrf.mxu1  ;;  %6532 = vmatmul.mubr.msk.bf16.gmra.mxu1 %vm218_vm1, %v10979_v51  ;;  %v2620_v4 = vmax.f32 %v2365_v54, 0.0 }
 0x40a   :  { %v2367_v2 = vpop.f32.mrf.mxu0  ;;  %6535 = vmatprep.mubr.msk.bf16.mxu1 %vm7227_vm0, %v10948_v63 }
 0x40b   :  { %v2368_v9 = vadd.f32 %v8974_v43, %v2367_v2  ;;  %v6437_v36 = vpop.f32.mrf.mxu1  ;;  %6902 = vmatpush3.bf16.msra.mxu0 %v9044_v30  ;;  %v7210_v30 = vld [vmem:[%s10880_s1 + $0x100] sm:$0xff]  }
 0x40c   :  { %v6284_v24 = vpop.f32.mrf.mxu0  ;;  %6903 = vmatprep.subr.bf16.mxu0 %v10948_v63  ;;  %7174 = vmatpush3.bf16.msra.mxu1 %v7210_v30 }
 0x40d   :  { %v2621_v35 = vmax.f32 %v2368_v9, 0.0  ;;  %v9306_v53 = vpop.f32.mrf.mxu1 }
 0x40e   :  { %10980 = vst [vmem:[#allocation9_spill] sm:$0xff] %v9306_v53  ;;  %v2372_v42 = vpop.f32.mrf.mxu0  ;;  %6652 = vmatmul.mubr.bf16.gmra.mxu0 %v8673_v15  ;;  %v10983_v15 = vld [vmem:[#allocation11_spill] sm:$0xff] }
 0x40f   :  { %v9309_v41 = vpack.c.bf16 %v2621_v35, %v2620_v4  ;;  %v6438_v51 = vpop.f32.mrf.mxu1  ;;  %6655 = vmatprep.mubr.msk.bf16.mxu0 %vm7227_vm0, %v10948_v63  ;;  %6904 = vmatpush3.bf16.msra.mxu0 %v9171_v29  ;;  %v2373_v54 = vadd.f32 %v8974_v43, %v2372_v42 }
 0x410   :  { %v6287_v2 = vpop.f32.mrf.mxu0  ;;  %6905 = vmatprep.subr.bf16.mxu0 %v10948_v63 }
 0x411   :  { %10981 = vst [vmem:[#allocation10_spill] sm:$0xff] %v9309_v41  ;;  %v9319_v9 = vpop.f32.mrf.mxu1  ;;  %6536 = vmatmul.mubr.msk.bf16.gmra.mxu1 %vm218_vm1, %v10983_v15  ;;  %v2622_v35 = vmax.f32 %v2373_v54, 0.0 }
 0x412   :  { %10982 = vst [vmem:[#allocation48_spill] sm:$0xff] %v9319_v9  ;;  %v2375_v36 = vpop.f32.mrf.mxu0  ;;  %6539 = vmatprep.mubr.msk.bf16.mxu1 %vm7227_vm0, %v10948_v63 }
 0x413   :  { %v2376_v24 = vadd.f32 %v8974_v43, %v2375_v36  ;;  %v6441_v4 = vpop.f32.mrf.mxu1  ;;  %6906 = vmatpush3.bf16.msra.mxu0 %v7210_v30  ;;  %v10986_v30 = vld [vmem:[#allocation12_spill] sm:$0xff] }
 0x414   :  { %v6288_v29 = vpop.f32.mrf.mxu0 }
 0x415   :  { %v2623_v51 = vmax.f32 %v2376_v24, 0.0  ;;  %v9326_v2 = vpop.f32.mrf.mxu1 }
 0x416   :  { %v2380_v42 = vpop.f32.mrf.mxu0  ;;  %6656 = vmatmul.mubr.bf16.gmra.mxu0 %v8688_v16 }
 0x417   :  { %v9329_v9 = vpack.c.bf16 %v2623_v51, %v2622_v35  ;;  %v6442_v15 = vpop.f32.mrf.mxu1  ;;  %6659 = vmatprep.mubr.msk.bf16.mxu0 %vm7227_vm0, %v10948_v63  ;;  %v2381_v53 = vadd.f32 %v8974_v43, %v2380_v42 }
 0x418   :  { %v6291_v41 = vpop.f32.mrf.mxu0 }
 0x419   :  { %10984 = vst [vmem:[#allocation11_spill] sm:$0xff] %v9329_v9  ;;  %v9334_v36 = vpop.f32.mrf.mxu1  ;;  %6540 = vmatmul.mubr.msk.bf16.gmra.mxu1 %vm218_vm1, %v10986_v30  ;;  %v2624_v29 = vmax.f32 %v2381_v53, 0.0 }
 0x41a   :  { %10985 = vst [vmem:[#allocation49_spill] sm:$0xff] %v9334_v36  ;;  %v2383_v54 = vpop.f32.mrf.mxu0  ;;  %6543 = vmatprep.mubr.msk.bf16.mxu1 %vm7227_vm0, %v10948_v63 }
 0x41b   :  { %v2384_v16 = vadd.f32 %v8974_v43, %v2383_v54  ;;  %v6445_v24 = vpop.f32.mrf.mxu1  ;;  %v10989_v54 = vld [vmem:[#allocation13_spill] sm:$0xff] }
 0x41c   :  { %v6292_v4 = vpop.f32.mrf.mxu0 }
 0x41d   :  { %v2625_v35 = vmax.f32 %v2384_v16, 0.0  ;;  %v9341_v51 = vpop.f32.mrf.mxu1 }
 0x41e   :  { %v2388_v41 = vpop.f32.mrf.mxu0  ;;  %6660 = vmatmul.mubr.bf16.gmra.mxu0 %v8703_v19 }
 0x41f   :  { %v9344_v42 = vpack.c.bf16 %v2625_v35, %v2624_v29  ;;  %v6446_v15 = vpop.f32.mrf.mxu1  ;;  %6663 = vmatprep.mubr.msk.bf16.mxu0 %vm7227_vm0, %v10948_v63  ;;  %v2389_v36 = vadd.f32 %v8974_v43, %v2388_v41 }
 0x420   :  { %v6295_v30 = vpop.f32.mrf.mxu0 }
 0x421   :  { %10987 = vst [vmem:[#allocation12_spill] sm:$0xff] %v9344_v42  ;;  %v9349_v9 = vpop.f32.mrf.mxu1  ;;  %6544 = vmatmul.mubr.msk.bf16.gmra.mxu1 %vm218_vm1, %v10989_v54  ;;  %v2626_v4 = vmax.f32 %v2389_v36, 0.0 }
 0x422   :  { %10988 = vst [vmem:[#allocation50_spill] sm:$0xff] %v9349_v9  ;;  %v2391_v53 = vpop.f32.mrf.mxu0  ;;  %6547 = vmatprep.mubr.msk.bf16.mxu1 %vm7227_vm0, %v10948_v63 }
 0x423   :  { %v2392_v19 = vadd.f32 %v8974_v43, %v2391_v53  ;;  %v6449_v16 = vpop.f32.mrf.mxu1  ;;  %v10992_v53 = vld [vmem:[#allocation14_spill] sm:$0xff] }
 0x424   :  { %v6296_v24 = vpop.f32.mrf.mxu0 }
 0x425   :  { %v2627_v29 = vmax.f32 %v2392_v19, 0.0  ;;  %v9356_v35 = vpop.f32.mrf.mxu1 }
 0x426   :  { %v2396_v15 = vpop.f32.mrf.mxu0  ;;  %6664 = vmatmul.mubr.bf16.gmra.mxu0 %v8723_v48 }
 0x427   :  { %v9359_v41 = vpack.c.bf16 %v2627_v29, %v2626_v4  ;;  %v6450_v30 = vpop.f32.mrf.mxu1  ;;  %6667 = vmatprep.mubr.msk.bf16.mxu0 %vm7227_vm0, %v10948_v63  ;;  %v2397_v9 = vadd.f32 %v8974_v43, %v2396_v15 }
 0x428   :  { %v6299_v54 = vpop.f32.mrf.mxu0 }
 0x429   :  { %10990 = vst [vmem:[#allocation13_spill] sm:$0xff] %v9359_v41  ;;  %v9364_v42 = vpop.f32.mrf.mxu1  ;;  %6548 = vmatmul.mubr.msk.bf16.gmra.mxu1 %vm218_vm1, %v10992_v53  ;;  %v2628_v24 = vmax.f32 %v2397_v9, 0.0 }
 0x42a   :  { %10991 = vst [vmem:[#allocation51_spill] sm:$0xff] %v9364_v42  ;;  %v2399_v36 = vpop.f32.mrf.mxu0  ;;  %6551 = vmatprep.mubr.msk.bf16.mxu1 %vm7227_vm0, %v10948_v63 }
 0x42b   :  { %v2400_v48 = vadd.f32 %v8974_v43, %v2399_v36  ;;  %v6453_v19 = vpop.f32.mrf.mxu1  ;;  %v10995_v36 = vld [vmem:[#allocation15_spill] sm:$0xff] }
 0x42c   :  { %v6300_v16 = vpop.f32.mrf.mxu0 }
 0x42d   :  { %v2629_v4 = vmax.f32 %v2400_v48, 0.0  ;;  %v9371_v29 = vpop.f32.mrf.mxu1 }
 0x42e   :  { %v2404_v30 = vpop.f32.mrf.mxu0  ;;  %6668 = vmatmul.mubr.bf16.gmra.mxu0 %v8741_v12 }
 0x42f   :  { %v9374_v15 = vpack.c.bf16 %v2629_v4, %v2628_v24  ;;  %v6454_v54 = vpop.f32.mrf.mxu1  ;;  %6671 = vmatprep.mubr.msk.bf16.mxu0 %vm7227_vm0, %v10948_v63  ;;  %v2405_v42 = vadd.f32 %v8974_v43, %v2404_v30 }
 0x430   :  { %v6303_v53 = vpop.f32.mrf.mxu0 }
 0x431   :  { %10993 = vst [vmem:[#allocation14_spill] sm:$0xff] %v9374_v15  ;;  %v9379_v41 = vpop.f32.mrf.mxu1  ;;  %6552 = vmatmul.mubr.msk.bf16.gmra.mxu1 %vm218_vm1, %v10995_v36  ;;  %v2630_v16 = vmax.f32 %v2405_v42, 0.0 }
 0x432   :  { %10994 = vst [vmem:[#allocation52_spill] sm:$0xff] %v9379_v41  ;;  %v2407_v9 = vpop.f32.mrf.mxu0  ;;  %6555 = vmatprep.mubr.msk.bf16.mxu1 %vm7227_vm0, %v10948_v63 }
 0x433   :  { %v2408_v12 = vadd.f32 %v8974_v43, %v2407_v9  ;;  %v6457_v48 = vpop.f32.mrf.mxu1  ;;  %v10998_v9 = vld [vmem:[#allocation16_spill] sm:$0xff] }
 0x434   :  { %v6304_v19 = vpop.f32.mrf.mxu0 }
 0x435   :  { %v2631_v24 = vmax.f32 %v2408_v12, 0.0  ;;  %v9386_v4 = vpop.f32.mrf.mxu1 }
 0x436   :  { %v2412_v54 = vpop.f32.mrf.mxu0  ;;  %6672 = vmatmul.mubr.bf16.gmra.mxu0 %v8757_v31 }
 0x437   :  { %v9389_v30 = vpack.c.bf16 %v2631_v24, %v2630_v16  ;;  %v6458_v53 = vpop.f32.mrf.mxu1  ;;  %6675 = vmatprep.mubr.msk.bf16.mxu0 %vm7227_vm0, %v10948_v63  ;;  %v2413_v41 = vadd.f32 %v8974_v43, %v2412_v54 }
 0x438   :  { %v6307_v36 = vpop.f32.mrf.mxu0 }
 0x439   :  { %10996 = vst [vmem:[#allocation15_spill] sm:$0xff] %v9389_v30  ;;  %v9394_v15 = vpop.f32.mrf.mxu1  ;;  %6556 = vmatmul.mubr.msk.bf16.gmra.mxu1 %vm218_vm1, %v10998_v9  ;;  %v2632_v19 = vmax.f32 %v2413_v41, 0.0 }
 0x43a   :  { %10997 = vst [vmem:[#allocation53_spill] sm:$0xff] %v9394_v15  ;;  %v2415_v42 = vpop.f32.mrf.mxu0  ;;  %6559 = vmatprep.mubr.msk.bf16.mxu1 %vm7227_vm0, %v10948_v63 }
 0x43b   :  { %v2416_v31 = vadd.f32 %v8974_v43, %v2415_v42  ;;  %v6461_v12 = vpop.f32.mrf.mxu1  ;;  %v11001_v42 = vld [vmem:[#allocation17_spill] sm:$0xff] }
 0x43c   :  { %v6308_v48 = vpop.f32.mrf.mxu0 }
 0x43d   :  { %v2633_v16 = vmax.f32 %v2416_v31, 0.0  ;;  %v9401_v24 = vpop.f32.mrf.mxu1 }
 0x43e   :  { %v2420_v53 = vpop.f32.mrf.mxu0  ;;  %6676 = vmatmul.mubr.bf16.gmra.mxu0 %v8772_v37 }
 0x43f   :  { %v9404_v54 = vpack.c.bf16 %v2633_v16, %v2632_v19  ;;  %v6462_v36 = vpop.f32.mrf.mxu1  ;;  %6679 = vmatprep.mubr.msk.bf16.mxu0 %vm7227_vm0, %v10948_v63  ;;  %v2421_v15 = vadd.f32 %v8974_v43, %v2420_v53 }
 0x440   :  { %v6311_v9 = vpop.f32.mrf.mxu0 }
 0x441   :  { %10999 = vst [vmem:[#allocation16_spill] sm:$0xff] %v9404_v54  ;;  %v9409_v30 = vpop.f32.mrf.mxu1  ;;  %6560 = vmatmul.mubr.msk.bf16.gmra.mxu1 %vm218_vm1, %v11001_v42  ;;  %v2634_v48 = vmax.f32 %v2421_v15, 0.0 }
 0x442   :  { %11000 = vst [vmem:[#allocation54_spill] sm:$0xff] %v9409_v30  ;;  %v2423_v41 = vpop.f32.mrf.mxu0  ;;  %6563 = vmatprep.mubr.msk.bf16.mxu1 %vm7227_vm0, %v10948_v63 }
 0x443   :  { %v2424_v37 = vadd.f32 %v8974_v43, %v2423_v41  ;;  %v6465_v31 = vpop.f32.mrf.mxu1  ;;  %v11003_v41 = vld [vmem:[#allocation18_spill] sm:$0xff] }
 0x444   :  { %v6312_v12 = vpop.f32.mrf.mxu0 }
 0x445   :  { %v2635_v19 = vmax.f32 %v2424_v37, 0.0  ;;  %v9416_v16 = vpop.f32.mrf.mxu1 }
 0x446   :  { %v2428_v36 = vpop.f32.mrf.mxu0  ;;  %6680 = vmatmul.mubr.bf16.gmra.mxu0 %v8791_v5 }
 0x447   :  { %v9419_v53 = vpack.c.bf16 %v2635_v19, %v2634_v48  ;;  %v6466_v9 = vpop.f32.mrf.mxu1  ;;  %6683 = vmatprep.mubr.msk.bf16.mxu0 %vm7227_vm0, %v10948_v63  ;;  %v2429_v30 = vadd.f32 %v8974_v43, %v2428_v36 }
 0x448   :  { %v6315_v42 = vpop.f32.mrf.mxu0 }
 0x449   :  { %v9424_v54 = vpop.f32.mrf.mxu1  ;;  %6564 = vmatmul.mubr.msk.bf16.gmra.mxu1 %vm218_vm1, %v11003_v41  ;;  %v2636_v12 = vmax.f32 %v2429_v30, 0.0 }
 0x44a   :  { %11002 = vst [vmem:[#allocation17_spill] sm:$0xff] %v9424_v54  ;;  %v2431_v15 = vpop.f32.mrf.mxu0  ;;  %6567 = vmatprep.mubr.msk.bf16.mxu1 %vm7227_vm0, %v10948_v63 }
 0x44b   :  { %v2432_v5 = vadd.f32 %v8974_v43, %v2431_v15  ;;  %v6469_v37 = vpop.f32.mrf.mxu1  ;;  %v9441_v43 = vld [vmem:[%s10882_s2 + $0x2] ss:$0 sm:$0xff] }
 0x44c   :  { %v6316_v31 = vpop.f32.mrf.mxu0 }
 0x44d   :  { %v2637_v48 = vmax.f32 %v2432_v5, 0.0  ;;  %v9431_v19 = vpop.f32.mrf.mxu1  ;;  %v11007_v5 = vld [vmem:[#allocation19_spill] sm:$0xff] }
 0x44e   :  { %11004 = vst [vmem:[#allocation18_spill] sm:$0xff] %v9431_v19  ;;  %v2436_v9 = vpop.f32.mrf.mxu0  ;;  %6684 = vmatmul.mubr.bf16.gmra.mxu0 %v8806_v46 }
 0x44f   :  { %v9434_v36 = vpack.c.bf16 %v2637_v48, %v2636_v12  ;;  %v6470_v42 = vpop.f32.mrf.mxu1  ;;  %6687 = vmatprep.mubr.msk.bf16.mxu0 %vm7227_vm0, %v10948_v63  ;;  %v2437_v30 = vadd.f32 %v9441_v43, %v2436_v9 }
 0x450   :  { %v6319_v41 = vpop.f32.mrf.mxu0 }
 0x451   :  { %11005 = vst [vmem:[#allocation55_spill] sm:$0xff] %v9434_v36  ;;  %v9444_v15 = vpop.f32.mrf.mxu1  ;;  %6568 = vmatmul.mubr.msk.bf16.gmra.mxu1 %vm218_vm1, %v11007_v5  ;;  %v2638_v48 = vmax.f32 %v2437_v30, 0.0 }
 0x452   :  { %11006 = vst [vmem:[#allocation56_spill] sm:$0xff] %v9444_v15  ;;  %v2439_v46 = vpop.f32.mrf.mxu0  ;;  %6571 = vmatprep.mubr.msk.bf16.mxu1 %vm7227_vm0, %v10948_v63 }
 0x453   :  { %v2440_v37 = vadd.f32 %v9441_v43, %v2439_v46  ;;  %v6473_v31 = vpop.f32.mrf.mxu1  ;;  %v11010_v46 = vld [vmem:[#allocation20_spill] sm:$0xff] }
 0x454   :  { %v6320_v12 = vpop.f32.mrf.mxu0 }
 0x455   :  { %v2639_v42 = vmax.f32 %v2440_v37, 0.0  ;;  %v9451_v41 = vpop.f32.mrf.mxu1 }
 0x456   :  { %v2444_v36 = vpop.f32.mrf.mxu0  ;;  %6688 = vmatmul.mubr.bf16.gmra.mxu0 %v8821_v49 }
 0x457   :  { %v9454_v9 = vpack.c.bf16 %v2639_v42, %v2638_v48  ;;  %v6474_v15 = vpop.f32.mrf.mxu1  ;;  %6691 = vmatprep.mubr.msk.bf16.mxu0 %vm7227_vm0, %v10948_v63  ;;  %v2445_v19 = vadd.f32 %v9441_v43, %v2444_v36 }
 0x458   :  { %v6323_v5 = vpop.f32.mrf.mxu0 }
 0x459   :  { %11008 = vst [vmem:[#allocation19_spill] sm:$0xff] %v9454_v9  ;;  %v9459_v54 = vpop.f32.mrf.mxu1  ;;  %6572 = vmatmul.mubr.msk.bf16.gmra.mxu1 %vm218_vm1, %v11010_v46  ;;  %v2640_v15 = vmax.f32 %v2445_v19, 0.0 }
 0x45a   :  { %11009 = vst [vmem:[#allocation57_spill] sm:$0xff] %v9459_v54  ;;  %v2447_v30 = vpop.f32.mrf.mxu0  ;;  %6575 = vmatprep.mubr.msk.bf16.mxu1 %vm7227_vm0, %v10948_v63 }
 0x45b   :  { %v2448_v49 = vadd.f32 %v9441_v43, %v2447_v30  ;;  %v6477_v37 = vpop.f32.mrf.mxu1  ;;  %v11013_v30 = vld [vmem:[#allocation21_spill] sm:$0xff] }
 0x45c   :  { %v6324_v31 = vpop.f32.mrf.mxu0 }
 0x45d   :  { %v2641_v12 = vmax.f32 %v2448_v49, 0.0  ;;  %v9466_v48 = vpop.f32.mrf.mxu1 }
 0x45e   :  { %v2452_v42 = vpop.f32.mrf.mxu0  ;;  %6692 = vmatmul.mubr.bf16.gmra.mxu0 %v8836_v52 }
 0x45f   :  { %v9469_v36 = vpack.c.bf16 %v2641_v12, %v2640_v15  ;;  %v6478_v5 = vpop.f32.mrf.mxu1  ;;  %6695 = vmatprep.mubr.msk.bf16.mxu0 %vm7227_vm0, %v10948_v63  ;;  %v2453_v54 = vadd.f32 %v9441_v43, %v2452_v42 }
 0x460   :  { %v6327_v46 = vpop.f32.mrf.mxu0 }
 0x461   :  { %11011 = vst [vmem:[#allocation20_spill] sm:$0xff] %v9469_v36  ;;  %v9474_v9 = vpop.f32.mrf.mxu1  ;;  %6576 = vmatmul.mubr.msk.bf16.gmra.mxu1 %vm218_vm1, %v11013_v30  ;;  %v2642_v31 = vmax.f32 %v2453_v54, 0.0 }
 0x462   :  { %11012 = vst [vmem:[#allocation58_spill] sm:$0xff] %v9474_v9  ;;  %v2455_v19 = vpop.f32.mrf.mxu0  ;;  %6579 = vmatprep.mubr.msk.bf16.mxu1 %vm7227_vm0, %v10948_v63 }
 0x463   :  { %v2456_v52 = vadd.f32 %v9441_v43, %v2455_v19  ;;  %v6481_v49 = vpop.f32.mrf.mxu1  ;;  %v11016_v19 = vld [vmem:[#allocation22_spill] sm:$0xff] }
 0x464   :  { %v6328_v37 = vpop.f32.mrf.mxu0 }
 0x465   :  { %v2643_v15 = vmax.f32 %v2456_v52, 0.0  ;;  %v9481_v12 = vpop.f32.mrf.mxu1 }
 0x466   :  { %v2460_v5 = vpop.f32.mrf.mxu0  ;;  %6696 = vmatmul.mubr.bf16.gmra.mxu0 %v8851_v55 }
 0x467   :  { %v9484_v42 = vpack.c.bf16 %v2643_v15, %v2642_v31  ;;  %v6482_v46 = vpop.f32.mrf.mxu1  ;;  %6699 = vmatprep.mubr.msk.bf16.mxu0 %vm7227_vm0, %v10948_v63  ;;  %v2461_v9 = vadd.f32 %v9441_v43, %v2460_v5 }
 0x468   :  { %v6331_v30 = vpop.f32.mrf.mxu0 }
 0x469   :  { %11014 = vst [vmem:[#allocation21_spill] sm:$0xff] %v9484_v42  ;;  %v9489_v36 = vpop.f32.mrf.mxu1  ;;  %6580 = vmatmul.mubr.msk.bf16.gmra.mxu1 %vm218_vm1, %v11016_v19  ;;  %v2644_v37 = vmax.f32 %v2461_v9, 0.0 }
 0x46a   :  { %11015 = vst [vmem:[#allocation59_spill] sm:$0xff] %v9489_v36  ;;  %v2463_v54 = vpop.f32.mrf.mxu0  ;;  %6583 = vmatprep.mubr.msk.bf16.mxu1 %vm7227_vm0, %v10948_v63 }
 0x46b   :  { %v2464_v55 = vadd.f32 %v9441_v43, %v2463_v54  ;;  %v6485_v52 = vpop.f32.mrf.mxu1  ;;  %v11019_v54 = vld [vmem:[#allocation23_spill] sm:$0xff] }
 0x46c   :  { %v6332_v49 = vpop.f32.mrf.mxu0 }
 0x46d   :  { %v2645_v31 = vmax.f32 %v2464_v55, 0.0  ;;  %v9496_v15 = vpop.f32.mrf.mxu1 }
 0x46e   :  { %v2468_v46 = vpop.f32.mrf.mxu0  ;;  %6700 = vmatmul.mubr.bf16.gmra.mxu0 %v8870_v33 }
 0x46f   :  { %v9499_v5 = vpack.c.bf16 %v2645_v31, %v2644_v37  ;;  %v6486_v30 = vpop.f32.mrf.mxu1  ;;  %6703 = vmatprep.mubr.msk.bf16.mxu0 %vm7227_vm0, %v10948_v63  ;;  %v2469_v36 = vadd.f32 %v9441_v43, %v2468_v46 }
 0x470   :  { %v6335_v19 = vpop.f32.mrf.mxu0 }
 0x471   :  { %11017 = vst [vmem:[#allocation22_spill] sm:$0xff] %v9499_v5  ;;  %v9504_v42 = vpop.f32.mrf.mxu1  ;;  %6584 = vmatmul.mubr.msk.bf16.gmra.mxu1 %vm218_vm1, %v11019_v54  ;;  %v2646_v49 = vmax.f32 %v2469_v36, 0.0 }
 0x472   :  { %11018 = vst [vmem:[#allocation60_spill] sm:$0xff] %v9504_v42  ;;  %v2471_v9 = vpop.f32.mrf.mxu0  ;;  %6587 = vmatprep.mubr.msk.bf16.mxu1 %vm7227_vm0, %v10948_v63 }
 0x473   :  { %v2472_v33 = vadd.f32 %v9441_v43, %v2471_v9  ;;  %v6489_v55 = vpop.f32.mrf.mxu1  ;;  %v11022_v9 = vld [vmem:[#allocation24_spill] sm:$0xff] }
 0x474   :  { %v6336_v52 = vpop.f32.mrf.mxu0 }
 0x475   :  { %v2647_v37 = vmax.f32 %v2472_v33, 0.0  ;;  %v9511_v31 = vpop.f32.mrf.mxu1 }
 0x476   :  { %v2476_v30 = vpop.f32.mrf.mxu0  ;;  %6704 = vmatmul.mubr.bf16.gmra.mxu0 %v8885_v61 }
 0x477   :  { %v9514_v46 = vpack.c.bf16 %v2647_v37, %v2646_v49  ;;  %v6490_v19 = vpop.f32.mrf.mxu1  ;;  %6707 = vmatprep.mubr.msk.bf16.mxu0 %vm7227_vm0, %v10948_v63  ;;  %v2477_v42 = vadd.f32 %v9441_v43, %v2476_v30 }
 0x478   :  { %v6339_v54 = vpop.f32.mrf.mxu0 }
 0x479   :  { %11020 = vst [vmem:[#allocation23_spill] sm:$0xff] %v9514_v46  ;;  %v9519_v5 = vpop.f32.mrf.mxu1  ;;  %6588 = vmatmul.mubr.msk.bf16.gmra.mxu1 %vm218_vm1, %v11022_v9  ;;  %v2648_v52 = vmax.f32 %v2477_v42, 0.0 }
 0x47a   :  { %11021 = vst [vmem:[#allocation61_spill] sm:$0xff] %v9519_v5  ;;  %v2479_v36 = vpop.f32.mrf.mxu0  ;;  %6591 = vmatprep.mubr.msk.bf16.mxu1 %vm7227_vm0, %v10948_v63 }
 0x47b   :  { %v2480_v61 = vadd.f32 %v9441_v43, %v2479_v36  ;;  %v6493_v33 = vpop.f32.mrf.mxu1  ;;  %v11025_v36 = vld [vmem:[#allocation25_spill] sm:$0xff] }
 0x47c   :  { %v6340_v55 = vpop.f32.mrf.mxu0 }
 0x47d   :  { %v2649_v49 = vmax.f32 %v2480_v61, 0.0  ;;  %v9526_v37 = vpop.f32.mrf.mxu1 }
 0x47e   :  { %v2484_v19 = vpop.f32.mrf.mxu0  ;;  %6708 = vmatmul.mubr.bf16.gmra.mxu0 %v8900_v1 }
 0x47f   :  { %v9529_v30 = vpack.c.bf16 %v2649_v49, %v2648_v52  ;;  %v6494_v54 = vpop.f32.mrf.mxu1  ;;  %6711 = vmatprep.mubr.msk.bf16.mxu0 %vm7227_vm0, %v10948_v63  ;;  %v2485_v5 = vadd.f32 %v9441_v43, %v2484_v19 }
 0x480   :  { %v6343_v9 = vpop.f32.mrf.mxu0 }
 0x481   :  { %11023 = vst [vmem:[#allocation24_spill] sm:$0xff] %v9529_v30  ;;  %v9534_v46 = vpop.f32.mrf.mxu1  ;;  %6592 = vmatmul.mubr.msk.bf16.gmra.mxu1 %vm218_vm1, %v11025_v36  ;;  %v2650_v55 = vmax.f32 %v2485_v5, 0.0 }
 0x482   :  { %11024 = vst [vmem:[#allocation62_spill] sm:$0xff] %v9534_v46  ;;  %v2487_v42 = vpop.f32.mrf.mxu0  ;;  %6595 = vmatprep.mubr.msk.bf16.mxu1 %vm7227_vm0, %v10948_v63 }
 0x483   :  { %v2488_v1 = vadd.f32 %v9441_v43, %v2487_v42  ;;  %v6497_v61 = vpop.f32.mrf.mxu1  ;;  %v11028_v42 = vld [vmem:[#allocation26_spill] sm:$0xff] }
 0x484   :  { %v6344_v33 = vpop.f32.mrf.mxu0 }
 0x485   :  { %v2651_v52 = vmax.f32 %v2488_v1, 0.0  ;;  %v9541_v49 = vpop.f32.mrf.mxu1 }
 0x486   :  { %v2492_v54 = vpop.f32.mrf.mxu0  ;;  %6712 = vmatmul.mubr.bf16.gmra.mxu0 %v8922_v17 }
 0x487   :  { %v9544_v19 = vpack.c.bf16 %v2651_v52, %v2650_v55  ;;  %v6498_v9 = vpop.f32.mrf.mxu1  ;;  %6715 = vmatprep.mubr.msk.bf16.mxu0 %vm7227_vm0, %v10948_v63  ;;  %v2493_v46 = vadd.f32 %v9441_v43, %v2492_v54 }
 0x488   :  { %v6347_v36 = vpop.f32.mrf.mxu0 }
 0x489   :  { %11026 = vst [vmem:[#allocation25_spill] sm:$0xff] %v9544_v19  ;;  %v9549_v30 = vpop.f32.mrf.mxu1  ;;  %6596 = vmatmul.mubr.msk.bf16.gmra.mxu1 %vm218_vm1, %v11028_v42  ;;  %v2652_v33 = vmax.f32 %v2493_v46, 0.0 }
 0x48a   :  { %11027 = vst [vmem:[#allocation63_spill] sm:$0xff] %v9549_v30  ;;  %v2495_v5 = vpop.f32.mrf.mxu0  ;;  %6599 = vmatprep.mubr.msk.bf16.mxu1 %vm7227_vm0, %v10948_v63 }
 0x48b   :  { %v2496_v17 = vadd.f32 %v9441_v43, %v2495_v5  ;;  %v6501_v1 = vpop.f32.mrf.mxu1  ;;  %v11031_v5 = vld [vmem:[#allocation27_spill] sm:$0xff] }
 0x48c   :  { %v6348_v61 = vpop.f32.mrf.mxu0 }
 0x48d   :  { %v2653_v55 = vmax.f32 %v2496_v17, 0.0  ;;  %v9556_v52 = vpop.f32.mrf.mxu1 }
 0x48e   :  { %v2500_v9 = vpop.f32.mrf.mxu0  ;;  %6716 = vmatmul.mubr.bf16.gmra.mxu0 %v8937_v10 }
 0x48f   :  { %v9559_v54 = vpack.c.bf16 %v2653_v55, %v2652_v33  ;;  %v6502_v36 = vpop.f32.mrf.mxu1  ;;  %6719 = vmatprep.mubr.msk.bf16.mxu0 %vm7227_vm0, %v10948_v63  ;;  %v2501_v30 = vadd.f32 %v9441_v43, %v2500_v9 }
 0x490   :  { %v6351_v42 = vpop.f32.mrf.mxu0 }
 0x491   :  { %11029 = vst [vmem:[#allocation26_spill] sm:$0xff] %v9559_v54  ;;  %v9564_v19 = vpop.f32.mrf.mxu1  ;;  %6600 = vmatmul.mubr.msk.bf16.gmra.mxu1 %vm218_vm1, %v11031_v5  ;;  %v2654_v61 = vmax.f32 %v2501_v30, 0.0 }
 0x492   :  { %11030 = vst [vmem:[#allocation64_spill] sm:$0xff] %v9564_v19  ;;  %v2503_v46 = vpop.f32.mrf.mxu0  ;;  %6603 = vmatprep.mubr.msk.bf16.mxu1 %vm7227_vm0, %v10948_v63 }
 0x493   :  { %v2504_v10 = vadd.f32 %v9441_v43, %v2503_v46  ;;  %v6505_v17 = vpop.f32.mrf.mxu1  ;;  %v11034_v46 = vld [vmem:[#allocation28_spill] sm:$0xff] }
 0x494   :  { %v6352_v1 = vpop.f32.mrf.mxu0 }
 0x495   :  { %v2655_v33 = vmax.f32 %v2504_v10, 0.0  ;;  %v9571_v55 = vpop.f32.mrf.mxu1 }
 0x496   :  { %v2508_v36 = vpop.f32.mrf.mxu0  ;;  %6720 = vmatmul.mubr.bf16.gmra.mxu0 %v8952_v14 }
 0x497   :  { %v9574_v9 = vpack.c.bf16 %v2655_v33, %v2654_v61  ;;  %v6506_v42 = vpop.f32.mrf.mxu1  ;;  %6723 = vmatprep.mubr.msk.bf16.mxu0 %vm7227_vm0, %v10948_v63  ;;  %v2509_v19 = vadd.f32 %v9441_v43, %v2508_v36 }
 0x498   :  { %v6355_v5 = vpop.f32.mrf.mxu0 }
 0x499   :  { %11032 = vst [vmem:[#allocation27_spill] sm:$0xff] %v9574_v9  ;;  %v9579_v54 = vpop.f32.mrf.mxu1  ;;  %6604 = vmatmul.mubr.msk.bf16.gmra.mxu1 %vm218_vm1, %v11034_v46  ;;  %v2656_v1 = vmax.f32 %v2509_v19, 0.0 }
 0x49a   :  { %11033 = vst [vmem:[#allocation65_spill] sm:$0xff] %v9579_v54  ;;  %v2511_v30 = vpop.f32.mrf.mxu0  ;;  %6607 = vmatprep.mubr.msk.bf16.mxu1 %vm7227_vm0, %v10948_v63 }
 0x49b   :  { %v2512_v14 = vadd.f32 %v9441_v43, %v2511_v30  ;;  %v6509_v10 = vpop.f32.mrf.mxu1  ;;  %v11037_v30 = vld [vmem:[#allocation29_spill] sm:$0xff] }
 0x49c   :  { %v6356_v17 = vpop.f32.mrf.mxu0 }
 0x49d   :  { %v2657_v61 = vmax.f32 %v2512_v14, 0.0  ;;  %v9586_v33 = vpop.f32.mrf.mxu1 }
 0x49e   :  { %v2516_v42 = vpop.f32.mrf.mxu0  ;;  %6724 = vmatmul.mubr.bf16.gmra.mxu0 %v8967_v18 }
 0x49f   :  { %v9589_v36 = vpack.c.bf16 %v2657_v61, %v2656_v1  ;;  %v6510_v5 = vpop.f32.mrf.mxu1  ;;  %6727 = vmatprep.mubr.msk.bf16.mxu0 %vm7227_vm0, %v10948_v63  ;;  %v2517_v54 = vadd.f32 %v9441_v43, %v2516_v42 }
 0x4a0   :  { %v6359_v46 = vpop.f32.mrf.mxu0 }
 0x4a1   :  { %11035 = vst [vmem:[#allocation28_spill] sm:$0xff] %v9589_v36  ;;  %v9594_v9 = vpop.f32.mrf.mxu1  ;;  %6608 = vmatmul.mubr.msk.bf16.gmra.mxu1 %vm218_vm1, %v11037_v30  ;;  %v2658_v17 = vmax.f32 %v2517_v54, 0.0 }
 0x4a2   :  { %11036 = vst [vmem:[#allocation66_spill] sm:$0xff] %v9594_v9  ;;  %v2519_v19 = vpop.f32.mrf.mxu0  ;;  %6611 = vmatprep.mubr.msk.bf16.mxu1 %vm7227_vm0, %v10948_v63 }
 0x4a3   :  { %v2520_v18 = vadd.f32 %v9441_v43, %v2519_v19  ;;  %v6513_v14 = vpop.f32.mrf.mxu1  ;;  %v11039_v19 = vld [vmem:[#allocation30_spill] sm:$0xff] }
 0x4a4   :  { %v6360_v10 = vpop.f32.mrf.mxu0 }
 0x4a5   :  { %v2659_v1 = vmax.f32 %v2520_v18, 0.0  ;;  %v9601_v61 = vpop.f32.mrf.mxu1 }
 0x4a6   :  { %v2524_v5 = vpop.f32.mrf.mxu0  ;;  %6728 = vmatmul.mubr.bf16.gmra.mxu0 %v8987_v23 }
 0x4a7   :  { %v9604_v42 = vpack.c.bf16 %v2659_v1, %v2658_v17  ;;  %v6514_v46 = vpop.f32.mrf.mxu1  ;;  %6731 = vmatprep.mubr.msk.bf16.mxu0 %vm7227_vm0, %v10948_v63  ;;  %v2525_v9 = vadd.f32 %v9441_v43, %v2524_v5 }
 0x4a8   :  { %v6363_v30 = vpop.f32.mrf.mxu0 }
 0x4a9   :  { %v9609_v36 = vpop.f32.mrf.mxu1  ;;  %6612 = vmatmul.mubr.msk.bf16.gmra.mxu1 %vm218_vm1, %v11039_v19  ;;  %v2660_v10 = vmax.f32 %v2525_v9, 0.0 }
 0x4aa   :  { %11038 = vst [vmem:[#allocation29_spill] sm:$0xff] %v9609_v36  ;;  %v2527_v54 = vpop.f32.mrf.mxu0  ;;  %6615 = vmatprep.mubr.msk.bf16.mxu1 %vm7227_vm0, %v10948_v63 }
 0x4ab   :  { %v2528_v23 = vadd.f32 %v9441_v43, %v2527_v54  ;;  %v6517_v18 = vpop.f32.mrf.mxu1  ;;  %v11042_v43 = vld [vmem:[#allocation31_spill] sm:$0xff] }
 0x4ac   :  { %v6364_v14 = vpop.f32.mrf.mxu0 }
 0x4ad   :  { %v2661_v17 = vmax.f32 %v2528_v23, 0.0  ;;  %v9616_v1 = vpop.f32.mrf.mxu1 }
 0x4ae   :  { %v9618_v46 = vpop.f32.mrf.mxu0  ;;  %6732 = vmatmul.mubr.bf16.gmra.mxu0 %v9002_v27 }
 0x4af   :  { %v9621_v5 = vpack.c.bf16 %v2661_v17, %v2660_v10  ;;  %v6518_v30 = vpop.f32.mrf.mxu1  ;;  %6735 = vmatprep.mubr.msk.bf16.mxu0 %vm7227_vm0, %v10948_v63  ;;  %v9640_v17 = vld [vmem:[%s10882_s2 + $0x3] ss:$0 sm:$0xff] }
 0x4b0   :  { %v6367_v19 = vpop.f32.mrf.mxu0 }
 0x4b1   :  { %11040 = vst [vmem:[#allocation30_spill] sm:$0xff] %v9621_v5  ;;  %v9625_v36 = vpop.f32.mrf.mxu1  ;;  %6616 = vmatmul.mubr.msk.bf16.gmra.mxu1 %vm218_vm1, %v11042_v43  ;;  %v11045_v43 = vld [vmem:[#allocation32_spill] sm:$0xff] }
 0x4b2   :  { %11041 = vst [vmem:[#allocation67_spill] sm:$0xff] %v9625_v36  ;;  %v2535_v9 = vpop.f32.mrf.mxu0  ;;  %6619 = vmatprep.mubr.msk.bf16.mxu1 %vm7227_vm0, %v10948_v63 }
 0x4b3   :  { %v6521_v54 = vpop.f32.mrf.mxu1 }
 0x4b4   :  { %v6368_v23 = vpop.f32.mrf.mxu0 }
 0x4b5   :  { %v9631_v18 = vpop.f32.mrf.mxu1 }
 0x4b6   :  { %11043 = vst [vmem:[#allocation31_spill] sm:$0xff] %v9631_v18  ;;  %v3370_v27 = vpop.f32.mrf.mxu0  ;;  %6736 = vmatmul.mubr.bf16.gmra.mxu0 %v9017_v21 }
 0x4b7   :  { %v3371_v14 = vadd.f32 %v3370_v27, %v9022_v7  ;;  %v6522_v10 = vpop.f32.mrf.mxu1  ;;  %6739 = vmatprep.mubr.msk.bf16.mxu0 %vm7227_vm0, %v10948_v63 }
 0x4b8   :  { %v6641_v30 = vpop.f32.mrf.mxu0 }
 0x4b9   :  { %v9642_v19 = vpop.f32.mrf.mxu1  ;;  %6620 = vmatmul.mubr.msk.bf16.gmra.mxu1 %vm218_vm1, %v11045_v43  ;;  %v3880_v21 = vadd.f32 %v9640_v17, %v3371_v14 }
 0x4ba   :  { %11044 = vst [vmem:[#allocation68_spill] sm:$0xff] %v9642_v19  ;;  %v3373_v9 = vpop.f32.mrf.mxu0  ;;  %6911 = vmatprep.mubr.msk.bf16.mxu1 %vm7227_vm0, %v10948_v63 }
 0x4bb   :  { %v3374_v7 = vadd.f32 %v3373_v9, %v9029_v11  ;;  %v6525_v54 = vpop.f32.mrf.mxu1  ;;  %v4005_v19 = vmax.f32 %v3880_v21, 0.0 }
 0x4bc   :  { %v6642_v23 = vpop.f32.mrf.mxu0 }
 0x4bd   :  { %v3881_v27 = vadd.f32 %v9640_v17, %v3374_v7  ;;  %v9651_v10 = vpop.f32.mrf.mxu1 }
 0x4be   :  { %v3378_v30 = vpop.f32.mrf.mxu0  ;;  %6740 = vmatmul.mubr.bf16.gmra.mxu0 %v9032_v50 }
 0x4bf   :  { %v4006_v18 = vmax.f32 %v3881_v27, 0.0  ;;  %v3379_v43 = vadd.f32 %v3378_v30, %v9037_v8  ;;  %v6526_v36 = vpop.f32.mrf.mxu1  ;;  %6743 = vmatprep.mubr.msk.bf16.mxu0 %vm7227_vm0, %v10948_v63 }
 0x4c0   :  { %v6645_v14 = vpop.f32.mrf.mxu0  ;;  %v11048_v36 = vld [vmem:[#allocation33_spill] sm:$0xff] }
 0x4c1   :  { %v9657_v5 = vpack.c.bf16 %v4006_v18, %v4005_v19  ;;  %v9659_v11 = vpop.f32.mrf.mxu1  ;;  %v3882_v7 = vadd.f32 %v9640_v17, %v3379_v43  ;;  %v11049_v18 = vld [vmem:[#allocation34_spill] sm:$0xff] }
 0x4c2   :  { %11047 = vst [vmem:[#allocation69_spill] sm:$0xff] %v9659_v11  ;;  %v3381_v9 = vpop.f32.mrf.mxu0 }
 0x4c3   :  { %11046 = vst [vmem:[#allocation32_spill] sm:$0xff] %v9657_v5  ;;  %v3382_v54 = vadd.f32 %v3381_v9, %v9051_v45  ;;  %v6529_v23 = vpop.f32.mrf.mxu1  ;;  %v4007_v30 = vmax.f32 %v3882_v7, 0.0 }
 0x4c4   :  { %v6646_v50 = vpop.f32.mrf.mxu0 }
 0x4c5   :  { %v3883_v21 = vadd.f32 %v9640_v17, %v3382_v54  ;;  %v9664_v27 = vpop.f32.mrf.mxu1 }
 0x4c6   :  { %v3386_v8 = vpop.f32.mrf.mxu0  ;;  %6744 = vmatmul.mubr.bf16.gmra.mxu0 %v11048_v36 }
 0x4c7   :  { %v4008_v14 = vmax.f32 %v3883_v21, 0.0  ;;  %v3387_v19 = vadd.f32 %v3386_v8, %v11049_v18  ;;  %v6530_v5 = vpop.f32.mrf.mxu1  ;;  %6747 = vmatprep.mubr.msk.bf16.mxu0 %vm7227_vm0, %v10948_v63 }
 0x4c8   :  { %v6649_v43 = vpop.f32.mrf.mxu0 }
 0x4c9   :  { %v4131_v11 = vpack.c.bf16 %v4008_v14, %v4007_v30  ;;  %v9670_v45 = vpop.f32.mrf.mxu1  ;;  %v3884_v54 = vadd.f32 %v9640_v17, %v3387_v19  ;;  %v11050_v14 = vld [vmem:[#allocation35_spill] sm:$0xff] }
 0x4ca   :  { %v3389_v9 = vpop.f32.mrf.mxu0 }
 0x4cb   :  { %v3390_v23 = vadd.f32 %v3389_v9, %v9066_v38  ;;  %6912 = vmatmul.mubr.bf16.vlgmr.msra.gmra.mxu1 %v4131_v11  ;;  %v6533_v50 = vpop.f32.mrf.mxu1  ;;  %v4009_v8 = vmax.f32 %v3884_v54, 0.0 }
 0x4cc   :  { %v6650_v36 = vpop.f32.mrf.mxu0  ;;  %6915 = vmatprep.mubr.msk.bf16.mxu1 %vm7227_vm0, %v10948_v63 }
 0x4cd   :  { %v3885_v5 = vadd.f32 %v9640_v17, %v3390_v23  ;;  %v9677_v7 = vpop.f32.mrf.mxu1 }
 0x4ce   :  { %v3394_v21 = vpop.f32.mrf.mxu0  ;;  %6748 = vmatmul.mubr.bf16.gmra.mxu0 %v9069_v60 }
 0x4cf   :  { %v4010_v30 = vmax.f32 %v3885_v5, 0.0  ;;  %v3395_v18 = vadd.f32 %v3394_v21, %v11050_v14  ;;  %v6534_v19 = vpop.f32.mrf.mxu1  ;;  %6751 = vmatprep.mubr.msk.bf16.mxu0 %vm7227_vm0, %v10948_v63  ;;  %v11051_v14 = vld [vmem:[#allocation36_spill] sm:$0xff] }
 0x4d0   :  { %v6653_v38 = vpop.f32.mrf.mxu0 }
 0x4d1   :  { %v4132_v11 = vpack.c.bf16 %v4010_v30, %v4009_v8  ;;  %v9683_v43 = vpop.f32.mrf.mxu1  ;;  %v3886_v23 = vadd.f32 %v9640_v17, %v3395_v18 }
 0x4d2   :  { %v3397_v9 = vpop.f32.mrf.mxu0 }
 0x4d3   :  { %v3398_v50 = vadd.f32 %v3397_v9, %v9081_v28  ;;  %6916 = vmatmul.mubr.bf16.gmra.mxu1 %v4132_v11  ;;  %v6537_v36 = vpop.f32.mrf.mxu1  ;;  %v4011_v8 = vmax.f32 %v3886_v23, 0.0 }
 0x4d4   :  { %v6654_v60 = vpop.f32.mrf.mxu0  ;;  %6919 = vmatprep.mubr.msk.bf16.mxu1 %vm7227_vm0, %v10948_v63 }
 0x4d5   :  { %v3887_v54 = vadd.f32 %v9640_v17, %v3398_v50  ;;  %v9690_v5 = vpop.f32.mrf.mxu1 }
 0x4d6   :  { %v3402_v21 = vpop.f32.mrf.mxu0  ;;  %6752 = vmatmul.mubr.bf16.gmra.mxu0 %v9084_v6 }
 0x4d7   :  { %v4012_v30 = vmax.f32 %v3887_v54, 0.0  ;;  %v3403_v19 = vadd.f32 %v3402_v21, %v11051_v14  ;;  %v6538_v18 = vpop.f32.mrf.mxu1  ;;  %6755 = vmatprep.mubr.msk.bf16.mxu0 %vm7227_vm0, %v10948_v63  ;;  %v11052_v14 = vld [vmem:[#allocation37_spill] sm:$0xff] }
 0x4d8   :  { %v6657_v28 = vpop.f32.mrf.mxu0 }
 0x4d9   :  { %v4133_v38 = vpack.c.bf16 %v4012_v30, %v4011_v8  ;;  %v9696_v11 = vpop.f32.mrf.mxu1  ;;  %v3888_v50 = vadd.f32 %v9640_v17, %v3403_v19 }
 0x4da   :  { %v3405_v9 = vpop.f32.mrf.mxu0 }
 0x4db   :  { %v3406_v36 = vadd.f32 %v3405_v9, %v9096_v62  ;;  %6920 = vmatmul.mubr.bf16.gmra.mxu1 %v4133_v38  ;;  %v6541_v60 = vpop.f32.mrf.mxu1  ;;  %v4013_v8 = vmax.f32 %v3888_v50, 0.0 }
 0x4dc   :  { %v6658_v6 = vpop.f32.mrf.mxu0  ;;  %6923 = vmatprep.mubr.msk.bf16.mxu1 %vm7227_vm0, %v10948_v63 }
 0x4dd   :  { %v3889_v23 = vadd.f32 %v9640_v17, %v3406_v36  ;;  %v9703_v54 = vpop.f32.mrf.mxu1 }
 0x4de   :  { %v3410_v21 = vpop.f32.mrf.mxu0  ;;  %6756 = vmatmul.mubr.bf16.gmra.mxu0 %v9099_v39 }
 0x4df   :  { %v4014_v30 = vmax.f32 %v3889_v23, 0.0  ;;  %v3411_v18 = vadd.f32 %v3410_v21, %v11052_v14  ;;  %v6542_v19 = vpop.f32.mrf.mxu1  ;;  %6759 = vmatprep.mubr.msk.bf16.mxu0 %vm7227_vm0, %v10948_v63  ;;  %v11053_v14 = vld [vmem:[#allocation38_spill] sm:$0xff] }
 0x4e0   :  { %v6661_v62 = vpop.f32.mrf.mxu0 }
 0x4e1   :  { %v4134_v28 = vpack.c.bf16 %v4014_v30, %v4013_v8  ;;  %v9709_v38 = vpop.f32.mrf.mxu1  ;;  %v3890_v36 = vadd.f32 %v9640_v17, %v3411_v18 }
 0x4e2   :  { %v3413_v9 = vpop.f32.mrf.mxu0 }
 0x4e3   :  { %v3414_v60 = vadd.f32 %v3413_v9, %v9111_v0  ;;  %6924 = vmatmul.mubr.bf16.gmra.mxu1 %v4134_v28  ;;  %v6545_v6 = vpop.f32.mrf.mxu1  ;;  %v4015_v8 = vmax.f32 %v3890_v36, 0.0 }
 0x4e4   :  { %v6662_v39 = vpop.f32.mrf.mxu0  ;;  %6927 = vmatprep.mubr.msk.bf16.mxu1 %vm7227_vm0, %v10948_v63 }
 0x4e5   :  { %v3891_v50 = vadd.f32 %v9640_v17, %v3414_v60  ;;  %v9716_v23 = vpop.f32.mrf.mxu1 }
 0x4e6   :  { %v3418_v21 = vpop.f32.mrf.mxu0  ;;  %6760 = vmatmul.mubr.bf16.gmra.mxu0 %v9114_v32 }
 0x4e7   :  { %v4016_v30 = vmax.f32 %v3891_v50, 0.0  ;;  %v3419_v19 = vadd.f32 %v3418_v21, %v11053_v14  ;;  %v6546_v18 = vpop.f32.mrf.mxu1  ;;  %6763 = vmatprep.mubr.msk.bf16.mxu0 %vm7227_vm0, %v10948_v63  ;;  %v11054_v14 = vld [vmem:[#allocation39_spill] sm:$0xff] }
 0x4e8   :  { %v6665_v0 = vpop.f32.mrf.mxu0 }
 0x4e9   :  { %v4135_v62 = vpack.c.bf16 %v4016_v30, %v4015_v8  ;;  %v9722_v28 = vpop.f32.mrf.mxu1  ;;  %v3892_v60 = vadd.f32 %v9640_v17, %v3419_v19 }
 0x4ea   :  { %v3421_v9 = vpop.f32.mrf.mxu0 }
 0x4eb   :  { %v3422_v6 = vadd.f32 %v3421_v9, %v9126_v34  ;;  %6928 = vmatmul.mubr.bf16.gmra.mxu1 %v4135_v62  ;;  %v6549_v39 = vpop.f32.mrf.mxu1  ;;  %v4017_v8 = vmax.f32 %v3892_v60, 0.0 }
 0x4ec   :  { %v6666_v32 = vpop.f32.mrf.mxu0  ;;  %6931 = vmatprep.mubr.msk.bf16.mxu1 %vm7227_vm0, %v10948_v63 }
 0x4ed   :  { %v3893_v36 = vadd.f32 %v9640_v17, %v3422_v6  ;;  %v9729_v50 = vpop.f32.mrf.mxu1 }
 0x4ee   :  { %v3426_v21 = vpop.f32.mrf.mxu0  ;;  %6764 = vmatmul.mubr.bf16.gmra.mxu0 %v9129_v26 }
 0x4ef   :  { %v4018_v30 = vmax.f32 %v3893_v36, 0.0  ;;  %v3427_v18 = vadd.f32 %v3426_v21, %v11054_v14  ;;  %v6550_v19 = vpop.f32.mrf.mxu1  ;;  %6767 = vmatprep.mubr.msk.bf16.mxu0 %vm7227_vm0, %v10948_v63  ;;  %v11056_v14 = vld [vmem:[#allocation40_spill] sm:$0xff] }
 0x4f0   :  { %v6669_v34 = vpop.f32.mrf.mxu0  ;;  %v11057_v19 = vld [vmem:[#allocation41_spill] sm:$0xff] }
 0x4f1   :  { %v4136_v0 = vpack.c.bf16 %v4018_v30, %v4017_v8  ;;  %v9735_v62 = vpop.f32.mrf.mxu1  ;;  %v3894_v6 = vadd.f32 %v9640_v17, %v3427_v18 }
 0x4f2   :  { %v3429_v9 = vpop.f32.mrf.mxu0 }
 0x4f3   :  { %v3430_v39 = vadd.f32 %v3429_v9, %v9141_v13  ;;  %6932 = vmatmul.mubr.bf16.gmra.mxu1 %v4136_v0  ;;  %v6553_v32 = vpop.f32.mrf.mxu1  ;;  %v4019_v8 = vmax.f32 %v3894_v6, 0.0 }
 0x4f4   :  { %v6670_v26 = vpop.f32.mrf.mxu0  ;;  %6935 = vmatprep.mubr.msk.bf16.mxu1 %vm7227_vm0, %v10948_v63 }
 0x4f5   :  { %v3895_v60 = vadd.f32 %v9640_v17, %v3430_v39  ;;  %v9742_v36 = vpop.f32.mrf.mxu1 }
 0x4f6   :  { %11055 = vst [vmem:[#allocation33_spill] sm:$0xff] %v9742_v36  ;;  %v3434_v21 = vpop.f32.mrf.mxu0  ;;  %6768 = vmatmul.mubr.bf16.gmra.mxu0 %v11056_v14 }
 0x4f7   :  { %v4020_v30 = vmax.f32 %v3895_v60, 0.0  ;;  %v3435_v34 = vadd.f32 %v3434_v21, %v11057_v19  ;;  %v6554_v18 = vpop.f32.mrf.mxu1  ;;  %6771 = vmatprep.mubr.msk.bf16.mxu0 %vm7227_vm0, %v10948_v63  ;;  %v11060_v19 = vld [vmem:[#allocation2_spill] sm:$0xff] }
 0x4f8   :  { %v6673_v13 = vpop.f32.mrf.mxu0  ;;  %v11061_v18 = vld [vmem:[#allocation42_spill] sm:$0xff] }
 0x4f9   :  { %v4137_v0 = vpack.c.bf16 %v4020_v30, %v4019_v8  ;;  %v9748_v9 = vpop.f32.mrf.mxu1  ;;  %v3896_v39 = vadd.f32 %v9640_v17, %v3435_v34 }
 0x4fa   :  { %11058 = vst [vmem:[#allocation34_spill] sm:$0xff] %v9748_v9  ;;  %v3437_v32 = vpop.f32.mrf.mxu0 }
 0x4fb   :  { %v3438_v26 = vadd.f32 %v3437_v32, %v9156_v40  ;;  %6936 = vmatmul.mubr.bf16.gmra.mxu1 %v4137_v0  ;;  %v6557_v36 = vpop.f32.mrf.mxu1  ;;  %v4021_v8 = vmax.f32 %v3896_v39, 0.0 }
 0x4fc   :  { %v6674_v14 = vpop.f32.mrf.mxu0  ;;  %6939 = vmatprep.mubr.msk.bf16.mxu1 %vm7227_vm0, %v10948_v63 }
 0x4fd   :  { %v3897_v6 = vadd.f32 %v9640_v17, %v3438_v26  ;;  %v9755_v60 = vpop.f32.mrf.mxu1  ;;  %v11063_v14 = vld [vmem:[#allocation3_spill] sm:$0xff] }
 0x4fe   :  { %11059 = vst [vmem:[#allocation35_spill] sm:$0xff] %v9755_v60  ;;  %v3442_v21 = vpop.f32.mrf.mxu0  ;;  %6772 = vmatmul.mubr.bf16.gmra.mxu0 %v11060_v19 }
 0x4ff   :  { %v4022_v30 = vmax.f32 %v3897_v6, 0.0  ;;  %v3443_v13 = vadd.f32 %v3442_v21, %v11061_v18  ;;  %v6558_v34 = vpop.f32.mrf.mxu1  ;;  %6775 = vmatprep.mubr.msk.bf16.mxu0 %vm7227_vm0, %v10948_v63  ;;  %v11065_v18 = vld [vmem:[#allocation43_spill] sm:$0xff] }
 0x500   :  { %v6677_v40 = vpop.f32.mrf.mxu0  ;;  %v11066_v34 = vld [vmem:[#allocation44_spill] sm:$0xff] }
 0x501   :  { %v4138_v36 = vpack.c.bf16 %v4022_v30, %v4021_v8  ;;  %v9761_v0 = vpop.f32.mrf.mxu1  ;;  %v3898_v26 = vadd.f32 %v9640_v17, %v3443_v13 }
 0x502   :  { %11062 = vst [vmem:[#allocation36_spill] sm:$0xff] %v9761_v0  ;;  %v3445_v32 = vpop.f32.mrf.mxu0 }
 0x503   :  { %v3446_v60 = vadd.f32 %v3445_v32, %v11063_v14  ;;  %6940 = vmatmul.mubr.bf16.gmra.mxu1 %v4138_v36  ;;  %v6561_v9 = vpop.f32.mrf.mxu1  ;;  %v4023_v8 = vmax.f32 %v3898_v26, 0.0 }
 0x504   :  { %v6678_v19 = vpop.f32.mrf.mxu0  ;;  %6943 = vmatprep.mubr.msk.bf16.mxu1 %vm7227_vm0, %v10948_v63 }
 0x505   :  { %v3899_v39 = vadd.f32 %v9640_v17, %v3446_v60  ;;  %v9768_v6 = vpop.f32.mrf.mxu1  ;;  %v11067_v19 = vld [vmem:[#allocation4_spill] sm:$0xff] }
 0x506   :  { %11064 = vst [vmem:[#allocation37_spill] sm:$0xff] %v9768_v6  ;;  %v3450_v21 = vpop.f32.mrf.mxu0  ;;  %6776 = vmatmul.mubr.bf16.gmra.mxu0 %v11065_v18 }
 0x507   :  { %v4024_v30 = vmax.f32 %v3899_v39, 0.0  ;;  %v3451_v40 = vadd.f32 %v3450_v21, %v11066_v34  ;;  %v6562_v13 = vpop.f32.mrf.mxu1  ;;  %6779 = vmatprep.mubr.msk.bf16.mxu0 %vm7227_vm0, %v10948_v63  ;;  %v11069_v34 = vld [vmem:[#allocation45_spill] sm:$0xff] }
 0x508   :  { %v6681_v9 = vpop.f32.mrf.mxu0  ;;  %v11070_v13 = vld [vmem:[#allocation46_spill] sm:$0xff] }
 0x509   :  { %v4139_v36 = vpack.c.bf16 %v4024_v30, %v4023_v8  ;;  %v9774_v32 = vpop.f32.mrf.mxu1  ;;  %v3900_v60 = vadd.f32 %v9640_v17, %v3451_v40 }
 0x50a   :  { %v3453_v14 = vpop.f32.mrf.mxu0 }
 0x50b   :  { %v3454_v6 = vadd.f32 %v3453_v14, %v11067_v19  ;;  %6944 = vmatmul.mubr.bf16.gmra.mxu1 %v4139_v36  ;;  %v6565_v0 = vpop.f32.mrf.mxu1  ;;  %v4025_v8 = vmax.f32 %v3900_v60, 0.0 }
 0x50c   :  { %v6682_v18 = vpop.f32.mrf.mxu0  ;;  %6947 = vmatprep.mubr.msk.bf16.mxu1 %vm7227_vm0, %v10948_v63 }
 0x50d   :  { %v3901_v26 = vadd.f32 %v9640_v17, %v3454_v6  ;;  %v9781_v39 = vpop.f32.mrf.mxu1 }
 0x50e   :  { %11068 = vst [vmem:[#allocation38_spill] sm:$0xff] %v9781_v39  ;;  %v3458_v21 = vpop.f32.mrf.mxu0  ;;  %6780 = vmatmul.mubr.bf16.gmra.mxu0 %v11069_v34 }
 0x50f   :  { %v4026_v30 = vmax.f32 %v3901_v26, 0.0  ;;  %v3459_v9 = vadd.f32 %v3458_v21, %v11070_v13  ;;  %v6566_v40 = vpop.f32.mrf.mxu1  ;;  %6783 = vmatprep.mubr.msk.bf16.mxu0 %vm7227_vm0, %v10948_v63  ;;  %v11072_v13 = vld [vmem:[#allocation5_spill] sm:$0xff] }
 0x510   :  { %v6685_v0 = vpop.f32.mrf.mxu0  ;;  %v11073_v40 = vld [vmem:[#allocation47_spill] sm:$0xff] }
 0x511   :  { %v4140_v36 = vpack.c.bf16 %v4026_v30, %v4025_v8  ;;  %v9787_v14 = vpop.f32.mrf.mxu1  ;;  %v3902_v6 = vadd.f32 %v9640_v17, %v3459_v9 }
 0x512   :  { %v3461_v19 = vpop.f32.mrf.mxu0 }
 0x513   :  { %v3462_v18 = vadd.f32 %v3461_v19, %v9212_v22  ;;  %6948 = vmatmul.mubr.bf16.gmra.mxu1 %v4140_v36  ;;  %v6569_v39 = vpop.f32.mrf.mxu1  ;;  %v4027_v8 = vmax.f32 %v3902_v6, 0.0 }
 0x514   :  { %v6686_v34 = vpop.f32.mrf.mxu0  ;;  %6951 = vmatprep.mubr.msk.bf16.mxu1 %vm7227_vm0, %v10948_v63 }
 0x515   :  { %v3903_v60 = vadd.f32 %v9640_v17, %v3462_v18  ;;  %v9794_v26 = vpop.f32.mrf.mxu1 }
 0x516   :  { %11071 = vst [vmem:[#allocation39_spill] sm:$0xff] %v9794_v26  ;;  %v3466_v21 = vpop.f32.mrf.mxu0  ;;  %6784 = vmatmul.mubr.bf16.gmra.mxu0 %v11072_v13 }
 0x517   :  { %v4028_v30 = vmax.f32 %v3903_v60, 0.0  ;;  %v3467_v0 = vadd.f32 %v3466_v21, %v11073_v40  ;;  %v6570_v9 = vpop.f32.mrf.mxu1  ;;  %6787 = vmatprep.mubr.msk.bf16.mxu0 %vm7227_vm0, %v10948_v63 }
 0x518   :  { %v6689_v22 = vpop.f32.mrf.mxu0 }
 0x519   :  { %v4141_v39 = vpack.c.bf16 %v4028_v30, %v4027_v8  ;;  %v9800_v36 = vpop.f32.mrf.mxu1  ;;  %v3904_v18 = vadd.f32 %v9640_v17, %v3467_v0 }
 0x51a   :  { %v3469_v19 = vpop.f32.mrf.mxu0 }
 0x51b   :  { %v3470_v34 = vadd.f32 %v3469_v19, %v9227_v58  ;;  %6952 = vmatmul.mubr.bf16.gmra.mxu1 %v4141_v39  ;;  %v6573_v26 = vpop.f32.mrf.mxu1  ;;  %v4029_v8 = vmax.f32 %v3904_v18, 0.0 }
 0x51c   :  { %v6690_v13 = vpop.f32.mrf.mxu0  ;;  %6955 = vmatprep.mubr.msk.bf16.mxu1 %vm7227_vm0, %v10948_v63 }
 0x51d   :  { %v3905_v6 = vadd.f32 %v9640_v17, %v3470_v34  ;;  %v9807_v60 = vpop.f32.mrf.mxu1 }
 0x51e   :  { %v3474_v21 = vpop.f32.mrf.mxu0  ;;  %6788 = vmatmul.mubr.bf16.gmra.mxu0 %v9229_v25 }
 0x51f   :  { %v4030_v30 = vmax.f32 %v3905_v6, 0.0  ;;  %v3475_v40 = vadd.f32 %v3474_v21, %v9234_v44  ;;  %v6574_v0 = vpop.f32.mrf.mxu1  ;;  %6791 = vmatprep.mubr.msk.bf16.mxu0 %vm7227_vm0, %v10948_v63 }
 0x520   :  { %v6693_v58 = vpop.f32.mrf.mxu0 }
 0x521   :  { %v4142_v26 = vpack.c.bf16 %v4030_v30, %v4029_v8  ;;  %v9813_v9 = vpop.f32.mrf.mxu1  ;;  %v3906_v39 = vadd.f32 %v9640_v17, %v3475_v40  ;;  %v11074_v8 = vld [vmem:[#allocation6_spill] sm:$0xff] }
 0x522   :  { %v3477_v22 = vpop.f32.mrf.mxu0 }
 0x523   :  { %v3478_v19 = vadd.f32 %v3477_v22, %v9241_v57  ;;  %6956 = vmatmul.mubr.bf16.gmra.mxu1 %v4142_v26  ;;  %v6577_v34 = vpop.f32.mrf.mxu1  ;;  %v4031_v6 = vmax.f32 %v3906_v39, 0.0 }
 0x524   :  { %v6694_v25 = vpop.f32.mrf.mxu0  ;;  %6959 = vmatprep.mubr.msk.bf16.mxu1 %vm7227_vm0, %v10948_v63 }
 0x525   :  { %v3907_v44 = vadd.f32 %v9640_v17, %v3478_v19  ;;  %v9820_v18 = vpop.f32.mrf.mxu1 }
 0x526   :  { %v3482_v13 = vpop.f32.mrf.mxu0  ;;  %6792 = vmatmul.mubr.bf16.gmra.mxu0 %v9244_v3 }
 0x527   :  { %v4032_v21 = vmax.f32 %v3907_v44, 0.0  ;;  %v3483_v30 = vadd.f32 %v3482_v13, %v11074_v8  ;;  %v6578_v40 = vpop.f32.mrf.mxu1  ;;  %6795 = vmatprep.mubr.msk.bf16.mxu0 %vm7227_vm0, %v10948_v63  ;;  %v11075_v13 = vld [vmem:[#allocation7_spill] sm:$0xff]  ;;  %v11076_v8 = vld [vmem:[#allocation8_spill] sm:$0xff] }
 0x528   :  { %v6697_v57 = vpop.f32.mrf.mxu0 }
 0x529   :  { %v4143_v0 = vpack.c.bf16 %v4032_v21, %v4031_v6  ;;  %v9826_v58 = vpop.f32.mrf.mxu1  ;;  %v3908_v22 = vadd.f32 %v9640_v17, %v3483_v30 }
 0x52a   :  { %v3485_v26 = vpop.f32.mrf.mxu0 }
 0x52b   :  { %v3486_v19 = vadd.f32 %v3485_v26, %v9264_v59  ;;  %6960 = vmatmul.mubr.bf16.gmra.mxu1 %v4143_v0  ;;  %v6581_v34 = vpop.f32.mrf.mxu1  ;;  %v4033_v6 = vmax.f32 %v3908_v22, 0.0 }
 0x52c   :  { %v6698_v3 = vpop.f32.mrf.mxu0  ;;  %6963 = vmatprep.mubr.msk.bf16.mxu1 %vm7227_vm0, %v10948_v63 }
 0x52d   :  { %v3909_v39 = vadd.f32 %v9640_v17, %v3486_v19  ;;  %v9833_v25 = vpop.f32.mrf.mxu1 }
 0x52e   :  { %v3490_v44 = vpop.f32.mrf.mxu0  ;;  %6796 = vmatmul.mubr.bf16.gmra.mxu0 %v11075_v13 }
 0x52f   :  { %v4034_v21 = vmax.f32 %v3909_v39, 0.0  ;;  %v3491_v40 = vadd.f32 %v3490_v44, %v11076_v8  ;;  %v6582_v30 = vpop.f32.mrf.mxu1  ;;  %6799 = vmatprep.mubr.msk.bf16.mxu0 %vm7227_vm0, %v10948_v63 }
 0x530   :  { %v6701_v59 = vpop.f32.mrf.mxu0 }
 0x531   :  { %v4144_v57 = vpack.c.bf16 %v4034_v21, %v4033_v6  ;;  %v9839_v0 = vpop.f32.mrf.mxu1  ;;  %v3910_v19 = vadd.f32 %v9640_v17, %v3491_v40 }
 0x532   :  { %v3493_v26 = vpop.f32.mrf.mxu0 }
 0x533   :  { %v3494_v34 = vadd.f32 %v3493_v26, %v9287_v56  ;;  %6964 = vmatmul.mubr.bf16.gmra.mxu1 %v4144_v57  ;;  %v6585_v3 = vpop.f32.mrf.mxu1  ;;  %v4035_v6 = vmax.f32 %v3910_v19, 0.0 }
 0x534   :  { %v6702_v13 = vpop.f32.mrf.mxu0  ;;  %6967 = vmatprep.mubr.msk.bf16.mxu1 %vm7227_vm0, %v10948_v63 }
 0x535   :  { %v3911_v22 = vadd.f32 %v9640_v17, %v3494_v34  ;;  %v9846_v39 = vpop.f32.mrf.mxu1  ;;  %v11077_v34 = vld [vmem:[#allocation9_spill] sm:$0xff] }
 0x536   :  { %v3498_v44 = vpop.f32.mrf.mxu0  ;;  %6800 = vmatmul.mubr.bf16.gmra.mxu0 %v9290_v20 }
 0x537   :  { %v4036_v21 = vmax.f32 %v3911_v22, 0.0  ;;  %v3499_v8 = vadd.f32 %v3498_v44, %v9297_v47  ;;  %v6586_v40 = vpop.f32.mrf.mxu1  ;;  %6803 = vmatprep.mubr.msk.bf16.mxu0 %vm7227_vm0, %v10948_v63  ;;  %v11079_v44 = vld [vmem:[#allocation10_spill] sm:$0xff] }
 0x538   :  { %v6705_v56 = vpop.f32.mrf.mxu0  ;;  %v11080_v40 = vld [vmem:[#allocation48_spill] sm:$0xff] }
 0x539   :  { %v4145_v30 = vpack.c.bf16 %v4036_v21, %v4035_v6  ;;  %v9852_v59 = vpop.f32.mrf.mxu1  ;;  %v3912_v26 = vadd.f32 %v9640_v17, %v3499_v8 }
 0x53a   :  { %v3501_v57 = vpop.f32.mrf.mxu0 }
 0x53b   :  { %v3502_v3 = vadd.f32 %v3501_v57, %v11077_v34  ;;  %6968 = vmatmul.mubr.bf16.gmra.mxu1 %v4145_v30  ;;  %v6589_v13 = vpop.f32.mrf.mxu1  ;;  %v4037_v6 = vmax.f32 %v3912_v26, 0.0 }
 0x53c   :  { %v6706_v20 = vpop.f32.mrf.mxu0  ;;  %6971 = vmatprep.mubr.msk.bf16.mxu1 %vm7227_vm0, %v10948_v63 }
 0x53d   :  { %v3913_v47 = vadd.f32 %v9640_v17, %v3502_v3  ;;  %v9859_v19 = vpop.f32.mrf.mxu1 }
 0x53e   :  { %11078 = vst [vmem:[#allocation40_spill] sm:$0xff] %v9859_v19  ;;  %v3506_v22 = vpop.f32.mrf.mxu0  ;;  %6804 = vmatmul.mubr.bf16.gmra.mxu0 %v11079_v44 }
 0x53f   :  { %v4038_v21 = vmax.f32 %v3913_v47, 0.0  ;;  %v3507_v56 = vadd.f32 %v3506_v22, %v11080_v40  ;;  %v6590_v8 = vpop.f32.mrf.mxu1  ;;  %6807 = vmatprep.mubr.msk.bf16.mxu0 %vm7227_vm0, %v10948_v63  ;;  %v11082_v40 = vld [vmem:[#allocation11_spill] sm:$0xff] }
 0x540   :  { %v6709_v30 = vpop.f32.mrf.mxu0  ;;  %v11083_v8 = vld [vmem:[#allocation49_spill] sm:$0xff] }
 0x541   :  { %v4146_v57 = vpack.c.bf16 %v4038_v21, %v4037_v6  ;;  %v9865_v34 = vpop.f32.mrf.mxu1  ;;  %v3914_v3 = vadd.f32 %v9640_v17, %v3507_v56 }
 0x542   :  { %v3509_v13 = vpop.f32.mrf.mxu0 }
 0x543   :  { %v3510_v20 = vadd.f32 %v3509_v13, %v9326_v2  ;;  %6972 = vmatmul.mubr.bf16.gmra.mxu1 %v4146_v57  ;;  %v6593_v19 = vpop.f32.mrf.mxu1  ;;  %v4039_v6 = vmax.f32 %v3914_v3, 0.0 }
 0x544   :  { %v6710_v44 = vpop.f32.mrf.mxu0  ;;  %6975 = vmatprep.mubr.msk.bf16.mxu1 %vm7227_vm0, %v10948_v63 }
 0x545   :  { %v3915_v26 = vadd.f32 %v9640_v17, %v3510_v20  ;;  %v9872_v47 = vpop.f32.mrf.mxu1 }
 0x546   :  { %11081 = vst [vmem:[#allocation41_spill] sm:$0xff] %v9872_v47  ;;  %v3514_v22 = vpop.f32.mrf.mxu0  ;;  %6808 = vmatmul.mubr.bf16.gmra.mxu0 %v11082_v40 }
 0x547   :  { %v4040_v21 = vmax.f32 %v3915_v26, 0.0  ;;  %v3515_v30 = vadd.f32 %v3514_v22, %v11083_v8  ;;  %v6594_v56 = vpop.f32.mrf.mxu1  ;;  %6811 = vmatprep.mubr.msk.bf16.mxu0 %vm7227_vm0, %v10948_v63  ;;  %v11085_v8 = vld [vmem:[#allocation12_spill] sm:$0xff] }
 0x548   :  { %v6713_v2 = vpop.f32.mrf.mxu0  ;;  %v11086_v56 = vld [vmem:[#allocation50_spill] sm:$0xff] }
 0x549   :  { %v4147_v19 = vpack.c.bf16 %v4040_v21, %v4039_v6  ;;  %v9878_v57 = vpop.f32.mrf.mxu1  ;;  %v3916_v20 = vadd.f32 %v9640_v17, %v3515_v30 }
 0x54a   :  { %v3517_v13 = vpop.f32.mrf.mxu0 }
 0x54b   :  { %v3518_v44 = vadd.f32 %v3517_v13, %v9341_v51  ;;  %6976 = vmatmul.mubr.bf16.gmra.mxu1 %v4147_v19  ;;  %v6597_v47 = vpop.f32.mrf.mxu1  ;;  %v4041_v6 = vmax.f32 %v3916_v20, 0.0 }
 0x54c   :  { %v6714_v40 = vpop.f32.mrf.mxu0  ;;  %6979 = vmatprep.mubr.msk.bf16.mxu1 %vm7227_vm0, %v10948_v63 }
 0x54d   :  { %v3917_v3 = vadd.f32 %v9640_v17, %v3518_v44  ;;  %v9885_v26 = vpop.f32.mrf.mxu1 }
 0x54e   :  { %11084 = vst [vmem:[#allocation2_spill] sm:$0xff] %v9885_v26  ;;  %v3522_v22 = vpop.f32.mrf.mxu0  ;;  %6812 = vmatmul.mubr.bf16.gmra.mxu0 %v11085_v8 }
 0x54f   :  { %v4042_v21 = vmax.f32 %v3917_v3, 0.0  ;;  %v3523_v2 = vadd.f32 %v3522_v22, %v11086_v56  ;;  %v6598_v30 = vpop.f32.mrf.mxu1  ;;  %6815 = vmatprep.mubr.msk.bf16.mxu0 %vm7227_vm0, %v10948_v63  ;;  %v11088_v56 = vld [vmem:[#allocation13_spill] sm:$0xff] }
 0x550   :  { %v6717_v51 = vpop.f32.mrf.mxu0  ;;  %v11089_v30 = vld [vmem:[#allocation51_spill] sm:$0xff] }
 0x551   :  { %v4148_v47 = vpack.c.bf16 %v4042_v21, %v4041_v6  ;;  %v9891_v19 = vpop.f32.mrf.mxu1  ;;  %v3918_v44 = vadd.f32 %v9640_v17, %v3523_v2 }
 0x552   :  { %v3525_v13 = vpop.f32.mrf.mxu0 }
 0x553   :  { %v3526_v40 = vadd.f32 %v3525_v13, %v9356_v35  ;;  %6980 = vmatmul.mubr.bf16.gmra.mxu1 %v4148_v47  ;;  %v6601_v26 = vpop.f32.mrf.mxu1  ;;  %v4043_v6 = vmax.f32 %v3918_v44, 0.0 }
 0x554   :  { %v6718_v8 = vpop.f32.mrf.mxu0  ;;  %6983 = vmatprep.mubr.msk.bf16.mxu1 %vm7227_vm0, %v10948_v63 }
 0x555   :  { %v3919_v20 = vadd.f32 %v9640_v17, %v3526_v40  ;;  %v9898_v3 = vpop.f32.mrf.mxu1 }
 0x556   :  { %11087 = vst [vmem:[#allocation42_spill] sm:$0xff] %v9898_v3  ;;  %v3530_v22 = vpop.f32.mrf.mxu0  ;;  %6816 = vmatmul.mubr.bf16.gmra.mxu0 %v11088_v56 }
 0x557   :  { %v4044_v21 = vmax.f32 %v3919_v20, 0.0  ;;  %v3531_v51 = vadd.f32 %v3530_v22, %v11089_v30  ;;  %v6602_v2 = vpop.f32.mrf.mxu1  ;;  %6819 = vmatprep.mubr.msk.bf16.mxu0 %vm7227_vm0, %v10948_v63  ;;  %v11091_v30 = vld [vmem:[#allocation14_spill] sm:$0xff] }
 0x558   :  { %v6721_v35 = vpop.f32.mrf.mxu0  ;;  %v11092_v2 = vld [vmem:[#allocation52_spill] sm:$0xff] }
 0x559   :  { %v4149_v26 = vpack.c.bf16 %v4044_v21, %v4043_v6  ;;  %v9904_v47 = vpop.f32.mrf.mxu1  ;;  %v3920_v40 = vadd.f32 %v9640_v17, %v3531_v51 }
 0x55a   :  { %v3533_v13 = vpop.f32.mrf.mxu0 }
 0x55b   :  { %v3534_v8 = vadd.f32 %v3533_v13, %v9371_v29  ;;  %6984 = vmatmul.mubr.bf16.gmra.mxu1 %v4149_v26  ;;  %v6605_v3 = vpop.f32.mrf.mxu1  ;;  %v4045_v6 = vmax.f32 %v3920_v40, 0.0 }
 0x55c   :  { %v6722_v56 = vpop.f32.mrf.mxu0  ;;  %6987 = vmatprep.mubr.msk.bf16.mxu1 %vm7227_vm0, %v10948_v63 }
 0x55d   :  { %v3921_v44 = vadd.f32 %v9640_v17, %v3534_v8  ;;  %v9911_v20 = vpop.f32.mrf.mxu1 }
 0x55e   :  { %11090 = vst [vmem:[#allocation3_spill] sm:$0xff] %v9911_v20  ;;  %v3538_v22 = vpop.f32.mrf.mxu0  ;;  %6820 = vmatmul.mubr.bf16.gmra.mxu0 %v11091_v30 }
 0x55f   :  { %v4046_v21 = vmax.f32 %v3921_v44, 0.0  ;;  %v3539_v35 = vadd.f32 %v3538_v22, %v11092_v2  ;;  %v6606_v51 = vpop.f32.mrf.mxu1  ;;  %6823 = vmatprep.mubr.msk.bf16.mxu0 %vm7227_vm0, %v10948_v63  ;;  %v11094_v2 = vld [vmem:[#allocation15_spill] sm:$0xff] }
 0x560   :  { %v6725_v29 = vpop.f32.mrf.mxu0  ;;  %v11095_v51 = vld [vmem:[#allocation53_spill] sm:$0xff] }
 0x561   :  { %v4150_v3 = vpack.c.bf16 %v4046_v21, %v4045_v6  ;;  %v9917_v26 = vpop.f32.mrf.mxu1  ;;  %v3922_v8 = vadd.f32 %v9640_v17, %v3539_v35 }
 0x562   :  { %v3541_v13 = vpop.f32.mrf.mxu0 }
 0x563   :  { %v3542_v56 = vadd.f32 %v3541_v13, %v9386_v4  ;;  %6988 = vmatmul.mubr.bf16.gmra.mxu1 %v4150_v3  ;;  %v6609_v20 = vpop.f32.mrf.mxu1  ;;  %v4047_v6 = vmax.f32 %v3922_v8, 0.0 }
 0x564   :  { %v6726_v30 = vpop.f32.mrf.mxu0  ;;  %6991 = vmatprep.mubr.msk.bf16.mxu1 %vm7227_vm0, %v10948_v63 }
 0x565   :  { %v3923_v40 = vadd.f32 %v9640_v17, %v3542_v56  ;;  %v9924_v44 = vpop.f32.mrf.mxu1 }
 0x566   :  { %11093 = vst [vmem:[#allocation43_spill] sm:$0xff] %v9924_v44  ;;  %v3546_v22 = vpop.f32.mrf.mxu0  ;;  %6824 = vmatmul.mubr.bf16.gmra.mxu0 %v11094_v2 }
 0x567   :  { %v4048_v21 = vmax.f32 %v3923_v40, 0.0  ;;  %v3547_v29 = vadd.f32 %v3546_v22, %v11095_v51  ;;  %v6610_v35 = vpop.f32.mrf.mxu1  ;;  %6827 = vmatprep.mubr.msk.bf16.mxu0 %vm7227_vm0, %v10948_v63  ;;  %v11097_v51 = vld [vmem:[#allocation16_spill] sm:$0xff] }
 0x568   :  { %v6729_v4 = vpop.f32.mrf.mxu0  ;;  %v11098_v35 = vld [vmem:[#allocation54_spill] sm:$0xff] }
 0x569   :  { %v4151_v20 = vpack.c.bf16 %v4048_v21, %v4047_v6  ;;  %v9930_v3 = vpop.f32.mrf.mxu1  ;;  %v3924_v56 = vadd.f32 %v9640_v17, %v3547_v29 }
 0x56a   :  { %v3549_v13 = vpop.f32.mrf.mxu0 }
 0x56b   :  { %v3550_v30 = vadd.f32 %v3549_v13, %v9401_v24  ;;  %6992 = vmatmul.mubr.bf16.gmra.mxu1 %v4151_v20  ;;  %v6613_v44 = vpop.f32.mrf.mxu1  ;;  %v4049_v6 = vmax.f32 %v3924_v56, 0.0 }
 0x56c   :  { %v6730_v2 = vpop.f32.mrf.mxu0  ;;  %6995 = vmatprep.mubr.msk.bf16.mxu1 %vm7227_vm0, %v10948_v63 }
 0x56d   :  { %v3925_v8 = vadd.f32 %v9640_v17, %v3550_v30  ;;  %v9937_v40 = vpop.f32.mrf.mxu1 }
 0x56e   :  { %11096 = vst [vmem:[#allocation44_spill] sm:$0xff] %v9937_v40  ;;  %v3554_v22 = vpop.f32.mrf.mxu0  ;;  %6828 = vmatmul.mubr.bf16.gmra.mxu0 %v11097_v51 }
 0x56f   :  { %v4050_v21 = vmax.f32 %v3925_v8, 0.0  ;;  %v3555_v4 = vadd.f32 %v3554_v22, %v11098_v35  ;;  %v6614_v29 = vpop.f32.mrf.mxu1  ;;  %6831 = vmatprep.mubr.msk.bf16.mxu0 %vm7227_vm0, %v10948_v63  ;;  %v11100_v35 = vld [vmem:[#allocation17_spill] sm:$0xff] }
 0x570   :  { %v6733_v24 = vpop.f32.mrf.mxu0 }
 0x571   :  { %v4152_v44 = vpack.c.bf16 %v4050_v21, %v4049_v6  ;;  %v9943_v20 = vpop.f32.mrf.mxu1  ;;  %v3926_v30 = vadd.f32 %v9640_v17, %v3555_v4 }
 0x572   :  { %v3557_v13 = vpop.f32.mrf.mxu0 }
 0x573   :  { %v3558_v2 = vadd.f32 %v3557_v13, %v9416_v16  ;;  %6996 = vmatmul.mubr.bf16.gmra.mxu1 %v4152_v44  ;;  %v6617_v40 = vpop.f32.mrf.mxu1  ;;  %v4051_v6 = vmax.f32 %v3926_v30, 0.0 }
 0x574   :  { %v6734_v51 = vpop.f32.mrf.mxu0  ;;  %6999 = vmatprep.mubr.msk.bf16.mxu1 %vm7227_vm0, %v10948_v63 }
 0x575   :  { %v3927_v56 = vadd.f32 %v9640_v17, %v3558_v2  ;;  %v9950_v8 = vpop.f32.mrf.mxu1  ;;  %v11102_v2 = vld [vmem:[#allocation18_spill] sm:$0xff] }
 0x576   :  { %11099 = vst [vmem:[#allocation4_spill] sm:$0xff] %v9950_v8  ;;  %v3562_v22 = vpop.f32.mrf.mxu0  ;;  %6832 = vmatmul.mubr.bf16.gmra.mxu0 %v9419_v53 }
 0x577   :  { %v4052_v21 = vmax.f32 %v3927_v56, 0.0  ;;  %v3563_v29 = vadd.f32 %v3562_v22, %v11100_v35  ;;  %v6618_v4 = vpop.f32.mrf.mxu1  ;;  %6835 = vmatprep.mubr.msk.bf16.mxu0 %vm7227_vm0, %v10948_v63  ;;  %v11103_v35 = vld [vmem:[#allocation55_spill] sm:$0xff] }
 0x578   :  { %v6737_v16 = vpop.f32.mrf.mxu0  ;;  %v11104_v4 = vld [vmem:[#allocation56_spill] sm:$0xff] }
 0x579   :  { %v4153_v40 = vpack.c.bf16 %v4052_v21, %v4051_v6  ;;  %v9956_v24 = vpop.f32.mrf.mxu1  ;;  %v3928_v13 = vadd.f32 %v9640_v17, %v3563_v29 }
 0x57a   :  { %11101 = vst [vmem:[#allocation45_spill] sm:$0xff] %v9956_v24  ;;  %v3565_v44 = vpop.f32.mrf.mxu0 }
 0x57b   :  { %v3566_v51 = vadd.f32 %v3565_v44, %v11102_v2  ;;  %7000 = vmatmul.mubr.bf16.gmra.mxu1 %v4153_v40  ;;  %v6621_v8 = vpop.f32.mrf.mxu1  ;;  %v4053_v6 = vmax.f32 %v3928_v13, 0.0 }
 0x57c   :  { %v6738_v53 = vpop.f32.mrf.mxu0  ;;  %7003 = vmatprep.mubr.msk.bf16.mxu1 %vm7227_vm0, %v10948_v63 }
 0x57d   :  { %v3929_v30 = vadd.f32 %v9640_v17, %v3566_v51  ;;  %v3285_v56 = vpop.f32.mrf.mxu1 }
 0x57e   :  { %v3570_v22 = vpop.f32.mrf.mxu0  ;;  %6836 = vmatmul.mubr.bf16.gmra.mxu0 %v11103_v35 }
 0x57f   :  { %v4054_v21 = vmax.f32 %v3929_v30, 0.0  ;;  %v3571_v16 = vadd.f32 %v3570_v22, %v11104_v4  ;;  %v6622_v24 = vpop.f32.mrf.mxu1  ;;  %6839 = vmatprep.mubr.msk.bf16.mxu0 %vm7227_vm0, %v10948_v63  ;;  %v11105_v30 = vld [vmem:[#allocation19_spill] sm:$0xff]  ;;  %v11106_v22 = vld [vmem:[#allocation57_spill] sm:$0xff] }
 0x580   :  { %v6741_v29 = vpop.f32.mrf.mxu0 }
 0x581   :  { %v4154_v8 = vpack.c.bf16 %v4054_v21, %v4053_v6  ;;  %v3930_v44 = vadd.f32 %v9640_v17, %v3571_v16 }
 0x582   :  { %v3573_v40 = vpop.f32.mrf.mxu0 }
 0x583   :  { %v3574_v2 = vadd.f32 %v3573_v40, %v9451_v41  ;;  %7004 = vmatmul.mubr.bf16.gmra.mxu1 %v4154_v8  ;;  %v4055_v24 = vmax.f32 %v3930_v44, 0.0  ;;  %v9979_v41 = vld [vmem:[%s10882_s2 + $0x4] ss:$0 sm:$0xff] }
 0x584   :  { %v6742_v51 = vpop.f32.mrf.mxu0  ;;  %7007 = vmatprep.mubr.msk.bf16.mxu1 %vm7227_vm0, %v10948_v63 }
 0x585   :  { %v3931_v13 = vadd.f32 %v9640_v17, %v3574_v2 }
 0x586   :  { %v3578_v53 = vpop.f32.mrf.mxu0  ;;  %6840 = vmatmul.mubr.bf16.gmra.mxu0 %v11105_v30 }
 0x587   :  { %v4056_v56 = vmax.f32 %v3931_v13, 0.0  ;;  %v3579_v35 = vadd.f32 %v3578_v53, %v11106_v22  ;;  %6843 = vmatprep.mubr.msk.bf16.mxu0 %vm7227_vm0, %v10948_v63  ;;  %v11107_v53 = vld [vmem:[#allocation20_spill] sm:$0xff] }
 0x588   :  { %v6745_v6 = vpop.f32.mrf.mxu0 }
 0x589   :  { %v4155_v21 = vpack.c.bf16 %v4056_v56, %v4055_v24  ;;  %v3932_v16 = vadd.f32 %v9640_v17, %v3579_v35  ;;  %v11108_v24 = vld [vmem:[#allocation58_spill] sm:$0xff] }
 0x58a   :  { %v3581_v4 = vpop.f32.mrf.mxu0 }
 0x58b   :  { %v3582_v29 = vadd.f32 %v3581_v4, %v9466_v48  ;;  %v4308_v8 = vpop.f32.mrf.mxu1  ;;  %7008 = vmatmul.mubr.bf16.gmra.mxu1 %v4155_v21  ;;  %v4057_v48 = vmax.f32 %v3932_v16, 0.0  ;;  %v10003_v16 = vld [vmem:[%s10882_s2 + $0x3] ss:$0 sm:$0xff] }
 0x58c   :  { %v4309_v40 = vadd.f32 %v9979_v41, %v4308_v8  ;;  %v6746_v44 = vpop.f32.mrf.mxu0  ;;  %7011 = vmatprep.mubr.msk.bf16.mxu1 %vm7227_vm0, %v10948_v63 }
 0x58d   :  { %v3933_v2 = vadd.f32 %v9640_v17, %v3582_v29  ;;  %v6913_v51 = vpop.f32.mrf.mxu1 }
 0x58e   :  { %4805 = vst.msk [vmem:[%s10883_s3 + $0x10] sm:$0xff] %vm4802_vm2, %v4309_v40  ;;  %v3586_v13 = vpop.f32.mrf.mxu0  ;;  %6844 = vmatmul.mubr.bf16.gmra.mxu0 %v11107_v53 }
 0x58f   :  { %v4058_v30 = vmax.f32 %v3933_v2, 0.0  ;;  %v3587_v56 = vadd.f32 %v3586_v13, %v11108_v24  ;;  %v4311_v22 = vpop.f32.mrf.mxu1  ;;  %6847 = vmatprep.mubr.msk.bf16.mxu0 %vm7227_vm0, %v10948_v63  ;;  %v11110_v24 = vld [vmem:[#allocation59_spill] sm:$0xff] }
 0x590   :  { %v4312_v35 = vadd.f32 %v9979_v41, %v4311_v22  ;;  %v6749_v17 = vpop.f32.mrf.mxu0 }
 0x591   :  { %v4156_v6 = vpack.c.bf16 %v4058_v30, %v4057_v48  ;;  %v6914_v21 = vpop.f32.mrf.mxu1  ;;  %v3934_v29 = vadd.f32 %v10003_v16, %v3587_v56  ;;  %v11109_v48 = vld [vmem:[#allocation21_spill] sm:$0xff] }
 0x592   :  { %4806 = vst.msk [vmem:[%s10883_s3 + $0x18] sm:$0xff] %vm4802_vm2, %v4312_v35  ;;  %v3589_v4 = vpop.f32.mrf.mxu0 }
 0x593   :  { %v3590_v8 = vadd.f32 %v3589_v4, %v9481_v12  ;;  %v4316_v40 = vpop.f32.mrf.mxu1  ;;  %7012 = vmatmul.mubr.bf16.gmra.mxu1 %v4156_v6  ;;  %v4059_v12 = vmax.f32 %v3934_v29, 0.0 }
 0x594   :  { %v4317_v44 = vadd.f32 %v9979_v41, %v4316_v40  ;;  %v6750_v2 = vpop.f32.mrf.mxu0  ;;  %7015 = vmatprep.mubr.msk.bf16.mxu1 %vm7227_vm0, %v10948_v63 }
 0x595   :  { %v3935_v51 = vadd.f32 %v10003_v16, %v3590_v8  ;;  %v6917_v13 = vpop.f32.mrf.mxu1 }
 0x596   :  { %4807 = vst.msk [vmem:[%s10883_s3 + $0x20] sm:$0xff] %vm4802_vm2, %v4317_v44  ;;  %v3594_v53 = vpop.f32.mrf.mxu0  ;;  %6848 = vmatmul.mubr.bf16.gmra.mxu0 %v11109_v48  ;;  %v11111_v48 = vld [vmem:[#allocation22_spill] sm:$0xff] }
 0x597   :  { %v4060_v30 = vmax.f32 %v3935_v51, 0.0  ;;  %v3595_v56 = vadd.f32 %v3594_v53, %v11110_v24  ;;  %v4319_v22 = vpop.f32.mrf.mxu1  ;;  %6851 = vmatprep.mubr.msk.bf16.mxu0 %vm7227_vm0, %v10948_v63 }
 0x598   :  { %v4320_v35 = vadd.f32 %v9979_v41, %v4319_v22  ;;  %v6753_v17 = vpop.f32.mrf.mxu0 }
 0x599   :  { %v4157_v6 = vpack.c.bf16 %v4060_v30, %v4059_v12  ;;  %v6918_v21 = vpop.f32.mrf.mxu1  ;;  %v3936_v29 = vadd.f32 %v10003_v16, %v3595_v56  ;;  %v11112_v30 = vld [vmem:[#allocation60_spill] sm:$0xff] }
 0x59a   :  { %4808 = vst.msk [vmem:[%s10883_s3 + $0x28] sm:$0xff] %vm4802_vm2, %v4320_v35  ;;  %v3597_v4 = vpop.f32.mrf.mxu0 }
 0x59b   :  { %v3598_v8 = vadd.f32 %v3597_v4, %v9496_v15  ;;  %v4324_v40 = vpop.f32.mrf.mxu1  ;;  %7016 = vmatmul.mubr.bf16.gmra.mxu1 %v4157_v6  ;;  %v4061_v15 = vmax.f32 %v3936_v29, 0.0 }
 0x59c   :  { %v4325_v44 = vadd.f32 %v9979_v41, %v4324_v40  ;;  %v6754_v2 = vpop.f32.mrf.mxu0  ;;  %7019 = vmatprep.mubr.msk.bf16.mxu1 %vm7227_vm0, %v10948_v63 }
 0x59d   :  { %v3937_v51 = vadd.f32 %v10003_v16, %v3598_v8  ;;  %v6921_v13 = vpop.f32.mrf.mxu1 }
 0x59e   :  { %4809 = vst.msk [vmem:[%s10883_s3 + $0x30] sm:$0xff] %vm4802_vm2, %v4325_v44  ;;  %v3602_v53 = vpop.f32.mrf.mxu0  ;;  %6852 = vmatmul.mubr.bf16.gmra.mxu0 %v11111_v48 }
 0x59f   :  { %v4062_v12 = vmax.f32 %v3937_v51, 0.0  ;;  %v3603_v24 = vadd.f32 %v3602_v53, %v11112_v30  ;;  %v4327_v56 = vpop.f32.mrf.mxu1  ;;  %6855 = vmatprep.mubr.msk.bf16.mxu0 %vm7227_vm0, %v10948_v63  ;;  %v11113_v53 = vld [vmem:[#allocation23_spill] sm:$0xff] }
 0x5a0   :  { %v4328_v22 = vadd.f32 %v9979_v41, %v4327_v56  ;;  %v6757_v35 = vpop.f32.mrf.mxu0 }
 0x5a1   :  { %v4158_v17 = vpack.c.bf16 %v4062_v12, %v4061_v15  ;;  %v6922_v6 = vpop.f32.mrf.mxu1  ;;  %v3938_v4 = vadd.f32 %v10003_v16, %v3603_v24  ;;  %v11114_v15 = vld [vmem:[#allocation61_spill] sm:$0xff] }
 0x5a2   :  { %4810 = vst.msk [vmem:[%s10883_s3 + $0x38] sm:$0xff] %vm4802_vm2, %v4328_v22  ;;  %v3605_v21 = vpop.f32.mrf.mxu0 }
 0x5a3   :  { %v3606_v29 = vadd.f32 %v3605_v21, %v9511_v31  ;;  %v4332_v8 = vpop.f32.mrf.mxu1  ;;  %7020 = vmatmul.mubr.bf16.gmra.mxu1 %v4158_v17  ;;  %v4063_v31 = vmax.f32 %v3938_v4, 0.0 }
 0x5a4   :  { %v4333_v40 = vadd.f32 %v9979_v41, %v4332_v8  ;;  %v6758_v44 = vpop.f32.mrf.mxu0  ;;  %7023 = vmatprep.mubr.msk.bf16.mxu1 %vm7227_vm0, %v10948_v63 }
 0x5a5   :  { %v3939_v2 = vadd.f32 %v10003_v16, %v3606_v29  ;;  %v6925_v51 = vpop.f32.mrf.mxu1 }
 0x5a6   :  { %4811 = vst.msk [vmem:[%s10883_s3 + $0x40] sm:$0xff] %vm4802_vm2, %v4333_v40  ;;  %v3610_v13 = vpop.f32.mrf.mxu0  ;;  %6856 = vmatmul.mubr.bf16.gmra.mxu0 %v11113_v53  ;;  %v11115_v51 = vld [vmem:[#allocation24_spill] sm:$0xff]  ;;  %v11116_v53 = vld [vmem:[#allocation62_spill] sm:$0xff] }
 0x5a7   :  { %v4064_v48 = vmax.f32 %v3939_v2, 0.0  ;;  %v3611_v12 = vadd.f32 %v3610_v13, %v11114_v15  ;;  %v4335_v30 = vpop.f32.mrf.mxu1  ;;  %6859 = vmatprep.mubr.msk.bf16.mxu0 %vm7227_vm0, %v10948_v63 }
 0x5a8   :  { %v4336_v24 = vadd.f32 %v9979_v41, %v4335_v30  ;;  %v6761_v56 = vpop.f32.mrf.mxu0 }
 0x5a9   :  { %v4159_v22 = vpack.c.bf16 %v4064_v48, %v4063_v31  ;;  %v6926_v35 = vpop.f32.mrf.mxu1  ;;  %v3940_v6 = vadd.f32 %v10003_v16, %v3611_v12 }
 0x5aa   :  { %4812 = vst.msk [vmem:[%s10883_s3 + $0x48] sm:$0xff] %vm4802_vm2, %v4336_v24  ;;  %v3613_v17 = vpop.f32.mrf.mxu0 }
 0x5ab   :  { %v3614_v21 = vadd.f32 %v3613_v17, %v9526_v37  ;;  %v4340_v4 = vpop.f32.mrf.mxu1  ;;  %7024 = vmatmul.mubr.bf16.gmra.mxu1 %v4159_v22  ;;  %v4065_v37 = vmax.f32 %v3940_v6, 0.0 }
 0x5ac   :  { %v4341_v29 = vadd.f32 %v9979_v41, %v4340_v4  ;;  %v6762_v8 = vpop.f32.mrf.mxu0  ;;  %7027 = vmatprep.mubr.msk.bf16.mxu1 %vm7227_vm0, %v10948_v63 }
 0x5ad   :  { %v3941_v40 = vadd.f32 %v10003_v16, %v3614_v21  ;;  %v6929_v44 = vpop.f32.mrf.mxu1 }
 0x5ae   :  { %4813 = vst.msk [vmem:[%s10883_s3 + $0x50] sm:$0xff] %vm4802_vm2, %v4341_v29  ;;  %v3618_v2 = vpop.f32.mrf.mxu0  ;;  %6860 = vmatmul.mubr.bf16.gmra.mxu0 %v11115_v51 }
 0x5af   :  { %v4066_v13 = vmax.f32 %v3941_v40, 0.0  ;;  %v3619_v31 = vadd.f32 %v3618_v2, %v11116_v53  ;;  %v4343_v48 = vpop.f32.mrf.mxu1  ;;  %6863 = vmatprep.mubr.msk.bf16.mxu0 %vm7227_vm0, %v10948_v63  ;;  %v11117_v40 = vld [vmem:[#allocation25_spill] sm:$0xff]  ;;  %v11118_v2 = vld [vmem:[#allocation63_spill] sm:$0xff] }
 0x5b0   :  { %v4344_v15 = vadd.f32 %v9979_v41, %v4343_v48  ;;  %v6765_v12 = vpop.f32.mrf.mxu0 }
 0x5b1   :  { %v4160_v30 = vpack.c.bf16 %v4066_v13, %v4065_v37  ;;  %v6930_v24 = vpop.f32.mrf.mxu1  ;;  %v3942_v22 = vadd.f32 %v10003_v16, %v3619_v31 }
 0x5b2   :  { %4814 = vst.msk [vmem:[%s10883_s3 + $0x58] sm:$0xff] %vm4802_vm2, %v4344_v15  ;;  %v3621_v56 = vpop.f32.mrf.mxu0 }
 0x5b3   :  { %v3622_v35 = vadd.f32 %v3621_v56, %v9541_v49  ;;  %v4348_v17 = vpop.f32.mrf.mxu1  ;;  %7028 = vmatmul.mubr.bf16.gmra.mxu1 %v4160_v30  ;;  %v4067_v49 = vmax.f32 %v3942_v22, 0.0 }
 0x5b4   :  { %v4349_v6 = vadd.f32 %v9979_v41, %v4348_v17  ;;  %v6766_v21 = vpop.f32.mrf.mxu0  ;;  %7031 = vmatprep.mubr.msk.bf16.mxu1 %vm7227_vm0, %v10948_v63 }
 0x5b5   :  { %v3943_v4 = vadd.f32 %v10003_v16, %v3622_v35  ;;  %v6933_v29 = vpop.f32.mrf.mxu1  ;;  %v11119_v21 = vld [vmem:[#allocation26_spill] sm:$0xff] }
 0x5b6   :  { %4815 = vst.msk [vmem:[%s10883_s3 + $0x60] sm:$0xff] %vm4802_vm2, %v4349_v6  ;;  %v3626_v8 = vpop.f32.mrf.mxu0  ;;  %6864 = vmatmul.mubr.bf16.gmra.mxu0 %v11117_v40  ;;  %v11120_v29 = vld [vmem:[#allocation64_spill] sm:$0xff] }
 0x5b7   :  { %v4068_v44 = vmax.f32 %v3943_v4, 0.0  ;;  %v3627_v51 = vadd.f32 %v3626_v8, %v11118_v2  ;;  %v4351_v37 = vpop.f32.mrf.mxu1  ;;  %6867 = vmatprep.mubr.msk.bf16.mxu0 %vm7227_vm0, %v10948_v63 }
 0x5b8   :  { %v4352_v13 = vadd.f32 %v9979_v41, %v4351_v37  ;;  %v6769_v53 = vpop.f32.mrf.mxu0 }
 0x5b9   :  { %v4161_v31 = vpack.c.bf16 %v4068_v44, %v4067_v49  ;;  %v6934_v48 = vpop.f32.mrf.mxu1  ;;  %v3944_v12 = vadd.f32 %v10003_v16, %v3627_v51 }
 0x5ba   :  { %4816 = vst.msk [vmem:[%s10883_s3 + $0x68] sm:$0xff] %vm4802_vm2, %v4352_v13  ;;  %v3629_v15 = vpop.f32.mrf.mxu0 }
 0x5bb   :  { %v3630_v30 = vadd.f32 %v3629_v15, %v9556_v52  ;;  %v4356_v24 = vpop.f32.mrf.mxu1  ;;  %7032 = vmatmul.mubr.bf16.gmra.mxu1 %v4161_v31  ;;  %v4069_v52 = vmax.f32 %v3944_v12, 0.0 }
 0x5bc   :  { %v4357_v56 = vadd.f32 %v9979_v41, %v4356_v24  ;;  %v6770_v22 = vpop.f32.mrf.mxu0  ;;  %7035 = vmatprep.mubr.msk.bf16.mxu1 %vm7227_vm0, %v10948_v63 }
 0x5bd   :  { %v3945_v35 = vadd.f32 %v10003_v16, %v3630_v30  ;;  %v6937_v17 = vpop.f32.mrf.mxu1 }
 0x5be   :  { %4817 = vst.msk [vmem:[%s10883_s3 + $0x70] sm:$0xff] %vm4802_vm2, %v4357_v56  ;;  %v3634_v6 = vpop.f32.mrf.mxu0  ;;  %6868 = vmatmul.mubr.bf16.gmra.mxu0 %v11119_v21  ;;  %v11121_v56 = vld [vmem:[#allocation27_spill] sm:$0xff] }
 0x5bf   :  { %v4070_v4 = vmax.f32 %v3945_v35, 0.0  ;;  %v3635_v8 = vadd.f32 %v3634_v6, %v11120_v29  ;;  %v4359_v40 = vpop.f32.mrf.mxu1  ;;  %6871 = vmatprep.mubr.msk.bf16.mxu0 %vm7227_vm0, %v10948_v63  ;;  %v11122_v35 = vld [vmem:[#allocation65_spill] sm:$0xff] }
 0x5c0   :  { %v4360_v49 = vadd.f32 %v9979_v41, %v4359_v40  ;;  %v6773_v44 = vpop.f32.mrf.mxu0 }
 0x5c1   :  { %v4162_v2 = vpack.c.bf16 %v4070_v4, %v4069_v52  ;;  %v6938_v51 = vpop.f32.mrf.mxu1  ;;  %v3946_v13 = vadd.f32 %v10003_v16, %v3635_v8 }
 0x5c2   :  { %4818 = vst.msk [vmem:[%s10883_s3 + $0x78] sm:$0xff] %vm4802_vm2, %v4360_v49  ;;  %v3637_v37 = vpop.f32.mrf.mxu0 }
 0x5c3   :  { %v3638_v53 = vadd.f32 %v3637_v37, %v9571_v55  ;;  %v4364_v31 = vpop.f32.mrf.mxu1  ;;  %7036 = vmatmul.mubr.bf16.gmra.mxu1 %v4162_v2  ;;  %v4071_v55 = vmax.f32 %v3946_v13, 0.0 }
 0x5c4   :  { %v4365_v48 = vadd.f32 %v9979_v41, %v4364_v31  ;;  %v6774_v15 = vpop.f32.mrf.mxu0  ;;  %7039 = vmatprep.mubr.msk.bf16.mxu1 %vm7227_vm0, %v10948_v63  ;;  %v11123_v31 = vld [vmem:[#allocation28_spill] sm:$0xff] }
 0x5c5   :  { %v3947_v12 = vadd.f32 %v10003_v16, %v3638_v53  ;;  %v6941_v30 = vpop.f32.mrf.mxu1  ;;  %v11124_v15 = vld [vmem:[#allocation66_spill] sm:$0xff] }
 0x5c6   :  { %4819 = vst.msk [vmem:[%s10883_s3 + $0x80] sm:$0xff] %vm4802_vm2, %v4365_v48  ;;  %v3642_v24 = vpop.f32.mrf.mxu0  ;;  %6872 = vmatmul.mubr.bf16.gmra.mxu0 %v11121_v56 }
 0x5c7   :  { %v4072_v22 = vmax.f32 %v3947_v12, 0.0  ;;  %v3643_v17 = vadd.f32 %v3642_v24, %v11122_v35  ;;  %v4367_v6 = vpop.f32.mrf.mxu1  ;;  %6875 = vmatprep.mubr.msk.bf16.mxu0 %vm7227_vm0, %v10948_v63 }
 0x5c8   :  { %v4368_v21 = vadd.f32 %v9979_v41, %v4367_v6  ;;  %v6777_v52 = vpop.f32.mrf.mxu0 }
 0x5c9   :  { %v4163_v4 = vpack.c.bf16 %v4072_v22, %v4071_v55  ;;  %v6942_v29 = vpop.f32.mrf.mxu1  ;;  %v3948_v40 = vadd.f32 %v10003_v16, %v3643_v17 }
 0x5ca   :  { %4820 = vst.msk [vmem:[%s10883_s3 + $0x88] sm:$0xff] %vm4802_vm2, %v4368_v21  ;;  %v3645_v8 = vpop.f32.mrf.mxu0 }
 0x5cb   :  { %v3646_v49 = vadd.f32 %v3645_v8, %v9586_v33  ;;  %v4372_v44 = vpop.f32.mrf.mxu1  ;;  %7040 = vmatmul.mubr.bf16.gmra.mxu1 %v4163_v4  ;;  %v4073_v33 = vmax.f32 %v3948_v40, 0.0 }
 0x5cc   :  { %v4373_v2 = vadd.f32 %v9979_v41, %v4372_v44  ;;  %v6778_v51 = vpop.f32.mrf.mxu0  ;;  %7043 = vmatprep.mubr.msk.bf16.mxu1 %vm7227_vm0, %v10948_v63  ;;  %v11125_v44 = vld [vmem:[#allocation29_spill] sm:$0xff] }
 0x5cd   :  { %v3949_v37 = vadd.f32 %v10003_v16, %v3646_v49  ;;  %v6945_v13 = vpop.f32.mrf.mxu1 }
 0x5ce   :  { %4821 = vst.msk [vmem:[%s10883_s3 + $0x90] sm:$0xff] %vm4802_vm2, %v4373_v2  ;;  %v3650_v53 = vpop.f32.mrf.mxu0  ;;  %6876 = vmatmul.mubr.bf16.gmra.mxu0 %v11123_v31 }
 0x5cf   :  { %v4074_v48 = vmax.f32 %v3949_v37, 0.0  ;;  %v3651_v12 = vadd.f32 %v3650_v53, %v11124_v15  ;;  %v4375_v30 = vpop.f32.mrf.mxu1  ;;  %6879 = vmatprep.mubr.msk.bf16.mxu0 %vm7227_vm0, %v10948_v63 }
 0x5d0   :  { %v4376_v24 = vadd.f32 %v9979_v41, %v4375_v30  ;;  %v6781_v56 = vpop.f32.mrf.mxu0 }
 0x5d1   :  { %v4164_v55 = vpack.c.bf16 %v4074_v48, %v4073_v33  ;;  %v6946_v22 = vpop.f32.mrf.mxu1  ;;  %v3950_v17 = vadd.f32 %v10003_v16, %v3651_v12  ;;  %v7223_v12 = vld [vmem:[%s10882_s2 + $0x2] ss:$0 sm:$0xff] }
 0x5d2   :  { %4822 = vst.msk [vmem:[%s10883_s3 + $0x98] sm:$0xff] %vm4802_vm2, %v4376_v24  ;;  %v3653_v35 = vpop.f32.mrf.mxu0  ;;  %v2533_v30 = vadd.f32 %v7223_v12, %v9618_v46  ;;  %v11127_v46 = vld [vmem:[#allocation67_spill] sm:$0xff] }
 0x5d3   :  { %v3654_v6 = vadd.f32 %v3653_v35, %v9601_v61  ;;  %v4380_v21 = vpop.f32.mrf.mxu1  ;;  %7044 = vmatmul.mubr.bf16.gmra.mxu1 %v4164_v55  ;;  %v4075_v61 = vmax.f32 %v3950_v17, 0.0  ;;  %v11126_v35 = vld [vmem:[#allocation30_spill] sm:$0xff] }
 0x5d4   :  { %v4381_v52 = vadd.f32 %v9979_v41, %v4380_v21  ;;  %v6782_v4 = vpop.f32.mrf.mxu0  ;;  %7047 = vmatprep.mubr.msk.bf16.mxu1 %vm7227_vm0, %v10948_v63 }
 0x5d5   :  { %v3951_v29 = vadd.f32 %v10003_v16, %v3654_v6  ;;  %v6949_v8 = vpop.f32.mrf.mxu1  ;;  %v2662_v4 = vmax.f32 %v2533_v30, 0.0  ;;  %v11129_v30 = vld [vmem:[#allocation68_spill] sm:$0xff] }
 0x5d6   :  { %4823 = vst.msk [vmem:[%s10883_s3 + $0xa0] sm:$0xff] %vm4802_vm2, %v4381_v52  ;;  %v3658_v40 = vpop.f32.mrf.mxu0  ;;  %6880 = vmatmul.mubr.bf16.gmra.mxu0 %v9604_v42 }
 0x5d7   :  { %v4076_v49 = vmax.f32 %v3951_v29, 0.0  ;;  %v3659_v2 = vadd.f32 %v3658_v40, %v11125_v44  ;;  %v4383_v51 = vpop.f32.mrf.mxu1  ;;  %6883 = vmatprep.mubr.msk.bf16.mxu0 %vm7227_vm0, %v10948_v63 }
 0x5d8   :  { %v4384_v37 = vadd.f32 %v9979_v41, %v4383_v51  ;;  %v6785_v13 = vpop.f32.mrf.mxu0 }
 0x5d9   :  { %v4165_v53 = vpack.c.bf16 %v4076_v49, %v4075_v61  ;;  %v6950_v31 = vpop.f32.mrf.mxu1  ;;  %v3952_v42 = vadd.f32 %v10003_v16, %v3659_v2  ;;  %v11128_v2 = vld [vmem:[#allocation31_spill] sm:$0xff]  ;;  %v2725_v13 = vpack.c.bf16 %v2662_v4, %v2662_v4 }
 0x5da   :  { %4824 = vst.msk [vmem:[%s10883_s3 + $0xa8] sm:$0xff] %vm4802_vm2, %v4384_v37  ;;  %v3661_v33 = vpop.f32.mrf.mxu0 }
 0x5db   :  { %v3662_v48 = vadd.f32 %v3661_v33, %v9616_v1  ;;  %v4388_v15 = vpop.f32.mrf.mxu1  ;;  %7048 = vmatmul.mubr.bf16.gmra.mxu1 %v4165_v53  ;;  %v4077_v17 = vmax.f32 %v3952_v42, 0.0 }
 0x5dc   :  { %v4389_v24 = vadd.f32 %v9979_v41, %v4388_v15  ;;  %v6786_v56 = vpop.f32.mrf.mxu0  ;;  %7051 = vmatprep.mubr.msk.bf16.mxu1 %vm7227_vm0, %v10948_v63 }
 0x5dd   :  { %v3953_v55 = vadd.f32 %v10003_v16, %v3662_v48  ;;  %v6953_v22 = vpop.f32.mrf.mxu1 }
 0x5de   :  { %4825 = vst.msk [vmem:[%s10883_s3 + $0xb0] sm:$0xff] %vm4802_vm2, %v4389_v24  ;;  %v3666_v1 = vpop.f32.mrf.mxu0  ;;  %6884 = vmatmul.mubr.bf16.gmra.mxu0 %v11126_v35 }
 0x5df   :  { %v4078_v6 = vmax.f32 %v3953_v55, 0.0  ;;  %v3667_v21 = vadd.f32 %v3666_v1, %v11127_v46  ;;  %v4391_v52 = vpop.f32.mrf.mxu1  ;;  %6887 = vmatprep.mubr.msk.bf16.mxu0 %vm7227_vm0, %v10948_v63 }
 0x5e0   :  { %v4392_v29 = vadd.f32 %v9979_v41, %v4391_v52  ;;  %v6789_v8 = vpop.f32.mrf.mxu0 }
 0x5e1   :  { %v4166_v40 = vpack.c.bf16 %v4078_v6, %v4077_v17  ;;  %v6954_v61 = vpop.f32.mrf.mxu1  ;;  %v3954_v44 = vadd.f32 %v10003_v16, %v3667_v21 }
 0x5e2   :  { %4826 = vst.msk [vmem:[%s10883_s3 + $0xb8] sm:$0xff] %vm4802_vm2, %v4392_v29  ;;  %v3669_v49 = vpop.f32.mrf.mxu0  ;;  %v11130_v61 = vld [vmem:[#allocation32_spill] sm:$0xff] }
 0x5e3   :  { %v3670_v51 = vadd.f32 %v3669_v49, %v11128_v2  ;;  %v4396_v37 = vpop.f32.mrf.mxu1  ;;  %7052 = vmatmul.mubr.bf16.gmra.mxu1 %v4166_v40  ;;  %v4079_v15 = vmax.f32 %v3954_v44, 0.0  ;;  %v11131_v44 = vld [vmem:[#allocation69_spill] sm:$0xff] }
 0x5e4   :  { %v4397_v53 = vadd.f32 %v9979_v41, %v4396_v37  ;;  %v6790_v31 = vpop.f32.mrf.mxu0  ;;  %7055 = vmatprep.mubr.msk.bf16.mxu1 %vm7227_vm0, %v10948_v63 }
 0x5e5   :  { %v3955_v33 = vadd.f32 %v10003_v16, %v3670_v51  ;;  %v6957_v42 = vpop.f32.mrf.mxu1 }
 0x5e6   :  { %4827 = vst.msk [vmem:[%s10883_s3 + $0xc0] sm:$0xff] %vm4802_vm2, %v4397_v53  ;;  %v3674_v48 = vpop.f32.mrf.mxu0  ;;  %6888 = vmatmul.mubr.bf16.gmra.mxu0 %v2725_v13 }
 0x5e7   :  { %v4080_v12 = vmax.f32 %v3955_v33, 0.0  ;;  %v3675_v24 = vadd.f32 %v3674_v48, %v11129_v30  ;;  %v4399_v56 = vpop.f32.mrf.mxu1  ;;  %6907 = vmatprep.mubr.msk.bf16.mxu0 %vm7227_vm0, %v10948_v63 }
 0x5e8   :  { %v4400_v55 = vadd.f32 %v9979_v41, %v4399_v56  ;;  %v6793_v22 = vpop.f32.mrf.mxu0 }
 0x5e9   :  { %v4167_v1 = vpack.c.bf16 %v4080_v12, %v4079_v15  ;;  %v6958_v35 = vpop.f32.mrf.mxu1  ;;  %v3956_v6 = vadd.f32 %v10003_v16, %v3675_v24 }
 0x5ea   :  { %4828 = vst.msk [vmem:[%s10883_s3 + $0xc8] sm:$0xff] %vm4802_vm2, %v4400_v55  ;;  %v3677_v17 = vpop.f32.mrf.mxu0 }
 0x5eb   :  { %v3678_v46 = vadd.f32 %v3677_v17, %v9651_v10  ;;  %v4404_v21 = vpop.f32.mrf.mxu1  ;;  %7056 = vmatmul.mubr.bf16.gmra.mxu1 %v4167_v1  ;;  %v4081_v10 = vmax.f32 %v3956_v6, 0.0 }
 0x5ec   :  { %v4405_v52 = vadd.f32 %v9979_v41, %v4404_v21  ;;  %v6794_v4 = vpop.f32.mrf.mxu0  ;;  %7059 = vmatprep.mubr.msk.bf16.mxu1 %vm7227_vm0, %v10948_v63 }
 0x5ed   :  { %v3957_v29 = vadd.f32 %v10003_v16, %v3678_v46  ;;  %v6961_v8 = vpop.f32.mrf.mxu1 }
 0x5ee   :  { %4829 = vst.msk [vmem:[%s10883_s3 + $0xd0] sm:$0xff] %vm4802_vm2, %v4405_v52  ;;  %v3682_v40 = vpop.f32.mrf.mxu0  ;;  %6908 = vmatmul.mubr.bf16.vlgmr.msra.gmra.mxu0 %v11130_v61 }
 0x5ef   :  { %v4082_v49 = vmax.f32 %v3957_v29, 0.0  ;;  %v3683_v2 = vadd.f32 %v3682_v40, %v11131_v44  ;;  %v4407_v51 = vpop.f32.mrf.mxu1 }
 0x5f0   :  { %v4408_v37 = vadd.f32 %v9979_v41, %v4407_v51  ;;  %v6797_v13 = vpop.f32.mrf.mxu0 }
 0x5f1   :  { %v4168_v53 = vpack.c.bf16 %v4082_v49, %v4081_v10  ;;  %v6962_v31 = vpop.f32.mrf.mxu1  ;;  %v3958_v42 = vadd.f32 %v10003_v16, %v3683_v2 }
 0x5f2   :  { %4830 = vst.msk [vmem:[%s10883_s3 + $0xd8] sm:$0xff] %vm4802_vm2, %v4408_v37  ;;  %v3685_v33 = vpop.f32.mrf.mxu0 }
 0x5f3   :  { %v3686_v48 = vadd.f32 %v3685_v33, %v9664_v27  ;;  %v4412_v15 = vpop.f32.mrf.mxu1  ;;  %7060 = vmatmul.mubr.bf16.gmra.mxu1 %v4168_v53  ;;  %v4083_v22 = vmax.f32 %v3958_v42, 0.0 }
 0x5f4   :  { %v4413_v12 = vadd.f32 %v9979_v41, %v4412_v15  ;;  %v6798_v30 = vpop.f32.mrf.mxu0  ;;  %7063 = vmatprep.mubr.msk.bf16.mxu1 %vm7227_vm0, %v10948_v63 }
 0x5f5   :  { %v3959_v24 = vadd.f32 %v10003_v16, %v3686_v48  ;;  %v6965_v56 = vpop.f32.mrf.mxu1 }
 0x5f6   :  { %4831 = vst.msk [vmem:[%s10883_s3 + $0xe0] sm:$0xff] %vm4802_vm2, %v4413_v12  ;;  %v3690_v55 = vpop.f32.mrf.mxu0 }
 0x5f7   :  { %v4084_v1 = vmax.f32 %v3959_v24, 0.0  ;;  %v3691_v27 = vadd.f32 %v3690_v55, %v9670_v45  ;;  %v4415_v35 = vpop.f32.mrf.mxu1 }
 0x5f8   :  { %v4416_v17 = vadd.f32 %v9979_v41, %v4415_v35  ;;  %v6801_v6 = vpop.f32.mrf.mxu0 }
 0x5f9   :  { %v4169_v46 = vpack.c.bf16 %v4084_v1, %v4083_v22  ;;  %v6966_v21 = vpop.f32.mrf.mxu1  ;;  %v3960_v4 = vadd.f32 %v10003_v16, %v3691_v27 }
 0x5fa   :  { %4832 = vst.msk [vmem:[%s10883_s3 + $0xe8] sm:$0xff] %vm4802_vm2, %v4416_v17  ;;  %v3693_v52 = vpop.f32.mrf.mxu0 }
 0x5fb   :  { %v3694_v29 = vadd.f32 %v3693_v52, %v9677_v7  ;;  %v4420_v8 = vpop.f32.mrf.mxu1  ;;  %7064 = vmatmul.mubr.bf16.gmra.mxu1 %v4169_v46  ;;  %v4085_v44 = vmax.f32 %v3960_v4, 0.0 }
 0x5fc   :  { %v4421_v45 = vadd.f32 %v9979_v41, %v4420_v8  ;;  %v6802_v40 = vpop.f32.mrf.mxu0  ;;  %7067 = vmatprep.mubr.msk.bf16.mxu1 %vm7227_vm0, %v10948_v63 }
 0x5fd   :  { %v3961_v61 = vadd.f32 %v10003_v16, %v3694_v29  ;;  %v6969_v10 = vpop.f32.mrf.mxu1 }
 0x5fe   :  { %4833 = vst.msk [vmem:[%s10883_s3 + $0xf0] sm:$0xff] %vm4802_vm2, %v4421_v45  ;;  %v3698_v49 = vpop.f32.mrf.mxu0 }
 0x5ff   :  { %v4086_v2 = vmax.f32 %v3961_v61, 0.0  ;;  %v3699_v7 = vadd.f32 %v3698_v49, %v9683_v43  ;;  %v4423_v51 = vpop.f32.mrf.mxu1 }
 0x600   :  { %v4424_v37 = vadd.f32 %v9979_v41, %v4423_v51  ;;  %v6805_v13 = vpop.f32.mrf.mxu0 }
 0x601   :  { %v4170_v53 = vpack.c.bf16 %v4086_v2, %v4085_v44  ;;  %v6970_v31 = vpop.f32.mrf.mxu1  ;;  %v3962_v42 = vadd.f32 %v10003_v16, %v3699_v7 }
 0x602   :  { %4834 = vst.msk [vmem:[%s10883_s3 + $0xf8] sm:$0xff] %vm4802_vm2, %v4424_v37  ;;  %v3701_v33 = vpop.f32.mrf.mxu0 }
 0x603   :  { %v3702_v48 = vadd.f32 %v3701_v33, %v9690_v5  ;;  %v4428_v15 = vpop.f32.mrf.mxu1  ;;  %7068 = vmatmul.mubr.bf16.gmra.mxu1 %v4170_v53  ;;  %v4087_v55 = vmax.f32 %v3962_v42, 0.0 }
 0x604   :  { %v4429_v43 = vadd.f32 %v9979_v41, %v4428_v15  ;;  %v6806_v12 = vpop.f32.mrf.mxu0  ;;  %7071 = vmatprep.mubr.msk.bf16.mxu1 %vm7227_vm0, %v10948_v63 }
 0x605   :  { %v3963_v30 = vadd.f32 %v10003_v16, %v3702_v48  ;;  %v6973_v24 = vpop.f32.mrf.mxu1 }
 0x606   :  { %4835 = vst.msk [vmem:[%s10883_s3 + $0x100] sm:$0xff] %vm4802_vm2, %v4429_v43  ;;  %v3706_v56 = vpop.f32.mrf.mxu0 }
 0x607   :  { %v4088_v22 = vmax.f32 %v3963_v30, 0.0  ;;  %v3707_v5 = vadd.f32 %v3706_v56, %v9696_v11  ;;  %v4431_v1 = vpop.f32.mrf.mxu1 }
 0x608   :  { %v4432_v27 = vadd.f32 %v9979_v41, %v4431_v1  ;;  %v6809_v35 = vpop.f32.mrf.mxu0 }
 0x609   :  { %v4171_v17 = vpack.c.bf16 %v4088_v22, %v4087_v55  ;;  %v6974_v6 = vpop.f32.mrf.mxu1  ;;  %v3964_v21 = vadd.f32 %v10003_v16, %v3707_v5 }
 0x60a   :  { %4836 = vst.msk [vmem:[%s10883_s3 + $0x108] sm:$0xff] %vm4802_vm2, %v4432_v27  ;;  %v3709_v46 = vpop.f32.mrf.mxu0 }
 0x60b   :  { %v3710_v52 = vadd.f32 %v3709_v46, %v9703_v54  ;;  %v4436_v4 = vpop.f32.mrf.mxu1  ;;  %7072 = vmatmul.mubr.bf16.gmra.mxu1 %v4171_v17  ;;  %v4089_v61 = vmax.f32 %v3964_v21, 0.0 }
 0x60c   :  { %v4437_v11 = vadd.f32 %v9979_v41, %v4436_v4  ;;  %v6810_v29 = vpop.f32.mrf.mxu0  ;;  %7075 = vmatprep.mubr.msk.bf16.mxu1 %vm7227_vm0, %v10948_v63 }
 0x60d   :  { %v3965_v8 = vadd.f32 %v10003_v16, %v3710_v52  ;;  %v6977_v45 = vpop.f32.mrf.mxu1 }
 0x60e   :  { %4837 = vst.msk [vmem:[%s10883_s3 + $0x110] sm:$0xff] %vm4802_vm2, %v4437_v11  ;;  %v3714_v40 = vpop.f32.mrf.mxu0 }
 0x60f   :  { %v4090_v10 = vmax.f32 %v3965_v8, 0.0  ;;  %v3715_v54 = vadd.f32 %v3714_v40, %v9709_v38  ;;  %v4439_v49 = vpop.f32.mrf.mxu1 }
 0x610   :  { %v4440_v44 = vadd.f32 %v9979_v41, %v4439_v49  ;;  %v6813_v2 = vpop.f32.mrf.mxu0 }
 0x611   :  { %v4172_v7 = vpack.c.bf16 %v4090_v10, %v4089_v61  ;;  %v6978_v51 = vpop.f32.mrf.mxu1  ;;  %v3966_v13 = vadd.f32 %v10003_v16, %v3715_v54  ;;  %v11132_v54 = vld [vmem:[#allocation33_spill] sm:$0xff] }
 0x612   :  { %4838 = vst.msk [vmem:[%s10883_s3 + $0x118] sm:$0xff] %vm4802_vm2, %v4440_v44  ;;  %v3717_v37 = vpop.f32.mrf.mxu0 }
 0x613   :  { %v3718_v53 = vadd.f32 %v3717_v37, %v9716_v23  ;;  %v4444_v31 = vpop.f32.mrf.mxu1  ;;  %7076 = vmatmul.mubr.bf16.gmra.mxu1 %v4172_v7  ;;  %v4091_v43 = vmax.f32 %v3966_v13, 0.0 }
 0x614   :  { %v4445_v38 = vadd.f32 %v9979_v41, %v4444_v31  ;;  %v6814_v33 = vpop.f32.mrf.mxu0  ;;  %7079 = vmatprep.mubr.msk.bf16.mxu1 %vm7227_vm0, %v10948_v63  ;;  %v11133_v31 = vld [vmem:[#allocation34_spill] sm:$0xff] }
 0x615   :  { %v3967_v42 = vadd.f32 %v10003_v16, %v3718_v53  ;;  %v6981_v48 = vpop.f32.mrf.mxu1 }
 0x616   :  { %4839 = vst.msk [vmem:[%s10883_s3 + $0x120] sm:$0xff] %vm4802_vm2, %v4445_v38  ;;  %v3722_v15 = vpop.f32.mrf.mxu0 }
 0x617   :  { %v4092_v12 = vmax.f32 %v3967_v42, 0.0  ;;  %v3723_v23 = vadd.f32 %v3722_v15, %v9722_v28  ;;  %v4447_v30 = vpop.f32.mrf.mxu1 }
 0x618   :  { %v4448_v24 = vadd.f32 %v9979_v41, %v4447_v30  ;;  %v6817_v56 = vpop.f32.mrf.mxu0  ;;  %v11134_v30 = vld [vmem:[#allocation35_spill] sm:$0xff] }
 0x619   :  { %v4173_v55 = vpack.c.bf16 %v4092_v12, %v4091_v43  ;;  %v6982_v22 = vpop.f32.mrf.mxu1  ;;  %v3968_v1 = vadd.f32 %v10003_v16, %v3723_v23 }
 0x61a   :  { %4840 = vst.msk [vmem:[%s10883_s3 + $0x128] sm:$0xff] %vm4802_vm2, %v4448_v24  ;;  %v3725_v5 = vpop.f32.mrf.mxu0 }
 0x61b   :  { %v3726_v27 = vadd.f32 %v3725_v5, %v9729_v50  ;;  %v4452_v35 = vpop.f32.mrf.mxu1  ;;  %7080 = vmatmul.mubr.bf16.gmra.mxu1 %v4173_v55  ;;  %v4093_v52 = vmax.f32 %v3968_v1, 0.0 }
 0x61c   :  { %v4453_v28 = vadd.f32 %v9979_v41, %v4452_v35  ;;  %v6818_v17 = vpop.f32.mrf.mxu0  ;;  %7083 = vmatprep.mubr.msk.bf16.mxu1 %vm7227_vm0, %v10948_v63 }
 0x61d   :  { %v3969_v6 = vadd.f32 %v10003_v16, %v3726_v27  ;;  %v6985_v46 = vpop.f32.mrf.mxu1  ;;  %v11135_v17 = vld [vmem:[#allocation36_spill] sm:$0xff] }
 0x61e   :  { %4841 = vst.msk [vmem:[%s10883_s3 + $0x130] sm:$0xff] %vm4802_vm2, %v4453_v28  ;;  %v3730_v21 = vpop.f32.mrf.mxu0 }
 0x61f   :  { %v4094_v4 = vmax.f32 %v3969_v6, 0.0  ;;  %v3731_v50 = vadd.f32 %v3730_v21, %v9735_v62  ;;  %v4455_v11 = vpop.f32.mrf.mxu1 }
 0x620   :  { %v4456_v29 = vadd.f32 %v9979_v41, %v4455_v11  ;;  %v6821_v8 = vpop.f32.mrf.mxu0 }
 0x621   :  { %v4174_v45 = vpack.c.bf16 %v4094_v4, %v4093_v52  ;;  %v6986_v40 = vpop.f32.mrf.mxu1  ;;  %v3970_v10 = vadd.f32 %v10003_v16, %v3731_v50  ;;  %v11136_v8 = vld [vmem:[#allocation37_spill] sm:$0xff] }
 0x622   :  { %4842 = vst.msk [vmem:[%s10883_s3 + $0x138] sm:$0xff] %vm4802_vm2, %v4456_v29  ;;  %v3733_v61 = vpop.f32.mrf.mxu0 }
 0x623   :  { %v3734_v49 = vadd.f32 %v3733_v61, %v11132_v54  ;;  %v4460_v44 = vpop.f32.mrf.mxu1  ;;  %7084 = vmatmul.mubr.bf16.gmra.mxu1 %v4174_v45  ;;  %v4095_v13 = vmax.f32 %v3970_v10, 0.0 }
 0x624   :  { %v4461_v62 = vadd.f32 %v9979_v41, %v4460_v44  ;;  %v6822_v2 = vpop.f32.mrf.mxu0  ;;  %7087 = vmatprep.mubr.msk.bf16.mxu1 %vm7227_vm0, %v10948_v63 }
 0x625   :  { %v3971_v7 = vadd.f32 %v10003_v16, %v3734_v49  ;;  %v6989_v51 = vpop.f32.mrf.mxu1 }
 0x626   :  { %4843 = vst.msk [vmem:[%s10883_s3 + $0x140] sm:$0xff] %vm4802_vm2, %v4461_v62  ;;  %v3738_v37 = vpop.f32.mrf.mxu0 }
 0x627   :  { %v4096_v53 = vmax.f32 %v3971_v7, 0.0  ;;  %v3739_v38 = vadd.f32 %v3738_v37, %v11133_v31  ;;  %v4463_v33 = vpop.f32.mrf.mxu1 }
 0x628   :  { %v4464_v42 = vadd.f32 %v9979_v41, %v4463_v33  ;;  %v6825_v48 = vpop.f32.mrf.mxu0 }
 0x629   :  { %v4175_v15 = vpack.c.bf16 %v4096_v53, %v4095_v13  ;;  %v6990_v43 = vpop.f32.mrf.mxu1  ;;  %v3972_v23 = vadd.f32 %v10003_v16, %v3739_v38 }
 0x62a   :  { %4844 = vst.msk [vmem:[%s10883_s3 + $0x148] sm:$0xff] %vm4802_vm2, %v4464_v42  ;;  %v3741_v12 = vpop.f32.mrf.mxu0  ;;  %v11137_v42 = vld [vmem:[#allocation38_spill] sm:$0xff] }
 0x62b   :  { %v3742_v24 = vadd.f32 %v3741_v12, %v11134_v30  ;;  %v4468_v56 = vpop.f32.mrf.mxu1  ;;  %7088 = vmatmul.mubr.bf16.gmra.mxu1 %v4175_v15  ;;  %v4097_v35 = vmax.f32 %v3972_v23, 0.0 }
 0x62c   :  { %v4469_v55 = vadd.f32 %v9979_v41, %v4468_v56  ;;  %v6826_v22 = vpop.f32.mrf.mxu0  ;;  %7091 = vmatprep.mubr.msk.bf16.mxu1 %vm7227_vm0, %v10948_v63 }
 0x62d   :  { %v3973_v5 = vadd.f32 %v10003_v16, %v3742_v24  ;;  %v6993_v1 = vpop.f32.mrf.mxu1 }
 0x62e   :  { %4845 = vst.msk [vmem:[%s10883_s3 + $0x150] sm:$0xff] %vm4802_vm2, %v4469_v55  ;;  %v3746_v27 = vpop.f32.mrf.mxu0 }
 0x62f   :  { %v4098_v28 = vmax.f32 %v3973_v5, 0.0  ;;  %v3747_v6 = vadd.f32 %v3746_v27, %v11135_v17  ;;  %v4471_v46 = vpop.f32.mrf.mxu1 }
 0x630   :  { %v4472_v21 = vadd.f32 %v9979_v41, %v4471_v46  ;;  %v6829_v52 = vpop.f32.mrf.mxu0 }
 0x631   :  { %v4176_v4 = vpack.c.bf16 %v4098_v28, %v4097_v35  ;;  %v6994_v50 = vpop.f32.mrf.mxu1  ;;  %v3974_v29 = vadd.f32 %v10003_v16, %v3747_v6  ;;  %v11138_v6 = vld [vmem:[#allocation39_spill] sm:$0xff] }
 0x632   :  { %4846 = vst.msk [vmem:[%s10883_s3 + $0x158] sm:$0xff] %vm4802_vm2, %v4472_v21  ;;  %v3749_v11 = vpop.f32.mrf.mxu0 }
 0x633   :  { %v3750_v45 = vadd.f32 %v3749_v11, %v11136_v8  ;;  %v4476_v40 = vpop.f32.mrf.mxu1  ;;  %7092 = vmatmul.mubr.bf16.gmra.mxu1 %v4176_v4  ;;  %v4099_v62 = vmax.f32 %v3974_v29, 0.0 }
 0x634   :  { %v4477_v61 = vadd.f32 %v9979_v41, %v4476_v40  ;;  %v6830_v10 = vpop.f32.mrf.mxu0  ;;  %7095 = vmatprep.mubr.msk.bf16.mxu1 %vm7227_vm0, %v10948_v63 }
 0x635   :  { %v3975_v54 = vadd.f32 %v10003_v16, %v3750_v45  ;;  %v6997_v49 = vpop.f32.mrf.mxu1 }
 0x636   :  { %4847 = vst.msk [vmem:[%s10883_s3 + $0x160] sm:$0xff] %vm4802_vm2, %v4477_v61  ;;  %v3754_v44 = vpop.f32.mrf.mxu0 }
 0x637   :  { %v4100_v2 = vmax.f32 %v3975_v54, 0.0  ;;  %v3755_v7 = vadd.f32 %v3754_v44, %v9774_v32  ;;  %v4479_v51 = vpop.f32.mrf.mxu1 }
 0x638   :  { %v4480_v37 = vadd.f32 %v9979_v41, %v4479_v51  ;;  %v6833_v13 = vpop.f32.mrf.mxu0 }
 0x639   :  { %v4177_v53 = vpack.c.bf16 %v4100_v2, %v4099_v62  ;;  %v6998_v31 = vpop.f32.mrf.mxu1  ;;  %v3976_v33 = vadd.f32 %v10003_v16, %v3755_v7 }
 0x63a   :  { %4848 = vst.msk [vmem:[%s10883_s3 + $0x168] sm:$0xff] %vm4802_vm2, %v4480_v37  ;;  %v3757_v38 = vpop.f32.mrf.mxu0  ;;  %v10423_v37 = vld [vmem:[%s10882_s2 + $0x3] ss:$0 sm:$0xff] }
 0x63b   :  { %v3758_v48 = vadd.f32 %v3757_v38, %v11137_v42  ;;  %v4484_v15 = vpop.f32.mrf.mxu1  ;;  %7096 = vmatmul.mubr.bf16.gmra.mxu1 %v4177_v53  ;;  %v4101_v24 = vmax.f32 %v3976_v33, 0.0 }
 0x63c   :  { %v4485_v32 = vadd.f32 %v9979_v41, %v4484_v15  ;;  %v6834_v43 = vpop.f32.mrf.mxu0  ;;  %7099 = vmatprep.mubr.msk.bf16.mxu1 %vm7227_vm0, %v10948_v63 }
 0x63d   :  { %v3977_v12 = vadd.f32 %v10003_v16, %v3758_v48  ;;  %v7001_v23 = vpop.f32.mrf.mxu1 }
 0x63e   :  { %4849 = vst.msk [vmem:[%s10883_s3 + $0x170] sm:$0xff] %vm4802_vm2, %v4485_v32  ;;  %v3762_v30 = vpop.f32.mrf.mxu0 }
 0x63f   :  { %v4102_v56 = vmax.f32 %v3977_v12, 0.0  ;;  %v3763_v55 = vadd.f32 %v3762_v30, %v9787_v14  ;;  %v4487_v22 = vpop.f32.mrf.mxu1  ;;  %v10399_v14 = vld [vmem:[%s10882_s2 + $0x4] ss:$0 sm:$0xff] }
 0x640   :  { %v4488_v5 = vadd.f32 %v9979_v41, %v4487_v22  ;;  %v6837_v1 = vpop.f32.mrf.mxu0 }
 0x641   :  { %v4178_v27 = vpack.c.bf16 %v4102_v56, %v4101_v24  ;;  %v7002_v35 = vpop.f32.mrf.mxu1  ;;  %v3978_v17 = vadd.f32 %v10003_v16, %v3763_v55 }
 0x642   :  { %4850 = vst.msk [vmem:[%s10883_s3 + $0x178] sm:$0xff] %vm4802_vm2, %v4488_v5  ;;  %v3765_v28 = vpop.f32.mrf.mxu0 }
 0x643   :  { %v3766_v46 = vadd.f32 %v3765_v28, %v11138_v6  ;;  %v4492_v21 = vpop.f32.mrf.mxu1  ;;  %7100 = vmatmul.mubr.bf16.gmra.mxu1 %v4178_v27  ;;  %v4103_v29 = vmax.f32 %v3978_v17, 0.0 }
 0x644   :  { %v4493_v41 = vadd.f32 %v10399_v14, %v4492_v21  ;;  %v6838_v52 = vpop.f32.mrf.mxu0  ;;  %7103 = vmatprep.mubr.msk.bf16.mxu1 %vm7227_vm0, %v10948_v63 }
 0x645   :  { %v3979_v4 = vadd.f32 %v10003_v16, %v3766_v46  ;;  %v7005_v50 = vpop.f32.mrf.mxu1 }
 0x646   :  { %4851 = vst.msk [vmem:[%s10883_s3 + $0x180] sm:$0xff] %vm4802_vm2, %v4493_v41  ;;  %v3770_v11 = vpop.f32.mrf.mxu0 }
 0x647   :  { %v4104_v8 = vmax.f32 %v3979_v4, 0.0  ;;  %v3771_v45 = vadd.f32 %v3770_v11, %v9800_v36  ;;  %v4495_v40 = vpop.f32.mrf.mxu1 }
 0x648   :  { %v4496_v61 = vadd.f32 %v10399_v14, %v4495_v40  ;;  %v6841_v10 = vpop.f32.mrf.mxu0 }
 0x649   :  { %v4179_v54 = vpack.c.bf16 %v4104_v8, %v4103_v29  ;;  %v7006_v49 = vpop.f32.mrf.mxu1  ;;  %v3980_v62 = vadd.f32 %v10003_v16, %v3771_v45 }
 0x64a   :  { %4852 = vst.msk [vmem:[%s10883_s3 + $0x188] sm:$0xff] %vm4802_vm2, %v4496_v61  ;;  %v3773_v44 = vpop.f32.mrf.mxu0 }
 0x64b   :  { %v3774_v2 = vadd.f32 %v3773_v44, %v9807_v60  ;;  %v4500_v7 = vpop.f32.mrf.mxu1  ;;  %7104 = vmatmul.mubr.bf16.gmra.mxu1 %v4179_v54  ;;  %v4105_v16 = vmax.f32 %v3980_v62, 0.0 }
 0x64c   :  { %v4501_v36 = vadd.f32 %v10399_v14, %v4500_v7  ;;  %v6842_v51 = vpop.f32.mrf.mxu0  ;;  %7107 = vmatprep.mubr.msk.bf16.mxu1 %vm7227_vm0, %v10948_v63 }
 0x64d   :  { %v3981_v13 = vadd.f32 %v10423_v37, %v3774_v2  ;;  %v7009_v53 = vpop.f32.mrf.mxu1 }
 0x64e   :  { %4853 = vst.msk [vmem:[%s10883_s3 + $0x190] sm:$0xff] %vm4802_vm2, %v4501_v36  ;;  %v3778_v60 = vpop.f32.mrf.mxu0 }
 0x64f   :  { %v4106_v31 = vmax.f32 %v3981_v13, 0.0  ;;  %v3779_v38 = vadd.f32 %v3778_v60, %v9813_v9  ;;  %v4503_v33 = vpop.f32.mrf.mxu1 }
 0x650   :  { %v4504_v42 = vadd.f32 %v10399_v14, %v4503_v33  ;;  %v6845_v48 = vpop.f32.mrf.mxu0 }
 0x651   :  { %v4180_v15 = vpack.c.bf16 %v4106_v31, %v4105_v16  ;;  %v7010_v32 = vpop.f32.mrf.mxu1  ;;  %v3982_v12 = vadd.f32 %v10423_v37, %v3779_v38 }
 0x652   :  { %4854 = vst.msk [vmem:[%s10883_s3 + $0x198] sm:$0xff] %vm4802_vm2, %v4504_v42  ;;  %v3781_v43 = vpop.f32.mrf.mxu0 }
 0x653   :  { %v3782_v23 = vadd.f32 %v3781_v43, %v9820_v18  ;;  %v4508_v30 = vpop.f32.mrf.mxu1  ;;  %7108 = vmatmul.mubr.bf16.gmra.mxu1 %v4180_v15  ;;  %v4107_v5 = vmax.f32 %v3982_v12, 0.0  ;;  %v11139_v43 = vld [vmem:[#allocation40_spill] sm:$0xff] }
 0x654   :  { %v4509_v9 = vadd.f32 %v10399_v14, %v4508_v30  ;;  %v6846_v24 = vpop.f32.mrf.mxu0  ;;  %7111 = vmatprep.mubr.msk.bf16.mxu1 %vm7227_vm0, %v10948_v63 }
 0x655   :  { %v3983_v56 = vadd.f32 %v10423_v37, %v3782_v23  ;;  %v7013_v55 = vpop.f32.mrf.mxu1 }
 0x656   :  { %4855 = vst.msk [vmem:[%s10883_s3 + $0x1a0] sm:$0xff] %vm4802_vm2, %v4509_v9  ;;  %v3786_v22 = vpop.f32.mrf.mxu0 }
 0x657   :  { %v4108_v1 = vmax.f32 %v3983_v56, 0.0  ;;  %v3787_v18 = vadd.f32 %v3786_v22, %v9826_v58  ;;  %v4511_v27 = vpop.f32.mrf.mxu1 }
 0x658   :  { %v4512_v35 = vadd.f32 %v10399_v14, %v4511_v27  ;;  %v6849_v28 = vpop.f32.mrf.mxu0 }
 0x659   :  { %v4181_v17 = vpack.c.bf16 %v4108_v1, %v4107_v5  ;;  %v7014_v6 = vpop.f32.mrf.mxu1  ;;  %v3984_v21 = vadd.f32 %v10423_v37, %v3787_v18 }
 0x65a   :  { %4856 = vst.msk [vmem:[%s10883_s3 + $0x1a8] sm:$0xff] %vm4802_vm2, %v4512_v35  ;;  %v3789_v46 = vpop.f32.mrf.mxu0 }
 0x65b   :  { %v3790_v41 = vadd.f32 %v3789_v46, %v9833_v25  ;;  %v4516_v52 = vpop.f32.mrf.mxu1  ;;  %7112 = vmatmul.mubr.bf16.gmra.mxu1 %v4181_v17  ;;  %v4109_v8 = vmax.f32 %v3984_v21, 0.0  ;;  %v11140_v46 = vld [vmem:[#allocation41_spill] sm:$0xff] }
 0x65c   :  { %v4517_v58 = vadd.f32 %v10399_v14, %v4516_v52  ;;  %v6850_v4 = vpop.f32.mrf.mxu0  ;;  %7115 = vmatprep.mubr.msk.bf16.mxu1 %vm7227_vm0, %v10948_v63 }
 0x65d   :  { %v3985_v50 = vadd.f32 %v10423_v37, %v3790_v41  ;;  %v7017_v11 = vpop.f32.mrf.mxu1 }
 0x65e   :  { %4857 = vst.msk [vmem:[%s10883_s3 + $0x1b0] sm:$0xff] %vm4802_vm2, %v4517_v58  ;;  %v3794_v29 = vpop.f32.mrf.mxu0 }
 0x65f   :  { %v4110_v45 = vmax.f32 %v3985_v50, 0.0  ;;  %v3795_v25 = vadd.f32 %v3794_v29, %v9839_v0  ;;  %v4519_v40 = vpop.f32.mrf.mxu1 }
 0x660   :  { %v4520_v61 = vadd.f32 %v10399_v14, %v4519_v40  ;;  %v6853_v10 = vpop.f32.mrf.mxu0 }
 0x661   :  { %v4182_v54 = vpack.c.bf16 %v4110_v45, %v4109_v8  ;;  %v7018_v49 = vpop.f32.mrf.mxu1  ;;  %v3986_v62 = vadd.f32 %v10423_v37, %v3795_v25 }
 0x662   :  { %4858 = vst.msk [vmem:[%s10883_s3 + $0x1b8] sm:$0xff] %vm4802_vm2, %v4520_v61  ;;  %v3797_v44 = vpop.f32.mrf.mxu0 }
 0x663   :  { %v3798_v2 = vadd.f32 %v3797_v44, %v9846_v39  ;;  %v4524_v7 = vpop.f32.mrf.mxu1  ;;  %7116 = vmatmul.mubr.bf16.gmra.mxu1 %v4182_v54  ;;  %v4111_v60 = vmax.f32 %v3986_v62, 0.0  ;;  %v11141_v44 = vld [vmem:[#allocation2_spill] sm:$0xff] }
 0x664   :  { %v4525_v0 = vadd.f32 %v10399_v14, %v4524_v7  ;;  %v6854_v36 = vpop.f32.mrf.mxu0  ;;  %7119 = vmatprep.mubr.msk.bf16.mxu1 %vm7227_vm0, %v10948_v63 }
 0x665   :  { %v3987_v51 = vadd.f32 %v10423_v37, %v3798_v2  ;;  %v7021_v13 = vpop.f32.mrf.mxu1 }
 0x666   :  { %4859 = vst.msk [vmem:[%s10883_s3 + $0x1c0] sm:$0xff] %vm4802_vm2, %v4525_v0  ;;  %v3802_v53 = vpop.f32.mrf.mxu0 }
 0x667   :  { %v4112_v16 = vmax.f32 %v3987_v51, 0.0  ;;  %v3803_v39 = vadd.f32 %v3802_v53, %v9852_v59  ;;  %v4527_v31 = vpop.f32.mrf.mxu1 }
 0x668   :  { %v4528_v38 = vadd.f32 %v10399_v14, %v4527_v31  ;;  %v6857_v33 = vpop.f32.mrf.mxu0 }
 0x669   :  { %v4183_v42 = vpack.c.bf16 %v4112_v16, %v4111_v60  ;;  %v7022_v48 = vpop.f32.mrf.mxu1  ;;  %v3988_v32 = vadd.f32 %v10423_v37, %v3803_v39 }
 0x66a   :  { %4860 = vst.msk [vmem:[%s10883_s3 + $0x1c8] sm:$0xff] %vm4802_vm2, %v4528_v38  ;;  %v3805_v15 = vpop.f32.mrf.mxu0 }
 0x66b   :  { %v3806_v12 = vadd.f32 %v3805_v15, %v11139_v43  ;;  %v4532_v23 = vpop.f32.mrf.mxu1  ;;  %7120 = vmatmul.mubr.bf16.gmra.mxu1 %v4183_v42  ;;  %v4113_v55 = vmax.f32 %v3988_v32, 0.0  ;;  %v11142_v15 = vld [vmem:[#allocation42_spill] sm:$0xff] }
 0x66c   :  { %v4533_v59 = vadd.f32 %v10399_v14, %v4532_v23  ;;  %v6858_v30 = vpop.f32.mrf.mxu0  ;;  %7123 = vmatprep.mubr.msk.bf16.mxu1 %vm7227_vm0, %v10948_v63 }
 0x66d   :  { %v3989_v9 = vadd.f32 %v10423_v37, %v3806_v12  ;;  %v7025_v24 = vpop.f32.mrf.mxu1 }
 0x66e   :  { %4861 = vst.msk [vmem:[%s10883_s3 + $0x1d0] sm:$0xff] %vm4802_vm2, %v4533_v59  ;;  %v3810_v56 = vpop.f32.mrf.mxu0 }
 0x66f   :  { %v4114_v22 = vmax.f32 %v3989_v9, 0.0  ;;  %v3811_v5 = vadd.f32 %v3810_v56, %v9865_v34  ;;  %v4535_v1 = vpop.f32.mrf.mxu1 }
 0x670   :  { %v4536_v18 = vadd.f32 %v10399_v14, %v4535_v1  ;;  %v6861_v27 = vpop.f32.mrf.mxu0 }
 0x671   :  { %v4184_v35 = vpack.c.bf16 %v4114_v22, %v4113_v55  ;;  %v7026_v28 = vpop.f32.mrf.mxu1  ;;  %v3990_v6 = vadd.f32 %v10423_v37, %v3811_v5 }
 0x672   :  { %4862 = vst.msk [vmem:[%s10883_s3 + $0x1d8] sm:$0xff] %vm4802_vm2, %v4536_v18  ;;  %v3813_v17 = vpop.f32.mrf.mxu0  ;;  %v11143_v28 = vld [vmem:[#allocation3_spill] sm:$0xff] }
 0x673   :  { %v3814_v21 = vadd.f32 %v3813_v17, %v11140_v46  ;;  %v4540_v41 = vpop.f32.mrf.mxu1  ;;  %7124 = vmatmul.mubr.bf16.gmra.mxu1 %v4184_v35  ;;  %v4115_v11 = vmax.f32 %v3990_v6, 0.0 }
 0x674   :  { %v4541_v34 = vadd.f32 %v10399_v14, %v4540_v41  ;;  %v6862_v52 = vpop.f32.mrf.mxu0  ;;  %7127 = vmatprep.mubr.msk.bf16.mxu1 %vm7227_vm0, %v10948_v63 }
 0x675   :  { %v3991_v58 = vadd.f32 %v10423_v37, %v3814_v21  ;;  %v7029_v4 = vpop.f32.mrf.mxu1 }
 0x676   :  { %4863 = vst.msk [vmem:[%s10883_s3 + $0x1e0] sm:$0xff] %vm4802_vm2, %v4541_v34  ;;  %v3818_v50 = vpop.f32.mrf.mxu0 }
 0x677   :  { %v4116_v29 = vmax.f32 %v3991_v58, 0.0  ;;  %v3819_v8 = vadd.f32 %v3818_v50, %v9878_v57  ;;  %v4543_v45 = vpop.f32.mrf.mxu1 }
 0x678   :  { %v4544_v25 = vadd.f32 %v10399_v14, %v4543_v45  ;;  %v6865_v40 = vpop.f32.mrf.mxu0 }
 0x679   :  { %v4185_v61 = vpack.c.bf16 %v4116_v29, %v4115_v11  ;;  %v7030_v10 = vpop.f32.mrf.mxu1  ;;  %v3992_v49 = vadd.f32 %v10423_v37, %v3819_v8 }
 0x67a   :  { %4864 = vst.msk [vmem:[%s10883_s3 + $0x1e8] sm:$0xff] %vm4802_vm2, %v4544_v25  ;;  %v3821_v54 = vpop.f32.mrf.mxu0 }
 0x67b   :  { %v3822_v62 = vadd.f32 %v3821_v54, %v11141_v44  ;;  %v4548_v2 = vpop.f32.mrf.mxu1  ;;  %7128 = vmatmul.mubr.bf16.gmra.mxu1 %v4185_v61  ;;  %v4117_v13 = vmax.f32 %v3992_v49, 0.0  ;;  %v11144_v61 = vld [vmem:[#allocation43_spill] sm:$0xff] }
 0x67c   :  { %v4549_v57 = vadd.f32 %v10399_v14, %v4548_v2  ;;  %v6866_v7 = vpop.f32.mrf.mxu0  ;;  %7131 = vmatprep.mubr.msk.bf16.mxu1 %vm7227_vm0, %v10948_v63 }
 0x67d   :  { %v3993_v0 = vadd.f32 %v10423_v37, %v3822_v62  ;;  %v7033_v36 = vpop.f32.mrf.mxu1 }
 0x67e   :  { %4865 = vst.msk [vmem:[%s10883_s3 + $0x1f0] sm:$0xff] %vm4802_vm2, %v4549_v57  ;;  %v3826_v51 = vpop.f32.mrf.mxu0 }
 0x67f   :  { %v4118_v53 = vmax.f32 %v3993_v0, 0.0  ;;  %v3827_v60 = vadd.f32 %v3826_v51, %v9891_v19  ;;  %v4551_v16 = vpop.f32.mrf.mxu1 }
 0x680   :  { %v4552_v39 = vadd.f32 %v10399_v14, %v4551_v16  ;;  %v6869_v31 = vpop.f32.mrf.mxu0 }
 0x681   :  { %v4186_v38 = vpack.c.bf16 %v4118_v53, %v4117_v13  ;;  %v7034_v33 = vpop.f32.mrf.mxu1  ;;  %v3994_v48 = vadd.f32 %v10423_v37, %v3827_v60  ;;  %v11145_v31 = vld [vmem:[#allocation44_spill] sm:$0xff] }
 0x682   :  { %4866 = vst.msk [vmem:[%s10883_s3 + $0x1f8] sm:$0xff] %vm4802_vm2, %v4552_v39  ;;  %v3829_v42 = vpop.f32.mrf.mxu0 }
 0x683   :  { %v3830_v32 = vadd.f32 %v3829_v42, %v11142_v15  ;;  %v4556_v43 = vpop.f32.mrf.mxu1  ;;  %7132 = vmatmul.mubr.bf16.gmra.mxu1 %v4186_v38  ;;  %v4119_v9 = vmax.f32 %v3994_v48, 0.0 }
 0x684   :  { %v4557_v19 = vadd.f32 %v10399_v14, %v4556_v43  ;;  %v6870_v12 = vpop.f32.mrf.mxu0  ;;  %7135 = vmatprep.mubr.msk.bf16.mxu1 %vm7227_vm0, %v10948_v63 }
 0x685   :  { %v3995_v23 = vadd.f32 %v10423_v37, %v3830_v32  ;;  %v7037_v59 = vpop.f32.mrf.mxu1 }
 0x686   :  { %4867 = vst.msk [vmem:[%s10883_s3 + $0x200] sm:$0xff] %vm4802_vm2, %v4557_v19  ;;  %v3834_v30 = vpop.f32.mrf.mxu0 }
 0x687   :  { %v4120_v24 = vmax.f32 %v3995_v23, 0.0  ;;  %v3835_v56 = vadd.f32 %v3834_v30, %v9904_v47  ;;  %v4559_v55 = vpop.f32.mrf.mxu1 }
 0x688   :  { %v4560_v22 = vadd.f32 %v10399_v14, %v4559_v55  ;;  %v6873_v5 = vpop.f32.mrf.mxu0 }
 0x689   :  { %v4187_v1 = vpack.c.bf16 %v4120_v24, %v4119_v9  ;;  %v7038_v18 = vpop.f32.mrf.mxu1  ;;  %v3996_v35 = vadd.f32 %v10423_v37, %v3835_v56 }
 0x68a   :  { %4868 = vst.msk [vmem:[%s10883_s3 + $0x208] sm:$0xff] %vm4802_vm2, %v4560_v22  ;;  %v3837_v27 = vpop.f32.mrf.mxu0  ;;  %v11146_v22 = vld [vmem:[#allocation4_spill] sm:$0xff] }
 0x68b   :  { %v3838_v17 = vadd.f32 %v3837_v27, %v11143_v28  ;;  %v4564_v6 = vpop.f32.mrf.mxu1  ;;  %7136 = vmatmul.mubr.bf16.gmra.mxu1 %v4187_v1  ;;  %v4121_v52 = vmax.f32 %v3996_v35, 0.0 }
 0x68c   :  { %v4565_v47 = vadd.f32 %v10399_v14, %v4564_v6  ;;  %v6874_v46 = vpop.f32.mrf.mxu0  ;;  %7139 = vmatprep.mubr.msk.bf16.mxu1 %vm7227_vm0, %v10948_v63 }
 0x68d   :  { %v3997_v21 = vadd.f32 %v10423_v37, %v3838_v17  ;;  %v7041_v41 = vpop.f32.mrf.mxu1 }
 0x68e   :  { %4869 = vst.msk [vmem:[%s10883_s3 + $0x210] sm:$0xff] %vm4802_vm2, %v4565_v47  ;;  %v3842_v34 = vpop.f32.mrf.mxu0  ;;  %v11147_v47 = vld [vmem:[#allocation45_spill] sm:$0xff] }
 0x68f   :  { %v4122_v58 = vmax.f32 %v3997_v21, 0.0  ;;  %v3843_v4 = vadd.f32 %v3842_v34, %v9917_v26  ;;  %v4567_v50 = vpop.f32.mrf.mxu1 }
 0x690   :  { %v4568_v11 = vadd.f32 %v10399_v14, %v4567_v50  ;;  %v6877_v29 = vpop.f32.mrf.mxu0 }
 0x691   :  { %v4188_v8 = vpack.c.bf16 %v4122_v58, %v4121_v52  ;;  %v7042_v45 = vpop.f32.mrf.mxu1  ;;  %v3998_v40 = vadd.f32 %v10423_v37, %v3843_v4 }
 0x692   :  { %4870 = vst.msk [vmem:[%s10883_s3 + $0x218] sm:$0xff] %vm4802_vm2, %v4568_v11  ;;  %v3845_v25 = vpop.f32.mrf.mxu0 }
 0x693   :  { %v3846_v10 = vadd.f32 %v3845_v25, %v11144_v61  ;;  %v4572_v54 = vpop.f32.mrf.mxu1  ;;  %7140 = vmatmul.mubr.bf16.gmra.mxu1 %v4188_v8  ;;  %v4123_v57 = vmax.f32 %v3998_v40, 0.0 }
 0x694   :  { %v4573_v26 = vadd.f32 %v10399_v14, %v4572_v54  ;;  %v6878_v49 = vpop.f32.mrf.mxu0  ;;  %7143 = vmatprep.mubr.msk.bf16.mxu1 %vm7227_vm0, %v10948_v63 }
 0x695   :  { %v3999_v44 = vadd.f32 %v10423_v37, %v3846_v10  ;;  %v7045_v62 = vpop.f32.mrf.mxu1 }
 0x696   :  { %4871 = vst.msk [vmem:[%s10883_s3 + $0x220] sm:$0xff] %vm4802_vm2, %v4573_v26  ;;  %v3850_v2 = vpop.f32.mrf.mxu0 }
 0x697   :  { %v4124_v7 = vmax.f32 %v3999_v44, 0.0  ;;  %v3851_v0 = vadd.f32 %v3850_v2, %v9930_v3  ;;  %v4575_v36 = vpop.f32.mrf.mxu1 }
 0x698   :  { %v4576_v51 = vadd.f32 %v10399_v14, %v4575_v36  ;;  %v6881_v13 = vpop.f32.mrf.mxu0 }
 0x699   :  { %v4189_v53 = vpack.c.bf16 %v4124_v7, %v4123_v57  ;;  %v7046_v60 = vpop.f32.mrf.mxu1  ;;  %v4000_v39 = vadd.f32 %v10423_v37, %v3851_v0 }
 0x69a   :  { %4872 = vst.msk [vmem:[%s10883_s3 + $0x228] sm:$0xff] %vm4802_vm2, %v4576_v51  ;;  %v3853_v16 = vpop.f32.mrf.mxu0 }
 0x69b   :  { %v3854_v38 = vadd.f32 %v3853_v16, %v11145_v31  ;;  %v4580_v33 = vpop.f32.mrf.mxu1  ;;  %7144 = vmatmul.mubr.bf16.gmra.mxu1 %v4189_v53  ;;  %v4125_v43 = vmax.f32 %v4000_v39, 0.0 }
 0x69c   :  { %v4581_v3 = vadd.f32 %v10399_v14, %v4580_v33  ;;  %v6882_v42 = vpop.f32.mrf.mxu0  ;;  %7147 = vmatprep.mubr.msk.bf16.mxu1 %vm7227_vm0, %v10948_v63 }
 0x69d   :  { %v4001_v48 = vadd.f32 %v10423_v37, %v3854_v38  ;;  %v7049_v15 = vpop.f32.mrf.mxu1 }
 0x69e   :  { %4873 = vst.msk [vmem:[%s10883_s3 + $0x230] sm:$0xff] %vm4802_vm2, %v4581_v3  ;;  %v3858_v32 = vpop.f32.mrf.mxu0 }
 0x69f   :  { %v4126_v19 = vmax.f32 %v4001_v48, 0.0  ;;  %v3859_v12 = vadd.f32 %v3858_v32, %v9943_v20  ;;  %v4583_v23 = vpop.f32.mrf.mxu1 }
 0x6a0   :  { %v4584_v59 = vadd.f32 %v10399_v14, %v4583_v23  ;;  %v6885_v30 = vpop.f32.mrf.mxu0 }
 0x6a1   :  { %v4190_v9 = vpack.c.bf16 %v4126_v19, %v4125_v43  ;;  %v7050_v24 = vpop.f32.mrf.mxu1  ;;  %v4002_v55 = vadd.f32 %v10423_v37, %v3859_v12 }
 0x6a2   :  { %4874 = vst.msk [vmem:[%s10883_s3 + $0x238] sm:$0xff] %vm4802_vm2, %v4584_v59  ;;  %v3861_v56 = vpop.f32.mrf.mxu0 }
 0x6a3   :  { %v3862_v5 = vadd.f32 %v3861_v56, %v11146_v22  ;;  %v4588_v1 = vpop.f32.mrf.mxu1  ;;  %7148 = vmatmul.mubr.bf16.gmra.mxu1 %v4190_v9  ;;  %v4127_v17 = vmax.f32 %v4002_v55, 0.0 }
 0x6a4   :  { %v4589_v20 = vadd.f32 %v10399_v14, %v4588_v1  ;;  %v6886_v18 = vpop.f32.mrf.mxu0  ;;  %7151 = vmatprep.mubr.msk.bf16.mxu1 %vm7227_vm0, %v10948_v63 }
 0x6a5   :  { %v4003_v27 = vadd.f32 %v10423_v37, %v3862_v5  ;;  %v7053_v35 = vpop.f32.mrf.mxu1 }
 0x6a6   :  { %4875 = vst.msk [vmem:[%s10883_s3 + $0x240] sm:$0xff] %vm4802_vm2, %v4589_v20  ;;  %v3866_v28 = vpop.f32.mrf.mxu0 }
 0x6a7   :  { %v4128_v6 = vmax.f32 %v4003_v27, 0.0  ;;  %v3867_v46 = vadd.f32 %v3866_v28, %v11147_v47  ;;  %v4591_v21 = vpop.f32.mrf.mxu1 }
 0x6a8   :  { %v4592_v41 = vadd.f32 %v10399_v14, %v4591_v21  ;;  %v6889_v34 = vpop.f32.mrf.mxu0 }
 0x6a9   :  { %v4191_v52 = vpack.c.bf16 %v4128_v6, %v4127_v17  ;;  %v4004_v58 = vadd.f32 %v10423_v37, %v3867_v46  ;;  %v7054_v4 = vpop.f32.mrf.mxu1 }
 0x6aa   :  { %4876 = vst.msk [vmem:[%s10883_s3 + $0x248] sm:$0xff] %vm4802_vm2, %v4592_v41  ;;  %v3869_v50 = vpop.f32.mrf.mxu0 }
 0x6ab   :  { %v4596_v11 = vpop.f32.mrf.mxu1  ;;  %7152 = vmatmul.mubr.bf16.gmra.mxu1 %v4191_v52  ;;  %v4129_v45 = vmax.f32 %v4004_v58, 0.0 }
 0x6ac   :  { %v4597_v29 = vadd.f32 %v10399_v14, %v4596_v11  ;;  %v6890_v8 = vpop.f32.mrf.mxu0  ;;  %7155 = vmatprep.mubr.msk.bf16.mxu1 %vm7227_vm0, %v10948_v63 }
 0x6ad   :  { %v7057_v25 = vpop.f32.mrf.mxu1  ;;  %v4192_v26 = vpack.c.bf16 %v4129_v45, %v4129_v45 }
 0x6ae   :  { %4877 = vst.msk [vmem:[%s10883_s3 + $0x250] sm:$0xff] %vm4802_vm2, %v4597_v29  ;;  %v4300_v37 = vpop.f32.mrf.mxu0 }
 0x6af   :  { %v4301_v40 = vadd.f32 %v10399_v14, %v4300_v37  ;;  %v4599_v61 = vpop.f32.mrf.mxu1 }
 0x6b0   :  { %v4600_v10 = vadd.f32 %v10399_v14, %v4599_v61  ;;  %v6909_v54 = vpop.f32.mrf.mxu0 }
 0x6b1   :  { %4803 = vst.msk [vmem:[%s10883_s3] sm:$0xff] %vm4802_vm2, %v4301_v40  ;;  %v7058_v63 = vpop.f32.mrf.mxu1 }
 0x6b2   :  { %4878 = vst.msk [vmem:[%s10883_s3 + $0x258] sm:$0xff] %vm4802_vm2, %v4600_v10  ;;  %v4303_v49 = vpop.f32.mrf.mxu0 }
 0x6b3   :  { %v4304_v44 = vadd.f32 %v10399_v14, %v4303_v49  ;;  %v4604_v62 = vpop.f32.mrf.mxu1  ;;  %7156 = vmatmul.mubr.bf16.gmra.mxu1 %v4192_v26 }
 0x6b4   :  { %v4605_v2 = vadd.f32 %v10399_v14, %v4604_v62  ;;  %v6910_v57 = vpop.f32.mrf.mxu0 }
 0x6b5   :  { %4804 = vst.msk [vmem:[%s10883_s3 + $0x8] sm:$0xff] %vm4802_vm2, %v4304_v44  ;;  %v7061_v7 = vpop.f32.mrf.mxu1 }
 0x6b6   :  { %4879 = vst.msk [vmem:[%s10883_s3 + $0x260] sm:$0xff] %vm4802_vm2, %v4605_v2 }
 0x6b7   :  { %v4607_v0 = vpop.f32.mrf.mxu1 }
 0x6b8   :  { %v4608_v36 = vadd.f32 %v10399_v14, %v4607_v0 }
 0x6b9   :  { %v7062_v51 = vpop.f32.mrf.mxu1 }
 0x6ba   :  { %4880 = vst.msk [vmem:[%s10883_s3 + $0x268] sm:$0xff] %vm4802_vm2, %v4608_v36 }
 0x6bb   :  { %v4612_v13 = vpop.f32.mrf.mxu1 }
 0x6bc   :  { %v4613_v53 = vadd.f32 %v10399_v14, %v4612_v13 }
 0x6bd   :  { %v7065_v60 = vpop.f32.mrf.mxu1 }
 0x6be   :  { %4881 = vst.msk [vmem:[%s10883_s3 + $0x270] sm:$0xff] %vm4802_vm2, %v4613_v53 }
 0x6bf   :  { %v4615_v16 = vpop.f32.mrf.mxu1 }
 0x6c0   :  { %v4616_v39 = vadd.f32 %v10399_v14, %v4615_v16 }
 0x6c1   :  { %v7066_v31 = vpop.f32.mrf.mxu1 }
 0x6c2   :  { %4882 = vst.msk [vmem:[%s10883_s3 + $0x278] sm:$0xff] %vm4802_vm2, %v4616_v39 }
 0x6c3   :  { %v4620_v38 = vpop.f32.mrf.mxu1 }
 0x6c4   :  { %v4621_v33 = vadd.f32 %v10399_v14, %v4620_v38 }
 0x6c5   :  { %v7069_v3 = vpop.f32.mrf.mxu1 }
 0x6c6   :  { %4883 = vst.msk [vmem:[%s10883_s3 + $0x280] sm:$0xff] %vm4802_vm2, %v4621_v33 }
 0x6c7   :  { %v4623_v42 = vpop.f32.mrf.mxu1 }
 0x6c8   :  { %v4624_v48 = vadd.f32 %v10399_v14, %v4623_v42 }
 0x6c9   :  { %v7070_v15 = vpop.f32.mrf.mxu1 }
 0x6ca   :  { %4884 = vst.msk [vmem:[%s10883_s3 + $0x288] sm:$0xff] %vm4802_vm2, %v4624_v48 }
 0x6cb   :  { %v4628_v32 = vpop.f32.mrf.mxu1 }
 0x6cc   :  { %v4629_v43 = vadd.f32 %v10399_v14, %v4628_v32 }
 0x6cd   :  { %v7073_v19 = vpop.f32.mrf.mxu1 }
 0x6ce   :  { %4885 = vst.msk [vmem:[%s10883_s3 + $0x290] sm:$0xff] %vm4802_vm2, %v4629_v43 }
 0x6cf   :  { %v4631_v12 = vpop.f32.mrf.mxu1 }
 0x6d0   :  { %v4632_v23 = vadd.f32 %v10399_v14, %v4631_v12 }
 0x6d1   :  { %v7074_v59 = vpop.f32.mrf.mxu1 }
 0x6d2   :  { %4886 = vst.msk [vmem:[%s10883_s3 + $0x298] sm:$0xff] %vm4802_vm2, %v4632_v23 }
 0x6d3   :  { %v4636_v30 = vpop.f32.mrf.mxu1 }
 0x6d4   :  { %v4637_v9 = vadd.f32 %v10399_v14, %v4636_v30 }
 0x6d5   :  { %v7077_v24 = vpop.f32.mrf.mxu1 }
 0x6d6   :  { %4887 = vst.msk [vmem:[%s10883_s3 + $0x2a0] sm:$0xff] %vm4802_vm2, %v4637_v9 }
 0x6d7   :  { %v4639_v56 = vpop.f32.mrf.mxu1 }
 0x6d8   :  { %v4640_v55 = vadd.f32 %v10399_v14, %v4639_v56 }
 0x6d9   :  { %v7078_v22 = vpop.f32.mrf.mxu1 }
 0x6da   :  { %4888 = vst.msk [vmem:[%s10883_s3 + $0x2a8] sm:$0xff] %vm4802_vm2, %v4640_v55 }
 0x6db   :  { %v4644_v5 = vpop.f32.mrf.mxu1 }
 0x6dc   :  { %v4645_v1 = vadd.f32 %v10399_v14, %v4644_v5 }
 0x6dd   :  { %v7081_v20 = vpop.f32.mrf.mxu1 }
 0x6de   :  { %4889 = vst.msk [vmem:[%s10883_s3 + $0x2b0] sm:$0xff] %vm4802_vm2, %v4645_v1 }
 0x6df   :  { %v4647_v18 = vpop.f32.mrf.mxu1 }
 0x6e0   :  { %v4648_v27 = vadd.f32 %v10399_v14, %v4647_v18 }
 0x6e1   :  { %v7082_v35 = vpop.f32.mrf.mxu1 }
 0x6e2   :  { %4890 = vst.msk [vmem:[%s10883_s3 + $0x2b8] sm:$0xff] %vm4802_vm2, %v4648_v27 }
 0x6e3   :  { %v4652_v28 = vpop.f32.mrf.mxu1 }
 0x6e4   :  { %v4653_v17 = vadd.f32 %v10399_v14, %v4652_v28 }
 0x6e5   :  { %v7085_v6 = vpop.f32.mrf.mxu1 }
 0x6e6   :  { %4891 = vst.msk [vmem:[%s10883_s3 + $0x2c0] sm:$0xff] %vm4802_vm2, %v4653_v17 }
 0x6e7   :  { %v4655_v47 = vpop.f32.mrf.mxu1 }
 0x6e8   :  { %v4656_v46 = vadd.f32 %v10399_v14, %v4655_v47 }
 0x6e9   :  { %v7086_v21 = vpop.f32.mrf.mxu1 }
 0x6ea   :  { %4892 = vst.msk [vmem:[%s10883_s3 + $0x2c8] sm:$0xff] %vm4802_vm2, %v4656_v46 }
 0x6eb   :  { %v4660_v41 = vpop.f32.mrf.mxu1 }
 0x6ec   :  { %v4661_v34 = vadd.f32 %v10399_v14, %v4660_v41 }
 0x6ed   :  { %v7089_v52 = vpop.f32.mrf.mxu1 }
 0x6ee   :  { %4893 = vst.msk [vmem:[%s10883_s3 + $0x2d0] sm:$0xff] %vm4802_vm2, %v4661_v34 }
 0x6ef   :  { %v4663_v58 = vpop.f32.mrf.mxu1 }
 0x6f0   :  { %v4664_v4 = vadd.f32 %v10399_v14, %v4663_v58 }
 0x6f1   :  { %v7090_v50 = vpop.f32.mrf.mxu1 }
 0x6f2   :  { %4894 = vst.msk [vmem:[%s10883_s3 + $0x2d8] sm:$0xff] %vm4802_vm2, %v4664_v4 }
 0x6f3   :  { %v4668_v11 = vpop.f32.mrf.mxu1 }
 0x6f4   :  { %v4669_v29 = vadd.f32 %v10399_v14, %v4668_v11 }
 0x6f5   :  { %v7093_v8 = vpop.f32.mrf.mxu1 }
 0x6f6   :  { %4895 = vst.msk [vmem:[%s10883_s3 + $0x2e0] sm:$0xff] %vm4802_vm2, %v4669_v29 }
 0x6f7   :  { %v4671_v45 = vpop.f32.mrf.mxu1 }
 0x6f8   :  { %v4672_v25 = vadd.f32 %v10399_v14, %v4671_v45 }
 0x6f9   :  { %v7094_v37 = vpop.f32.mrf.mxu1 }
 0x6fa   :  { %4896 = vst.msk [vmem:[%s10883_s3 + $0x2e8] sm:$0xff] %vm4802_vm2, %v4672_v25 }
 0x6fb   :  { %v4676_v40 = vpop.f32.mrf.mxu1 }
 0x6fc   :  { %v4677_v61 = vadd.f32 %v10399_v14, %v4676_v40 }
 0x6fd   :  { %v7097_v10 = vpop.f32.mrf.mxu1 }
 0x6fe   :  { %4897 = vst.msk [vmem:[%s10883_s3 + $0x2f0] sm:$0xff] %vm4802_vm2, %v4677_v61 }
 0x6ff   :  { %v4679_v54 = vpop.f32.mrf.mxu1 }
 0x700   :  { %v4680_v26 = vadd.f32 %v10399_v14, %v4679_v54 }
 0x701   :  { %v7098_v63 = vpop.f32.mrf.mxu1 }
 0x702   :  { %4898 = vst.msk [vmem:[%s10883_s3 + $0x2f8] sm:$0xff] %vm4802_vm2, %v4680_v26 }
 0x703   :  { %v4684_v49 = vpop.f32.mrf.mxu1 }
 0x704   :  { %v4685_v44 = vadd.f32 %v10399_v14, %v4684_v49 }
 0x705   :  { %v7101_v62 = vpop.f32.mrf.mxu1 }
 0x706   :  { %4899 = vst.msk [vmem:[%s10883_s3 + $0x300] sm:$0xff] %vm4802_vm2, %v4685_v44 }
 0x707   :  { %v4687_v2 = vpop.f32.mrf.mxu1 }
 0x708   :  { %v4688_v57 = vadd.f32 %v10399_v14, %v4687_v2 }
 0x709   :  { %v7102_v7 = vpop.f32.mrf.mxu1 }
 0x70a   :  { %4900 = vst.msk [vmem:[%s10883_s3 + $0x308] sm:$0xff] %vm4802_vm2, %v4688_v57 }
 0x70b   :  { %v4692_v0 = vpop.f32.mrf.mxu1 }
 0x70c   :  { %v4693_v36 = vadd.f32 %v10399_v14, %v4692_v0 }
 0x70d   :  { %v7105_v51 = vpop.f32.mrf.mxu1 }
 0x70e   :  { %4901 = vst.msk [vmem:[%s10883_s3 + $0x310] sm:$0xff] %vm4802_vm2, %v4693_v36 }
 0x70f   :  { %v4695_v13 = vpop.f32.mrf.mxu1 }
 0x710   :  { %v4696_v53 = vadd.f32 %v10399_v14, %v4695_v13 }
 0x711   :  { %v7106_v60 = vpop.f32.mrf.mxu1 }
 0x712   :  { %4902 = vst.msk [vmem:[%s10883_s3 + $0x318] sm:$0xff] %vm4802_vm2, %v4696_v53 }
 0x713   :  { %v4700_v16 = vpop.f32.mrf.mxu1 }
 0x714   :  { %v4701_v39 = vadd.f32 %v10399_v14, %v4700_v16 }
 0x715   :  { %v7109_v31 = vpop.f32.mrf.mxu1 }
 0x716   :  { %4903 = vst.msk [vmem:[%s10883_s3 + $0x320] sm:$0xff] %vm4802_vm2, %v4701_v39 }
 0x717   :  { %v4703_v38 = vpop.f32.mrf.mxu1 }
 0x718   :  { %v4704_v33 = vadd.f32 %v10399_v14, %v4703_v38 }
 0x719   :  { %v7110_v3 = vpop.f32.mrf.mxu1 }
 0x71a   :  { %4904 = vst.msk [vmem:[%s10883_s3 + $0x328] sm:$0xff] %vm4802_vm2, %v4704_v33 }
 0x71b   :  { %v4708_v42 = vpop.f32.mrf.mxu1 }
 0x71c   :  { %v4709_v48 = vadd.f32 %v10399_v14, %v4708_v42 }
 0x71d   :  { %v7113_v15 = vpop.f32.mrf.mxu1 }
 0x71e   :  { %4905 = vst.msk [vmem:[%s10883_s3 + $0x330] sm:$0xff] %vm4802_vm2, %v4709_v48 }
 0x71f   :  { %v4711_v32 = vpop.f32.mrf.mxu1 }
 0x720   :  { %v4712_v43 = vadd.f32 %v10399_v14, %v4711_v32 }
 0x721   :  { %v7114_v19 = vpop.f32.mrf.mxu1 }
 0x722   :  { %4906 = vst.msk [vmem:[%s10883_s3 + $0x338] sm:$0xff] %vm4802_vm2, %v4712_v43 }
 0x723   :  { %v4716_v12 = vpop.f32.mrf.mxu1 }
 0x724   :  { %v4717_v23 = vadd.f32 %v10399_v14, %v4716_v12 }
 0x725   :  { %v7117_v59 = vpop.f32.mrf.mxu1 }
 0x726   :  { %4907 = vst.msk [vmem:[%s10883_s3 + $0x340] sm:$0xff] %vm4802_vm2, %v4717_v23 }
 0x727   :  { %v4719_v30 = vpop.f32.mrf.mxu1 }
 0x728   :  { %v4720_v9 = vadd.f32 %v10399_v14, %v4719_v30 }
 0x729   :  { %v7118_v24 = vpop.f32.mrf.mxu1 }
 0x72a   :  { %4908 = vst.msk [vmem:[%s10883_s3 + $0x348] sm:$0xff] %vm4802_vm2, %v4720_v9 }
 0x72b   :  { %v4724_v56 = vpop.f32.mrf.mxu1 }
 0x72c   :  { %v4725_v55 = vadd.f32 %v10399_v14, %v4724_v56 }
 0x72d   :  { %v7121_v22 = vpop.f32.mrf.mxu1 }
 0x72e   :  { %4909 = vst.msk [vmem:[%s10883_s3 + $0x350] sm:$0xff] %vm4802_vm2, %v4725_v55 }
 0x72f   :  { %v4727_v5 = vpop.f32.mrf.mxu1 }
 0x730   :  { %v4728_v1 = vadd.f32 %v10399_v14, %v4727_v5 }
 0x731   :  { %v7122_v20 = vpop.f32.mrf.mxu1 }
 0x732   :  { %4910 = vst.msk [vmem:[%s10883_s3 + $0x358] sm:$0xff] %vm4802_vm2, %v4728_v1 }
 0x733   :  { %v4732_v18 = vpop.f32.mrf.mxu1 }
 0x734   :  { %v4733_v27 = vadd.f32 %v10399_v14, %v4732_v18 }
 0x735   :  { %v7125_v35 = vpop.f32.mrf.mxu1 }
 0x736   :  { %4911 = vst.msk [vmem:[%s10883_s3 + $0x360] sm:$0xff] %vm4802_vm2, %v4733_v27 }
 0x737   :  { %v4735_v28 = vpop.f32.mrf.mxu1 }
 0x738   :  { %v4736_v17 = vadd.f32 %v10399_v14, %v4735_v28 }
 0x739   :  { %v7126_v6 = vpop.f32.mrf.mxu1 }
 0x73a   :  { %4912 = vst.msk [vmem:[%s10883_s3 + $0x368] sm:$0xff] %vm4802_vm2, %v4736_v17 }
 0x73b   :  { %v4740_v47 = vpop.f32.mrf.mxu1 }
 0x73c   :  { %v4741_v46 = vadd.f32 %v10399_v14, %v4740_v47 }
 0x73d   :  { %v7129_v21 = vpop.f32.mrf.mxu1 }
 0x73e   :  { %4913 = vst.msk [vmem:[%s10883_s3 + $0x370] sm:$0xff] %vm4802_vm2, %v4741_v46 }
 0x73f   :  { %v4743_v41 = vpop.f32.mrf.mxu1 }
 0x740   :  { %v4744_v34 = vadd.f32 %v10399_v14, %v4743_v41 }
 0x741   :  { %v7130_v52 = vpop.f32.mrf.mxu1 }
 0x742   :  { %4914 = vst.msk [vmem:[%s10883_s3 + $0x378] sm:$0xff] %vm4802_vm2, %v4744_v34 }
 0x743   :  { %v4748_v58 = vpop.f32.mrf.mxu1 }
 0x744   :  { %v4749_v4 = vadd.f32 %v10399_v14, %v4748_v58 }
 0x745   :  { %v7133_v50 = vpop.f32.mrf.mxu1 }
 0x746   :  { %4915 = vst.msk [vmem:[%s10883_s3 + $0x380] sm:$0xff] %vm4802_vm2, %v4749_v4 }
 0x747   :  { %v4751_v11 = vpop.f32.mrf.mxu1 }
 0x748   :  { %v4752_v29 = vadd.f32 %v10399_v14, %v4751_v11 }
 0x749   :  { %v7134_v8 = vpop.f32.mrf.mxu1 }
 0x74a   :  { %4916 = vst.msk [vmem:[%s10883_s3 + $0x388] sm:$0xff] %vm4802_vm2, %v4752_v29 }
 0x74b   :  { %v4756_v45 = vpop.f32.mrf.mxu1 }
 0x74c   :  { %v4757_v25 = vadd.f32 %v10399_v14, %v4756_v45 }
 0x74d   :  { %v7137_v37 = vpop.f32.mrf.mxu1 }
 0x74e   :  { %4917 = vst.msk [vmem:[%s10883_s3 + $0x390] sm:$0xff] %vm4802_vm2, %v4757_v25 }
 0x74f   :  { %v4759_v40 = vpop.f32.mrf.mxu1 }
 0x750   :  { %v4760_v61 = vadd.f32 %v10399_v14, %v4759_v40 }
 0x751   :  { %v7138_v10 = vpop.f32.mrf.mxu1 }
 0x752   :  { %4918 = vst.msk [vmem:[%s10883_s3 + $0x398] sm:$0xff] %vm4802_vm2, %v4760_v61 }
 0x753   :  { %v4764_v54 = vpop.f32.mrf.mxu1 }
 0x754   :  { %v4765_v26 = vadd.f32 %v10399_v14, %v4764_v54 }
 0x755   :  { %v7141_v63 = vpop.f32.mrf.mxu1 }
 0x756   :  { %4919 = vst.msk [vmem:[%s10883_s3 + $0x3a0] sm:$0xff] %vm4802_vm2, %v4765_v26 }
 0x757   :  { %v4767_v49 = vpop.f32.mrf.mxu1 }
 0x758   :  { %v4768_v44 = vadd.f32 %v10399_v14, %v4767_v49 }
 0x759   :  { %v7142_v62 = vpop.f32.mrf.mxu1 }
 0x75a   :  { %4920 = vst.msk [vmem:[%s10883_s3 + $0x3a8] sm:$0xff] %vm4802_vm2, %v4768_v44 }
 0x75b   :  { %v4772_v2 = vpop.f32.mrf.mxu1 }
 0x75c   :  { %v4773_v57 = vadd.f32 %v10399_v14, %v4772_v2 }
 0x75d   :  { %v7145_v7 = vpop.f32.mrf.mxu1 }
 0x75e   :  { %4921 = vst.msk [vmem:[%s10883_s3 + $0x3b0] sm:$0xff] %vm4802_vm2, %v4773_v57 }
 0x75f   :  { %v4775_v0 = vpop.f32.mrf.mxu1 }
 0x760   :  { %v4776_v36 = vadd.f32 %v10399_v14, %v4775_v0 }
 0x761   :  { %v7146_v51 = vpop.f32.mrf.mxu1 }
 0x762   :  { %4922 = vst.msk [vmem:[%s10883_s3 + $0x3b8] sm:$0xff] %vm4802_vm2, %v4776_v36 }
 0x763   :  { %v4780_v13 = vpop.f32.mrf.mxu1 }
 0x764   :  { %v4781_v53 = vadd.f32 %v10399_v14, %v4780_v13 }
 0x765   :  { %v7149_v60 = vpop.f32.mrf.mxu1 }
 0x766   :  { %4923 = vst.msk [vmem:[%s10883_s3 + $0x3c0] sm:$0xff] %vm4802_vm2, %v4781_v53 }
 0x767   :  { %v4783_v16 = vpop.f32.mrf.mxu1 }
 0x768   :  { %v4784_v39 = vadd.f32 %v10399_v14, %v4783_v16 }
 0x769   :  { %v7150_v31 = vpop.f32.mrf.mxu1 }
 0x76a   :  { %4924 = vst.msk [vmem:[%s10883_s3 + $0x3c8] sm:$0xff] %vm4802_vm2, %v4784_v39 }
 0x76b   :  { %v4788_v38 = vpop.f32.mrf.mxu1 }
 0x76c   :  { %v4789_v33 = vadd.f32 %v10399_v14, %v4788_v38 }
 0x76d   :  { %v7153_v3 = vpop.f32.mrf.mxu1 }
 0x76e   :  { %4925 = vst.msk [vmem:[%s10883_s3 + $0x3d0] sm:$0xff] %vm4802_vm2, %v4789_v33 }
 0x76f   :  { %v4791_v42 = vpop.f32.mrf.mxu1 }
 0x770   :  { %v4792_v48 = vadd.f32 %v10399_v14, %v4791_v42 }
 0x771   :  { %v7154_v15 = vpop.f32.mrf.mxu1 }
 0x772   :  { %4926 = vst.msk [vmem:[%s10883_s3 + $0x3d8] sm:$0xff] %vm4802_vm2, %v4792_v48 }
 0x773   :  { %v4796_v32 = vpop.f32.mrf.mxu1 }
 0x774   :  { %v4797_v43 = vadd.f32 %v10399_v14, %v4796_v32 }
 0x775   :  { %v7157_v19 = vpop.f32.mrf.mxu1 }
 0x776   :  { %4927 = vst.msk [vmem:[%s10883_s3 + $0x3e0] sm:$0xff] %vm4802_vm2, %v4797_v43 }
 0x777   :  { %v4799_v12 = vpop.f32.mrf.mxu1 }
 0x779   :  { %v7158_v23 = vpop.f32.mrf.mxu1 }

</bundles_post_ra>
